<compile_context>
chip_gen: v7x
topology: tpu7x:2x2x1
jax: 0.10.0
libtpu: 0.0.40
codegen_flags: <defaults>
</compile_context>

<pallas_src>
import jax
import jax.numpy as jnp
from jax.experimental import pallas as pl
from jax.experimental.pallas import tpu as pltpu

_PAD = 8  # >= max dilation (5); 8 keeps scratch center stores sublane-aligned


def _make_dac_kernel(H, W, C):
    HW = H * W
    PAD = _PAD

    def kernel(xp_ref, w1_ref, b1_ref, w2_ref, b2_ref, w3_ref, b3_ref,
               wc_ref, bc_ref, o_ref, pad_ref):
        # xp_ref : (1, H+2P, W+2P, C) zero-padded input, channels-last
        # w*_ref : (9, Cin, Cout) tap-major 3x3 weights;  b*_ref: (1, C)
        # wc_ref : (Cin, Cout) 1x1 conv weight;           bc_ref: (1, C)
        # o_ref  : (1, H*W, C) output block
        # pad_ref: (H+2P, W+2P, C) VMEM scratch for chained (padded) intermediates

        def conv3x3(get_patch, w_ref, b_ref, dil):
            acc = None
            t = 0
            for dy in (-1, 0, 1):
                for dx in (-1, 0, 1):
                    p = get_patch(PAD + dy * dil, PAD + dx * dil)   # (H, W, C)
                    part = jnp.dot(p.reshape(HW, C), w_ref[t],
                                   preferred_element_type=jnp.float32)
                    acc = part if acc is None else acc + part
                    t += 1
            return acc + b_ref[...]                                  # (HW, C)

        x_patch = lambda r0, c0: xp_ref[0, r0:r0 + H, c0:c0 + W, :]
        s_patch = lambda r0, c0: pad_ref[r0:r0 + H, c0:c0 + W, :]

        pad_ref[...] = jnp.zeros_like(pad_ref)          # zero border each grid step

        a = conv3x3(x_patch, w1_ref, b1_ref, 1)         # dilate1(x)   (pre-ReLU)
        b2x = conv3x3(x_patch, w2_ref, b2_ref, 3)       # dilate2(x)

        pad_ref[PAD:PAD + H, PAD:PAD + W, :] = a.reshape(H, W, C)
        c = conv3x3(s_patch, w2_ref, b2_ref, 3)         # dilate2(dilate1(x))

        pad_ref[PAD:PAD + H, PAD:PAD + W, :] = c.reshape(H, W, C)
        e = conv3x3(s_patch, w3_ref, b3_ref, 5)         # dilate3(dilate2(dilate1(x)))

        wc = wc_ref[...]
        bc = bc_ref[...]
        conv1x1 = lambda t: jnp.dot(t, wc, preferred_element_type=jnp.float32) + bc
        relu = lambda t: jnp.maximum(t, 0.0)

        x_center = x_patch(PAD, PAD).reshape(HW, C)
        out = (x_center
               + relu(a)                 # dilate1_out
               + relu(conv1x1(b2x))      # dilate2_out
               + relu(conv1x1(c))        # dilate3_out
               + relu(conv1x1(e)))       # dilate4_out
        o_ref[0] = out.astype(o_ref.dtype)

    return kernel


@jax.jit
def dac_block(x, w1, b1, w2, b2, w3, b3, wc, bc):
    """DACblock.forward.  x: (N, C, H, W); conv weights/biases in PyTorch layout."""
    N, C, H, W = x.shape
    PAD = _PAD
    Hp, Wp = H + 2 * PAD, W + 2 * PAD

    # glue: channels-last + zero padding (pure layout, no compute)
    x_nhwc = jnp.transpose(x, (0, 2, 3, 1)).astype(jnp.float32)
    xp = jnp.pad(x_nhwc, ((0, 0), (PAD, PAD), (PAD, PAD), (0, 0)))

    def taps(w):  # (Cout, Cin, 3, 3) -> (9, Cin, Cout), lane-dense in Cout
        return jnp.transpose(w, (2, 3, 1, 0)).reshape(9, C, C).astype(jnp.float32)

    w1t, w2t, w3t = taps(w1), taps(w2), taps(w3)
    wct = jnp.transpose(wc.reshape(C, C), (1, 0)).astype(jnp.float32)
    b1r = b1.reshape(1, C).astype(jnp.float32)
    b2r = b2.reshape(1, C).astype(jnp.float32)
    b3r = b3.reshape(1, C).astype(jnp.float32)
    bcr = bc.reshape(1, C).astype(jnp.float32)

    # TODO(synk): for production C (e.g. 512) add an output-channel tile axis per
    # conv stage if 3x(9,C,C) weights no longer fit comfortably in v7x VMEM.
    out_flat = pl.pallas_call(
        _make_dac_kernel(H, W, C),
        out_shape=jax.ShapeDtypeStruct((N, H * W, C), jnp.float32),
        grid=(N,),
        in_specs=[
            pl.BlockSpec((1, Hp, Wp, C), lambda n: (n, 0, 0, 0)),
            pl.BlockSpec((9, C, C), lambda n: (0, 0, 0)),
            pl.BlockSpec((1, C), lambda n: (0, 0)),
            pl.BlockSpec((9, C, C), lambda n: (0, 0, 0)),
            pl.BlockSpec((1, C), lambda n: (0, 0)),
            pl.BlockSpec((9, C, C), lambda n: (0, 0, 0)),
            pl.BlockSpec((1, C), lambda n: (0, 0)),
            pl.BlockSpec((C, C), lambda n: (0, 0)),
            pl.BlockSpec((1, C), lambda n: (0, 0)),
        ],
        out_specs=pl.BlockSpec((1, H * W, C), lambda n: (n, 0, 0)),
        scratch_shapes=[pltpu.VMEM((Hp, Wp, C), jnp.float32)],
        compiler_params=pltpu.CompilerParams(
            dimension_semantics=("parallel",),           # batch -> 2 TCs on v7x
            vmem_limit_bytes=32 * 1024 * 1024),
    )(xp, w1t, b1r, w2t, b2r, w3t, b3r, wct, bcr)

    out = out_flat.reshape(N, H, W, C).transpose(0, 3, 1, 2)
    return out.astype(x.dtype)


# ---------------- pure-JAX reference (for correctness check) ----------------
def _conv2d_ref(x, w, b, dilation, padding):
    y = jax.lax.conv_general_dilated(
        x, w, window_strides=(1, 1),
        padding=((padding, padding), (padding, padding)),
        rhs_dilation=(dilation, dilation),
        dimension_numbers=("NCHW", "OIHW", "NCHW"),
        precision=jax.lax.Precision.HIGHEST)
    return y + b.reshape(1, -1, 1, 1)


def dac_block_reference(x, w1, b1, w2, b2, w3, b3, wc, bc):
    relu = lambda t: jnp.maximum(t, 0.0)
    a = _conv2d_ref(x, w1, b1, 1, 1)                       # dilate1(x)
    d1 = relu(a)
    d2 = relu(_conv2d_ref(_conv2d_ref(x, w2, b2, 3, 3), wc, bc, 1, 0))
    c = _conv2d_ref(a, w2, b2, 3, 3)                       # dilate2(dilate1(x))
    d3 = relu(_conv2d_ref(c, wc, bc, 1, 0))
    e = _conv2d_ref(c, w3, b3, 5, 5)                       # dilate3(...)
    d4 = relu(_conv2d_ref(e, wc, bc, 1, 0))
    return x + d1 + d2 + d3 + d4


if __name__ == "__main__":
    key = jax.random.PRNGKey(0)
    kx, k1, k2, k3, kc = jax.random.split(key, 5)
    N, C, H, W = 2, 4, 16, 16
    x = jax.random.normal(kx, (N, C, H, W), dtype=jnp.float32)

    def conv_weight(k, cout, cin, ksz):
        bound = 1.0 / float((cin * ksz * ksz) ** 0.5)   # PyTorch default init range
        return jax.random.uniform(k, (cout, cin, ksz, ksz), jnp.float32, -bound, bound)

    w1 = conv_weight(k1, C, C, 3)   # dilate1
    w2 = conv_weight(k2, C, C, 3)   # dilate2
    w3 = conv_weight(k3, C, C, 3)   # dilate3
    wc = conv_weight(kc, C, C, 1)   # conv1x1
    zb = jnp.zeros((C,), jnp.float32)   # DACblock zeroes every conv bias at init

    out = jax.block_until_ready(dac_block(x, w1, zb, w2, zb, w3, zb, wc, zb))
    assert out.shape == (N, C, H, W), out.shape
    assert bool(jnp.all(jnp.isfinite(out)))

    ref = dac_block_reference(x, w1, zb, w2, zb, w3, zb, wc, zb)
    max_err = float(jnp.max(jnp.abs(out - ref)))
    assert max_err < 1e-2, f"max abs error vs reference: {max_err}"
    print("KERNEL_OK")
</pallas_src>

<mosaic_0001>
module attributes {stable_mosaic.version = 11 : i64} {
  func.func @kernel(%arg0: i32, %arg1: memref<1x32x32x4xf32, #tpu.memory_space<vmem>>, %arg2: memref<9x4x4xf32, #tpu.memory_space<vmem>>, %arg3: memref<1x4xf32, #tpu.memory_space<vmem>>, %arg4: memref<9x4x4xf32, #tpu.memory_space<vmem>>, %arg5: memref<1x4xf32, #tpu.memory_space<vmem>>, %arg6: memref<9x4x4xf32, #tpu.memory_space<vmem>>, %arg7: memref<1x4xf32, #tpu.memory_space<vmem>>, %arg8: memref<4x4xf32, #tpu.memory_space<vmem>>, %arg9: memref<1x4xf32, #tpu.memory_space<vmem>>, %arg10: memref<1x256x4xf32, #tpu.memory_space<vmem>>, %arg11: memref<32x32x4xf32, #tpu.memory_space<vmem>>) attributes {dimension_semantics = [#tpu.dimension_semantics<parallel>], iteration_bounds = array<i64: 2>, scalar_prefetch = 0 : i64, scratch_operands = 1 : i64, tpu.core_type = #tpu.core_type<tc>, window_params = [{transform_indices = @transform_0, window_bounds = array<i64: 1, 32, 32, 4>}, {pipeline_mode = #tpu.pipeline_mode<synchronous>, transform_indices = @transform_1, window_bounds = array<i64: 9, 4, 4>}, {pipeline_mode = #tpu.pipeline_mode<synchronous>, transform_indices = @transform_2, window_bounds = array<i64: 1, 4>}, {pipeline_mode = #tpu.pipeline_mode<synchronous>, transform_indices = @transform_3, window_bounds = array<i64: 9, 4, 4>}, {pipeline_mode = #tpu.pipeline_mode<synchronous>, transform_indices = @transform_4, window_bounds = array<i64: 1, 4>}, {pipeline_mode = #tpu.pipeline_mode<synchronous>, transform_indices = @transform_5, window_bounds = array<i64: 9, 4, 4>}, {pipeline_mode = #tpu.pipeline_mode<synchronous>, transform_indices = @transform_6, window_bounds = array<i64: 1, 4>}, {pipeline_mode = #tpu.pipeline_mode<synchronous>, transform_indices = @transform_7, window_bounds = array<i64: 4, 4>}, {pipeline_mode = #tpu.pipeline_mode<synchronous>, transform_indices = @transform_8, window_bounds = array<i64: 1, 4>}, {transform_indices = @transform_9, window_bounds = array<i64: 1, 256, 4>}]} {
    %cst = arith.constant 0.000000e+00 : f32
    %0 = vector.broadcast %cst : f32 to vector<32x32x4xf32>
    %c0 = arith.constant 0 : index
    %c0_0 = arith.constant 0 : index
    %c0_1 = arith.constant 0 : index
    %1 = vector.load %arg11[%c0, %c0_0, %c0_1] : memref<32x32x4xf32, #tpu.memory_space<vmem>>, vector<32x32x4xf32>
    tpu.vector_store %arg11[%c0, %c0_0, %c0_1], %0 {strides = array<i32>} : memref<32x32x4xf32, #tpu.memory_space<vmem>>, vector<32x32x4xf32>,
    %c0_2 = arith.constant 0 : index
    %c7 = arith.constant 7 : index
    %c7_3 = arith.constant 7 : index
    %c0_4 = arith.constant 0 : index
    %2 = vector.load %arg1[%c0_2, %c7, %c7_3, %c0_4] : memref<1x32x32x4xf32, #tpu.memory_space<vmem>>, vector<1x16x16x4xf32>
    %3 = vector.shape_cast %2 : vector<1x16x16x4xf32> to vector<16x16x4xf32>
    %4 = vector.shape_cast %3 : vector<16x16x4xf32> to vector<256x4xf32>
    %c0_5 = arith.constant 0 : index
    %c0_6 = arith.constant 0 : index
    %c0_7 = arith.constant 0 : index
    %5 = vector.load %arg2[%c0_5, %c0_6, %c0_7] : memref<9x4x4xf32, #tpu.memory_space<vmem>>, vector<1x4x4xf32>
    %6 = vector.shape_cast %5 : vector<1x4x4xf32> to vector<4x4xf32>
    %cst_8 = arith.constant dense<0.000000e+00> : vector<256x4xf32>
    %7 = tpu.matmul %4, %6, %cst_8 {dimension_numbers = #tpu.dot_dimension_numbers<[1], [0], [0], [1], [0, 0, 1, 1], [], []>} : vector<256x4xf32>, vector<4x4xf32>, vector<256x4xf32> -> vector<256x4xf32>
    %c0_9 = arith.constant 0 : index
    %c7_10 = arith.constant 7 : index
    %c8 = arith.constant 8 : index
    %c0_11 = arith.constant 0 : index
    %8 = vector.load %arg1[%c0_9, %c7_10, %c8, %c0_11] : memref<1x32x32x4xf32, #tpu.memory_space<vmem>>, vector<1x16x16x4xf32>
    %9 = vector.shape_cast %8 : vector<1x16x16x4xf32> to vector<16x16x4xf32>
    %10 = vector.shape_cast %9 : vector<16x16x4xf32> to vector<256x4xf32>
    %c1 = arith.constant 1 : index
    %c0_12 = arith.constant 0 : index
    %c0_13 = arith.constant 0 : index
    %11 = vector.load %arg2[%c1, %c0_12, %c0_13] : memref<9x4x4xf32, #tpu.memory_space<vmem>>, vector<1x4x4xf32>
    %12 = vector.shape_cast %11 : vector<1x4x4xf32> to vector<4x4xf32>
    %cst_14 = arith.constant dense<0.000000e+00> : vector<256x4xf32>
    %13 = tpu.matmul %10, %12, %cst_14 {dimension_numbers = #tpu.dot_dimension_numbers<[1], [0], [0], [1], [0, 0, 1, 1], [], []>} : vector<256x4xf32>, vector<4x4xf32>, vector<256x4xf32> -> vector<256x4xf32>
    %14 = arith.addf %7, %13 : vector<256x4xf32>
    %c0_15 = arith.constant 0 : index
    %c7_16 = arith.constant 7 : index
    %c9 = arith.constant 9 : index
    %c0_17 = arith.constant 0 : index
    %15 = vector.load %arg1[%c0_15, %c7_16, %c9, %c0_17] : memref<1x32x32x4xf32, #tpu.memory_space<vmem>>, vector<1x16x16x4xf32>
    %16 = vector.shape_cast %15 : vector<1x16x16x4xf32> to vector<16x16x4xf32>
    %17 = vector.shape_cast %16 : vector<16x16x4xf32> to vector<256x4xf32>
    %c2 = arith.constant 2 : index
    %c0_18 = arith.constant 0 : index
    %c0_19 = arith.constant 0 : index
    %18 = vector.load %arg2[%c2, %c0_18, %c0_19] : memref<9x4x4xf32, #tpu.memory_space<vmem>>, vector<1x4x4xf32>
    %19 = vector.shape_cast %18 : vector<1x4x4xf32> to vector<4x4xf32>
    %cst_20 = arith.constant dense<0.000000e+00> : vector<256x4xf32>
    %20 = tpu.matmul %17, %19, %cst_20 {dimension_numbers = #tpu.dot_dimension_numbers<[1], [0], [0], [1], [0, 0, 1, 1], [], []>} : vector<256x4xf32>, vector<4x4xf32>, vector<256x4xf32> -> vector<256x4xf32>
    %21 = arith.addf %14, %20 : vector<256x4xf32>
    %c0_21 = arith.constant 0 : index
    %c8_22 = arith.constant 8 : index
    %c7_23 = arith.constant 7 : index
    %c0_24 = arith.constant 0 : index
    %22 = vector.load %arg1[%c0_21, %c8_22, %c7_23, %c0_24] : memref<1x32x32x4xf32, #tpu.memory_space<vmem>>, vector<1x16x16x4xf32>
    %23 = vector.shape_cast %22 : vector<1x16x16x4xf32> to vector<16x16x4xf32>
    %24 = vector.shape_cast %23 : vector<16x16x4xf32> to vector<256x4xf32>
    %c3 = arith.constant 3 : index
    %c0_25 = arith.constant 0 : index
    %c0_26 = arith.constant 0 : index
    %25 = vector.load %arg2[%c3, %c0_25, %c0_26] : memref<9x4x4xf32, #tpu.memory_space<vmem>>, vector<1x4x4xf32>
    %26 = vector.shape_cast %25 : vector<1x4x4xf32> to vector<4x4xf32>
    %cst_27 = arith.constant dense<0.000000e+00> : vector<256x4xf32>
    %27 = tpu.matmul %24, %26, %cst_27 {dimension_numbers = #tpu.dot_dimension_numbers<[1], [0], [0], [1], [0, 0, 1, 1], [], []>} : vector<256x4xf32>, vector<4x4xf32>, vector<256x4xf32> -> vector<256x4xf32>
    %28 = arith.addf %21, %27 : vector<256x4xf32>
    %c0_28 = arith.constant 0 : index
    %c8_29 = arith.constant 8 : index
    %c8_30 = arith.constant 8 : index
    %c0_31 = arith.constant 0 : index
    %29 = vector.load %arg1[%c0_28, %c8_29, %c8_30, %c0_31] : memref<1x32x32x4xf32, #tpu.memory_space<vmem>>, vector<1x16x16x4xf32>
    %30 = vector.shape_cast %29 : vector<1x16x16x4xf32> to vector<16x16x4xf32>
    %31 = vector.shape_cast %30 : vector<16x16x4xf32> to vector<256x4xf32>
    %c4 = arith.constant 4 : index
    %c0_32 = arith.constant 0 : index
    %c0_33 = arith.constant 0 : index
    %32 = vector.load %arg2[%c4, %c0_32, %c0_33] : memref<9x4x4xf32, #tpu.memory_space<vmem>>, vector<1x4x4xf32>
    %33 = vector.shape_cast %32 : vector<1x4x4xf32> to vector<4x4xf32>
    %cst_34 = arith.constant dense<0.000000e+00> : vector<256x4xf32>
    %34 = tpu.matmul %31, %33, %cst_34 {dimension_numbers = #tpu.dot_dimension_numbers<[1], [0], [0], [1], [0, 0, 1, 1], [], []>} : vector<256x4xf32>, vector<4x4xf32>, vector<256x4xf32> -> vector<256x4xf32>
    %35 = arith.addf %28, %34 : vector<256x4xf32>
    %c0_35 = arith.constant 0 : index
    %c8_36 = arith.constant 8 : index
    %c9_37 = arith.constant 9 : index
    %c0_38 = arith.constant 0 : index
    %36 = vector.load %arg1[%c0_35, %c8_36, %c9_37, %c0_38] : memref<1x32x32x4xf32, #tpu.memory_space<vmem>>, vector<1x16x16x4xf32>
    %37 = vector.shape_cast %36 : vector<1x16x16x4xf32> to vector<16x16x4xf32>
    %38 = vector.shape_cast %37 : vector<16x16x4xf32> to vector<256x4xf32>
    %c5 = arith.constant 5 : index
    %c0_39 = arith.constant 0 : index
    %c0_40 = arith.constant 0 : index
    %39 = vector.load %arg2[%c5, %c0_39, %c0_40] : memref<9x4x4xf32, #tpu.memory_space<vmem>>, vector<1x4x4xf32>
    %40 = vector.shape_cast %39 : vector<1x4x4xf32> to vector<4x4xf32>
    %cst_41 = arith.constant dense<0.000000e+00> : vector<256x4xf32>
    %41 = tpu.matmul %38, %40, %cst_41 {dimension_numbers = #tpu.dot_dimension_numbers<[1], [0], [0], [1], [0, 0, 1, 1], [], []>} : vector<256x4xf32>, vector<4x4xf32>, vector<256x4xf32> -> vector<256x4xf32>
    %42 = arith.addf %35, %41 : vector<256x4xf32>
    %c0_42 = arith.constant 0 : index
    %c9_43 = arith.constant 9 : index
    %c7_44 = arith.constant 7 : index
    %c0_45 = arith.constant 0 : index
    %43 = vector.load %arg1[%c0_42, %c9_43, %c7_44, %c0_45] : memref<1x32x32x4xf32, #tpu.memory_space<vmem>>, vector<1x16x16x4xf32>
    %44 = vector.shape_cast %43 : vector<1x16x16x4xf32> to vector<16x16x4xf32>
    %45 = vector.shape_cast %44 : vector<16x16x4xf32> to vector<256x4xf32>
    %c6 = arith.constant 6 : index
    %c0_46 = arith.constant 0 : index
    %c0_47 = arith.constant 0 : index
    %46 = vector.load %arg2[%c6, %c0_46, %c0_47] : memref<9x4x4xf32, #tpu.memory_space<vmem>>, vector<1x4x4xf32>
    %47 = vector.shape_cast %46 : vector<1x4x4xf32> to vector<4x4xf32>
    %cst_48 = arith.constant dense<0.000000e+00> : vector<256x4xf32>
    %48 = tpu.matmul %45, %47, %cst_48 {dimension_numbers = #tpu.dot_dimension_numbers<[1], [0], [0], [1], [0, 0, 1, 1], [], []>} : vector<256x4xf32>, vector<4x4xf32>, vector<256x4xf32> -> vector<256x4xf32>
    %49 = arith.addf %42, %48 : vector<256x4xf32>
    %c0_49 = arith.constant 0 : index
    %c9_50 = arith.constant 9 : index
    %c8_51 = arith.constant 8 : index
    %c0_52 = arith.constant 0 : index
    %50 = vector.load %arg1[%c0_49, %c9_50, %c8_51, %c0_52] : memref<1x32x32x4xf32, #tpu.memory_space<vmem>>, vector<1x16x16x4xf32>
    %51 = vector.shape_cast %50 : vector<1x16x16x4xf32> to vector<16x16x4xf32>
    %52 = vector.shape_cast %51 : vector<16x16x4xf32> to vector<256x4xf32>
    %c7_53 = arith.constant 7 : index
    %c0_54 = arith.constant 0 : index
    %c0_55 = arith.constant 0 : index
    %53 = vector.load %arg2[%c7_53, %c0_54, %c0_55] : memref<9x4x4xf32, #tpu.memory_space<vmem>>, vector<1x4x4xf32>
    %54 = vector.shape_cast %53 : vector<1x4x4xf32> to vector<4x4xf32>
    %cst_56 = arith.constant dense<0.000000e+00> : vector<256x4xf32>
    %55 = tpu.matmul %52, %54, %cst_56 {dimension_numbers = #tpu.dot_dimension_numbers<[1], [0], [0], [1], [0, 0, 1, 1], [], []>} : vector<256x4xf32>, vector<4x4xf32>, vector<256x4xf32> -> vector<256x4xf32>
    %56 = arith.addf %49, %55 : vector<256x4xf32>
    %c0_57 = arith.constant 0 : index
    %c9_58 = arith.constant 9 : index
    %c9_59 = arith.constant 9 : index
    %c0_60 = arith.constant 0 : index
    %57 = vector.load %arg1[%c0_57, %c9_58, %c9_59, %c0_60] : memref<1x32x32x4xf32, #tpu.memory_space<vmem>>, vector<1x16x16x4xf32>
    %58 = vector.shape_cast %57 : vector<1x16x16x4xf32> to vector<16x16x4xf32>
    %59 = vector.shape_cast %58 : vector<16x16x4xf32> to vector<256x4xf32>
    %c8_61 = arith.constant 8 : index
    %c0_62 = arith.constant 0 : index
    %c0_63 = arith.constant 0 : index
    %60 = vector.load %arg2[%c8_61, %c0_62, %c0_63] : memref<9x4x4xf32, #tpu.memory_space<vmem>>, vector<1x4x4xf32>
    %61 = vector.shape_cast %60 : vector<1x4x4xf32> to vector<4x4xf32>
    %cst_64 = arith.constant dense<0.000000e+00> : vector<256x4xf32>
    %62 = tpu.matmul %59, %61, %cst_64 {dimension_numbers = #tpu.dot_dimension_numbers<[1], [0], [0], [1], [0, 0, 1, 1], [], []>} : vector<256x4xf32>, vector<4x4xf32>, vector<256x4xf32> -> vector<256x4xf32>
    %63 = arith.addf %56, %62 : vector<256x4xf32>
    %c0_65 = arith.constant 0 : index
    %c0_66 = arith.constant 0 : index
    %64 = vector.load %arg3[%c0_65, %c0_66] : memref<1x4xf32, #tpu.memory_space<vmem>>, vector<1x4xf32>
    %65 = vector.broadcast %64 : vector<1x4xf32> to vector<256x4xf32>
    %66 = arith.addf %63, %65 : vector<256x4xf32>
    %c0_67 = arith.constant 0 : index
    %c5_68 = arith.constant 5 : index
    %c5_69 = arith.constant 5 : index
    %c0_70 = arith.constant 0 : index
    %67 = vector.load %arg1[%c0_67, %c5_68, %c5_69, %c0_70] : memref<1x32x32x4xf32, #tpu.memory_space<vmem>>, vector<1x16x16x4xf32>
    %68 = vector.shape_cast %67 : vector<1x16x16x4xf32> to vector<16x16x4xf32>
    %69 = vector.shape_cast %68 : vector<16x16x4xf32> to vector<256x4xf32>
    %c0_71 = arith.constant 0 : index
    %c0_72 = arith.constant 0 : index
    %c0_73 = arith.constant 0 : index
    %70 = vector.load %arg4[%c0_71, %c0_72, %c0_73] : memref<9x4x4xf32, #tpu.memory_space<vmem>>, vector<1x4x4xf32>
    %71 = vector.shape_cast %70 : vector<1x4x4xf32> to vector<4x4xf32>
    %cst_74 = arith.constant dense<0.000000e+00> : vector<256x4xf32>
    %72 = tpu.matmul %69, %71, %cst_74 {dimension_numbers = #tpu.dot_dimension_numbers<[1], [0], [0], [1], [0, 0, 1, 1], [], []>} : vector<256x4xf32>, vector<4x4xf32>, vector<256x4xf32> -> vector<256x4xf32>
    %c0_75 = arith.constant 0 : index
    %c5_76 = arith.constant 5 : index
    %c8_77 = arith.constant 8 : index
    %c0_78 = arith.constant 0 : index
    %73 = vector.load %arg1[%c0_75, %c5_76, %c8_77, %c0_78] : memref<1x32x32x4xf32, #tpu.memory_space<vmem>>, vector<1x16x16x4xf32>
    %74 = vector.shape_cast %73 : vector<1x16x16x4xf32> to vector<16x16x4xf32>
    %75 = vector.shape_cast %74 : vector<16x16x4xf32> to vector<256x4xf32>
    %c1_79 = arith.constant 1 : index
    %c0_80 = arith.constant 0 : index
    %c0_81 = arith.constant 0 : index
    %76 = vector.load %arg4[%c1_79, %c0_80, %c0_81] : memref<9x4x4xf32, #tpu.memory_space<vmem>>, vector<1x4x4xf32>
    %77 = vector.shape_cast %76 : vector<1x4x4xf32> to vector<4x4xf32>
    %cst_82 = arith.constant dense<0.000000e+00> : vector<256x4xf32>
    %78 = tpu.matmul %75, %77, %cst_82 {dimension_numbers = #tpu.dot_dimension_numbers<[1], [0], [0], [1], [0, 0, 1, 1], [], []>} : vector<256x4xf32>, vector<4x4xf32>, vector<256x4xf32> -> vector<256x4xf32>
    %79 = arith.addf %72, %78 : vector<256x4xf32>
    %c0_83 = arith.constant 0 : index
    %c5_84 = arith.constant 5 : index
    %c11 = arith.constant 11 : index
    %c0_85 = arith.constant 0 : index
    %80 = vector.load %arg1[%c0_83, %c5_84, %c11, %c0_85] : memref<1x32x32x4xf32, #tpu.memory_space<vmem>>, vector<1x16x16x4xf32>
    %81 = vector.shape_cast %80 : vector<1x16x16x4xf32> to vector<16x16x4xf32>
    %82 = vector.shape_cast %81 : vector<16x16x4xf32> to vector<256x4xf32>
    %c2_86 = arith.constant 2 : index
    %c0_87 = arith.constant 0 : index
    %c0_88 = arith.constant 0 : index
    %83 = vector.load %arg4[%c2_86, %c0_87, %c0_88] : memref<9x4x4xf32, #tpu.memory_space<vmem>>, vector<1x4x4xf32>
    %84 = vector.shape_cast %83 : vector<1x4x4xf32> to vector<4x4xf32>
    %cst_89 = arith.constant dense<0.000000e+00> : vector<256x4xf32>
    %85 = tpu.matmul %82, %84, %cst_89 {dimension_numbers = #tpu.dot_dimension_numbers<[1], [0], [0], [1], [0, 0, 1, 1], [], []>} : vector<256x4xf32>, vector<4x4xf32>, vector<256x4xf32> -> vector<256x4xf32>
    %86 = arith.addf %79, %85 : vector<256x4xf32>
    %c0_90 = arith.constant 0 : index
    %c8_91 = arith.constant 8 : index
    %c5_92 = arith.constant 5 : index
    %c0_93 = arith.constant 0 : index
    %87 = vector.load %arg1[%c0_90, %c8_91, %c5_92, %c0_93] : memref<1x32x32x4xf32, #tpu.memory_space<vmem>>, vector<1x16x16x4xf32>
    %88 = vector.shape_cast %87 : vector<1x16x16x4xf32> to vector<16x16x4xf32>
    %89 = vector.shape_cast %88 : vector<16x16x4xf32> to vector<256x4xf32>
    %c3_94 = arith.constant 3 : index
    %c0_95 = arith.constant 0 : index
    %c0_96 = arith.constant 0 : index
    %90 = vector.load %arg4[%c3_94, %c0_95, %c0_96] : memref<9x4x4xf32, #tpu.memory_space<vmem>>, vector<1x4x4xf32>
    %91 = vector.shape_cast %90 : vector<1x4x4xf32> to vector<4x4xf32>
    %cst_97 = arith.constant dense<0.000000e+00> : vector<256x4xf32>
    %92 = tpu.matmul %89, %91, %cst_97 {dimension_numbers = #tpu.dot_dimension_numbers<[1], [0], [0], [1], [0, 0, 1, 1], [], []>} : vector<256x4xf32>, vector<4x4xf32>, vector<256x4xf32> -> vector<256x4xf32>
    %93 = arith.addf %86, %92 : vector<256x4xf32>
    %c0_98 = arith.constant 0 : index
    %c8_99 = arith.constant 8 : index
    %c8_100 = arith.constant 8 : index
    %c0_101 = arith.constant 0 : index
    %94 = vector.load %arg1[%c0_98, %c8_99, %c8_100, %c0_101] : memref<1x32x32x4xf32, #tpu.memory_space<vmem>>, vector<1x16x16x4xf32>
    %95 = vector.shape_cast %94 : vector<1x16x16x4xf32> to vector<16x16x4xf32>
    %96 = vector.shape_cast %95 : vector<16x16x4xf32> to vector<256x4xf32>
    %c4_102 = arith.constant 4 : index
    %c0_103 = arith.constant 0 : index
    %c0_104 = arith.constant 0 : index
    %97 = vector.load %arg4[%c4_102, %c0_103, %c0_104] : memref<9x4x4xf32, #tpu.memory_space<vmem>>, vector<1x4x4xf32>
    %98 = vector.shape_cast %97 : vector<1x4x4xf32> to vector<4x4xf32>
    %cst_105 = arith.constant dense<0.000000e+00> : vector<256x4xf32>
    %99 = tpu.matmul %96, %98, %cst_105 {dimension_numbers = #tpu.dot_dimension_numbers<[1], [0], [0], [1], [0, 0, 1, 1], [], []>} : vector<256x4xf32>, vector<4x4xf32>, vector<256x4xf32> -> vector<256x4xf32>
    %100 = arith.addf %93, %99 : vector<256x4xf32>
    %c0_106 = arith.constant 0 : index
    %c8_107 = arith.constant 8 : index
    %c11_108 = arith.constant 11 : index
    %c0_109 = arith.constant 0 : index
    %101 = vector.load %arg1[%c0_106, %c8_107, %c11_108, %c0_109] : memref<1x32x32x4xf32, #tpu.memory_space<vmem>>, vector<1x16x16x4xf32>
    %102 = vector.shape_cast %101 : vector<1x16x16x4xf32> to vector<16x16x4xf32>
    %103 = vector.shape_cast %102 : vector<16x16x4xf32> to vector<256x4xf32>
    %c5_110 = arith.constant 5 : index
    %c0_111 = arith.constant 0 : index
    %c0_112 = arith.constant 0 : index
    %104 = vector.load %arg4[%c5_110, %c0_111, %c0_112] : memref<9x4x4xf32, #tpu.memory_space<vmem>>, vector<1x4x4xf32>
    %105 = vector.shape_cast %104 : vector<1x4x4xf32> to vector<4x4xf32>
    %cst_113 = arith.constant dense<0.000000e+00> : vector<256x4xf32>
    %106 = tpu.matmul %103, %105, %cst_113 {dimension_numbers = #tpu.dot_dimension_numbers<[1], [0], [0], [1], [0, 0, 1, 1], [], []>} : vector<256x4xf32>, vector<4x4xf32>, vector<256x4xf32> -> vector<256x4xf32>
    %107 = arith.addf %100, %106 : vector<256x4xf32>
    %c0_114 = arith.constant 0 : index
    %c11_115 = arith.constant 11 : index
    %c5_116 = arith.constant 5 : index
    %c0_117 = arith.constant 0 : index
    %108 = vector.load %arg1[%c0_114, %c11_115, %c5_116, %c0_117] : memref<1x32x32x4xf32, #tpu.memory_space<vmem>>, vector<1x16x16x4xf32>
    %109 = vector.shape_cast %108 : vector<1x16x16x4xf32> to vector<16x16x4xf32>
    %110 = vector.shape_cast %109 : vector<16x16x4xf32> to vector<256x4xf32>
    %c6_118 = arith.constant 6 : index
    %c0_119 = arith.constant 0 : index
    %c0_120 = arith.constant 0 : index
    %111 = vector.load %arg4[%c6_118, %c0_119, %c0_120] : memref<9x4x4xf32, #tpu.memory_space<vmem>>, vector<1x4x4xf32>
    %112 = vector.shape_cast %111 : vector<1x4x4xf32> to vector<4x4xf32>
    %cst_121 = arith.constant dense<0.000000e+00> : vector<256x4xf32>
    %113 = tpu.matmul %110, %112, %cst_121 {dimension_numbers = #tpu.dot_dimension_numbers<[1], [0], [0], [1], [0, 0, 1, 1], [], []>} : vector<256x4xf32>, vector<4x4xf32>, vector<256x4xf32> -> vector<256x4xf32>
    %114 = arith.addf %107, %113 : vector<256x4xf32>
    %c0_122 = arith.constant 0 : index
    %c11_123 = arith.constant 11 : index
    %c8_124 = arith.constant 8 : index
    %c0_125 = arith.constant 0 : index
    %115 = vector.load %arg1[%c0_122, %c11_123, %c8_124, %c0_125] : memref<1x32x32x4xf32, #tpu.memory_space<vmem>>, vector<1x16x16x4xf32>
    %116 = vector.shape_cast %115 : vector<1x16x16x4xf32> to vector<16x16x4xf32>
    %117 = vector.shape_cast %116 : vector<16x16x4xf32> to vector<256x4xf32>
    %c7_126 = arith.constant 7 : index
    %c0_127 = arith.constant 0 : index
    %c0_128 = arith.constant 0 : index
    %118 = vector.load %arg4[%c7_126, %c0_127, %c0_128] : memref<9x4x4xf32, #tpu.memory_space<vmem>>, vector<1x4x4xf32>
    %119 = vector.shape_cast %118 : vector<1x4x4xf32> to vector<4x4xf32>
    %cst_129 = arith.constant dense<0.000000e+00> : vector<256x4xf32>
    %120 = tpu.matmul %117, %119, %cst_129 {dimension_numbers = #tpu.dot_dimension_numbers<[1], [0], [0], [1], [0, 0, 1, 1], [], []>} : vector<256x4xf32>, vector<4x4xf32>, vector<256x4xf32> -> vector<256x4xf32>
    %121 = arith.addf %114, %120 : vector<256x4xf32>
    %c0_130 = arith.constant 0 : index
    %c11_131 = arith.constant 11 : index
    %c11_132 = arith.constant 11 : index
    %c0_133 = arith.constant 0 : index
    %122 = vector.load %arg1[%c0_130, %c11_131, %c11_132, %c0_133] : memref<1x32x32x4xf32, #tpu.memory_space<vmem>>, vector<1x16x16x4xf32>
    %123 = vector.shape_cast %122 : vector<1x16x16x4xf32> to vector<16x16x4xf32>
    %124 = vector.shape_cast %123 : vector<16x16x4xf32> to vector<256x4xf32>
    %c8_134 = arith.constant 8 : index
    %c0_135 = arith.constant 0 : index
    %c0_136 = arith.constant 0 : index
    %125 = vector.load %arg4[%c8_134, %c0_135, %c0_136] : memref<9x4x4xf32, #tpu.memory_space<vmem>>, vector<1x4x4xf32>
    %126 = vector.shape_cast %125 : vector<1x4x4xf32> to vector<4x4xf32>
    %cst_137 = arith.constant dense<0.000000e+00> : vector<256x4xf32>
    %127 = tpu.matmul %124, %126, %cst_137 {dimension_numbers = #tpu.dot_dimension_numbers<[1], [0], [0], [1], [0, 0, 1, 1], [], []>} : vector<256x4xf32>, vector<4x4xf32>, vector<256x4xf32> -> vector<256x4xf32>
    %128 = arith.addf %121, %127 : vector<256x4xf32>
    %c0_138 = arith.constant 0 : index
    %c0_139 = arith.constant 0 : index
    %129 = vector.load %arg5[%c0_138, %c0_139] : memref<1x4xf32, #tpu.memory_space<vmem>>, vector<1x4xf32>
    %130 = vector.broadcast %129 : vector<1x4xf32> to vector<256x4xf32>
    %131 = arith.addf %128, %130 : vector<256x4xf32>
    %132 = vector.shape_cast %66 : vector<256x4xf32> to vector<16x16x4xf32>
    %c8_140 = arith.constant 8 : index
    %c8_141 = arith.constant 8 : index
    %c0_142 = arith.constant 0 : index
    %133 = vector.load %arg11[%c8_140, %c8_141, %c0_142] : memref<32x32x4xf32, #tpu.memory_space<vmem>>, vector<16x16x4xf32>
    tpu.vector_store %arg11[%c8_140, %c8_141, %c0_142], %132 {strides = array<i32>} : memref<32x32x4xf32, #tpu.memory_space<vmem>>, vector<16x16x4xf32>,
    %c5_143 = arith.constant 5 : index
    %c5_144 = arith.constant 5 : index
    %c0_145 = arith.constant 0 : index
    %134 = vector.load %arg11[%c5_143, %c5_144, %c0_145] : memref<32x32x4xf32, #tpu.memory_space<vmem>>, vector<16x16x4xf32>
    %135 = vector.shape_cast %134 : vector<16x16x4xf32> to vector<256x4xf32>
    %c0_146 = arith.constant 0 : index
    %c0_147 = arith.constant 0 : index
    %c0_148 = arith.constant 0 : index
    %136 = vector.load %arg4[%c0_146, %c0_147, %c0_148] : memref<9x4x4xf32, #tpu.memory_space<vmem>>, vector<1x4x4xf32>
    %137 = vector.shape_cast %136 : vector<1x4x4xf32> to vector<4x4xf32>
    %cst_149 = arith.constant dense<0.000000e+00> : vector<256x4xf32>
    %138 = tpu.matmul %135, %137, %cst_149 {dimension_numbers = #tpu.dot_dimension_numbers<[1], [0], [0], [1], [0, 0, 1, 1], [], []>} : vector<256x4xf32>, vector<4x4xf32>, vector<256x4xf32> -> vector<256x4xf32>
    %c5_150 = arith.constant 5 : index
    %c8_151 = arith.constant 8 : index
    %c0_152 = arith.constant 0 : index
    %139 = vector.load %arg11[%c5_150, %c8_151, %c0_152] : memref<32x32x4xf32, #tpu.memory_space<vmem>>, vector<16x16x4xf32>
    %140 = vector.shape_cast %139 : vector<16x16x4xf32> to vector<256x4xf32>
    %c1_153 = arith.constant 1 : index
    %c0_154 = arith.constant 0 : index
    %c0_155 = arith.constant 0 : index
    %141 = vector.load %arg4[%c1_153, %c0_154, %c0_155] : memref<9x4x4xf32, #tpu.memory_space<vmem>>, vector<1x4x4xf32>
    %142 = vector.shape_cast %141 : vector<1x4x4xf32> to vector<4x4xf32>
    %cst_156 = arith.constant dense<0.000000e+00> : vector<256x4xf32>
    %143 = tpu.matmul %140, %142, %cst_156 {dimension_numbers = #tpu.dot_dimension_numbers<[1], [0], [0], [1], [0, 0, 1, 1], [], []>} : vector<256x4xf32>, vector<4x4xf32>, vector<256x4xf32> -> vector<256x4xf32>
    %144 = arith.addf %138, %143 : vector<256x4xf32>
    %c5_157 = arith.constant 5 : index
    %c11_158 = arith.constant 11 : index
    %c0_159 = arith.constant 0 : index
    %145 = vector.load %arg11[%c5_157, %c11_158, %c0_159] : memref<32x32x4xf32, #tpu.memory_space<vmem>>, vector<16x16x4xf32>
    %146 = vector.shape_cast %145 : vector<16x16x4xf32> to vector<256x4xf32>
    %c2_160 = arith.constant 2 : index
    %c0_161 = arith.constant 0 : index
    %c0_162 = arith.constant 0 : index
    %147 = vector.load %arg4[%c2_160, %c0_161, %c0_162] : memref<9x4x4xf32, #tpu.memory_space<vmem>>, vector<1x4x4xf32>
    %148 = vector.shape_cast %147 : vector<1x4x4xf32> to vector<4x4xf32>
    %cst_163 = arith.constant dense<0.000000e+00> : vector<256x4xf32>
    %149 = tpu.matmul %146, %148, %cst_163 {dimension_numbers = #tpu.dot_dimension_numbers<[1], [0], [0], [1], [0, 0, 1, 1], [], []>} : vector<256x4xf32>, vector<4x4xf32>, vector<256x4xf32> -> vector<256x4xf32>
    %150 = arith.addf %144, %149 : vector<256x4xf32>
    %c8_164 = arith.constant 8 : index
    %c5_165 = arith.constant 5 : index
    %c0_166 = arith.constant 0 : index
    %151 = vector.load %arg11[%c8_164, %c5_165, %c0_166] : memref<32x32x4xf32, #tpu.memory_space<vmem>>, vector<16x16x4xf32>
    %152 = vector.shape_cast %151 : vector<16x16x4xf32> to vector<256x4xf32>
    %c3_167 = arith.constant 3 : index
    %c0_168 = arith.constant 0 : index
    %c0_169 = arith.constant 0 : index
    %153 = vector.load %arg4[%c3_167, %c0_168, %c0_169] : memref<9x4x4xf32, #tpu.memory_space<vmem>>, vector<1x4x4xf32>
    %154 = vector.shape_cast %153 : vector<1x4x4xf32> to vector<4x4xf32>
    %cst_170 = arith.constant dense<0.000000e+00> : vector<256x4xf32>
    %155 = tpu.matmul %152, %154, %cst_170 {dimension_numbers = #tpu.dot_dimension_numbers<[1], [0], [0], [1], [0, 0, 1, 1], [], []>} : vector<256x4xf32>, vector<4x4xf32>, vector<256x4xf32> -> vector<256x4xf32>
    %156 = arith.addf %150, %155 : vector<256x4xf32>
    %c8_171 = arith.constant 8 : index
    %c8_172 = arith.constant 8 : index
    %c0_173 = arith.constant 0 : index
    %157 = vector.load %arg11[%c8_171, %c8_172, %c0_173] : memref<32x32x4xf32, #tpu.memory_space<vmem>>, vector<16x16x4xf32>
    %158 = vector.shape_cast %157 : vector<16x16x4xf32> to vector<256x4xf32>
    %c4_174 = arith.constant 4 : index
    %c0_175 = arith.constant 0 : index
    %c0_176 = arith.constant 0 : index
    %159 = vector.load %arg4[%c4_174, %c0_175, %c0_176] : memref<9x4x4xf32, #tpu.memory_space<vmem>>, vector<1x4x4xf32>
    %160 = vector.shape_cast %159 : vector<1x4x4xf32> to vector<4x4xf32>
    %cst_177 = arith.constant dense<0.000000e+00> : vector<256x4xf32>
    %161 = tpu.matmul %158, %160, %cst_177 {dimension_numbers = #tpu.dot_dimension_numbers<[1], [0], [0], [1], [0, 0, 1, 1], [], []>} : vector<256x4xf32>, vector<4x4xf32>, vector<256x4xf32> -> vector<256x4xf32>
    %162 = arith.addf %156, %161 : vector<256x4xf32>
    %c8_178 = arith.constant 8 : index
    %c11_179 = arith.constant 11 : index
    %c0_180 = arith.constant 0 : index
    %163 = vector.load %arg11[%c8_178, %c11_179, %c0_180] : memref<32x32x4xf32, #tpu.memory_space<vmem>>, vector<16x16x4xf32>
    %164 = vector.shape_cast %163 : vector<16x16x4xf32> to vector<256x4xf32>
    %c5_181 = arith.constant 5 : index
    %c0_182 = arith.constant 0 : index
    %c0_183 = arith.constant 0 : index
    %165 = vector.load %arg4[%c5_181, %c0_182, %c0_183] : memref<9x4x4xf32, #tpu.memory_space<vmem>>, vector<1x4x4xf32>
    %166 = vector.shape_cast %165 : vector<1x4x4xf32> to vector<4x4xf32>
    %cst_184 = arith.constant dense<0.000000e+00> : vector<256x4xf32>
    %167 = tpu.matmul %164, %166, %cst_184 {dimension_numbers = #tpu.dot_dimension_numbers<[1], [0], [0], [1], [0, 0, 1, 1], [], []>} : vector<256x4xf32>, vector<4x4xf32>, vector<256x4xf32> -> vector<256x4xf32>
    %168 = arith.addf %162, %167 : vector<256x4xf32>
    %c11_185 = arith.constant 11 : index
    %c5_186 = arith.constant 5 : index
    %c0_187 = arith.constant 0 : index
    %169 = vector.load %arg11[%c11_185, %c5_186, %c0_187] : memref<32x32x4xf32, #tpu.memory_space<vmem>>, vector<16x16x4xf32>
    %170 = vector.shape_cast %169 : vector<16x16x4xf32> to vector<256x4xf32>
    %c6_188 = arith.constant 6 : index
    %c0_189 = arith.constant 0 : index
    %c0_190 = arith.constant 0 : index
    %171 = vector.load %arg4[%c6_188, %c0_189, %c0_190] : memref<9x4x4xf32, #tpu.memory_space<vmem>>, vector<1x4x4xf32>
    %172 = vector.shape_cast %171 : vector<1x4x4xf32> to vector<4x4xf32>
    %cst_191 = arith.constant dense<0.000000e+00> : vector<256x4xf32>
    %173 = tpu.matmul %170, %172, %cst_191 {dimension_numbers = #tpu.dot_dimension_numbers<[1], [0], [0], [1], [0, 0, 1, 1], [], []>} : vector<256x4xf32>, vector<4x4xf32>, vector<256x4xf32> -> vector<256x4xf32>
    %174 = arith.addf %168, %173 : vector<256x4xf32>
    %c11_192 = arith.constant 11 : index
    %c8_193 = arith.constant 8 : index
    %c0_194 = arith.constant 0 : index
    %175 = vector.load %arg11[%c11_192, %c8_193, %c0_194] : memref<32x32x4xf32, #tpu.memory_space<vmem>>, vector<16x16x4xf32>
    %176 = vector.shape_cast %175 : vector<16x16x4xf32> to vector<256x4xf32>
    %c7_195 = arith.constant 7 : index
    %c0_196 = arith.constant 0 : index
    %c0_197 = arith.constant 0 : index
    %177 = vector.load %arg4[%c7_195, %c0_196, %c0_197] : memref<9x4x4xf32, #tpu.memory_space<vmem>>, vector<1x4x4xf32>
    %178 = vector.shape_cast %177 : vector<1x4x4xf32> to vector<4x4xf32>
    %cst_198 = arith.constant dense<0.000000e+00> : vector<256x4xf32>
    %179 = tpu.matmul %176, %178, %cst_198 {dimension_numbers = #tpu.dot_dimension_numbers<[1], [0], [0], [1], [0, 0, 1, 1], [], []>} : vector<256x4xf32>, vector<4x4xf32>, vector<256x4xf32> -> vector<256x4xf32>
    %180 = arith.addf %174, %179 : vector<256x4xf32>
    %c11_199 = arith.constant 11 : index
    %c11_200 = arith.constant 11 : index
    %c0_201 = arith.constant 0 : index
    %181 = vector.load %arg11[%c11_199, %c11_200, %c0_201] : memref<32x32x4xf32, #tpu.memory_space<vmem>>, vector<16x16x4xf32>
    %182 = vector.shape_cast %181 : vector<16x16x4xf32> to vector<256x4xf32>
    %c8_202 = arith.constant 8 : index
    %c0_203 = arith.constant 0 : index
    %c0_204 = arith.constant 0 : index
    %183 = vector.load %arg4[%c8_202, %c0_203, %c0_204] : memref<9x4x4xf32, #tpu.memory_space<vmem>>, vector<1x4x4xf32>
    %184 = vector.shape_cast %183 : vector<1x4x4xf32> to vector<4x4xf32>
    %cst_205 = arith.constant dense<0.000000e+00> : vector<256x4xf32>
    %185 = tpu.matmul %182, %184, %cst_205 {dimension_numbers = #tpu.dot_dimension_numbers<[1], [0], [0], [1], [0, 0, 1, 1], [], []>} : vector<256x4xf32>, vector<4x4xf32>, vector<256x4xf32> -> vector<256x4xf32>
    %186 = arith.addf %180, %185 : vector<256x4xf32>
    %c0_206 = arith.constant 0 : index
    %c0_207 = arith.constant 0 : index
    %187 = vector.load %arg5[%c0_206, %c0_207] : memref<1x4xf32, #tpu.memory_space<vmem>>, vector<1x4xf32>
    %188 = vector.broadcast %187 : vector<1x4xf32> to vector<256x4xf32>
    %189 = arith.addf %186, %188 : vector<256x4xf32>
    %190 = vector.shape_cast %189 : vector<256x4xf32> to vector<16x16x4xf32>
    %c8_208 = arith.constant 8 : index
    %c8_209 = arith.constant 8 : index
    %c0_210 = arith.constant 0 : index
    %191 = vector.load %arg11[%c8_208, %c8_209, %c0_210] : memref<32x32x4xf32, #tpu.memory_space<vmem>>, vector<16x16x4xf32>
    tpu.vector_store %arg11[%c8_208, %c8_209, %c0_210], %190 {strides = array<i32>} : memref<32x32x4xf32, #tpu.memory_space<vmem>>, vector<16x16x4xf32>,
    %c3_211 = arith.constant 3 : index
    %c3_212 = arith.constant 3 : index
    %c0_213 = arith.constant 0 : index
    %192 = vector.load %arg11[%c3_211, %c3_212, %c0_213] : memref<32x32x4xf32, #tpu.memory_space<vmem>>, vector<16x16x4xf32>
    %193 = vector.shape_cast %192 : vector<16x16x4xf32> to vector<256x4xf32>
    %c0_214 = arith.constant 0 : index
    %c0_215 = arith.constant 0 : index
    %c0_216 = arith.constant 0 : index
    %194 = vector.load %arg6[%c0_214, %c0_215, %c0_216] : memref<9x4x4xf32, #tpu.memory_space<vmem>>, vector<1x4x4xf32>
    %195 = vector.shape_cast %194 : vector<1x4x4xf32> to vector<4x4xf32>
    %cst_217 = arith.constant dense<0.000000e+00> : vector<256x4xf32>
    %196 = tpu.matmul %193, %195, %cst_217 {dimension_numbers = #tpu.dot_dimension_numbers<[1], [0], [0], [1], [0, 0, 1, 1], [], []>} : vector<256x4xf32>, vector<4x4xf32>, vector<256x4xf32> -> vector<256x4xf32>
    %c3_218 = arith.constant 3 : index
    %c8_219 = arith.constant 8 : index
    %c0_220 = arith.constant 0 : index
    %197 = vector.load %arg11[%c3_218, %c8_219, %c0_220] : memref<32x32x4xf32, #tpu.memory_space<vmem>>, vector<16x16x4xf32>
    %198 = vector.shape_cast %197 : vector<16x16x4xf32> to vector<256x4xf32>
    %c1_221 = arith.constant 1 : index
    %c0_222 = arith.constant 0 : index
    %c0_223 = arith.constant 0 : index
    %199 = vector.load %arg6[%c1_221, %c0_222, %c0_223] : memref<9x4x4xf32, #tpu.memory_space<vmem>>, vector<1x4x4xf32>
    %200 = vector.shape_cast %199 : vector<1x4x4xf32> to vector<4x4xf32>
    %cst_224 = arith.constant dense<0.000000e+00> : vector<256x4xf32>
    %201 = tpu.matmul %198, %200, %cst_224 {dimension_numbers = #tpu.dot_dimension_numbers<[1], [0], [0], [1], [0, 0, 1, 1], [], []>} : vector<256x4xf32>, vector<4x4xf32>, vector<256x4xf32> -> vector<256x4xf32>
    %202 = arith.addf %196, %201 : vector<256x4xf32>
    %c3_225 = arith.constant 3 : index
    %c13 = arith.constant 13 : index
    %c0_226 = arith.constant 0 : index
    %203 = vector.load %arg11[%c3_225, %c13, %c0_226] : memref<32x32x4xf32, #tpu.memory_space<vmem>>, vector<16x16x4xf32>
    %204 = vector.shape_cast %203 : vector<16x16x4xf32> to vector<256x4xf32>
    %c2_227 = arith.constant 2 : index
    %c0_228 = arith.constant 0 : index
    %c0_229 = arith.constant 0 : index
    %205 = vector.load %arg6[%c2_227, %c0_228, %c0_229] : memref<9x4x4xf32, #tpu.memory_space<vmem>>, vector<1x4x4xf32>
    %206 = vector.shape_cast %205 : vector<1x4x4xf32> to vector<4x4xf32>
    %cst_230 = arith.constant dense<0.000000e+00> : vector<256x4xf32>
    %207 = tpu.matmul %204, %206, %cst_230 {dimension_numbers = #tpu.dot_dimension_numbers<[1], [0], [0], [1], [0, 0, 1, 1], [], []>} : vector<256x4xf32>, vector<4x4xf32>, vector<256x4xf32> -> vector<256x4xf32>
    %208 = arith.addf %202, %207 : vector<256x4xf32>
    %c8_231 = arith.constant 8 : index
    %c3_232 = arith.constant 3 : index
    %c0_233 = arith.constant 0 : index
    %209 = vector.load %arg11[%c8_231, %c3_232, %c0_233] : memref<32x32x4xf32, #tpu.memory_space<vmem>>, vector<16x16x4xf32>
    %210 = vector.shape_cast %209 : vector<16x16x4xf32> to vector<256x4xf32>
    %c3_234 = arith.constant 3 : index
    %c0_235 = arith.constant 0 : index
    %c0_236 = arith.constant 0 : index
    %211 = vector.load %arg6[%c3_234, %c0_235, %c0_236] : memref<9x4x4xf32, #tpu.memory_space<vmem>>, vector<1x4x4xf32>
    %212 = vector.shape_cast %211 : vector<1x4x4xf32> to vector<4x4xf32>
    %cst_237 = arith.constant dense<0.000000e+00> : vector<256x4xf32>
    %213 = tpu.matmul %210, %212, %cst_237 {dimension_numbers = #tpu.dot_dimension_numbers<[1], [0], [0], [1], [0, 0, 1, 1], [], []>} : vector<256x4xf32>, vector<4x4xf32>, vector<256x4xf32> -> vector<256x4xf32>
    %214 = arith.addf %208, %213 : vector<256x4xf32>
    %c8_238 = arith.constant 8 : index
    %c8_239 = arith.constant 8 : index
    %c0_240 = arith.constant 0 : index
    %215 = vector.load %arg11[%c8_238, %c8_239, %c0_240] : memref<32x32x4xf32, #tpu.memory_space<vmem>>, vector<16x16x4xf32>
    %216 = vector.shape_cast %215 : vector<16x16x4xf32> to vector<256x4xf32>
    %c4_241 = arith.constant 4 : index
    %c0_242 = arith.constant 0 : index
    %c0_243 = arith.constant 0 : index
    %217 = vector.load %arg6[%c4_241, %c0_242, %c0_243] : memref<9x4x4xf32, #tpu.memory_space<vmem>>, vector<1x4x4xf32>
    %218 = vector.shape_cast %217 : vector<1x4x4xf32> to vector<4x4xf32>
    %cst_244 = arith.constant dense<0.000000e+00> : vector<256x4xf32>
    %219 = tpu.matmul %216, %218, %cst_244 {dimension_numbers = #tpu.dot_dimension_numbers<[1], [0], [0], [1], [0, 0, 1, 1], [], []>} : vector<256x4xf32>, vector<4x4xf32>, vector<256x4xf32> -> vector<256x4xf32>
    %220 = arith.addf %214, %219 : vector<256x4xf32>
    %c8_245 = arith.constant 8 : index
    %c13_246 = arith.constant 13 : index
    %c0_247 = arith.constant 0 : index
    %221 = vector.load %arg11[%c8_245, %c13_246, %c0_247] : memref<32x32x4xf32, #tpu.memory_space<vmem>>, vector<16x16x4xf32>
    %222 = vector.shape_cast %221 : vector<16x16x4xf32> to vector<256x4xf32>
    %c5_248 = arith.constant 5 : index
    %c0_249 = arith.constant 0 : index
    %c0_250 = arith.constant 0 : index
    %223 = vector.load %arg6[%c5_248, %c0_249, %c0_250] : memref<9x4x4xf32, #tpu.memory_space<vmem>>, vector<1x4x4xf32>
    %224 = vector.shape_cast %223 : vector<1x4x4xf32> to vector<4x4xf32>
    %cst_251 = arith.constant dense<0.000000e+00> : vector<256x4xf32>
    %225 = tpu.matmul %222, %224, %cst_251 {dimension_numbers = #tpu.dot_dimension_numbers<[1], [0], [0], [1], [0, 0, 1, 1], [], []>} : vector<256x4xf32>, vector<4x4xf32>, vector<256x4xf32> -> vector<256x4xf32>
    %226 = arith.addf %220, %225 : vector<256x4xf32>
    %c13_252 = arith.constant 13 : index
    %c3_253 = arith.constant 3 : index
    %c0_254 = arith.constant 0 : index
    %227 = vector.load %arg11[%c13_252, %c3_253, %c0_254] : memref<32x32x4xf32, #tpu.memory_space<vmem>>, vector<16x16x4xf32>
    %228 = vector.shape_cast %227 : vector<16x16x4xf32> to vector<256x4xf32>
    %c6_255 = arith.constant 6 : index
    %c0_256 = arith.constant 0 : index
    %c0_257 = arith.constant 0 : index
    %229 = vector.load %arg6[%c6_255, %c0_256, %c0_257] : memref<9x4x4xf32, #tpu.memory_space<vmem>>, vector<1x4x4xf32>
    %230 = vector.shape_cast %229 : vector<1x4x4xf32> to vector<4x4xf32>
    %cst_258 = arith.constant dense<0.000000e+00> : vector<256x4xf32>
    %231 = tpu.matmul %228, %230, %cst_258 {dimension_numbers = #tpu.dot_dimension_numbers<[1], [0], [0], [1], [0, 0, 1, 1], [], []>} : vector<256x4xf32>, vector<4x4xf32>, vector<256x4xf32> -> vector<256x4xf32>
    %232 = arith.addf %226, %231 : vector<256x4xf32>
    %c13_259 = arith.constant 13 : index
    %c8_260 = arith.constant 8 : index
    %c0_261 = arith.constant 0 : index
    %233 = vector.load %arg11[%c13_259, %c8_260, %c0_261] : memref<32x32x4xf32, #tpu.memory_space<vmem>>, vector<16x16x4xf32>
    %234 = vector.shape_cast %233 : vector<16x16x4xf32> to vector<256x4xf32>
    %c7_262 = arith.constant 7 : index
    %c0_263 = arith.constant 0 : index
    %c0_264 = arith.constant 0 : index
    %235 = vector.load %arg6[%c7_262, %c0_263, %c0_264] : memref<9x4x4xf32, #tpu.memory_space<vmem>>, vector<1x4x4xf32>
    %236 = vector.shape_cast %235 : vector<1x4x4xf32> to vector<4x4xf32>
    %cst_265 = arith.constant dense<0.000000e+00> : vector<256x4xf32>
    %237 = tpu.matmul %234, %236, %cst_265 {dimension_numbers = #tpu.dot_dimension_numbers<[1], [0], [0], [1], [0, 0, 1, 1], [], []>} : vector<256x4xf32>, vector<4x4xf32>, vector<256x4xf32> -> vector<256x4xf32>
    %238 = arith.addf %232, %237 : vector<256x4xf32>
    %c13_266 = arith.constant 13 : index
    %c13_267 = arith.constant 13 : index
    %c0_268 = arith.constant 0 : index
    %239 = vector.load %arg11[%c13_266, %c13_267, %c0_268] : memref<32x32x4xf32, #tpu.memory_space<vmem>>, vector<16x16x4xf32>
    %240 = vector.shape_cast %239 : vector<16x16x4xf32> to vector<256x4xf32>
    %c8_269 = arith.constant 8 : index
    %c0_270 = arith.constant 0 : index
    %c0_271 = arith.constant 0 : index
    %241 = vector.load %arg6[%c8_269, %c0_270, %c0_271] : memref<9x4x4xf32, #tpu.memory_space<vmem>>, vector<1x4x4xf32>
    %242 = vector.shape_cast %241 : vector<1x4x4xf32> to vector<4x4xf32>
    %cst_272 = arith.constant dense<0.000000e+00> : vector<256x4xf32>
    %243 = tpu.matmul %240, %242, %cst_272 {dimension_numbers = #tpu.dot_dimension_numbers<[1], [0], [0], [1], [0, 0, 1, 1], [], []>} : vector<256x4xf32>, vector<4x4xf32>, vector<256x4xf32> -> vector<256x4xf32>
    %244 = arith.addf %238, %243 : vector<256x4xf32>
    %c0_273 = arith.constant 0 : index
    %c0_274 = arith.constant 0 : index
    %245 = vector.load %arg7[%c0_273, %c0_274] : memref<1x4xf32, #tpu.memory_space<vmem>>, vector<1x4xf32>
    %246 = vector.broadcast %245 : vector<1x4xf32> to vector<256x4xf32>
    %247 = arith.addf %244, %246 : vector<256x4xf32>
    %c0_275 = arith.constant 0 : index
    %c0_276 = arith.constant 0 : index
    %248 = vector.load %arg8[%c0_275, %c0_276] : memref<4x4xf32, #tpu.memory_space<vmem>>, vector<4x4xf32>
    %c0_277 = arith.constant 0 : index
    %c0_278 = arith.constant 0 : index
    %249 = vector.load %arg9[%c0_277, %c0_278] : memref<1x4xf32, #tpu.memory_space<vmem>>, vector<1x4xf32>
    %c0_279 = arith.constant 0 : index
    %c8_280 = arith.constant 8 : index
    %c8_281 = arith.constant 8 : index
    %c0_282 = arith.constant 0 : index
    %250 = vector.load %arg1[%c0_279, %c8_280, %c8_281, %c0_282] : memref<1x32x32x4xf32, #tpu.memory_space<vmem>>, vector<1x16x16x4xf32>
    %251 = vector.shape_cast %250 : vector<1x16x16x4xf32> to vector<16x16x4xf32>
    %252 = vector.shape_cast %251 : vector<16x16x4xf32> to vector<256x4xf32>
    %cst_283 = arith.constant 0.000000e+00 : f32
    %253 = vector.broadcast %cst_283 : f32 to vector<256x4xf32>
    %254 = arith.maximumf %66, %253 : vector<256x4xf32>
    %255 = arith.addf %252, %254 : vector<256x4xf32>
    %cst_284 = arith.constant dense<0.000000e+00> : vector<256x4xf32>
    %256 = tpu.matmul %131, %248, %cst_284 {dimension_numbers = #tpu.dot_dimension_numbers<[1], [0], [0], [1], [0, 0, 1, 1], [], []>} : vector<256x4xf32>, vector<4x4xf32>, vector<256x4xf32> -> vector<256x4xf32>
    %257 = vector.broadcast %249 : vector<1x4xf32> to vector<256x4xf32>
    %258 = arith.addf %256, %257 : vector<256x4xf32>
    %cst_285 = arith.constant 0.000000e+00 : f32
    %259 = vector.broadcast %cst_285 : f32 to vector<256x4xf32>
    %260 = arith.maximumf %258, %259 : vector<256x4xf32>
    %261 = arith.addf %255, %260 : vector<256x4xf32>
    %cst_286 = arith.constant dense<0.000000e+00> : vector<256x4xf32>
    %262 = tpu.matmul %189, %248, %cst_286 {dimension_numbers = #tpu.dot_dimension_numbers<[1], [0], [0], [1], [0, 0, 1, 1], [], []>} : vector<256x4xf32>, vector<4x4xf32>, vector<256x4xf32> -> vector<256x4xf32>
    %263 = vector.broadcast %249 : vector<1x4xf32> to vector<256x4xf32>
    %264 = arith.addf %262, %263 : vector<256x4xf32>
    %cst_287 = arith.constant 0.000000e+00 : f32
    %265 = vector.broadcast %cst_287 : f32 to vector<256x4xf32>
    %266 = arith.maximumf %264, %265 : vector<256x4xf32>
    %267 = arith.addf %261, %266 : vector<256x4xf32>
    %cst_288 = arith.constant dense<0.000000e+00> : vector<256x4xf32>
    %268 = tpu.matmul %247, %248, %cst_288 {dimension_numbers = #tpu.dot_dimension_numbers<[1], [0], [0], [1], [0, 0, 1, 1], [], []>} : vector<256x4xf32>, vector<4x4xf32>, vector<256x4xf32> -> vector<256x4xf32>
    %269 = vector.broadcast %249 : vector<1x4xf32> to vector<256x4xf32>
    %270 = arith.addf %268, %269 : vector<256x4xf32>
    %cst_289 = arith.constant 0.000000e+00 : f32
    %271 = vector.broadcast %cst_289 : f32 to vector<256x4xf32>
    %272 = arith.maximumf %270, %271 : vector<256x4xf32>
    %273 = arith.addf %267, %272 : vector<256x4xf32>
    %c0_290 = arith.constant 0 : index
    %c0_291 = arith.constant 0 : index
    %c0_292 = arith.constant 0 : index
    %274 = vector.load %arg10[%c0_290, %c0_291, %c0_292] : memref<1x256x4xf32, #tpu.memory_space<vmem>>, vector<1x256x4xf32>
    %275 = vector.shape_cast %274 : vector<1x256x4xf32> to vector<256x4xf32>
    %276 = vector.shape_cast %273 : vector<256x4xf32> to vector<1x256x4xf32>
    tpu.vector_store %arg10[%c0_290, %c0_291, %c0_292], %276 {strides = array<i32>} : memref<1x256x4xf32, #tpu.memory_space<vmem>>, vector<1x256x4xf32>,
    return
  }
  func.func @transform_0(%arg0: i32) -> (i32, i32, i32, i32) {
    %c0_i32 = arith.constant 0 : i32
    %c0_i32_0 = arith.constant 0 : i32
    %c0_i32_1 = arith.constant 0 : i32
    %c0_i32_2 = arith.constant 0 : i32
    return %arg0, %c0_i32, %c0_i32_0, %c0_i32_1 : i32, i32, i32, i32
  }
  func.func @transform_1(%arg0: i32) -> (i32, i32, i32) {
    %c0_i32 = arith.constant 0 : i32
    %c0_i32_0 = arith.constant 0 : i32
    %c0_i32_1 = arith.constant 0 : i32
    %c0_i32_2 = arith.constant 0 : i32
    return %c0_i32, %c0_i32_0, %c0_i32_1 : i32, i32, i32
  }
  func.func @transform_2(%arg0: i32) -> (i32, i32) {
    %c0_i32 = arith.constant 0 : i32
    %c0_i32_0 = arith.constant 0 : i32
    %c0_i32_1 = arith.constant 0 : i32
    return %c0_i32, %c0_i32_0 : i32, i32
  }
  func.func @transform_3(%arg0: i32) -> (i32, i32, i32) {
    %c0_i32 = arith.constant 0 : i32
    %c0_i32_0 = arith.constant 0 : i32
    %c0_i32_1 = arith.constant 0 : i32
    %c0_i32_2 = arith.constant 0 : i32
    return %c0_i32, %c0_i32_0, %c0_i32_1 : i32, i32, i32
  }
  func.func @transform_4(%arg0: i32) -> (i32, i32) {
    %c0_i32 = arith.constant 0 : i32
    %c0_i32_0 = arith.constant 0 : i32
    %c0_i32_1 = arith.constant 0 : i32
    return %c0_i32, %c0_i32_0 : i32, i32
  }
  func.func @transform_5(%arg0: i32) -> (i32, i32, i32) {
    %c0_i32 = arith.constant 0 : i32
    %c0_i32_0 = arith.constant 0 : i32
    %c0_i32_1 = arith.constant 0 : i32
    %c0_i32_2 = arith.constant 0 : i32
    return %c0_i32, %c0_i32_0, %c0_i32_1 : i32, i32, i32
  }
  func.func @transform_6(%arg0: i32) -> (i32, i32) {
    %c0_i32 = arith.constant 0 : i32
    %c0_i32_0 = arith.constant 0 : i32
    %c0_i32_1 = arith.constant 0 : i32
    return %c0_i32, %c0_i32_0 : i32, i32
  }
  func.func @transform_7(%arg0: i32) -> (i32, i32) {
    %c0_i32 = arith.constant 0 : i32
    %c0_i32_0 = arith.constant 0 : i32
    %c0_i32_1 = arith.constant 0 : i32
    return %c0_i32, %c0_i32_0 : i32, i32
  }
  func.func @transform_8(%arg0: i32) -> (i32, i32) {
    %c0_i32 = arith.constant 0 : i32
    %c0_i32_0 = arith.constant 0 : i32
    %c0_i32_1 = arith.constant 0 : i32
    return %c0_i32, %c0_i32_0 : i32, i32
  }
  func.func @transform_9(%arg0: i32) -> (i32, i32, i32) {
    %c0_i32 = arith.constant 0 : i32
    %c0_i32_0 = arith.constant 0 : i32
    %c0_i32_1 = arith.constant 0 : i32
    return %arg0, %c0_i32, %c0_i32_0 : i32, i32, i32
  }
}

</mosaic_0001>

<bundles_post_ra>
// kernel: dac_block.1
= control target key start
LH: loop header
LB: loop body
LE: loop exit
PB: predicated region body
PF: predicated region fallthrough
CT: control target
= control target key end

     0   :  { %s21974_s30 = smov 0   ;;  %s26596_s0 = inlined_call_operand.vmem [shape: f32[2,32,32,4], index: 0, kind: input, shape index: {}]   ;;  %s26597_s1 = inlined_call_operand.vmem [shape: f32[9,4,4], index: 1, kind: input, shape index: {}]   ;;  %s26598_s2 = inlined_call_operand.vmem [shape: f32[1,4], index: 2, kind: input, shape index: {}]   ;;  %s26599_s3 = inlined_call_operand.vmem [shape: f32[9,4,4], index: 3, kind: input, shape index: {}]   ;;  %s26600_s4 = inlined_call_operand.vmem [shape: f32[1,4], index: 4, kind: input, shape index: {}]   ;;  %s26601_s5 = inlined_call_operand.vmem [shape: f32[9,4,4], index: 5, kind: input, shape index: {}]   ;;  %s26602_s6 = inlined_call_operand.vmem [shape: f32[1,4], index: 6, kind: input, shape index: {}]   ;;  %s26603_s7 = inlined_call_operand.vmem [shape: f32[4,4], index: 7, kind: input, shape index: {}]   ;;  %s26604_s8 = inlined_call_operand.vmem [shape: f32[1,4], index: 8, kind: input, shape index: {}]   ;;  %s26605_s9 = inlined_call_operand.vmem [shape: f32[2,256,4], index: 9, kind: output, shape index: {}]  }
   0x1 LB: > { %s15686_s10 = sadd.s32 4294967295, %s21921_s30   ;;  %p15690_p0 = scmp.ge.s32.totalorder %s21921_s30, 1  ;;  %s21921_s30 = sphi %s21974_s30, %s19_s30  }
   0x2   : > { %p287_p1 = scmp.lt.s32.totalorder %s21921_s30, 3 }
   0x4   : > { %p288_p2 = pnand %p15690_p0, %p287_p1 }
   0x6   : > { %291 = sbr.rel (%p288_p2) target bundleno = 2438 (0x986), region = 56 }
   0xd   : > { %v15759_v0 = vld [vmem:[%s26597_s1 + $0x4] sm:$0xf]  ;;  %vm626_vm0 = vcmask 1043456   ;;  %p323_p3 = scmp.lt.s32.totalorder %s15686_s10, 1  ;;  %v495_v1 = vld [vmem:[%s26597_s1] sm:$0xf] }
   0xe   : > { %18886 = vmatprep.subr.msk.mxu0 %vm626_vm0, %v15759_v0  ;;  %20836 = vmatprep.subr.msk.mxu1 %vm626_vm0, %v15759_v0  ;;  %vm333_vm1 = vcmask 31744   ;;  %v15858_v5 = vld [vmem:[%s26597_s1 + $0x8] sm:$0xf]  ;;  %v22095_v22 = vld [vmem:[%s26597_s1 + $0xc] sm:$0xf] }
   0xf   : > { %18887 = vmatpush3.msk.msra.mxu0 %vm626_vm0, %v15759_v0  ;;  %s27102_s10 = smov (!%p323_p3, %s15686_s10), 1  ;;  %20837 = vmatpush3.msk.msra.mxu1 %vm626_vm0, %v15759_v0  ;;  %v22257_v55 = vld [vmem:[%s26597_s1 + $0x10] sm:$0xf] }
  0x10   : > { %18936 = vmatprep.subr.msk.mxu0 %vm626_vm0, %v495_v1  ;;  %s17597_s15 = sshll.u32 %s27102_s10, 10  ;;  %s17598_s28 = sshll.u32 %s27102_s10, 8 }
  0x11   : > { %s21999_s18 = scalar_lea.vmem %s26596_s0, %s17597_s15  ;;  %s26465_s12 = scalar_lea.vmem %s26605_s9, %s17598_s28 }
  0x12   : > { %v22002_v2 = vld [vmem:[%s21999_s18 + $0xe8] sm:$0xff]  ;;  %v22005_v3 = vld [vmem:[%s21999_s18 + $0xf0] sm:$0xff] }
  0x13   : > { %v22008_v4 = vld [vmem:[%s21999_s18 + $0x108] sm:$0xff]  ;;  %18888 = vmatprep.mubr.msk.f32.mxu0 %vm333_vm1, %v22002_v2  ;;  %v22021_v6 = vld [vmem:[%s21999_s18 + $0x110] sm:$0xff] }
  0x14   : > { %18889 = vmatmul.mubr.msk.f32.vlgmr.msra.gmra.mrb[0].mxu0 %vm333_vm1, %v22005_v3  ;;  %v22024_v7 = vld [vmem:[%s21999_s18 + $0x128] sm:$0xff]  ;;  %v22032_v8 = vld [vmem:[%s21999_s18 + $0x130] sm:$0xff] }
  0x15   : > { %18937 = vmatpush3.msk.msra.mxu0 %vm626_vm0, %v495_v1  ;;  %18891 = vmatprep.mubr.msk.f32.mxu0 %vm333_vm1, %v22008_v4  ;;  %v22035_v9 = vld [vmem:[%s21999_s18 + $0x148] sm:$0xff]  ;;  %v22042_v10 = vld [vmem:[%s21999_s18 + $0x150] sm:$0xff] }
  0x16   : > { %18986 = vmatprep.subr.msk.mxu0 %vm626_vm0, %v15858_v5  ;;  %v22045_v11 = vld [vmem:[%s21999_s18 + $0x168] sm:$0xff]  ;;  %v22052_v12 = vld [vmem:[%s21999_s18 + $0x170] sm:$0xff] }
  0x17   : > { %v22055_v13 = vld [vmem:[%s21999_s18 + $0x188] sm:$0xff]  ;;  %v22062_v14 = vld [vmem:[%s21999_s18 + $0x190] sm:$0xff] }
  0x18   : > { %18892 = vmatmul.mubr.msk.f32.gmra.mrb[2].mxu0 %vm333_vm1, %v22021_v6  ;;  %v22065_v15 = vld [vmem:[%s21999_s18 + $0x1a8] sm:$0xff]  ;;  %v22072_v16 = vld [vmem:[%s21999_s18 + $0x1b0] sm:$0xff] }
  0x19   : > { %18894 = vmatprep.mubr.msk.f32.mxu0 %vm333_vm1, %v22024_v7  ;;  %v22075_v17 = vld [vmem:[%s21999_s18 + $0x1c8] sm:$0xff]  ;;  %v22082_v18 = vld [vmem:[%s21999_s18 + $0x1d0] sm:$0xff] }
  0x1a   : > { %v15695_v19 = vld [vmem:[%s21999_s18 + $0xe7] sm:$0xff]  ;;  %v15696_v20 = vld [vmem:[%s21999_s18 + $0xef] sm:$0xff] }
  0x1b   : > { %v22090_v21 = vld [vmem:[%s21999_s18 + $0x107] sm:$0xff]  ;;  %v22102_v23 = vld [vmem:[%s21999_s18 + $0x10f] sm:$0xff] }
  0x1c   : > { %18895 = vmatmul.mubr.msk.f32.gmra.mrb[4].mxu0 %vm333_vm1, %v22032_v8  ;;  %v22105_v24 = vld [vmem:[%s21999_s18 + $0x127] sm:$0xff]  ;;  %v22114_v25 = vld [vmem:[%s21999_s18 + $0x12f] sm:$0xff] }
  0x1d   : > { %18897 = vmatprep.mubr.msk.f32.mxu0 %vm333_vm1, %v22035_v9  ;;  %v22117_v26 = vld [vmem:[%s21999_s18 + $0x147] sm:$0xff]  ;;  %v22124_v27 = vld [vmem:[%s21999_s18 + $0x14f] sm:$0xff] }
  0x1e   : > { %v22127_v28 = vld [vmem:[%s21999_s18 + $0x167] sm:$0xff]  ;;  %v22134_v29 = vld [vmem:[%s21999_s18 + $0x16f] sm:$0xff] }
  0x1f   : > { %v22137_v30 = vld [vmem:[%s21999_s18 + $0x187] sm:$0xff]  ;;  %v22144_v31 = vld [vmem:[%s21999_s18 + $0x18f] sm:$0xff] }
  0x20   : > { %18898 = vmatmul.mubr.msk.f32.gmra.mrb[6].mxu0 %vm333_vm1, %v22042_v10  ;;  %v22147_v32 = vld [vmem:[%s21999_s18 + $0x1a7] sm:$0xff]  ;;  %v22154_v33 = vld [vmem:[%s21999_s18 + $0x1af] sm:$0xff] }
  0x21   : > { %18900 = vmatprep.mubr.msk.f32.mxu0 %vm333_vm1, %v22045_v11  ;;  %v22157_v34 = vld [vmem:[%s21999_s18 + $0x1c7] sm:$0xff]  ;;  %v22164_v35 = vld [vmem:[%s21999_s18 + $0x1cf] sm:$0xff] }
  0x22   : > { %v22167_v36 = vld [vmem:[%s21999_s18 + $0x1e7] sm:$0xff]  ;;  %v22174_v37 = vld [vmem:[%s21999_s18 + $0x1ef] sm:$0xff] }
  0x23   : > { %26737 = vst [vmem:[#allocation3_spill] sm:$0xff] %v22174_v37  ;;  %v22177_v38 = vld [vmem:[%s21999_s18 + $0x207] sm:$0xff]  ;;  %v22184_v39 = vld [vmem:[%s21999_s18 + $0x20f] sm:$0xff] }
  0x24   : > { %18901 = vmatmul.mubr.msk.f32.gmra.mrb[8].mxu0 %vm333_vm1, %v22052_v12  ;;  %26738 = vst [vmem:[#allocation4_spill] sm:$0xff] %v22177_v38  ;;  %v22187_v40 = vld [vmem:[%s21999_s18 + $0x227] sm:$0xff]  ;;  %v22194_v41 = vld [vmem:[%s21999_s18 + $0x22f] sm:$0xff] }
  0x25   : > { %18903 = vmatprep.mubr.msk.f32.mxu0 %vm333_vm1, %v22055_v13  ;;  %v22197_v42 = vld [vmem:[%s21999_s18 + $0x247] sm:$0xff]  ;;  %v22204_v43 = vld [vmem:[%s21999_s18 + $0x24f] sm:$0xff] }
  0x26   : > { %v22207_v44 = vld [vmem:[%s21999_s18 + $0x267] sm:$0xff]  ;;  %v22214_v45 = vld [vmem:[%s21999_s18 + $0x26f] sm:$0xff] }
  0x27   : > { %v22217_v46 = vld [vmem:[%s21999_s18 + $0x287] sm:$0xff]  ;;  %v22224_v47 = vld [vmem:[%s21999_s18 + $0x28f] sm:$0xff] }
  0x28   : > { %18904 = vmatmul.mubr.msk.f32.gmra.mrb[10].mxu0 %vm333_vm1, %v22062_v14  ;;  %v22227_v48 = vld [vmem:[%s21999_s18 + $0x2a7] sm:$0xff]  ;;  %v22234_v49 = vld [vmem:[%s21999_s18 + $0x2af] sm:$0xff] }
  0x29   : > { %18906 = vmatprep.mubr.msk.f32.mxu0 %vm333_vm1, %v22065_v15  ;;  %v22237_v50 = vld [vmem:[%s21999_s18 + $0x2c7] sm:$0xff]  ;;  %v22244_v51 = vld [vmem:[%s21999_s18 + $0x2cf] sm:$0xff] }
  0x2a   : > { %v15826_v52 = vld [vmem:[%s21999_s18 + $0xe9] sm:$0xff]  ;;  %v15827_v53 = vld [vmem:[%s21999_s18 + $0xf1] sm:$0xff] }
  0x2b   : > { %v22252_v54 = vld [vmem:[%s21999_s18 + $0x109] sm:$0xff]  ;;  %v22265_v56 = vld [vmem:[%s21999_s18 + $0x111] sm:$0xff] }
  0x2c   : > { %18907 = vmatmul.mubr.msk.f32.gmra.mrb[12].mxu0 %vm333_vm1, %v22072_v16  ;;  %26739 = vst [vmem:[#allocation5_spill] sm:$0xff] %v22252_v54  ;;  %26740 = vst [vmem:[#allocation6_spill] sm:$0xff] %v22265_v56  ;;  %v22268_v57 = vld [vmem:[%s21999_s18 + $0x129] sm:$0xff]  ;;  %v22277_v58 = vld [vmem:[%s21999_s18 + $0x131] sm:$0xff] }
  0x2d   : > { %18909 = vmatprep.mubr.msk.f32.mxu0 %vm333_vm1, %v22075_v17  ;;  %26741 = vst [vmem:[#allocation7_spill] sm:$0xff] %v22268_v57  ;;  %26742 = vst [vmem:[#allocation8_spill] sm:$0xff] %v22277_v58  ;;  %v22280_v59 = vld [vmem:[%s21999_s18 + $0x149] sm:$0xff]  ;;  %v22287_v60 = vld [vmem:[%s21999_s18 + $0x151] sm:$0xff] }
  0x2e   : > { %26743 = vst [vmem:[#allocation9_spill] sm:$0xff] %v22280_v59  ;;  %26744 = vst [vmem:[#allocation10_spill] sm:$0xff] %v22287_v60  ;;  %v22290_v61 = vld [vmem:[%s21999_s18 + $0x169] sm:$0xff]  ;;  %v22297_v62 = vld [vmem:[%s21999_s18 + $0x171] sm:$0xff] }
  0x2f   : > { %26745 = vst [vmem:[#allocation11_spill] sm:$0xff] %v22290_v61  ;;  %26746 = vst [vmem:[#allocation12_spill] sm:$0xff] %v22297_v62  ;;  %v22300_v63 = vld [vmem:[%s21999_s18 + $0x189] sm:$0xff]  ;;  %v22307_v0 = vld [vmem:[%s21999_s18 + $0x191] sm:$0xff] }
  0x30   : > { %18910 = vmatmul.mubr.msk.f32.gmra.mrb[14].mxu0 %vm333_vm1, %v22082_v18  ;;  %26747 = vst [vmem:[#allocation13_spill] sm:$0xff] %v22300_v63  ;;  %26748 = vst [vmem:[#allocation14_spill] sm:$0xff] %v22307_v0  ;;  %v22310_v1 = vld [vmem:[%s21999_s18 + $0x1a9] sm:$0xff] }
  0x31   : > { %18938 = vmatprep.mubr.msk.f32.mxu0 %vm333_vm1, %v15695_v19  ;;  %26749 = vst [vmem:[#allocation15_spill] sm:$0xff] %v22310_v1  ;;  %v22320_v19 = vld [vmem:[%s21999_s18 + $0x1c9] sm:$0xff] }
  0x32   : > { %26751 = vst [vmem:[#allocation17_spill] sm:$0xff] %v22320_v19 }
  0x34   : > { %18939 = vmatmul.mubr.msk.f32.vlgmr.msra.gmra.mrb[0].mxu0 %vm333_vm1, %v15696_v20  ;;  %v22325_v20 = vld [vmem:[%s21999_s18 + $0x1e8] sm:$0xff] }
  0x35   : > { %18987 = vmatpush3.msk.msra.mxu0 %vm626_vm0, %v15858_v5  ;;  %18941 = vmatprep.mubr.msk.f32.mxu0 %vm333_vm1, %v22090_v21  ;;  %v22317_v5 = vld [vmem:[%s21999_s18 + $0x1b1] sm:$0xff] }
  0x36   : > { %19036 = vmatprep.subr.msk.mxu0 %vm626_vm0, %v22095_v22  ;;  %26750 = vst [vmem:[#allocation16_spill] sm:$0xff] %v22317_v5  ;;  %18912 = vmatprep.mubr.msk.f32.mxu1 %vm333_vm1, %v22325_v20 }
  0x38   : > { %18942 = vmatmul.mubr.msk.f32.gmra.mrb[2].mxu0 %vm333_vm1, %v22102_v23 }
  0x39   : > { %18944 = vmatprep.mubr.msk.f32.mxu0 %vm333_vm1, %v22105_v24 }
  0x3c   : > { %18945 = vmatmul.mubr.msk.f32.gmra.mrb[4].mxu0 %vm333_vm1, %v22114_v25 }
  0x3d   : > { %18947 = vmatprep.mubr.msk.f32.mxu0 %vm333_vm1, %v22117_v26 }
  0x40   : > { %18948 = vmatmul.mubr.msk.f32.gmra.mrb[6].mxu0 %vm333_vm1, %v22124_v27 }
  0x41   : > { %18950 = vmatprep.mubr.msk.f32.mxu0 %vm333_vm1, %v22127_v28 }
  0x44   : > { %18951 = vmatmul.mubr.msk.f32.gmra.mrb[8].mxu0 %vm333_vm1, %v22134_v29 }
  0x45   : > { %18953 = vmatprep.mubr.msk.f32.mxu0 %vm333_vm1, %v22137_v30 }
  0x48   : > { %18954 = vmatmul.mubr.msk.f32.gmra.mrb[10].mxu0 %vm333_vm1, %v22144_v31 }
  0x49   : > { %18956 = vmatprep.mubr.msk.f32.mxu0 %vm333_vm1, %v22147_v32 }
  0x4c   : > { %18957 = vmatmul.mubr.msk.f32.gmra.mrb[12].mxu0 %vm333_vm1, %v22154_v33 }
  0x4d   : > { %18959 = vmatprep.mubr.msk.f32.mxu0 %vm333_vm1, %v22157_v34 }
  0x50   : > { %18960 = vmatmul.mubr.msk.f32.gmra.mrb[14].mxu0 %vm333_vm1, %v22164_v35 }
  0x51   : > { %18962 = vmatprep.mubr.msk.f32.mxu0 %vm333_vm1, %v22167_v36 }
  0x54   : > { %18963 = vmatmul.mubr.msk.f32.gmra.mrb[16].mxu0 %vm333_vm1, %v22174_v37 }
  0x55   : > { %18965 = vmatprep.mubr.msk.f32.mxu0 %vm333_vm1, %v22177_v38 }
  0x58   : > { %18966 = vmatmul.mubr.msk.f32.gmra.mrb[18].mxu0 %vm333_vm1, %v22184_v39 }
  0x59   : > { %18968 = vmatprep.mubr.msk.f32.mxu0 %vm333_vm1, %v22187_v40 }
  0x5c   : > { %18969 = vmatmul.mubr.msk.f32.gmra.mrb[20].mxu0 %vm333_vm1, %v22194_v41 }
  0x5d   : > { %18971 = vmatprep.mubr.msk.f32.mxu0 %vm333_vm1, %v22197_v42 }
  0x60   : > { %18972 = vmatmul.mubr.msk.f32.gmra.mrb[22].mxu0 %vm333_vm1, %v22204_v43 }
  0x61   : > { %18974 = vmatprep.mubr.msk.f32.mxu0 %vm333_vm1, %v22207_v44 }
  0x64   : > { %18975 = vmatmul.mubr.msk.f32.gmra.mrb[24].mxu0 %vm333_vm1, %v22214_v45 }
  0x65   : > { %18977 = vmatprep.mubr.msk.f32.mxu0 %vm333_vm1, %v22217_v46 }
  0x68   : > { %18978 = vmatmul.mubr.msk.f32.gmra.mrb[26].mxu0 %vm333_vm1, %v22224_v47 }
  0x69   : > { %18980 = vmatprep.mubr.msk.f32.mxu0 %vm333_vm1, %v22227_v48 }
  0x6c   : > { %18981 = vmatmul.mubr.msk.f32.gmra.mrb[28].mxu0 %vm333_vm1, %v22234_v49 }
  0x6d   : > { %18983 = vmatprep.mubr.msk.f32.mxu0 %vm333_vm1, %v22237_v50 }
  0x70   : > { %18984 = vmatmul.mubr.msk.f32.gmra.mrb[30].mxu0 %vm333_vm1, %v22244_v51 }
  0x71   : > { %18988 = vmatprep.mubr.msk.f32.mxu0 %vm333_vm1, %v15826_v52  ;;  %v22333_v52 = vld [vmem:[%s21999_s18 + $0x1f0] sm:$0xff] }
  0x72   : > { %18913 = vmatmul.mubr.msk.f32.vlgmr.msra.gmra.mrb[0].mxu1 %vm333_vm1, %v22333_v52 }
  0x74   : > { %18989 = vmatmul.mubr.msk.f32.vlgmr.msra.gmra.mrb[0].mxu0 %vm333_vm1, %v15827_v53  ;;  %v22338_v53 = vld [vmem:[%s21999_s18 + $0x1e9] sm:$0xff] }
  0x75   : > { %19037 = vmatpush3.msk.msra.mxu0 %vm626_vm0, %v22095_v22  ;;  %18991 = vmatprep.mubr.msk.f32.mxu0 %vm333_vm1, %v22252_v54  ;;  %v22330_v22 = vld [vmem:[%s21999_s18 + $0x1d1] sm:$0xff]  ;;  %26753 = vst [vmem:[#allocation19_spill] sm:$0xff] %v22338_v53 }
  0x76   : > { %19086 = vmatprep.subr.msk.mxu0 %vm626_vm0, %v22257_v55  ;;  %26752 = vst [vmem:[#allocation18_spill] sm:$0xff] %v22330_v22  ;;  %v22453_v54 = vld [vmem:[%s21999_s18 + $0x2b0] sm:$0xff] }
  0x78   : > { %18992 = vmatmul.mubr.msk.f32.gmra.mrb[2].mxu0 %vm333_vm1, %v22265_v56  ;;  %v22438_v56 = vld [vmem:[%s21999_s18 + $0x289] sm:$0xff] }
  0x79   : > { %18994 = vmatprep.mubr.msk.f32.mxu0 %vm333_vm1, %v22268_v57  ;;  %v22433_v57 = vld [vmem:[%s21999_s18 + $0x290] sm:$0xff]  ;;  %26765 = vst [vmem:[#allocation31_spill] sm:$0xff] %v22438_v56 }
  0x7a   : > { %26764 = vst [vmem:[#allocation30_spill] sm:$0xff] %v22433_v57 }
  0x7c   : > { %18995 = vmatmul.mubr.msk.f32.gmra.mrb[4].mxu0 %vm333_vm1, %v22277_v58  ;;  %v22418_v58 = vld [vmem:[%s21999_s18 + $0x269] sm:$0xff] }
  0x7d   : > { %18997 = vmatprep.mubr.msk.f32.mxu0 %vm333_vm1, %v22280_v59  ;;  %v22413_v59 = vld [vmem:[%s21999_s18 + $0x270] sm:$0xff]  ;;  %26761 = vst [vmem:[#allocation27_spill] sm:$0xff] %v22418_v58 }
  0x80   : > { %18998 = vmatmul.mubr.msk.f32.gmra.mrb[6].mxu0 %vm333_vm1, %v22287_v60  ;;  %v22398_v60 = vld [vmem:[%s21999_s18 + $0x249] sm:$0xff] }
  0x81   : > { %19000 = vmatprep.mubr.msk.f32.mxu0 %vm333_vm1, %v22290_v61  ;;  %v22393_v61 = vld [vmem:[%s21999_s18 + $0x250] sm:$0xff]  ;;  %26759 = vst [vmem:[#allocation25_spill] sm:$0xff] %v22398_v60 }
  0x84   : > { %19001 = vmatmul.mubr.msk.f32.gmra.mrb[8].mxu0 %vm333_vm1, %v22297_v62  ;;  %v22378_v62 = vld [vmem:[%s21999_s18 + $0x229] sm:$0xff] }
  0x85   : > { %19003 = vmatprep.mubr.msk.f32.mxu0 %vm333_vm1, %v22300_v63  ;;  %v22373_v63 = vld [vmem:[%s21999_s18 + $0x230] sm:$0xff]  ;;  %26757 = vst [vmem:[#allocation23_spill] sm:$0xff] %v22378_v62 }
  0x88   : > { %19004 = vmatmul.mubr.msk.f32.gmra.mrb[10].mxu0 %vm333_vm1, %v22307_v0  ;;  %v22358_v0 = vld [vmem:[%s21999_s18 + $0x209] sm:$0xff] }
  0x89   : > { %19006 = vmatprep.mubr.msk.f32.mxu0 %vm333_vm1, %v22310_v1  ;;  %v22353_v1 = vld [vmem:[%s21999_s18 + $0x210] sm:$0xff]  ;;  %26755 = vst [vmem:[#allocation21_spill] sm:$0xff] %v22358_v0 }
  0x8c   : > { %19007 = vmatmul.mubr.msk.f32.gmra.mrb[12].mxu0 %vm333_vm1, %v22317_v5  ;;  %v22345_v5 = vld [vmem:[%s21999_s18 + $0x208] sm:$0xff] }
  0x8d   : > { %19009 = vmatprep.mubr.msk.f32.mxu0 %vm333_vm1, %v22320_v19  ;;  %v22350_v19 = vld [vmem:[%s21999_s18 + $0x1f1] sm:$0xff]  ;;  %18915 = vmatprep.mubr.msk.f32.mxu1 %vm333_vm1, %v22345_v5 }
  0x8e   : > { %26754 = vst [vmem:[#allocation20_spill] sm:$0xff] %v22350_v19  ;;  %18916 = vmatmul.mubr.msk.f32.gmra.mrb[2].mxu1 %vm333_vm1, %v22353_v1 }
  0x90   : > { %19010 = vmatmul.mubr.msk.f32.gmra.mrb[14].mxu0 %vm333_vm1, %v22330_v22  ;;  %v22365_v22 = vld [vmem:[%s21999_s18 + $0x228] sm:$0xff] }
  0x91   : > { %19012 = vmatprep.mubr.msk.f32.mxu0 %vm333_vm1, %v22338_v53  ;;  %v22370_v53 = vld [vmem:[%s21999_s18 + $0x211] sm:$0xff]  ;;  %18918 = vmatprep.mubr.msk.f32.mxu1 %vm333_vm1, %v22365_v22 }
  0x92   : > { %26756 = vst [vmem:[#allocation22_spill] sm:$0xff] %v22370_v53  ;;  %18919 = vmatmul.mubr.msk.f32.gmra.mrb[4].mxu1 %vm333_vm1, %v22373_v63 }
  0x94   : > { %19013 = vmatmul.mubr.msk.f32.gmra.mrb[16].mxu0 %vm333_vm1, %v22350_v19  ;;  %v22385_v19 = vld [vmem:[%s21999_s18 + $0x248] sm:$0xff] }
  0x95   : > { %19015 = vmatprep.mubr.msk.f32.mxu0 %vm333_vm1, %v22358_v0  ;;  %v22390_v0 = vld [vmem:[%s21999_s18 + $0x231] sm:$0xff]  ;;  %18921 = vmatprep.mubr.msk.f32.mxu1 %vm333_vm1, %v22385_v19 }
  0x96   : > { %26758 = vst [vmem:[#allocation24_spill] sm:$0xff] %v22390_v0  ;;  %18922 = vmatmul.mubr.msk.f32.gmra.mrb[6].mxu1 %vm333_vm1, %v22393_v61 }
  0x98   : > { %19016 = vmatmul.mubr.msk.f32.gmra.mrb[18].mxu0 %vm333_vm1, %v22370_v53  ;;  %v22405_v53 = vld [vmem:[%s21999_s18 + $0x268] sm:$0xff] }
  0x99   : > { %19018 = vmatprep.mubr.msk.f32.mxu0 %vm333_vm1, %v22378_v62  ;;  %v22410_v62 = vld [vmem:[%s21999_s18 + $0x251] sm:$0xff]  ;;  %18924 = vmatprep.mubr.msk.f32.mxu1 %vm333_vm1, %v22405_v53 }
  0x9a   : > { %26760 = vst [vmem:[#allocation26_spill] sm:$0xff] %v22410_v62  ;;  %18925 = vmatmul.mubr.msk.f32.gmra.mrb[8].mxu1 %vm333_vm1, %v22413_v59 }
  0x9c   : > { %19019 = vmatmul.mubr.msk.f32.gmra.mrb[20].mxu0 %vm333_vm1, %v22390_v0  ;;  %v22425_v0 = vld [vmem:[%s21999_s18 + $0x288] sm:$0xff] }
  0x9d   : > { %19021 = vmatprep.mubr.msk.f32.mxu0 %vm333_vm1, %v22398_v60  ;;  %26762 = vst [vmem:[#allocation28_spill] sm:$0xff] %v22425_v0  ;;  %v22430_v60 = vld [vmem:[%s21999_s18 + $0x271] sm:$0xff]  ;;  %18927 = vmatprep.mubr.msk.f32.mxu1 %vm333_vm1, %v22425_v0  ;;  %v22458_v0 = vld [vmem:[%s21999_s18 + $0x2a9] sm:$0xff] }
  0x9e   : > { %26763 = vst [vmem:[#allocation29_spill] sm:$0xff] %v22430_v60  ;;  %18928 = vmatmul.mubr.msk.f32.gmra.mrb[10].mxu1 %vm333_vm1, %v22433_v57  ;;  %26768 = vst [vmem:[#allocation34_spill] sm:$0xff] %v22458_v0  ;;  %v22473_v57 = vld [vmem:[%s21999_s18 + $0x2d0] sm:$0xff] }
  0xa0   : > { %19022 = vmatmul.mubr.msk.f32.gmra.mrb[22].mxu0 %vm333_vm1, %v22410_v62  ;;  %v22445_v62 = vld [vmem:[%s21999_s18 + $0x2a8] sm:$0xff] }
  0xa1   : > { %19024 = vmatprep.mubr.msk.f32.mxu0 %vm333_vm1, %v22418_v58  ;;  %26766 = vst [vmem:[#allocation32_spill] sm:$0xff] %v22445_v62  ;;  %v22450_v58 = vld [vmem:[%s21999_s18 + $0x291] sm:$0xff]  ;;  %18930 = vmatprep.mubr.msk.f32.mxu1 %vm333_vm1, %v22445_v62  ;;  %v22478_v62 = vld [vmem:[%s21999_s18 + $0x2c9] sm:$0xff] }
  0xa2   : > { %26767 = vst [vmem:[#allocation33_spill] sm:$0xff] %v22450_v58  ;;  %18931 = vmatmul.mubr.msk.f32.gmra.mrb[12].mxu1 %vm333_vm1, %v22453_v54 }
  0xa4   : > { %19025 = vmatmul.mubr.msk.f32.gmra.mrb[24].mxu0 %vm333_vm1, %v22430_v60  ;;  %v22465_v60 = vld [vmem:[%s21999_s18 + $0x2c8] sm:$0xff] }
  0xa5   : > { %19027 = vmatprep.mubr.msk.f32.mxu0 %vm333_vm1, %v22438_v56  ;;  %v22470_v56 = vld [vmem:[%s21999_s18 + $0x2b1] sm:$0xff]  ;;  %18933 = vmatprep.mubr.msk.f32.mxu1 %vm333_vm1, %v22465_v60 }
  0xa6   : > { %18934 = vmatmul.mubr.msk.f32.gmra.mrb[14].mxu1 %vm333_vm1, %v22473_v57 }
  0xa8   : > { %19028 = vmatmul.mubr.msk.f32.gmra.mrb[26].mxu0 %vm333_vm1, %v22450_v58  ;;  %v22487_v58 = vld [vmem:[%s21999_s18 + $0x2d1] sm:$0xff] }
  0xa9   : > { %19030 = vmatprep.mubr.msk.f32.mxu0 %vm333_vm1, %v22458_v0  ;;  %v22496_v0 = vld [vmem:[%s26597_s1 + $0x14] sm:$0xf] }
  0xac   : > { %19031 = vmatmul.mubr.msk.f32.gmra.mrb[28].mxu0 %vm333_vm1, %v22470_v56 }
  0xad   : > { %19033 = vmatprep.mubr.msk.f32.mxu0 %vm333_vm1, %v22478_v62 }
  0xb0   : > { %19034 = vmatmul.mubr.msk.f32.gmra.mrb[30].mxu0 %vm333_vm1, %v22487_v58 }
  0xb1   : > { %19038 = vmatprep.mubr.msk.f32.mxu0 %vm333_vm1, %v22090_v21  ;;  %v16353_v21 = vld [vmem:[%s26599_s3 + $0x4] sm:$0xf] }
  0xb2   : > { %19336 = vmatprep.subr.msk.mxu1 %vm626_vm0, %v16353_v21 }
  0xb3   : > { %19337 = vmatpush3.msk.msra.mxu1 %vm626_vm0, %v16353_v21  ;;  %v26777_v21 = vld [vmem:[#allocation8_spill] sm:$0xff] }
  0xb4   : > { %19039 = vmatmul.mubr.msk.f32.vlgmr.msra.gmra.mrb[0].mxu0 %vm333_vm1, %v22102_v23  ;;  %v16321_v23 = vld [vmem:[%s21999_s18 + $0xa8] sm:$0xff] }
  0xb5   : > { %19087 = vmatpush3.msk.msra.mxu0 %vm626_vm0, %v22257_v55  ;;  %19041 = vmatprep.mubr.msk.f32.mxu0 %vm333_vm1, %v22105_v24  ;;  %v16322_v55 = vld [vmem:[%s21999_s18 + $0xb0] sm:$0xff] }
  0xb6   : > { %19136 = vmatprep.subr.msk.mxu0 %vm626_vm0, %v22496_v0  ;;  %19338 = vmatprep.mubr.msk.f32.mxu1 %vm333_vm1, %v16321_v23  ;;  %v22818_v23 = vld [vmem:[%s21999_s18 + $0x1cd] sm:$0xff] }
  0xb7   : > { %19339 = vmatmul.mubr.msk.f32.vlgmr.msra.gmra.mrb[16].mxu1 %vm333_vm1, %v16322_v55  ;;  %v26778_v55 = vld [vmem:[#allocation9_spill] sm:$0xff] }
  0xb8   : > { %19042 = vmatmul.mubr.msk.f32.gmra.mrb[2].mxu0 %vm333_vm1, %v22114_v25 }
  0xb9   : > { %19044 = vmatprep.mubr.msk.f32.mxu0 %vm333_vm1, %v22117_v26 }
  0xbc   : > { %19045 = vmatmul.mubr.msk.f32.gmra.mrb[4].mxu0 %vm333_vm1, %v22124_v27 }
  0xbd   : > { %19047 = vmatprep.mubr.msk.f32.mxu0 %vm333_vm1, %v22127_v28 }
  0xc0   : > { %19048 = vmatmul.mubr.msk.f32.gmra.mrb[6].mxu0 %vm333_vm1, %v22134_v29 }
  0xc1   : > { %19050 = vmatprep.mubr.msk.f32.mxu0 %vm333_vm1, %v22137_v30 }
  0xc4   : > { %19051 = vmatmul.mubr.msk.f32.gmra.mrb[8].mxu0 %vm333_vm1, %v22144_v31 }
  0xc5   : > { %19053 = vmatprep.mubr.msk.f32.mxu0 %vm333_vm1, %v22147_v32 }
  0xc8   : > { %19054 = vmatmul.mubr.msk.f32.gmra.mrb[10].mxu0 %vm333_vm1, %v22154_v33 }
  0xc9   : > { %19056 = vmatprep.mubr.msk.f32.mxu0 %vm333_vm1, %v22157_v34 }
  0xcc   : > { %19057 = vmatmul.mubr.msk.f32.gmra.mrb[12].mxu0 %vm333_vm1, %v22164_v35 }
  0xcd   : > { %19059 = vmatprep.mubr.msk.f32.mxu0 %vm333_vm1, %v22167_v36 }
  0xd0   : > { %19060 = vmatmul.mubr.msk.f32.gmra.mrb[14].mxu0 %vm333_vm1, %v22174_v37  ;;  %v16324_v37 = vld [vmem:[%s21999_s18 + $0xd0] sm:$0xff] }
  0xd1   : > { %19062 = vmatprep.mubr.msk.f32.mxu0 %vm333_vm1, %v22177_v38  ;;  %v16323_v38 = vld [vmem:[%s21999_s18 + $0xc8] sm:$0xff] }
  0xd2   : > { %19341 = vmatprep.mubr.msk.f32.mxu1 %vm333_vm1, %v16323_v38  ;;  %v22740_v38 = vld [vmem:[%s21999_s18 + $0x145] sm:$0xff] }
  0xd3   : > { %19342 = vmatmul.mubr.msk.f32.gmra.mrb[18].mxu1 %vm333_vm1, %v16324_v37  ;;  %v22614_v37 = vld [vmem:[%s26597_s1 + $0x18] sm:$0xf] }
  0xd4   : > { %19063 = vmatmul.mubr.msk.f32.gmra.mrb[16].mxu0 %vm333_vm1, %v22184_v39  ;;  %19344 = vmatprep.mubr.msk.f32.mxu1 %vm333_vm1, %v22002_v2  ;;  %v22588_v2 = vld [vmem:[%s21999_s18 + $0x2e7] sm:$0xff] }
  0xd5   : > { %19065 = vmatprep.mubr.msk.f32.mxu0 %vm333_vm1, %v22187_v40 }
  0xd7   : > { %19345 = vmatmul.mubr.msk.f32.gmra.mrb[20].mxu1 %vm333_vm1, %v22005_v3  ;;  %v22597_v3 = vld [vmem:[%s21999_s18 + $0x2ef] sm:$0xff] }
  0xd8   : > { %19066 = vmatmul.mubr.msk.f32.gmra.mrb[18].mxu0 %vm333_vm1, %v22194_v41  ;;  %19347 = vmatprep.mubr.msk.f32.mxu1 %vm333_vm1, %v22008_v4 }
  0xd9   : > { %19068 = vmatprep.mubr.msk.f32.mxu0 %vm333_vm1, %v22197_v42 }
  0xdb   : > { %19348 = vmatmul.mubr.msk.f32.gmra.mrb[22].mxu1 %vm333_vm1, %v22021_v6 }
  0xdc   : > { %19069 = vmatmul.mubr.msk.f32.gmra.mrb[20].mxu0 %vm333_vm1, %v22204_v43  ;;  %19350 = vmatprep.mubr.msk.f32.mxu1 %vm333_vm1, %v22024_v7 }
  0xdd   : > { %19071 = vmatprep.mubr.msk.f32.mxu0 %vm333_vm1, %v22207_v44 }
  0xdf   : > { %19351 = vmatmul.mubr.msk.f32.gmra.mrb[24].mxu1 %vm333_vm1, %v22032_v8 }
  0xe0   : > { %19072 = vmatmul.mubr.msk.f32.gmra.mrb[22].mxu0 %vm333_vm1, %v22214_v45  ;;  %19353 = vmatprep.mubr.msk.f32.mxu1 %vm333_vm1, %v22035_v9 }
  0xe1   : > { %19074 = vmatprep.mubr.msk.f32.mxu0 %vm333_vm1, %v22217_v46 }
  0xe3   : > { %19354 = vmatmul.mubr.msk.f32.gmra.mrb[26].mxu1 %vm333_vm1, %v22042_v10 }
  0xe4   : > { %19075 = vmatmul.mubr.msk.f32.gmra.mrb[24].mxu0 %vm333_vm1, %v22224_v47  ;;  %19356 = vmatprep.mubr.msk.f32.mxu1 %vm333_vm1, %v22045_v11 }
  0xe5   : > { %19077 = vmatprep.mubr.msk.f32.mxu0 %vm333_vm1, %v22227_v48 }
  0xe7   : > { %19357 = vmatmul.mubr.msk.f32.gmra.mrb[28].mxu1 %vm333_vm1, %v22052_v12 }
  0xe8   : > { %19078 = vmatmul.mubr.msk.f32.gmra.mrb[26].mxu0 %vm333_vm1, %v22234_v49  ;;  %19359 = vmatprep.mubr.msk.f32.mxu1 %vm333_vm1, %v22055_v13 }
  0xe9   : > { %19080 = vmatprep.mubr.msk.f32.mxu0 %vm333_vm1, %v22237_v50 }
  0xeb   : > { %19360 = vmatmul.mubr.msk.f32.gmra.mrb[30].mxu1 %vm333_vm1, %v22062_v14 }
  0xec   : > { %19081 = vmatmul.mubr.msk.f32.gmra.mrb[28].mxu0 %vm333_vm1, %v22244_v51  ;;  %19362 = vmatprep.mubr.msk.f32.mxu1 %vm333_vm1, %v22065_v15 }
  0xed   : > { %19083 = vmatprep.mubr.msk.f32.mxu0 %vm333_vm1, %v22588_v2 }
  0xef   : > { %19363 = vmatmul.mubr.msk.f32.gmra.mrb[32].mxu1 %vm333_vm1, %v22072_v16 }
  0xf0   : > { %19084 = vmatmul.mubr.msk.f32.gmra.mrb[30].mxu0 %vm333_vm1, %v22597_v3  ;;  %19365 = vmatprep.mubr.msk.f32.mxu1 %vm333_vm1, %v22075_v17 }
  0xf1   : > { %19088 = vmatprep.mubr.msk.f32.mxu0 %vm333_vm1, %v22008_v4  ;;  %v26769_v4 = vld [vmem:[#allocation28_spill] sm:$0xff] }
  0xf3   : > { %19366 = vmatmul.mubr.msk.f32.gmra.mrb[34].mxu1 %vm333_vm1, %v22082_v18 }
  0xf4   : > { %19089 = vmatmul.mubr.msk.f32.vlgmr.msra.gmra.mrb[0].mxu0 %vm333_vm1, %v22021_v6  ;;  %19368 = vmatprep.mubr.msk.f32.mxu1 %vm333_vm1, %v22325_v20  ;;  %v3983_v6 = vld [vmem:[%s26599_s3] sm:$0xf] }
  0xf5   : > { %19137 = vmatpush3.msk.msra.mxu0 %vm626_vm0, %v22496_v0  ;;  %19091 = vmatprep.mubr.msk.f32.mxu0 %vm333_vm1, %v22024_v7  ;;  %v26770_v7 = vld [vmem:[#allocation30_spill] sm:$0xff]  ;;  %v22774_v0 = vld [vmem:[%s21999_s18 + $0x185] sm:$0xff] }
  0xf6   : > { %19186 = vmatprep.subr.msk.mxu0 %vm626_vm0, %v22614_v37  ;;  %19386 = vmatprep.subr.msk.mxu1 %vm626_vm0, %v3983_v6 }
  0xf7   : > { %19369 = vmatmul.mubr.msk.f32.gmra.mrb[36].mxu1 %vm333_vm1, %v22333_v52 }
  0xf8   : > { %19092 = vmatmul.mubr.msk.f32.gmra.mrb[2].mxu0 %vm333_vm1, %v22032_v8  ;;  %19371 = vmatprep.mubr.msk.f32.mxu1 %vm333_vm1, %v22345_v5  ;;  %v16289_v8 = vld [vmem:[%s21999_s18 + $0xa5] sm:$0xff] }
  0xf9   : > { %19094 = vmatprep.mubr.msk.f32.mxu0 %vm333_vm1, %v22035_v9  ;;  %19387 = vmatpush3.msk.msra.mxu1 %vm626_vm0, %v3983_v6  ;;  %v16290_v9 = vld [vmem:[%s21999_s18 + $0xad] sm:$0xff] }
  0xfa   : > { %v22832_v6 = vld [vmem:[%s21999_s18 + $0x1ed] sm:$0xff] }
  0xfb   : > { %19372 = vmatmul.mubr.msk.f32.gmra.mrb[38].mxu1 %vm333_vm1, %v22353_v1 }
  0xfc   : > { %19095 = vmatmul.mubr.msk.f32.gmra.mrb[4].mxu0 %vm333_vm1, %v22042_v10  ;;  %19374 = vmatprep.mubr.msk.f32.mxu1 %vm333_vm1, %v22365_v22  ;;  %v16291_v10 = vld [vmem:[%s21999_s18 + $0xc5] sm:$0xff] }
  0xfd   : > { %19097 = vmatprep.mubr.msk.f32.mxu0 %vm333_vm1, %v22045_v11  ;;  %v16292_v11 = vld [vmem:[%s21999_s18 + $0xcd] sm:$0xff] }
  0xff   : > { %19375 = vmatmul.mubr.msk.f32.gmra.mrb[40].mxu1 %vm333_vm1, %v22373_v63 }
 0x100   : > { %19098 = vmatmul.mubr.msk.f32.gmra.mrb[6].mxu0 %vm333_vm1, %v22052_v12  ;;  %19377 = vmatprep.mubr.msk.f32.mxu1 %vm333_vm1, %v22385_v19  ;;  %v16293_v12 = vld [vmem:[%s21999_s18 + $0xe5] sm:$0xff] }
 0x101   : > { %19100 = vmatprep.mubr.msk.f32.mxu0 %vm333_vm1, %v22055_v13  ;;  %v16294_v13 = vld [vmem:[%s21999_s18 + $0xed] sm:$0xff] }
 0x103   : > { %19378 = vmatmul.mubr.msk.f32.gmra.mrb[42].mxu1 %vm333_vm1, %v22393_v61 }
 0x104   : > { %19101 = vmatmul.mubr.msk.f32.gmra.mrb[8].mxu0 %vm333_vm1, %v22062_v14  ;;  %19380 = vmatprep.mubr.msk.f32.mxu1 %vm333_vm1, %v22405_v53  ;;  %v22712_v14 = vld [vmem:[%s21999_s18 + $0x105] sm:$0xff] }
 0x105   : > { %19103 = vmatprep.mubr.msk.f32.mxu0 %vm333_vm1, %v22065_v15  ;;  %v22719_v15 = vld [vmem:[%s21999_s18 + $0x10d] sm:$0xff] }
 0x107   : > { %19381 = vmatmul.mubr.msk.f32.gmra.mrb[44].mxu1 %vm333_vm1, %v22413_v59 }
 0x108   : > { %19104 = vmatmul.mubr.msk.f32.gmra.mrb[10].mxu0 %vm333_vm1, %v22072_v16  ;;  %19383 = vmatprep.mubr.msk.f32.mxu1 %vm333_vm1, %v26769_v4  ;;  %v22726_v16 = vld [vmem:[%s21999_s18 + $0x125] sm:$0xff] }
 0x109   : > { %19106 = vmatprep.mubr.msk.f32.mxu0 %vm333_vm1, %v22075_v17  ;;  %v22733_v17 = vld [vmem:[%s21999_s18 + $0x12d] sm:$0xff] }
 0x10b   : > { %19384 = vmatmul.mubr.msk.f32.gmra.mrb[46].mxu1 %vm333_vm1, %v26770_v7 }
 0x10c   : > { %19107 = vmatmul.mubr.msk.f32.gmra.mrb[12].mxu0 %vm333_vm1, %v22082_v18  ;;  %19388 = vmatprep.mubr.msk.f32.mxu1 %vm333_vm1, %v16289_v8  ;;  %v26771_v18 = vld [vmem:[#allocation32_spill] sm:$0xff] }
 0x10d   : > { %19109 = vmatprep.mubr.msk.f32.mxu0 %vm333_vm1, %v22325_v20  ;;  %v26775_v20 = vld [vmem:[#allocation6_spill] sm:$0xff]  ;;  %v22839_v8 = vld [vmem:[%s21999_s18 + $0x205] sm:$0xff] }
 0x10f   : > { %19389 = vmatmul.mubr.msk.f32.vlgmr.msra.gmra.mrb[16].mxu1 %vm333_vm1, %v16290_v9  ;;  %v26781_v9 = vld [vmem:[#allocation12_spill] sm:$0xff] }
 0x110   : > { %19110 = vmatmul.mubr.msk.f32.gmra.mrb[14].mxu0 %vm333_vm1, %v22333_v52  ;;  %19391 = vmatprep.mubr.msk.f32.mxu1 %vm333_vm1, %v16291_v10  ;;  %v26776_v52 = vld [vmem:[#allocation7_spill] sm:$0xff]  ;;  %v22846_v10 = vld [vmem:[%s21999_s18 + $0x20d] sm:$0xff] }
 0x111   : > { %19112 = vmatprep.mubr.msk.f32.mxu0 %vm333_vm1, %v22345_v5  ;;  %v22790_v5 = vld [vmem:[%s26597_s1 + $0x1c] sm:$0xf] }
 0x113   : > { %19392 = vmatmul.mubr.msk.f32.gmra.mrb[18].mxu1 %vm333_vm1, %v16292_v11  ;;  %v26782_v11 = vld [vmem:[#allocation13_spill] sm:$0xff] }
 0x114   : > { %19113 = vmatmul.mubr.msk.f32.gmra.mrb[16].mxu0 %vm333_vm1, %v22353_v1  ;;  %19394 = vmatprep.mubr.msk.f32.mxu1 %vm333_vm1, %v16293_v12  ;;  %v26774_v1 = vld [vmem:[#allocation5_spill] sm:$0xff]  ;;  %v22853_v12 = vld [vmem:[%s21999_s18 + $0x225] sm:$0xff] }
 0x115   : > { %19115 = vmatprep.mubr.msk.f32.mxu0 %vm333_vm1, %v22365_v22  ;;  %v22800_v22 = vld [vmem:[%s21999_s18 + $0x1ad] sm:$0xff] }
 0x117   : > { %19395 = vmatmul.mubr.msk.f32.gmra.mrb[20].mxu1 %vm333_vm1, %v16294_v13  ;;  %v26783_v13 = vld [vmem:[#allocation14_spill] sm:$0xff] }
 0x118   : > { %19116 = vmatmul.mubr.msk.f32.gmra.mrb[18].mxu0 %vm333_vm1, %v22373_v63  ;;  %19397 = vmatprep.mubr.msk.f32.mxu1 %vm333_vm1, %v22712_v14  ;;  %v22757_v63 = vld [vmem:[%s21999_s18 + $0x165] sm:$0xff] }
 0x119   : > { %19118 = vmatprep.mubr.msk.f32.mxu0 %vm333_vm1, %v22385_v19  ;;  %v22793_v19 = vld [vmem:[%s21999_s18 + $0x1a5] sm:$0xff] }
 0x11b   : > { %19398 = vmatmul.mubr.msk.f32.gmra.mrb[22].mxu1 %vm333_vm1, %v22719_v15 }
 0x11c   : > { %19119 = vmatmul.mubr.msk.f32.gmra.mrb[20].mxu0 %vm333_vm1, %v22393_v61  ;;  %19400 = vmatprep.mubr.msk.f32.mxu1 %vm333_vm1, %v22726_v16  ;;  %v22752_v61 = vld [vmem:[%s21999_s18 + $0x2e8] sm:$0xff] }
 0x11d   : > { %19121 = vmatprep.mubr.msk.f32.mxu0 %vm333_vm1, %v22405_v53  ;;  %26772 = vst [vmem:[#allocation28_spill] sm:$0xff] %v22752_v61  ;;  %v22811_v53 = vld [vmem:[%s21999_s18 + $0x1c5] sm:$0xff] }
 0x11f   : > { %19401 = vmatmul.mubr.msk.f32.gmra.mrb[24].mxu1 %vm333_vm1, %v22733_v17 }
 0x120   : > { %19122 = vmatmul.mubr.msk.f32.gmra.mrb[22].mxu0 %vm333_vm1, %v22413_v59  ;;  %19403 = vmatprep.mubr.msk.f32.mxu1 %vm333_vm1, %v22740_v38  ;;  %v22747_v59 = vld [vmem:[%s21999_s18 + $0x14d] sm:$0xff] }
 0x121   : > { %19124 = vmatprep.mubr.msk.f32.mxu0 %vm333_vm1, %v26769_v4  ;;  %v26779_v4 = vld [vmem:[#allocation10_spill] sm:$0xff] }
 0x123   : > { %19404 = vmatmul.mubr.msk.f32.gmra.mrb[26].mxu1 %vm333_vm1, %v22747_v59 }
 0x124   : > { %19125 = vmatmul.mubr.msk.f32.gmra.mrb[24].mxu0 %vm333_vm1, %v26770_v7  ;;  %19406 = vmatprep.mubr.msk.f32.mxu1 %vm333_vm1, %v22757_v63  ;;  %v26780_v7 = vld [vmem:[#allocation11_spill] sm:$0xff] }
 0x125   : > { %19127 = vmatprep.mubr.msk.f32.mxu0 %vm333_vm1, %v26771_v18  ;;  %v22860_v18 = vld [vmem:[%s21999_s18 + $0x22d] sm:$0xff] }
 0x128   : > { %19128 = vmatmul.mubr.msk.f32.gmra.mrb[26].mxu0 %vm333_vm1, %v22453_v54  ;;  %v22764_v54 = vld [vmem:[%s21999_s18 + $0x16d] sm:$0xff] }
 0x129   : > { %19130 = vmatprep.mubr.msk.f32.mxu0 %vm333_vm1, %v22465_v60  ;;  %v22769_v60 = vld [vmem:[%s21999_s18 + $0x2f0] sm:$0xff]  ;;  %19407 = vmatmul.mubr.msk.f32.gmra.mrb[28].mxu1 %vm333_vm1, %v22764_v54 }
 0x12a   : > { %26773 = vst [vmem:[#allocation30_spill] sm:$0xff] %v22769_v60  ;;  %19409 = vmatprep.mubr.msk.f32.mxu1 %vm333_vm1, %v22774_v0 }
 0x12c   : > { %19131 = vmatmul.mubr.msk.f32.gmra.mrb[28].mxu0 %vm333_vm1, %v22473_v57  ;;  %v22781_v57 = vld [vmem:[%s21999_s18 + $0x18d] sm:$0xff] }
 0x12d   : > { %19133 = vmatprep.mubr.msk.f32.mxu0 %vm333_vm1, %v22752_v61  ;;  %19410 = vmatmul.mubr.msk.f32.gmra.mrb[30].mxu1 %vm333_vm1, %v22781_v57  ;;  %v16422_v61 = vld [vmem:[%s21999_s18 + $0xcb] sm:$0xff] }
 0x12e   : > { %19412 = vmatprep.mubr.msk.f32.mxu1 %vm333_vm1, %v22793_v19 }
 0x130   : > { %19134 = vmatmul.mubr.msk.f32.gmra.mrb[30].mxu0 %vm333_vm1, %v22769_v60  ;;  %v26794_v60 = vld [vmem:[#allocation23_spill] sm:$0xff] }
 0x131   : > { %19138 = vmatprep.mubr.msk.f32.mxu0 %vm333_vm1, %v26774_v1  ;;  %19413 = vmatmul.mubr.msk.f32.gmra.mrb[32].mxu1 %vm333_vm1, %v22800_v22  ;;  %v26784_v1 = vld [vmem:[#allocation15_spill] sm:$0xff] }
 0x132   : > { %19415 = vmatprep.mubr.msk.f32.mxu1 %vm333_vm1, %v22811_v53 }
 0x134   : > { %19139 = vmatmul.mubr.msk.f32.vlgmr.msra.gmra.mrb[0].mxu0 %vm333_vm1, %v26775_v20  ;;  %v22867_v20 = vld [vmem:[%s21999_s18 + $0x245] sm:$0xff] }
 0x135   : > { %19187 = vmatpush3.msk.msra.mxu0 %vm626_vm0, %v22614_v37  ;;  %19141 = vmatprep.mubr.msk.f32.mxu0 %vm333_vm1, %v26776_v52  ;;  %v22825_v37 = vld [vmem:[%s21999_s18 + $0x1e5] sm:$0xff] }
 0x136   : > { %19236 = vmatprep.subr.msk.mxu0 %vm626_vm0, %v22790_v5  ;;  %19416 = vmatmul.mubr.msk.f32.gmra.mrb[34].mxu1 %vm333_vm1, %v22818_v23  ;;  %v26785_v52 = vld [vmem:[#allocation16_spill] sm:$0xff] }
 0x137   : > { %19418 = vmatprep.mubr.msk.f32.mxu1 %vm333_vm1, %v22825_v37 }
 0x138   : > { %19142 = vmatmul.mubr.msk.f32.gmra.mrb[2].mxu0 %vm333_vm1, %v26777_v21  ;;  %v22874_v21 = vld [vmem:[%s21999_s18 + $0x24d] sm:$0xff] }
 0x139   : > { %19144 = vmatprep.mubr.msk.f32.mxu0 %vm333_vm1, %v26778_v55  ;;  %v26786_v55 = vld [vmem:[#allocation17_spill] sm:$0xff] }
 0x13a   : > { %19419 = vmatmul.mubr.msk.f32.gmra.mrb[36].mxu1 %vm333_vm1, %v22832_v6 }
 0x13b   : > { %19421 = vmatprep.mubr.msk.f32.mxu1 %vm333_vm1, %v22839_v8 }
 0x13c   : > { %19145 = vmatmul.mubr.msk.f32.gmra.mrb[4].mxu0 %vm333_vm1, %v26779_v4  ;;  %v22881_v4 = vld [vmem:[%s21999_s18 + $0x265] sm:$0xff] }
 0x13d   : > { %19147 = vmatprep.mubr.msk.f32.mxu0 %vm333_vm1, %v26780_v7  ;;  %v26787_v7 = vld [vmem:[#allocation18_spill] sm:$0xff] }
 0x13e   : > { %19422 = vmatmul.mubr.msk.f32.gmra.mrb[38].mxu1 %vm333_vm1, %v22846_v10 }
 0x13f   : > { %19424 = vmatprep.mubr.msk.f32.mxu1 %vm333_vm1, %v22853_v12 }
 0x140   : > { %19148 = vmatmul.mubr.msk.f32.gmra.mrb[6].mxu0 %vm333_vm1, %v26781_v9  ;;  %v22888_v9 = vld [vmem:[%s21999_s18 + $0x26d] sm:$0xff] }
 0x141   : > { %19150 = vmatprep.mubr.msk.f32.mxu0 %vm333_vm1, %v26782_v11  ;;  %v26788_v11 = vld [vmem:[#allocation19_spill] sm:$0xff] }
 0x142   : > { %19425 = vmatmul.mubr.msk.f32.gmra.mrb[40].mxu1 %vm333_vm1, %v22860_v18 }
 0x143   : > { %19427 = vmatprep.mubr.msk.f32.mxu1 %vm333_vm1, %v22867_v20 }
 0x144   : > { %19151 = vmatmul.mubr.msk.f32.gmra.mrb[8].mxu0 %vm333_vm1, %v26783_v13  ;;  %v22895_v13 = vld [vmem:[%s21999_s18 + $0x285] sm:$0xff] }
 0x145   : > { %19153 = vmatprep.mubr.msk.f32.mxu0 %vm333_vm1, %v26784_v1  ;;  %26789 = vst [vmem:[#allocation32_spill] sm:$0xff] %v22895_v13  ;;  %v26790_v1 = vld [vmem:[#allocation20_spill] sm:$0xff] }
 0x146   : > { %19428 = vmatmul.mubr.msk.f32.gmra.mrb[42].mxu1 %vm333_vm1, %v22874_v21 }
 0x147   : > { %19430 = vmatprep.mubr.msk.f32.mxu1 %vm333_vm1, %v22881_v4 }
 0x148   : > { %19154 = vmatmul.mubr.msk.f32.gmra.mrb[10].mxu0 %vm333_vm1, %v26785_v52  ;;  %v22902_v52 = vld [vmem:[%s21999_s18 + $0x28d] sm:$0xff] }
 0x149   : > { %19156 = vmatprep.mubr.msk.f32.mxu0 %vm333_vm1, %v26786_v55  ;;  %26791 = vst [vmem:[#allocation5_spill] sm:$0xff] %v22902_v52  ;;  %v26792_v55 = vld [vmem:[#allocation21_spill] sm:$0xff] }
 0x14a   : > { %19431 = vmatmul.mubr.msk.f32.gmra.mrb[44].mxu1 %vm333_vm1, %v22888_v9 }
 0x14b   : > { %19433 = vmatprep.mubr.msk.f32.mxu1 %vm333_vm1, %v22895_v13  ;;  %v26796_v13 = vld [vmem:[#allocation25_spill] sm:$0xff] }
 0x14c   : > { %19157 = vmatmul.mubr.msk.f32.gmra.mrb[12].mxu0 %vm333_vm1, %v26787_v7  ;;  %v16452_v7 = vld [vmem:[%s26599_s3 + $0x8] sm:$0xf] }
 0x14d   : > { %19159 = vmatprep.mubr.msk.f32.mxu0 %vm333_vm1, %v26788_v11  ;;  %19436 = vmatprep.subr.msk.mxu1 %vm626_vm0, %v16452_v7  ;;  %v16420_v11 = vld [vmem:[%s21999_s18 + $0xab] sm:$0xff] }
 0x14e   : > { %19434 = vmatmul.mubr.msk.f32.gmra.mrb[46].mxu1 %vm333_vm1, %v22902_v52  ;;  %v26795_v52 = vld [vmem:[#allocation24_spill] sm:$0xff] }
 0x14f   : > { %19437 = vmatpush3.msk.msra.mxu1 %vm626_vm0, %v16452_v7  ;;  %19438 = vmatprep.mubr.msk.f32.mxu1 %vm333_vm1, %v16420_v11  ;;  %v16423_v7 = vld [vmem:[%s21999_s18 + $0xd3] sm:$0xff]  ;;  %v16424_v11 = vld [vmem:[%s21999_s18 + $0xeb] sm:$0xff] }
 0x150   : > { %19160 = vmatmul.mubr.msk.f32.gmra.mrb[14].mxu0 %vm333_vm1, %v26790_v1  ;;  %v26793_v1 = vld [vmem:[#allocation22_spill] sm:$0xff] }
 0x151   : > { %19162 = vmatprep.mubr.msk.f32.mxu0 %vm333_vm1, %v26792_v55  ;;  %v16421_v55 = vld [vmem:[%s21999_s18 + $0xb3] sm:$0xff] }
 0x152   : > { %19439 = vmatmul.mubr.msk.f32.vlgmr.msra.gmra.mrb[16].mxu1 %vm333_vm1, %v16421_v55  ;;  %v26798_v55 = vld [vmem:[#allocation27_spill] sm:$0xff] }
 0x153   : > { %19441 = vmatprep.mubr.msk.f32.mxu1 %vm333_vm1, %v16422_v61  ;;  %v22938_v61 = vld [vmem:[%s21999_s18 + $0x10b] sm:$0xff] }
 0x154   : > { %19163 = vmatmul.mubr.msk.f32.gmra.mrb[16].mxu0 %vm333_vm1, %v26793_v1  ;;  %v26797_v1 = vld [vmem:[#allocation26_spill] sm:$0xff] }
 0x155   : > { %19165 = vmatprep.mubr.msk.f32.mxu0 %vm333_vm1, %v26794_v60  ;;  %v16425_v60 = vld [vmem:[%s21999_s18 + $0xf3] sm:$0xff] }
 0x156   : > { %19442 = vmatmul.mubr.msk.f32.gmra.mrb[18].mxu1 %vm333_vm1, %v16423_v7  ;;  %v26800_v7 = vld [vmem:[#allocation31_spill] sm:$0xff] }
 0x157   : > { %19444 = vmatprep.mubr.msk.f32.mxu1 %vm333_vm1, %v16424_v11  ;;  %v22952_v11 = vld [vmem:[%s21999_s18 + $0x12b] sm:$0xff] }
 0x158   : > { %19166 = vmatmul.mubr.msk.f32.gmra.mrb[18].mxu0 %vm333_vm1, %v26795_v52  ;;  %v22945_v52 = vld [vmem:[%s21999_s18 + $0x113] sm:$0xff] }
 0x159   : > { %19168 = vmatprep.mubr.msk.f32.mxu0 %vm333_vm1, %v26796_v13  ;;  %v26799_v13 = vld [vmem:[#allocation29_spill] sm:$0xff] }
 0x15a   : > { %19445 = vmatmul.mubr.msk.f32.gmra.mrb[20].mxu1 %vm333_vm1, %v16425_v60  ;;  %v22959_v60 = vld [vmem:[%s21999_s18 + $0x133] sm:$0xff] }
 0x15b   : > { %19447 = vmatprep.mubr.msk.f32.mxu1 %vm333_vm1, %v22938_v61 }
 0x15c   : > { %19169 = vmatmul.mubr.msk.f32.gmra.mrb[20].mxu0 %vm333_vm1, %v26797_v1  ;;  %v26801_v1 = vld [vmem:[#allocation33_spill] sm:$0xff] }
 0x15d   : > { %19171 = vmatprep.mubr.msk.f32.mxu0 %vm333_vm1, %v26798_v55  ;;  %v26802_v55 = vld [vmem:[#allocation34_spill] sm:$0xff] }
 0x15e   : > { %19448 = vmatmul.mubr.msk.f32.gmra.mrb[22].mxu1 %vm333_vm1, %v22945_v52 }
 0x15f   : > { %19450 = vmatprep.mubr.msk.f32.mxu1 %vm333_vm1, %v22952_v11 }
 0x160   : > { %19172 = vmatmul.mubr.msk.f32.gmra.mrb[22].mxu0 %vm333_vm1, %v26799_v13  ;;  %v22966_v13 = vld [vmem:[%s21999_s18 + $0x14b] sm:$0xff] }
 0x161   : > { %19174 = vmatprep.mubr.msk.f32.mxu0 %vm333_vm1, %v26800_v7  ;;  %v22973_v7 = vld [vmem:[%s21999_s18 + $0x153] sm:$0xff] }
 0x162   : > { %19451 = vmatmul.mubr.msk.f32.gmra.mrb[24].mxu1 %vm333_vm1, %v22959_v60  ;;  %26803 = vst [vmem:[#allocation6_spill] sm:$0xff] %v22973_v7 }
 0x163   : > { %19453 = vmatprep.mubr.msk.f32.mxu1 %vm333_vm1, %v22966_v13 }
 0x164   : > { %19175 = vmatmul.mubr.msk.f32.gmra.mrb[24].mxu0 %vm333_vm1, %v26801_v1  ;;  %v22978_v1 = vld [vmem:[%s21999_s18 + $0x2e9] sm:$0xff] }
 0x165   : > { %19177 = vmatprep.mubr.msk.f32.mxu0 %vm333_vm1, %v26802_v55  ;;  %26804 = vst [vmem:[#allocation7_spill] sm:$0xff] %v22978_v1  ;;  %v22983_v55 = vld [vmem:[%s21999_s18 + $0x16b] sm:$0xff] }
 0x166   : > { %19454 = vmatmul.mubr.msk.f32.gmra.mrb[26].mxu1 %vm333_vm1, %v22973_v7  ;;  %v23000_v7 = vld [vmem:[%s21999_s18 + $0x18b] sm:$0xff] }
 0x167   : > { %19456 = vmatprep.mubr.msk.f32.mxu1 %vm333_vm1, %v22983_v55 }
 0x168   : > { %19178 = vmatmul.mubr.msk.f32.gmra.mrb[26].mxu0 %vm333_vm1, %v22470_v56  ;;  %v22990_v56 = vld [vmem:[%s21999_s18 + $0x173] sm:$0xff] }
 0x169   : > { %19180 = vmatprep.mubr.msk.f32.mxu0 %vm333_vm1, %v22478_v62  ;;  %26805 = vst [vmem:[#allocation8_spill] sm:$0xff] %v22990_v56  ;;  %v22995_v62 = vld [vmem:[%s21999_s18 + $0x2f1] sm:$0xff] }
 0x16a   : > { %26806 = vst [vmem:[#allocation9_spill] sm:$0xff] %v22995_v62  ;;  %19457 = vmatmul.mubr.msk.f32.gmra.mrb[28].mxu1 %vm333_vm1, %v22990_v56  ;;  %v23019_v56 = vld [vmem:[%s21999_s18 + $0x1ab] sm:$0xff] }
 0x16b   : > { %19459 = vmatprep.mubr.msk.f32.mxu1 %vm333_vm1, %v23000_v7 }
 0x16c   : > { %19181 = vmatmul.mubr.msk.f32.gmra.mrb[28].mxu0 %vm333_vm1, %v22487_v58  ;;  %v23007_v58 = vld [vmem:[%s21999_s18 + $0x193] sm:$0xff] }
 0x16d   : > { %19183 = vmatprep.mubr.msk.f32.mxu0 %vm333_vm1, %v22978_v1  ;;  %v23016_v1 = vld [vmem:[%s26597_s1 + $0x20] sm:$0xf] }
 0x16e   : > { %19460 = vmatmul.mubr.msk.f32.gmra.mrb[30].mxu1 %vm333_vm1, %v23007_v58 }
 0x16f   : > { %19462 = vmatprep.mubr.msk.f32.mxu1 %vm333_vm1, %v23019_v56 }
 0x170   : > { %19184 = vmatmul.mubr.msk.f32.gmra.mrb[30].mxu0 %vm333_vm1, %v22995_v62  ;;  %v23026_v62 = vld [vmem:[%s21999_s18 + $0x1b3] sm:$0xff] }
 0x171   : > { %19188 = vmatprep.mubr.msk.f32.mxu0 %vm333_vm1, %v22105_v24  ;;  %v23037_v24 = vld [vmem:[%s21999_s18 + $0x1cb] sm:$0xff] }
 0x172   : > { %19463 = vmatmul.mubr.msk.f32.gmra.mrb[32].mxu1 %vm333_vm1, %v23026_v62 }
 0x173   : > { %19465 = vmatprep.mubr.msk.f32.mxu1 %vm333_vm1, %v23037_v24 }
 0x174   : > { %19189 = vmatmul.mubr.msk.f32.vlgmr.msra.gmra.mrb[0].mxu0 %vm333_vm1, %v22114_v25  ;;  %v23044_v25 = vld [vmem:[%s21999_s18 + $0x1d3] sm:$0xff] }
 0x175   : > { %19237 = vmatpush3.msk.msra.mxu0 %vm626_vm0, %v22790_v5  ;;  %19191 = vmatprep.mubr.msk.f32.mxu0 %vm333_vm1, %v22117_v26  ;;  %v23051_v26 = vld [vmem:[%s21999_s18 + $0x1eb] sm:$0xff]  ;;  %v26808_v5 = vld [vmem:[#allocation3_spill] sm:$0xff] }
 0x176   : > { %19286 = vmatprep.subr.msk.mxu0 %vm626_vm0, %v23016_v1  ;;  %19466 = vmatmul.mubr.msk.f32.gmra.mrb[34].mxu1 %vm333_vm1, %v23044_v25 }
 0x177   : > { %19468 = vmatprep.mubr.msk.f32.mxu1 %vm333_vm1, %v23051_v26 }
 0x178   : > { %19192 = vmatmul.mubr.msk.f32.gmra.mrb[2].mxu0 %vm333_vm1, %v22124_v27  ;;  %v23058_v27 = vld [vmem:[%s21999_s18 + $0x1f3] sm:$0xff] }
 0x179   : > { %19194 = vmatprep.mubr.msk.f32.mxu0 %vm333_vm1, %v22127_v28  ;;  %v23065_v28 = vld [vmem:[%s21999_s18 + $0x20b] sm:$0xff] }
 0x17a   : > { %19469 = vmatmul.mubr.msk.f32.gmra.mrb[36].mxu1 %vm333_vm1, %v23058_v27 }
 0x17b   : > { %19471 = vmatprep.mubr.msk.f32.mxu1 %vm333_vm1, %v23065_v28 }
 0x17c   : > { %19195 = vmatmul.mubr.msk.f32.gmra.mrb[4].mxu0 %vm333_vm1, %v22134_v29  ;;  %v23072_v29 = vld [vmem:[%s21999_s18 + $0x213] sm:$0xff] }
 0x17d   : > { %19197 = vmatprep.mubr.msk.f32.mxu0 %vm333_vm1, %v22137_v30  ;;  %v23079_v30 = vld [vmem:[%s21999_s18 + $0x22b] sm:$0xff] }
 0x17e   : > { %19472 = vmatmul.mubr.msk.f32.gmra.mrb[38].mxu1 %vm333_vm1, %v23072_v29 }
 0x17f   : > { %19474 = vmatprep.mubr.msk.f32.mxu1 %vm333_vm1, %v23079_v30 }
 0x180   : > { %19198 = vmatmul.mubr.msk.f32.gmra.mrb[6].mxu0 %vm333_vm1, %v22144_v31  ;;  %v23086_v31 = vld [vmem:[%s21999_s18 + $0x233] sm:$0xff] }
 0x181   : > { %19200 = vmatprep.mubr.msk.f32.mxu0 %vm333_vm1, %v22147_v32  ;;  %26807 = vst [vmem:[#allocation10_spill] sm:$0xff] %v23086_v31  ;;  %v23093_v32 = vld [vmem:[%s21999_s18 + $0x24b] sm:$0xff] }
 0x182   : > { %19475 = vmatmul.mubr.msk.f32.gmra.mrb[40].mxu1 %vm333_vm1, %v23086_v31  ;;  %v26809_v31 = vld [vmem:[#allocation4_spill] sm:$0xff] }
 0x183   : > { %19477 = vmatprep.mubr.msk.f32.mxu1 %vm333_vm1, %v23093_v32 }
 0x184   : > { %19201 = vmatmul.mubr.msk.f32.gmra.mrb[8].mxu0 %vm333_vm1, %v22154_v33  ;;  %v23100_v33 = vld [vmem:[%s21999_s18 + $0x253] sm:$0xff] }
 0x185   : > { %19203 = vmatprep.mubr.msk.f32.mxu0 %vm333_vm1, %v22157_v34  ;;  %v23107_v34 = vld [vmem:[%s21999_s18 + $0x26b] sm:$0xff] }
 0x186   : > { %19478 = vmatmul.mubr.msk.f32.gmra.mrb[42].mxu1 %vm333_vm1, %v23100_v33 }
 0x187   : > { %19480 = vmatprep.mubr.msk.f32.mxu1 %vm333_vm1, %v23107_v34 }
 0x188   : > { %19204 = vmatmul.mubr.msk.f32.gmra.mrb[10].mxu0 %vm333_vm1, %v22164_v35  ;;  %v23114_v35 = vld [vmem:[%s21999_s18 + $0x273] sm:$0xff] }
 0x189   : > { %19206 = vmatprep.mubr.msk.f32.mxu0 %vm333_vm1, %v22167_v36  ;;  %v23121_v36 = vld [vmem:[%s21999_s18 + $0x28b] sm:$0xff] }
 0x18a   : > { %19481 = vmatmul.mubr.msk.f32.gmra.mrb[44].mxu1 %vm333_vm1, %v23114_v35 }
 0x18b   : > { %19483 = vmatprep.mubr.msk.f32.mxu1 %vm333_vm1, %v23121_v36 }
 0x18c   : > { %19207 = vmatmul.mubr.msk.f32.gmra.mrb[12].mxu0 %vm333_vm1, %v26808_v5  ;;  %v23128_v5 = vld [vmem:[%s21999_s18 + $0x293] sm:$0xff] }
 0x18d   : > { %19209 = vmatprep.mubr.msk.f32.mxu0 %vm333_vm1, %v26809_v31  ;;  %v16518_v31 = vld [vmem:[%s26599_s3 + $0xc] sm:$0xf] }
 0x18e   : > { %19484 = vmatmul.mubr.msk.f32.gmra.mrb[46].mxu1 %vm333_vm1, %v23128_v5  ;;  %19486 = vmatprep.subr.msk.mxu1 %vm626_vm0, %v16518_v31 }
 0x18f   : > { %19487 = vmatpush3.msk.msra.mxu1 %vm626_vm0, %v16518_v31  ;;  %19488 = vmatprep.mubr.msk.f32.mxu1 %vm333_vm1, %v22712_v14  ;;  %v16166_v14 = vld [vmem:[%s21999_s18 + $0x1c8] sm:$0xff]  ;;  %v23550_v31 = vld [vmem:[%s21999_s18 + $0x270] sm:$0xff] }
 0x190   : > { %19210 = vmatmul.mubr.msk.f32.gmra.mrb[14].mxu0 %vm333_vm1, %v22184_v39  ;;  %v16120_v39 = vld [vmem:[%s21999_s18 + $0x307] sm:$0xff] }
 0x191   : > { %19212 = vmatprep.mubr.msk.f32.mxu0 %vm333_vm1, %v22187_v40  ;;  %v16121_v40 = vld [vmem:[%s21999_s18 + $0x30f] sm:$0xff] }
 0x192   : > { %19489 = vmatmul.mubr.msk.f32.vlgmr.msra.gmra.mrb[16].mxu1 %vm333_vm1, %v22719_v15  ;;  %v26810_v15 = vld [vmem:[#allocation32_spill] sm:$0xff] }
 0x193   : > { %19491 = vmatprep.mubr.msk.f32.mxu1 %vm333_vm1, %v22726_v16  ;;  %v16512_v16 = vld [vmem:[%s21999_s18 + $0x2a5] sm:$0xff] }
 0x194   : > { %19213 = vmatmul.mubr.msk.f32.gmra.mrb[16].mxu0 %vm333_vm1, %v22194_v41  ;;  %v16156_v41 = vld [vmem:[%s21999_s18 + $0x128] sm:$0xff] }
 0x195   : > { %19215 = vmatprep.mubr.msk.f32.mxu0 %vm333_vm1, %v22197_v42  ;;  %v16157_v42 = vld [vmem:[%s21999_s18 + $0x130] sm:$0xff] }
 0x196   : > { %19492 = vmatmul.mubr.msk.f32.gmra.mrb[18].mxu1 %vm333_vm1, %v22733_v17  ;;  %v23264_v17 = vld [vmem:[%s21999_s18 + $0x1d0] sm:$0xff] }
 0x197   : > { %19494 = vmatprep.mubr.msk.f32.mxu1 %vm333_vm1, %v22740_v38  ;;  %v26811_v38 = vld [vmem:[#allocation5_spill] sm:$0xff] }
 0x198   : > { %19216 = vmatmul.mubr.msk.f32.gmra.mrb[18].mxu0 %vm333_vm1, %v22204_v43  ;;  %v16158_v43 = vld [vmem:[%s21999_s18 + $0x148] sm:$0xff] }
 0x199   : > { %19218 = vmatprep.mubr.msk.f32.mxu0 %vm333_vm1, %v22207_v44  ;;  %v16552_v44 = vld [vmem:[%s26599_s3 + $0x10] sm:$0xf] }
 0x19a   : > { %19495 = vmatmul.mubr.msk.f32.gmra.mrb[20].mxu1 %vm333_vm1, %v22747_v59  ;;  %19536 = vmatprep.subr.msk.mxu1 %vm626_vm0, %v16552_v44  ;;  %v23270_v59 = vld [vmem:[%s21999_s18 + $0x2ad] sm:$0xff] }
 0x19b   : > { %19497 = vmatprep.mubr.msk.f32.mxu1 %vm333_vm1, %v22757_v63  ;;  %19537 = vmatpush3.msk.msra.mxu1 %vm626_vm0, %v16552_v44  ;;  %v21923_v63 = vmov 0.0   ;;  %v21891_v44 = vld [vmem:[%s21999_s18 + $0x170] sm:$0xff] }
 0x19c   : > { %19219 = vmatmul.mubr.msk.f32.gmra.mrb[20].mxu0 %vm333_vm1, %v22214_v45  ;;  %v23214_v45 = vld [vmem:[%s26599_s3 + $0x4] sm:$0xf]  ;;  %368 = vst.msk [vmem:[#allocation2 + $0x110] sm:$0xff] %vm333_vm1, %v21923_v63  ;;  %346 = vst.msk [vmem:[#allocation2 + $0x60] sm:$0xff] %vm333_vm1, %v21923_v63 }
 0x19d   : > { %19221 = vmatprep.mubr.msk.f32.mxu0 %vm333_vm1, %v22217_v46  ;;  %v23221_v46 = vld [vmem:[%s26599_s3 + $0x14] sm:$0xf]  ;;  %347 = vst.msk [vmem:[#allocation2 + $0x68] sm:$0xff] %vm333_vm1, %v21923_v63  ;;  %348 = vst.msk [vmem:[#allocation2 + $0x70] sm:$0xff] %vm333_vm1, %v21923_v63 }
 0x19e   : > { %19498 = vmatmul.mubr.msk.f32.gmra.mrb[22].mxu1 %vm333_vm1, %v22764_v54  ;;  %19586 = vmatprep.subr.msk.mxu1 %vm626_vm0, %v23221_v46  ;;  %349 = vst.msk [vmem:[#allocation2 + $0x78] sm:$0xff] %vm333_vm1, %v21923_v63  ;;  %350 = vst.msk [vmem:[#allocation2 + $0x80] sm:$0xff] %vm333_vm1, %v21923_v63  ;;  %v16514_v54 = vld [vmem:[%s21999_s18 + $0x2c5] sm:$0xff] }
 0x19f   : > { %19500 = vmatprep.mubr.msk.f32.mxu1 %vm333_vm1, %v22774_v0  ;;  %351 = vst.msk [vmem:[#allocation2 + $0x88] sm:$0xff] %vm333_vm1, %v21923_v63  ;;  %352 = vst.msk [vmem:[#allocation2 + $0x90] sm:$0xff] %vm333_vm1, %v21923_v63  ;;  %v23484_v0 = vld [vmem:[%s21999_s18 + $0x1e8] sm:$0xff] }
 0x1a0   : > { %19222 = vmatmul.mubr.msk.f32.gmra.mrb[22].mxu0 %vm333_vm1, %v22224_v47  ;;  %v16159_v47 = vld [vmem:[%s21999_s18 + $0x150] sm:$0xff]  ;;  %353 = vst.msk [vmem:[#allocation2 + $0x98] sm:$0xff] %vm333_vm1, %v21923_v63  ;;  %354 = vst.msk [vmem:[#allocation2 + $0xa0] sm:$0xff] %vm333_vm1, %v21923_v63 }
 0x1a1   : > { %19224 = vmatprep.mubr.msk.f32.mxu0 %vm333_vm1, %v22227_v48  ;;  %v16160_v48 = vld [vmem:[%s21999_s18 + $0x168] sm:$0xff]  ;;  %355 = vst.msk [vmem:[#allocation2 + $0xa8] sm:$0xff] %vm333_vm1, %v21923_v63  ;;  %356 = vst.msk [vmem:[#allocation2 + $0xb0] sm:$0xff] %vm333_vm1, %v21923_v63 }
 0x1a2   : > { %19501 = vmatmul.mubr.msk.f32.gmra.mrb[24].mxu1 %vm333_vm1, %v22781_v57  ;;  %357 = vst.msk [vmem:[#allocation2 + $0xb8] sm:$0xff] %vm333_vm1, %v21923_v63  ;;  %358 = vst.msk [vmem:[#allocation2 + $0xc0] sm:$0xff] %vm333_vm1, %v21923_v63  ;;  %v16515_v57 = vld [vmem:[%s21999_s18 + $0x2cd] sm:$0xff] }
 0x1a3   : > { %19503 = vmatprep.mubr.msk.f32.mxu1 %vm333_vm1, %v22793_v19  ;;  %359 = vst.msk [vmem:[#allocation2 + $0xc8] sm:$0xff] %vm333_vm1, %v21923_v63  ;;  %360 = vst.msk [vmem:[#allocation2 + $0xd0] sm:$0xff] %vm333_vm1, %v21923_v63  ;;  %v23493_v19 = vld [vmem:[%s21999_s18 + $0x1f0] sm:$0xff] }
 0x1a4   : > { %19225 = vmatmul.mubr.msk.f32.gmra.mrb[24].mxu0 %vm333_vm1, %v22234_v49  ;;  %v16161_v49 = vld [vmem:[%s21999_s18 + $0x170] sm:$0xff]  ;;  %361 = vst.msk [vmem:[#allocation2 + $0xd8] sm:$0xff] %vm333_vm1, %v21923_v63  ;;  %362 = vst.msk [vmem:[#allocation2 + $0xe0] sm:$0xff] %vm333_vm1, %v21923_v63 }
 0x1a5   : > { %19227 = vmatprep.mubr.msk.f32.mxu0 %vm333_vm1, %v22237_v50  ;;  %v16162_v50 = vld [vmem:[%s21999_s18 + $0x188] sm:$0xff]  ;;  %363 = vst.msk [vmem:[#allocation2 + $0xe8] sm:$0xff] %vm333_vm1, %v21923_v63  ;;  %364 = vst.msk [vmem:[#allocation2 + $0xf0] sm:$0xff] %vm333_vm1, %v21923_v63 }
 0x1a6   : > { %19504 = vmatmul.mubr.msk.f32.gmra.mrb[26].mxu1 %vm333_vm1, %v22800_v22  ;;  %365 = vst.msk [vmem:[#allocation2 + $0xf8] sm:$0xff] %vm333_vm1, %v21923_v63  ;;  %366 = vst.msk [vmem:[#allocation2 + $0x100] sm:$0xff] %vm333_vm1, %v21923_v63  ;;  %v16516_v22 = vld [vmem:[%s21999_s18 + $0x2e5] sm:$0xff] }
 0x1a7   : > { %19506 = vmatprep.mubr.msk.f32.mxu1 %vm333_vm1, %v22811_v53  ;;  %367 = vst.msk [vmem:[#allocation2 + $0x108] sm:$0xff] %vm333_vm1, %v21923_v63  ;;  %369 = vst.msk [vmem:[#allocation2 + $0x118] sm:$0xff] %vm333_vm1, %v21923_v63  ;;  %v23499_v53 = vld [vmem:[%s21999_s18 + $0x208] sm:$0xff] }
 0x1a8   : > { %19228 = vmatmul.mubr.msk.f32.gmra.mrb[26].mxu0 %vm333_vm1, %v22244_v51  ;;  %v16163_v51 = vld [vmem:[%s21999_s18 + $0x190] sm:$0xff]  ;;  %370 = vst.msk [vmem:[#allocation2 + $0x120] sm:$0xff] %vm333_vm1, %v21923_v63  ;;  %371 = vst.msk [vmem:[#allocation2 + $0x128] sm:$0xff] %vm333_vm1, %v21923_v63 }
 0x1a9   : > { %19230 = vmatprep.mubr.msk.f32.mxu0 %vm333_vm1, %v22588_v2  ;;  %v16164_v2 = vld [vmem:[%s21999_s18 + $0x1a8] sm:$0xff]  ;;  %372 = vst.msk [vmem:[#allocation2 + $0x130] sm:$0xff] %vm333_vm1, %v21923_v63  ;;  %373 = vst.msk [vmem:[#allocation2 + $0x138] sm:$0xff] %vm333_vm1, %v21923_v63 }
 0x1aa   : > { %19507 = vmatmul.mubr.msk.f32.gmra.mrb[28].mxu1 %vm333_vm1, %v22818_v23  ;;  %374 = vst.msk [vmem:[#allocation2 + $0x140] sm:$0xff] %vm333_vm1, %v21923_v63  ;;  %375 = vst.msk [vmem:[#allocation2 + $0x148] sm:$0xff] %vm333_vm1, %v21923_v63  ;;  %v16517_v23 = vld [vmem:[%s21999_s18 + $0x2ed] sm:$0xff] }
 0x1ab   : > { %19509 = vmatprep.mubr.msk.f32.mxu1 %vm333_vm1, %v22825_v37  ;;  %376 = vst.msk [vmem:[#allocation2 + $0x150] sm:$0xff] %vm333_vm1, %v21923_v63  ;;  %377 = vst.msk [vmem:[#allocation2 + $0x158] sm:$0xff] %vm333_vm1, %v21923_v63  ;;  %v23507_v37 = vld [vmem:[%s21999_s18 + $0x210] sm:$0xff] }
 0x1ac   : > { %19231 = vmatmul.mubr.msk.f32.gmra.mrb[28].mxu0 %vm333_vm1, %v22597_v3  ;;  %v16165_v3 = vld [vmem:[%s21999_s18 + $0x1b0] sm:$0xff]  ;;  %378 = vst.msk [vmem:[#allocation2 + $0x160] sm:$0xff] %vm333_vm1, %v21923_v63  ;;  %379 = vst.msk [vmem:[#allocation2 + $0x168] sm:$0xff] %vm333_vm1, %v21923_v63 }
 0x1ad   : > { %19233 = vmatprep.mubr.msk.f32.mxu0 %vm333_vm1, %v16120_v39  ;;  %380 = vst.msk [vmem:[#allocation2 + $0x170] sm:$0xff] %vm333_vm1, %v21923_v63  ;;  %381 = vst.msk [vmem:[#allocation2 + $0x178] sm:$0xff] %vm333_vm1, %v21923_v63  ;;  %v23555_v39 = vld [vmem:[%s21999_s18 + $0x288] sm:$0xff] }
 0x1ae   : > { %19510 = vmatmul.mubr.msk.f32.gmra.mrb[30].mxu1 %vm333_vm1, %v22832_v6  ;;  %382 = vst.msk [vmem:[#allocation2 + $0x180] sm:$0xff] %vm333_vm1, %v21923_v63  ;;  %383 = vst.msk [vmem:[#allocation2 + $0x188] sm:$0xff] %vm333_vm1, %v21923_v63  ;;  %v23512_v6 = vld [vmem:[%s21999_s18 + $0x228] sm:$0xff] }
 0x1af   : > { %19512 = vmatprep.mubr.msk.f32.mxu1 %vm333_vm1, %v22839_v8  ;;  %384 = vst.msk [vmem:[#allocation2 + $0x190] sm:$0xff] %vm333_vm1, %v21923_v63  ;;  %385 = vst.msk [vmem:[#allocation2 + $0x198] sm:$0xff] %vm333_vm1, %v21923_v63  ;;  %v21876_v8 = vld [vmem:[%s21999_s18 + $0x108] sm:$0xff] }
 0x1b0   : > { %19234 = vmatmul.mubr.msk.f32.gmra.mrb[30].mxu0 %vm333_vm1, %v16121_v40  ;;  %386 = vst.msk [vmem:[#allocation2 + $0x1a0] sm:$0xff] %vm333_vm1, %v21923_v63  ;;  %387 = vst.msk [vmem:[#allocation2 + $0x1a8] sm:$0xff] %vm333_vm1, %v21923_v63  ;;  %v21887_v40 = vld [vmem:[%s21999_s18 + $0x150] sm:$0xff] }
 0x1b1   : > { %19238 = vmatprep.mubr.msk.f32.mxu0 %vm333_vm1, %v16156_v41  ;;  %388 = vst.msk [vmem:[#allocation2 + $0x1b0] sm:$0xff] %vm333_vm1, %v21923_v63  ;;  %389 = vst.msk [vmem:[#allocation2 + $0x1b8] sm:$0xff] %vm333_vm1, %v21923_v63  ;;  %v21888_v41 = vld [vmem:[%s21999_s18 + $0x168] sm:$0xff] }
 0x1b2   : > { %19513 = vmatmul.mubr.msk.f32.gmra.mrb[32].mxu1 %vm333_vm1, %v22846_v10  ;;  %390 = vst.msk [vmem:[#allocation2 + $0x1c0] sm:$0xff] %vm333_vm1, %v21923_v63  ;;  %391 = vst.msk [vmem:[#allocation2 + $0x1c8] sm:$0xff] %vm333_vm1, %v21923_v63  ;;  %v23520_v10 = vld [vmem:[%s21999_s18 + $0x230] sm:$0xff] }
 0x1b3   : > { %19515 = vmatprep.mubr.msk.f32.mxu1 %vm333_vm1, %v22853_v12  ;;  %392 = vst.msk [vmem:[#allocation2 + $0x1d0] sm:$0xff] %vm333_vm1, %v21923_v63  ;;  %393 = vst.msk [vmem:[#allocation2 + $0x1d8] sm:$0xff] %vm333_vm1, %v21923_v63  ;;  %v23525_v12 = vld [vmem:[%s21999_s18 + $0x248] sm:$0xff] }
 0x1b4   : > { %19239 = vmatmul.mubr.msk.f32.vlgmr.msra.gmra.mrb[0].mxu0 %vm333_vm1, %v16157_v42  ;;  %394 = vst.msk [vmem:[#allocation2 + $0x1e0] sm:$0xff] %vm333_vm1, %v21923_v63  ;;  %395 = vst.msk [vmem:[#allocation2 + $0x1e8] sm:$0xff] %vm333_vm1, %v21923_v63  ;;  %v23564_v42 = vld [vmem:[%s21999_s18 + $0x290] sm:$0xff] }
 0x1b5   : > { %19287 = vmatpush3.msk.msra.mxu0 %vm626_vm0, %v23016_v1  ;;  %19241 = vmatprep.mubr.msk.f32.mxu0 %vm333_vm1, %v16158_v43  ;;  %396 = vst.msk [vmem:[#allocation2 + $0x1f0] sm:$0xff] %vm333_vm1, %v21923_v63  ;;  %397 = vst.msk [vmem:[#allocation2 + $0x1f8] sm:$0xff] %vm333_vm1, %v21923_v63  ;;  %v21884_v1 = vld [vmem:[%s21999_s18 + $0x148] sm:$0xff] }
 0x1b6   : > { %19786 = vmatprep.subr.msk.mxu0 %vm626_vm0, %v23214_v45  ;;  %19516 = vmatmul.mubr.msk.f32.gmra.mrb[34].mxu1 %vm333_vm1, %v22860_v18  ;;  %398 = vst.msk [vmem:[#allocation2 + $0x200] sm:$0xff] %vm333_vm1, %v21923_v63  ;;  %399 = vst.msk [vmem:[#allocation2 + $0x208] sm:$0xff] %vm333_vm1, %v21923_v63  ;;  %v21879_v18 = vld [vmem:[%s21999_s18 + $0x110] sm:$0xff]  ;;  %v23569_v43 = vld [vmem:[%s21999_s18 + $0x2a8] sm:$0xff] }
 0x1b7   : > { %19518 = vmatprep.mubr.msk.f32.mxu1 %vm333_vm1, %v22867_v20  ;;  %400 = vst.msk [vmem:[#allocation2 + $0x210] sm:$0xff] %vm333_vm1, %v21923_v63  ;;  %401 = vst.msk [vmem:[#allocation2 + $0x218] sm:$0xff] %vm333_vm1, %v21923_v63  ;;  %v21880_v20 = vld [vmem:[%s21999_s18 + $0x128] sm:$0xff] }
 0x1b8   : > { %19242 = vmatmul.mubr.msk.f32.gmra.mrb[2].mxu0 %vm333_vm1, %v16159_v47  ;;  %402 = vst.msk [vmem:[#allocation2 + $0x220] sm:$0xff] %vm333_vm1, %v21923_v63  ;;  %403 = vst.msk [vmem:[#allocation2 + $0x228] sm:$0xff] %vm333_vm1, %v21923_v63  ;;  %v23578_v47 = vld [vmem:[%s21999_s18 + $0x2b0] sm:$0xff] }
 0x1b9   : > { %19244 = vmatprep.mubr.msk.f32.mxu0 %vm333_vm1, %v16160_v48  ;;  %404 = vst.msk [vmem:[#allocation2 + $0x230] sm:$0xff] %vm333_vm1, %v21923_v63  ;;  %405 = vst.msk [vmem:[#allocation2 + $0x238] sm:$0xff] %vm333_vm1, %v21923_v63  ;;  %v23583_v48 = vld [vmem:[%s21999_s18 + $0x2c8] sm:$0xff] }
 0x1ba   : > { %19519 = vmatmul.mubr.msk.f32.gmra.mrb[36].mxu1 %vm333_vm1, %v22874_v21  ;;  %406 = vst.msk [vmem:[#allocation2 + $0x240] sm:$0xff] %vm333_vm1, %v21923_v63  ;;  %407 = vst.msk [vmem:[#allocation2 + $0x248] sm:$0xff] %vm333_vm1, %v21923_v63  ;;  %v23536_v21 = vld [vmem:[%s21999_s18 + $0x250] sm:$0xff] }
 0x1bb   : > { %19521 = vmatprep.mubr.msk.f32.mxu1 %vm333_vm1, %v22881_v4  ;;  %408 = vst.msk [vmem:[#allocation2 + $0x250] sm:$0xff] %vm333_vm1, %v21923_v63  ;;  %409 = vst.msk [vmem:[#allocation2 + $0x258] sm:$0xff] %vm333_vm1, %v21923_v63  ;;  %v23541_v4 = vld [vmem:[%s21999_s18 + $0x268] sm:$0xff] }
 0x1bc   : > { %19245 = vmatmul.mubr.msk.f32.gmra.mrb[4].mxu0 %vm333_vm1, %v16161_v49  ;;  %410 = vst.msk [vmem:[#allocation2 + $0x260] sm:$0xff] %vm333_vm1, %v21923_v63  ;;  %411 = vst.msk [vmem:[#allocation2 + $0x268] sm:$0xff] %vm333_vm1, %v21923_v63  ;;  %v21895_v49 = vld [vmem:[%s21999_s18 + $0x190] sm:$0xff] }
 0x1bd   : > { %19247 = vmatprep.mubr.msk.f32.mxu0 %vm333_vm1, %v16162_v50  ;;  %412 = vst.msk [vmem:[#allocation2 + $0x270] sm:$0xff] %vm333_vm1, %v21923_v63  ;;  %413 = vst.msk [vmem:[#allocation2 + $0x278] sm:$0xff] %vm333_vm1, %v21923_v63  ;;  %v21896_v50 = vld [vmem:[%s21999_s18 + $0x1a8] sm:$0xff] }
 0x1be   : > { %19522 = vmatmul.mubr.msk.f32.gmra.mrb[38].mxu1 %vm333_vm1, %v22888_v9  ;;  %414 = vst.msk [vmem:[#allocation2 + $0x280] sm:$0xff] %vm333_vm1, %v21923_v63  ;;  %415 = vst.msk [vmem:[#allocation2 + $0x288] sm:$0xff] %vm333_vm1, %v21923_v63  ;;  %v21883_v9 = vld [vmem:[%s21999_s18 + $0x130] sm:$0xff] }
 0x1bf   : > { %19524 = vmatprep.mubr.msk.f32.mxu1 %vm333_vm1, %v26810_v15  ;;  %416 = vst.msk [vmem:[#allocation2 + $0x290] sm:$0xff] %vm333_vm1, %v21923_v63  ;;  %417 = vst.msk [vmem:[#allocation2 + $0x298] sm:$0xff] %vm333_vm1, %v21923_v63  ;;  %v21899_v15 = vld [vmem:[%s21999_s18 + $0x1c8] sm:$0xff] }
 0x1c0   : > { %19248 = vmatmul.mubr.msk.f32.gmra.mrb[6].mxu0 %vm333_vm1, %v16163_v51  ;;  %418 = vst.msk [vmem:[#allocation2 + $0x2a0] sm:$0xff] %vm333_vm1, %v21923_v63  ;;  %419 = vst.msk [vmem:[#allocation2 + $0x2a8] sm:$0xff] %vm333_vm1, %v21923_v63  ;;  %v21897_v51 = vld [vmem:[%s21999_s18 + $0x2d0] sm:$0xff] }
 0x1c1   : > { %19250 = vmatprep.mubr.msk.f32.mxu0 %vm333_vm1, %v16164_v2  ;;  %420 = vst.msk [vmem:[#allocation2 + $0x2b0] sm:$0xff] %vm333_vm1, %v21923_v63  ;;  %421 = vst.msk [vmem:[#allocation2 + $0x2b8] sm:$0xff] %vm333_vm1, %v21923_v63  ;;  %v26812_v2 = vld [vmem:[#allocation28_spill] sm:$0xff] }
 0x1c2   : > { %19525 = vmatmul.mubr.msk.f32.gmra.mrb[40].mxu1 %vm333_vm1, %v26811_v38  ;;  %422 = vst.msk [vmem:[#allocation2 + $0x2c0] sm:$0xff] %vm333_vm1, %v21923_v63  ;;  %423 = vst.msk [vmem:[#allocation2 + $0x2c8] sm:$0xff] %vm333_vm1, %v21923_v63  ;;  %v16222_v38 = vld [vmem:[%s21999_s18 + $0x129] sm:$0xff] }
 0x1c3   : > { %19527 = vmatprep.mubr.msk.f32.mxu1 %vm333_vm1, %v16512_v16  ;;  %424 = vst.msk [vmem:[#allocation2 + $0x2d0] sm:$0xff] %vm333_vm1, %v21923_v63  ;;  %425 = vst.msk [vmem:[#allocation2 + $0x2d8] sm:$0xff] %vm333_vm1, %v21923_v63  ;;  %v26813_v16 = vld [vmem:[#allocation30_spill] sm:$0xff] }
 0x1c4   : > { %19251 = vmatmul.mubr.msk.f32.gmra.mrb[8].mxu0 %vm333_vm1, %v16165_v3  ;;  %426 = vst.msk [vmem:[#allocation2 + $0x2e0] sm:$0xff] %vm333_vm1, %v21923_v63  ;;  %427 = vst.msk [vmem:[#allocation2 + $0x2e8] sm:$0xff] %vm333_vm1, %v21923_v63  ;;  %v16186_v3 = vld [vmem:[%s21999_s18 + $0x308] sm:$0xff] }
 0x1c5   : > { %19253 = vmatprep.mubr.msk.f32.mxu0 %vm333_vm1, %v16166_v14  ;;  %428 = vst.msk [vmem:[#allocation2 + $0x2f0] sm:$0xff] %vm333_vm1, %v21923_v63  ;;  %429 = vst.msk [vmem:[#allocation2 + $0x2f8] sm:$0xff] %vm333_vm1, %v21923_v63  ;;  %v21898_v14 = vld [vmem:[%s21999_s18 + $0x1b0] sm:$0xff] }
 0x1c6   : > { %430 = vst.msk [vmem:[#allocation2 + $0x300] sm:$0xff] %vm333_vm1, %v21923_v63  ;;  %431 = vst.msk [vmem:[#allocation2 + $0x308] sm:$0xff] %vm333_vm1, %v21923_v63  ;;  %19528 = vmatmul.mubr.msk.f32.gmra.mrb[42].mxu1 %vm333_vm1, %v23270_v59  ;;  %v21900_v59 = vld [vmem:[%s21999_s18 + $0x1d0] sm:$0xff] }
 0x1c7   : > { %432 = vst.msk [vmem:[#allocation2 + $0x310] sm:$0xff] %vm333_vm1, %v21923_v63  ;;  %433 = vst.msk [vmem:[#allocation2 + $0x318] sm:$0xff] %vm333_vm1, %v21923_v63  ;;  %19530 = vmatprep.mubr.msk.f32.mxu1 %vm333_vm1, %v16514_v54  ;;  %v16224_v54 = vld [vmem:[%s21999_s18 + $0x149] sm:$0xff] }
 0x1c8   : > { %434 = vst.msk [vmem:[#allocation2 + $0x320] sm:$0xff] %vm333_vm1, %v21923_v63  ;;  %435 = vst.msk [vmem:[#allocation2 + $0x328] sm:$0xff] %vm333_vm1, %v21923_v63  ;;  %19254 = vmatmul.mubr.msk.f32.gmra.mrb[10].mxu0 %vm333_vm1, %v23264_v17  ;;  %v16187_v17 = vld [vmem:[%s21999_s18 + $0x310] sm:$0xff] }
 0x1c9   : > { %436 = vst.msk [vmem:[#allocation2 + $0x330] sm:$0xff] %vm333_vm1, %v21923_v63  ;;  %437 = vst.msk [vmem:[#allocation2 + $0x338] sm:$0xff] %vm333_vm1, %v21923_v63  ;;  %19256 = vmatprep.mubr.msk.f32.mxu0 %vm333_vm1, %v23484_v0 }
 0x1ca   : > { %438 = vst.msk [vmem:[#allocation2 + $0x340] sm:$0xff] %vm333_vm1, %v21923_v63  ;;  %439 = vst.msk [vmem:[#allocation2 + $0x348] sm:$0xff] %vm333_vm1, %v21923_v63  ;;  %19531 = vmatmul.mubr.msk.f32.gmra.mrb[44].mxu1 %vm333_vm1, %v16515_v57  ;;  %v16226_v57 = vld [vmem:[%s21999_s18 + $0x169] sm:$0xff] }
 0x1cb   : > { %440 = vst.msk [vmem:[#allocation2 + $0x350] sm:$0xff] %vm333_vm1, %v21923_v63  ;;  %441 = vst.msk [vmem:[#allocation2 + $0x358] sm:$0xff] %vm333_vm1, %v21923_v63  ;;  %19533 = vmatprep.mubr.msk.f32.mxu1 %vm333_vm1, %v16516_v22  ;;  %v16228_v22 = vld [vmem:[%s21999_s18 + $0x189] sm:$0xff] }
 0x1cc   : > { %442 = vst.msk [vmem:[#allocation2 + $0x360] sm:$0xff] %vm333_vm1, %v21923_v63  ;;  %443 = vst.msk [vmem:[#allocation2 + $0x368] sm:$0xff] %vm333_vm1, %v21923_v63  ;;  %19257 = vmatmul.mubr.msk.f32.gmra.mrb[12].mxu0 %vm333_vm1, %v23493_v19 }
 0x1cd   : > { %444 = vst.msk [vmem:[#allocation2 + $0x370] sm:$0xff] %vm333_vm1, %v21923_v63  ;;  %445 = vst.msk [vmem:[#allocation2 + $0x378] sm:$0xff] %vm333_vm1, %v21923_v63  ;;  %19259 = vmatprep.mubr.msk.f32.mxu0 %vm333_vm1, %v23499_v53 }
 0x1ce   : > { %446 = vst.msk [vmem:[#allocation2 + $0x380] sm:$0xff] %vm333_vm1, %v21923_v63  ;;  %447 = vst.msk [vmem:[#allocation2 + $0x388] sm:$0xff] %vm333_vm1, %v21923_v63  ;;  %19534 = vmatmul.mubr.msk.f32.gmra.mrb[46].mxu1 %vm333_vm1, %v16517_v23  ;;  %v16231_v23 = vld [vmem:[%s21999_s18 + $0x1b1] sm:$0xff] }
 0x1cf   : > { %448 = vst.msk [vmem:[#allocation2 + $0x390] sm:$0xff] %vm333_vm1, %v21923_v63  ;;  %449 = vst.msk [vmem:[#allocation2 + $0x398] sm:$0xff] %vm333_vm1, %v21923_v63  ;;  %19538 = vmatprep.mubr.msk.f32.mxu1 %vm333_vm1, %v21876_v8  ;;  %v16223_v63 = vld [vmem:[%s21999_s18 + $0x131] sm:$0xff]  ;;  %v16234_v8 = vld [vmem:[%s21999_s18 + $0x1e9] sm:$0xff] }
 0x1d0   : > { %19260 = vmatmul.mubr.msk.f32.gmra.mrb[14].mxu0 %vm333_vm1, %v23507_v37 }
 0x1d1   : > { %19262 = vmatprep.mubr.msk.f32.mxu0 %vm333_vm1, %v23512_v6 }
 0x1d2   : > { %19539 = vmatmul.mubr.msk.f32.vlgmr.msra.gmra.mrb[16].mxu1 %vm333_vm1, %v21879_v18  ;;  %v16237_v18 = vld [vmem:[%s21999_s18 + $0x211] sm:$0xff] }
 0x1d3   : > { %19541 = vmatprep.mubr.msk.f32.mxu1 %vm333_vm1, %v21880_v20  ;;  %19587 = vmatpush3.msk.msra.mxu1 %vm626_vm0, %v23221_v46  ;;  %v21892_v46 = vld [vmem:[%s21999_s18 + $0x188] sm:$0xff] }
 0x1d4   : > { %19263 = vmatmul.mubr.msk.f32.gmra.mrb[16].mxu0 %vm333_vm1, %v23520_v10  ;;  %v16238_v20 = vld [vmem:[%s21999_s18 + $0x229] sm:$0xff] }
 0x1d5   : > { %19265 = vmatprep.mubr.msk.f32.mxu0 %vm333_vm1, %v23525_v12 }
 0x1d6   : > { %19542 = vmatmul.mubr.msk.f32.gmra.mrb[18].mxu1 %vm333_vm1, %v21883_v9  ;;  %v16241_v9 = vld [vmem:[%s21999_s18 + $0x251] sm:$0xff] }
 0x1d7   : > { %19544 = vmatprep.mubr.msk.f32.mxu1 %vm333_vm1, %v21884_v1  ;;  %v16242_v1 = vld [vmem:[%s21999_s18 + $0x269] sm:$0xff] }
 0x1d8   : > { %19266 = vmatmul.mubr.msk.f32.gmra.mrb[18].mxu0 %vm333_vm1, %v23536_v21 }
 0x1d9   : > { %19268 = vmatprep.mubr.msk.f32.mxu0 %vm333_vm1, %v23541_v4 }
 0x1da   : > { %19545 = vmatmul.mubr.msk.f32.gmra.mrb[20].mxu1 %vm333_vm1, %v21887_v40  ;;  %v26815_v40 = vld [vmem:[#allocation8_spill] sm:$0xff] }
 0x1db   : > { %19547 = vmatprep.mubr.msk.f32.mxu1 %vm333_vm1, %v21888_v41  ;;  %v16249_v41 = vld [vmem:[%s21999_s18 + $0x2d1] sm:$0xff] }
 0x1dc   : > { %19269 = vmatmul.mubr.msk.f32.gmra.mrb[20].mxu0 %vm333_vm1, %v23550_v31 }
 0x1dd   : > { %19271 = vmatprep.mubr.msk.f32.mxu0 %vm333_vm1, %v23555_v39 }
 0x1de   : > { %19548 = vmatmul.mubr.msk.f32.gmra.mrb[22].mxu1 %vm333_vm1, %v21891_v44  ;;  %v16653_v44 = vld [vmem:[%s21999_s18 + $0x16d] sm:$0xff] }
 0x1df   : > { %19550 = vmatprep.mubr.msk.f32.mxu1 %vm333_vm1, %v21892_v46  ;;  %v16654_v46 = vld [vmem:[%s21999_s18 + $0x185] sm:$0xff] }
 0x1e0   : > { %19272 = vmatmul.mubr.msk.f32.gmra.mrb[22].mxu0 %vm333_vm1, %v23564_v42 }
 0x1e1   : > { %19274 = vmatprep.mubr.msk.f32.mxu0 %vm333_vm1, %v23569_v43 }
 0x1e2   : > { %19551 = vmatmul.mubr.msk.f32.gmra.mrb[24].mxu1 %vm333_vm1, %v21895_v49  ;;  %v16657_v49 = vld [vmem:[%s21999_s18 + $0x1ad] sm:$0xff] }
 0x1e3   : > { %19553 = vmatprep.mubr.msk.f32.mxu1 %vm333_vm1, %v21896_v50  ;;  %v16658_v50 = vld [vmem:[%s21999_s18 + $0x1c5] sm:$0xff] }
 0x1e4   : > { %19275 = vmatmul.mubr.msk.f32.gmra.mrb[24].mxu0 %vm333_vm1, %v23578_v47 }
 0x1e5   : > { %19277 = vmatprep.mubr.msk.f32.mxu0 %vm333_vm1, %v23583_v48 }
 0x1e6   : > { %19554 = vmatmul.mubr.msk.f32.gmra.mrb[26].mxu1 %vm333_vm1, %v21898_v14  ;;  %v23808_v14 = vpop.f32.mrb[0].mxu1 }
 0x1e7   : > { %19556 = vmatprep.mubr.msk.f32.mxu1 %vm333_vm1, %v21899_v15  ;;  %v23810_v15 = vpop.f32.mrb[1].mxu1 }
 0x1e8   : > { %19278 = vmatmul.mubr.msk.f32.gmra.mrb[26].mxu0 %vm333_vm1, %v21897_v51 }
 0x1e9   : > { %19280 = vmatprep.mubr.msk.f32.mxu0 %vm333_vm1, %v26812_v2 }
 0x1ea   : > { %19557 = vmatmul.mubr.msk.f32.gmra.mrb[28].mxu1 %vm333_vm1, %v21900_v59 }
 0x1eb   : > { %19559 = vmatprep.mubr.msk.f32.mxu1 %vm333_vm1, %v23484_v0  ;;  %v16225_v0 = vld [vmem:[%s21999_s18 + $0x151] sm:$0xff] }
 0x1ec   : > { %19281 = vmatmul.mubr.msk.f32.gmra.mrb[28].mxu0 %vm333_vm1, %v26813_v16 }
 0x1ed   : > { %19283 = vmatprep.mubr.msk.f32.mxu0 %vm333_vm1, %v16186_v3  ;;  %v16661_v3 = vld [vmem:[%s21999_s18 + $0x1ed] sm:$0xff] }
 0x1ee   : > { %19560 = vmatmul.mubr.msk.f32.gmra.mrb[30].mxu1 %vm333_vm1, %v23493_v19  ;;  %v16227_v19 = vld [vmem:[%s21999_s18 + $0x171] sm:$0xff] }
 0x1ef   : > { %19562 = vmatprep.mubr.msk.f32.mxu1 %vm333_vm1, %v23499_v53  ;;  %v16230_v53 = vld [vmem:[%s21999_s18 + $0x1a9] sm:$0xff] }
 0x1f0   : > { %19284 = vmatmul.mubr.msk.f32.gmra.mrb[30].mxu0 %vm333_vm1, %v16187_v17  ;;  %v16663_v17 = vld [vmem:[%s21999_s18 + $0x20d] sm:$0xff] }
 0x1f1   : > { %19288 = vmatprep.mubr.msk.f32.mxu0 %vm333_vm1, %v16222_v38  ;;  %v23816_v38 = vpop.f32.mrb[2].mxu1 }
 0x1f2   : > { %19563 = vmatmul.mubr.msk.f32.gmra.mrb[32].mxu1 %vm333_vm1, %v23507_v37  ;;  %v16232_v37 = vld [vmem:[%s21999_s18 + $0x1c9] sm:$0xff]  ;;  %v23818_v59 = vpop.f32.mrb[3].mxu1 }
 0x1f3   : > { %19565 = vmatprep.mubr.msk.f32.mxu1 %vm333_vm1, %v23512_v6  ;;  %v16233_v6 = vld [vmem:[%s21999_s18 + $0x1d1] sm:$0xff] }
 0x1f4   : > { %19289 = vmatmul.mubr.msk.f32.vlgmr.msra.gmra.mrb[0].mxu0 %vm333_vm1, %v16223_v63  ;;  %v16664_v63 = vld [vmem:[%s21999_s18 + $0x225] sm:$0xff] }
 0x1f5   : > { %19291 = vmatprep.mubr.msk.f32.mxu0 %vm333_vm1, %v16224_v54  ;;  %19787 = vmatpush3.msk.msra.mxu0 %vm626_vm0, %v23214_v45  ;;  %v16229_v45 = vld [vmem:[%s21999_s18 + $0x191] sm:$0xff] }
 0x1f6   : > { %19566 = vmatmul.mubr.msk.f32.gmra.mrb[34].mxu1 %vm333_vm1, %v23520_v10  ;;  %v16235_v10 = vld [vmem:[%s21999_s18 + $0x1f1] sm:$0xff] }
 0x1f7   : > { %19568 = vmatprep.mubr.msk.f32.mxu1 %vm333_vm1, %v23525_v12  ;;  %v16236_v12 = vld [vmem:[%s21999_s18 + $0x209] sm:$0xff] }
 0x1f8   : > { %19292 = vmatmul.mubr.msk.f32.gmra.mrb[2].mxu0 %vm333_vm1, %v16225_v0  ;;  %v16665_v54 = vld [vmem:[%s21999_s18 + $0x22d] sm:$0xff]  ;;  %v23824_v0 = vpop.f32.mrb[4].mxu1 }
 0x1f9   : > { %19294 = vmatprep.mubr.msk.f32.mxu0 %vm333_vm1, %v16226_v57  ;;  %v23826_v57 = vpop.f32.mrb[5].mxu1 }
 0x1fa   : > { %19569 = vmatmul.mubr.msk.f32.gmra.mrb[36].mxu1 %vm333_vm1, %v23536_v21  ;;  %v16239_v21 = vld [vmem:[%s21999_s18 + $0x231] sm:$0xff] }
 0x1fb   : > { %19571 = vmatprep.mubr.msk.f32.mxu1 %vm333_vm1, %v23541_v4  ;;  %v16240_v4 = vld [vmem:[%s21999_s18 + $0x249] sm:$0xff] }
 0x1fc   : > { %19295 = vmatmul.mubr.msk.f32.gmra.mrb[4].mxu0 %vm333_vm1, %v16227_v19  ;;  %v16666_v19 = vld [vmem:[%s21999_s18 + $0x245] sm:$0xff] }
 0x1fd   : > { %19297 = vmatprep.mubr.msk.f32.mxu0 %vm333_vm1, %v16228_v22  ;;  %v16667_v22 = vld [vmem:[%s21999_s18 + $0x24d] sm:$0xff] }
 0x1fe   : > { %19572 = vmatmul.mubr.msk.f32.gmra.mrb[38].mxu1 %vm333_vm1, %v23550_v31  ;;  %v16244_v31 = vld [vmem:[%s21999_s18 + $0x289] sm:$0xff] }
 0x1ff   : > { %19574 = vmatprep.mubr.msk.f32.mxu1 %vm333_vm1, %v23555_v39  ;;  %v26814_v39 = vld [vmem:[#allocation6_spill] sm:$0xff] }
 0x200   : > { %19298 = vmatmul.mubr.msk.f32.gmra.mrb[6].mxu0 %vm333_vm1, %v16229_v45  ;;  %v23832_v45 = vpop.f32.mrb[6].mxu1 }
 0x201   : > { %19300 = vmatprep.mubr.msk.f32.mxu0 %vm333_vm1, %v16230_v53  ;;  %v23834_v53 = vpop.f32.mrb[7].mxu1 }
 0x202   : > { %19575 = vmatmul.mubr.msk.f32.gmra.mrb[40].mxu1 %vm333_vm1, %v23564_v42  ;;  %v16252_v42 = vld [vmem:[%s21999_s18 + $0x309] sm:$0xff] }
 0x203   : > { %19577 = vmatprep.mubr.msk.f32.mxu1 %vm333_vm1, %v23569_v43  ;;  %v16652_v43 = vld [vmem:[%s21999_s18 + $0x165] sm:$0xff] }
 0x204   : > { %19301 = vmatmul.mubr.msk.f32.gmra.mrb[8].mxu0 %vm333_vm1, %v16231_v23  ;;  %v16668_v23 = vld [vmem:[%s21999_s18 + $0x265] sm:$0xff] }
 0x205   : > { %19303 = vmatprep.mubr.msk.f32.mxu0 %vm333_vm1, %v16232_v37  ;;  %v16669_v37 = vld [vmem:[%s21999_s18 + $0x26d] sm:$0xff] }
 0x206   : > { %19578 = vmatmul.mubr.msk.f32.gmra.mrb[42].mxu1 %vm333_vm1, %v23578_v47  ;;  %v16655_v47 = vld [vmem:[%s21999_s18 + $0x18d] sm:$0xff] }
 0x207   : > { %19580 = vmatprep.mubr.msk.f32.mxu1 %vm333_vm1, %v23583_v48  ;;  %v16656_v48 = vld [vmem:[%s21999_s18 + $0x1a5] sm:$0xff] }
 0x208   : > { %19304 = vmatmul.mubr.msk.f32.gmra.mrb[10].mxu0 %vm333_vm1, %v16233_v6  ;;  %v23840_v6 = vpop.f32.mrb[8].mxu1 }
 0x209   : > { %19306 = vmatprep.mubr.msk.f32.mxu0 %vm333_vm1, %v16234_v8  ;;  %v23842_v8 = vpop.f32.mrb[9].mxu1 }
 0x20a   : > { %19581 = vmatmul.mubr.msk.f32.gmra.mrb[44].mxu1 %vm333_vm1, %v21897_v51  ;;  %v16659_v51 = vld [vmem:[%s21999_s18 + $0x1cd] sm:$0xff] }
 0x20b   : > { %19583 = vmatprep.mubr.msk.f32.mxu1 %vm333_vm1, %v26812_v2  ;;  %v16660_v2 = vld [vmem:[%s21999_s18 + $0x1e5] sm:$0xff] }
 0x20c   : > { %19307 = vmatmul.mubr.msk.f32.gmra.mrb[12].mxu0 %vm333_vm1, %v16235_v10  ;;  %v16670_v10 = vld [vmem:[%s21999_s18 + $0x285] sm:$0xff] }
 0x20d   : > { %19309 = vmatprep.mubr.msk.f32.mxu0 %vm333_vm1, %v16236_v12  ;;  %v16671_v12 = vld [vmem:[%s21999_s18 + $0x28d] sm:$0xff] }
 0x20e   : > { %19584 = vmatmul.mubr.msk.f32.gmra.mrb[46].mxu1 %vm333_vm1, %v26813_v16  ;;  %v16662_v16 = vld [vmem:[%s21999_s18 + $0x205] sm:$0xff] }
 0x20f   : > { %19588 = vmatprep.mubr.msk.f32.mxu1 %vm333_vm1, %v22938_v61  ;;  %v16243_v61 = vld [vmem:[%s21999_s18 + $0x271] sm:$0xff] }
 0x210   : > { %19310 = vmatmul.mubr.msk.f32.gmra.mrb[14].mxu0 %vm333_vm1, %v16237_v18  ;;  %v23848_v18 = vpop.f32.mrb[10].mxu1 }
 0x211   : > { %19312 = vmatprep.mubr.msk.f32.mxu0 %vm333_vm1, %v16238_v20  ;;  %v16672_v20 = vld [vmem:[%s21999_s18 + $0x2a5] sm:$0xff] }
 0x212   : > { %19589 = vmatmul.mubr.msk.f32.vlgmr.msra.gmra.mrb[16].mxu1 %vm333_vm1, %v22945_v52  ;;  %v16245_v52 = vld [vmem:[%s21999_s18 + $0x291] sm:$0xff] }
 0x213   : > { %19591 = vmatprep.mubr.msk.f32.mxu1 %vm333_vm1, %v22952_v11  ;;  %v16246_v11 = vld [vmem:[%s21999_s18 + $0x2a9] sm:$0xff] }
 0x214   : > { %19313 = vmatmul.mubr.msk.f32.gmra.mrb[16].mxu0 %vm333_vm1, %v16239_v21  ;;  %v23851_v21 = vpop.f32.mrb[11].mxu1 }
 0x215   : > { %19315 = vmatprep.mubr.msk.f32.mxu0 %vm333_vm1, %v16240_v4  ;;  %v16673_v4 = vld [vmem:[%s21999_s18 + $0x2ad] sm:$0xff] }
 0x216   : > { %19592 = vmatmul.mubr.msk.f32.gmra.mrb[18].mxu1 %vm333_vm1, %v22959_v60  ;;  %v16247_v60 = vld [vmem:[%s21999_s18 + $0x2b1] sm:$0xff] }
 0x217   : > { %19594 = vmatprep.mubr.msk.f32.mxu1 %vm333_vm1, %v22966_v13  ;;  %v16248_v13 = vld [vmem:[%s21999_s18 + $0x2c9] sm:$0xff] }
 0x218   : > { %19316 = vmatmul.mubr.msk.f32.gmra.mrb[18].mxu0 %vm333_vm1, %v16241_v9  ;;  %v23856_v9 = vpop.f32.mrb[12].mxu1 }
 0x219   : > { %19318 = vmatprep.mubr.msk.f32.mxu0 %vm333_vm1, %v16242_v1  ;;  %v16674_v1 = vld [vmem:[%s21999_s18 + $0x2c5] sm:$0xff] }
 0x21a   : > { %19595 = vmatmul.mubr.msk.f32.gmra.mrb[20].mxu1 %vm333_vm1, %v26814_v39 }
 0x21b   : > { %19597 = vmatprep.mubr.msk.f32.mxu1 %vm333_vm1, %v22983_v55  ;;  %v26816_v55 = vld [vmem:[#allocation7_spill] sm:$0xff] }
 0x21c   : > { %19319 = vmatmul.mubr.msk.f32.gmra.mrb[20].mxu0 %vm333_vm1, %v16243_v61  ;;  %v23859_v61 = vpop.f32.mrb[13].mxu1 }
 0x21d   : > { %19321 = vmatprep.mubr.msk.f32.mxu0 %vm333_vm1, %v16244_v31  ;;  %v16675_v31 = vld [vmem:[%s21999_s18 + $0x2cd] sm:$0xff] }
 0x21e   : > { %19598 = vmatmul.mubr.msk.f32.gmra.mrb[22].mxu1 %vm333_vm1, %v26815_v40  ;;  %v16679_v40 = vld [vmem:[%s21999_s18 + $0x30d] sm:$0xff] }
 0x21f   : > { %19600 = vmatprep.mubr.msk.f32.mxu1 %vm333_vm1, %v23000_v7  ;;  %v26817_v7 = vld [vmem:[#allocation9_spill] sm:$0xff] }
 0x220   : > { %19322 = vmatmul.mubr.msk.f32.gmra.mrb[22].mxu0 %vm333_vm1, %v16245_v52  ;;  %v23864_v52 = vpop.f32.mrb[14].mxu1 }
 0x221   : > { %19324 = vmatprep.mubr.msk.f32.mxu0 %vm333_vm1, %v16246_v11  ;;  %v16676_v11 = vld [vmem:[%s21999_s18 + $0x2e5] sm:$0xff]  ;;  %v23867_v39 = vpop.f32.mrb[15].mxu1 }
 0x222   : > { %19601 = vmatmul.mubr.msk.f32.gmra.mrb[24].mxu1 %vm333_vm1, %v23007_v58  ;;  %v16253_v58 = vld [vmem:[%s21999_s18 + $0x311] sm:$0xff] }
 0x223   : > { %19603 = vmatprep.mubr.msk.f32.mxu1 %vm333_vm1, %v23019_v56  ;;  %v26818_v56 = vld [vmem:[#allocation10_spill] sm:$0xff] }
 0x224   : > { %19325 = vmatmul.mubr.msk.f32.gmra.mrb[24].mxu0 %vm333_vm1, %v16247_v60  ;;  %v16677_v60 = vld [vmem:[%s21999_s18 + $0x2ed] sm:$0xff] }
 0x225   : > { %19327 = vmatprep.mubr.msk.f32.mxu0 %vm333_vm1, %v16248_v13  ;;  %v16678_v13 = vld [vmem:[%s21999_s18 + $0x305] sm:$0xff] }
 0x226   : > { %19604 = vmatmul.mubr.msk.f32.gmra.mrb[26].mxu1 %vm333_vm1, %v23026_v62  ;;  %v7375_v62 = vld [vmem:[#allocation2 + $0xa8] sm:$0xff] }
 0x227   : > { %19606 = vmatprep.mubr.msk.f32.mxu1 %vm333_vm1, %v23037_v24  ;;  %v16612_v24 = vld [vmem:[%s21999_s18 + $0x2ab] sm:$0xff] }
 0x228   : > { %19328 = vmatmul.mubr.msk.f32.gmra.mrb[26].mxu0 %vm333_vm1, %v16249_v41  ;;  %v23878_v41 = vld [vmem:[%s26599_s3 + $0x8] sm:$0xf] }
 0x229   : > { %19330 = vmatprep.mubr.msk.f32.mxu0 %vm333_vm1, %v26816_v55  ;;  %v16680_v55 = vld [vmem:[%s21999_s18 + $0x325] sm:$0xff] }
 0x22a   : > { %19607 = vmatmul.mubr.msk.f32.gmra.mrb[28].mxu1 %vm333_vm1, %v23044_v25  ;;  %v7376_v25 = vld [vmem:[#allocation2 + $0xb0] sm:$0xff] }
 0x22b   : > { %19609 = vmatprep.mubr.msk.f32.mxu1 %vm333_vm1, %v23051_v26  ;;  %v16613_v26 = vld [vmem:[%s21999_s18 + $0x2b3] sm:$0xff] }
 0x22c   : > { %19331 = vmatmul.mubr.msk.f32.gmra.mrb[28].mxu0 %vm333_vm1, %v26817_v7  ;;  %v16682_v7 = vld [vmem:[%s21999_s18 + $0x345] sm:$0xff] }
 0x22d   : > { %19333 = vmatprep.mubr.msk.f32.mxu0 %vm333_vm1, %v16252_v42  ;;  %v16681_v42 = vld [vmem:[%s21999_s18 + $0x32d] sm:$0xff] }
 0x22e   : > { %19610 = vmatmul.mubr.msk.f32.gmra.mrb[30].mxu1 %vm333_vm1, %v23058_v27  ;;  %v7377_v27 = vld [vmem:[#allocation2 + $0xc8] sm:$0xff] }
 0x22f   : > { %19612 = vmatprep.mubr.msk.f32.mxu1 %vm333_vm1, %v23065_v28  ;;  %v16614_v28 = vld [vmem:[%s21999_s18 + $0x2cb] sm:$0xff] }
 0x230   : > { %19334 = vmatmul.mubr.msk.f32.gmra.mrb[30].mxu0 %vm333_vm1, %v16253_v58  ;;  %v16683_v58 = vld [vmem:[%s21999_s18 + $0x34d] sm:$0xff] }
 0x231   : > { %19788 = vmatprep.mubr.msk.f32.mxu0 %vm333_vm1, %v7375_v62  ;;  %v16750_v62 = vld [vmem:[%s26599_s3 + $0x1c] sm:$0xf] }
 0x232   : > { %19613 = vmatmul.mubr.msk.f32.gmra.mrb[32].mxu1 %vm333_vm1, %v23072_v29  ;;  %v7378_v29 = vld [vmem:[#allocation2 + $0xd0] sm:$0xff] }
 0x233   : > { %19615 = vmatprep.mubr.msk.f32.mxu1 %vm333_vm1, %v23079_v30  ;;  %v16615_v30 = vld [vmem:[%s21999_s18 + $0x2d3] sm:$0xff] }
 0x234   : > { %19789 = vmatmul.mubr.msk.f32.vlgmr.msra.gmra.mrb[32].mxu0 %vm333_vm1, %v7376_v25  ;;  %v17471_v25 = vld [vmem:[%s21999_s18 + $0x188] sm:$0xff] }
 0x235   : > { %19791 = vmatprep.mubr.msk.f32.mxu0 %vm333_vm1, %v7377_v27  ;;  %v17473_v27 = vld [vmem:[%s21999_s18 + $0x1a8] sm:$0xff] }
 0x236   : > { %19616 = vmatmul.mubr.msk.f32.gmra.mrb[34].mxu1 %vm333_vm1, %v26818_v56  ;;  %v17469_v56 = vld [vmem:[%s21999_s18 + $0x168] sm:$0xff] }
 0x237   : > { %19618 = vmatprep.mubr.msk.f32.mxu1 %vm333_vm1, %v23093_v32  ;;  %v7374_v32 = vld [vmem:[%s26599_s3] sm:$0xf] }
 0x238   : > { %19792 = vmatmul.mubr.msk.f32.gmra.mrb[34].mxu0 %vm333_vm1, %v7378_v29  ;;  %19836 = vmatprep.subr.msk.mxu0 %vm626_vm0, %v7374_v32  ;;  %v17475_v29 = vld [vmem:[%s21999_s18 + $0x1c8] sm:$0xff] }
 0x239   : > { %19837 = vmatpush3.msk.msra.mxu0 %vm626_vm0, %v7374_v32  ;;  %v17477_v32 = vld [vmem:[%s21999_s18 + $0x1e8] sm:$0xff] }
 0x23a   : > { %19619 = vmatmul.mubr.msk.f32.gmra.mrb[36].mxu1 %vm333_vm1, %v23100_v33  ;;  %v7379_v33 = vld [vmem:[#allocation2 + $0xe8] sm:$0xff]  ;;  %19886 = vmatprep.subr.msk.mxu0 %vm626_vm0, %v23878_v41 }
 0x23b   : > { %19621 = vmatprep.mubr.msk.f32.mxu1 %vm333_vm1, %v23107_v34  ;;  %19794 = vmatprep.mubr.msk.f32.mxu0 %vm333_vm1, %v7379_v33  ;;  %v16616_v34 = vld [vmem:[%s21999_s18 + $0x2eb] sm:$0xff] }
 0x23c   : > { %v17478_v33 = vld [vmem:[%s21999_s18 + $0x1f0] sm:$0xff] }
 0x23e   : > { %19622 = vmatmul.mubr.msk.f32.gmra.mrb[38].mxu1 %vm333_vm1, %v23114_v35  ;;  %v7380_v35 = vld [vmem:[#allocation2 + $0xf0] sm:$0xff] }
 0x23f   : > { %19624 = vmatprep.mubr.msk.f32.mxu1 %vm333_vm1, %v23121_v36  ;;  %19795 = vmatmul.mubr.msk.f32.gmra.mrb[36].mxu0 %vm333_vm1, %v7380_v35  ;;  %v16617_v36 = vld [vmem:[%s21999_s18 + $0x2f3] sm:$0xff] }
 0x240   : > { %v16729_v35 = vld [vmem:[%s21999_s18 + $0x210] sm:$0xff] }
 0x242   : > { %19625 = vmatmul.mubr.msk.f32.gmra.mrb[40].mxu1 %vm333_vm1, %v23128_v5  ;;  %v16684_v5 = vld [vmem:[%s26599_s3 + $0x18] sm:$0xf] }
 0x243   : > { %19627 = vmatprep.mubr.msk.f32.mxu1 %vm333_vm1, %v16612_v24  ;;  %19636 = vmatprep.subr.msk.mxu1 %vm626_vm0, %v16684_v5  ;;  %v17470_v24 = vld [vmem:[%s21999_s18 + $0x170] sm:$0xff] }
 0x244   : > { %19637 = vmatpush3.msk.msra.mxu1 %vm626_vm0, %v16684_v5  ;;  %v16731_v5 = vld [vmem:[%s21999_s18 + $0x230] sm:$0xff] }
 0x245   : > { %19686 = vmatprep.subr.msk.mxu1 %vm626_vm0, %v16750_v62 }
 0x246   : > { %19628 = vmatmul.mubr.msk.f32.gmra.mrb[42].mxu1 %vm333_vm1, %v16613_v26  ;;  %v17472_v26 = vld [vmem:[%s21999_s18 + $0x190] sm:$0xff] }
 0x247   : > { %19630 = vmatprep.mubr.msk.f32.mxu1 %vm333_vm1, %v16614_v28  ;;  %v17474_v28 = vld [vmem:[%s21999_s18 + $0x1b0] sm:$0xff] }
 0x24a   : > { %19631 = vmatmul.mubr.msk.f32.gmra.mrb[44].mxu1 %vm333_vm1, %v16615_v30  ;;  %v17476_v30 = vld [vmem:[%s21999_s18 + $0x1d0] sm:$0xff] }
 0x24b   : > { %19633 = vmatprep.mubr.msk.f32.mxu1 %vm333_vm1, %v16616_v34  ;;  %v16728_v34 = vld [vmem:[%s21999_s18 + $0x208] sm:$0xff] }
 0x24e   : > { %19634 = vmatmul.mubr.msk.f32.gmra.mrb[46].mxu1 %vm333_vm1, %v16617_v36  ;;  %v16730_v36 = vld [vmem:[%s21999_s18 + $0x228] sm:$0xff] }
 0x24f   : > { %19638 = vmatprep.mubr.msk.f32.mxu1 %vm333_vm1, %v16652_v43  ;;  %v16732_v43 = vld [vmem:[%s21999_s18 + $0x248] sm:$0xff] }
 0x252   : > { %19639 = vmatmul.mubr.msk.f32.vlgmr.msra.gmra.mrb[16].mxu1 %vm333_vm1, %v16653_v44  ;;  %v16733_v44 = vld [vmem:[%s21999_s18 + $0x250] sm:$0xff] }
 0x253   : > { %19641 = vmatprep.mubr.msk.f32.mxu1 %vm333_vm1, %v16654_v46  ;;  %19687 = vmatpush3.msk.msra.mxu1 %vm626_vm0, %v16750_v62  ;;  %v16734_v46 = vld [vmem:[%s21999_s18 + $0x268] sm:$0xff] }
 0x256   : > { %19642 = vmatmul.mubr.msk.f32.gmra.mrb[18].mxu1 %vm333_vm1, %v16655_v47  ;;  %v16735_v47 = vld [vmem:[%s21999_s18 + $0x270] sm:$0xff] }
 0x257   : > { %19644 = vmatprep.mubr.msk.f32.mxu1 %vm333_vm1, %v16656_v48  ;;  %v16736_v48 = vld [vmem:[%s21999_s18 + $0x288] sm:$0xff] }
 0x25a   : > { %19645 = vmatmul.mubr.msk.f32.gmra.mrb[20].mxu1 %vm333_vm1, %v16657_v49  ;;  %v16737_v49 = vld [vmem:[%s21999_s18 + $0x290] sm:$0xff] }
 0x25b   : > { %19647 = vmatprep.mubr.msk.f32.mxu1 %vm333_vm1, %v16658_v50  ;;  %v16738_v50 = vld [vmem:[%s21999_s18 + $0x2a8] sm:$0xff] }
 0x25e   : > { %19648 = vmatmul.mubr.msk.f32.gmra.mrb[22].mxu1 %vm333_vm1, %v16659_v51  ;;  %v16739_v51 = vld [vmem:[%s21999_s18 + $0x2b0] sm:$0xff] }
 0x25f   : > { %19650 = vmatprep.mubr.msk.f32.mxu1 %vm333_vm1, %v16660_v2  ;;  %v16740_v2 = vld [vmem:[%s21999_s18 + $0x2c8] sm:$0xff] }
 0x262   : > { %19651 = vmatmul.mubr.msk.f32.gmra.mrb[24].mxu1 %vm333_vm1, %v16661_v3  ;;  %v16741_v3 = vld [vmem:[%s21999_s18 + $0x2d0] sm:$0xff] }
 0x263   : > { %19653 = vmatprep.mubr.msk.f32.mxu1 %vm333_vm1, %v16662_v16  ;;  %v16742_v16 = vld [vmem:[%s21999_s18 + $0x2e8] sm:$0xff] }
 0x266   : > { %19654 = vmatmul.mubr.msk.f32.gmra.mrb[26].mxu1 %vm333_vm1, %v16663_v17  ;;  %v16743_v17 = vld [vmem:[%s21999_s18 + $0x2f0] sm:$0xff] }
 0x267   : > { %19656 = vmatprep.mubr.msk.f32.mxu1 %vm333_vm1, %v16664_v63  ;;  %v23950_v63 = vld [vmem:[%s26598_s2] ss:$0 sm:$0xff] }
 0x26a   : > { %19657 = vmatmul.mubr.msk.f32.gmra.mrb[28].mxu1 %vm333_vm1, %v16665_v54  ;;  %v16744_v54 = vld [vmem:[%s21999_s18 + $0x308] sm:$0xff] }
 0x26b   : > { %19659 = vmatprep.mubr.msk.f32.mxu1 %vm333_vm1, %v16666_v19 }
 0x26e   : > { %19660 = vmatmul.mubr.msk.f32.gmra.mrb[30].mxu1 %vm333_vm1, %v16667_v22  ;;  %v16745_v22 = vld [vmem:[%s21999_s18 + $0x310] sm:$0xff] }
 0x26f   : > { %19662 = vmatprep.mubr.msk.f32.mxu1 %vm333_vm1, %v16668_v23 }
 0x272   : > { %19663 = vmatmul.mubr.msk.f32.gmra.mrb[32].mxu1 %vm333_vm1, %v16669_v37 }
 0x273   : > { %19665 = vmatprep.mubr.msk.f32.mxu1 %vm333_vm1, %v16670_v10 }
 0x276   : > { %19666 = vmatmul.mubr.msk.f32.gmra.mrb[34].mxu1 %vm333_vm1, %v16671_v12 }
 0x277   : > { %19668 = vmatprep.mubr.msk.f32.mxu1 %vm333_vm1, %v16672_v20  ;;  %v16746_v20 = vld [vmem:[%s21999_s18 + $0x328] sm:$0xff] }
 0x27a   : > { %19669 = vmatmul.mubr.msk.f32.gmra.mrb[36].mxu1 %vm333_vm1, %v16673_v4  ;;  %v16747_v4 = vld [vmem:[%s21999_s18 + $0x330] sm:$0xff] }
 0x27b   : > { %19671 = vmatprep.mubr.msk.f32.mxu1 %vm333_vm1, %v16674_v1 }
 0x27e   : > { %19672 = vmatmul.mubr.msk.f32.gmra.mrb[38].mxu1 %vm333_vm1, %v16675_v31 }
 0x27f   : > { %19674 = vmatprep.mubr.msk.f32.mxu1 %vm333_vm1, %v16676_v11 }
 0x282   : > { %19675 = vmatmul.mubr.msk.f32.gmra.mrb[40].mxu1 %vm333_vm1, %v16677_v60  ;;  %v16748_v60 = vld [vmem:[%s21999_s18 + $0x348] sm:$0xff] }
 0x283   : > { %19677 = vmatprep.mubr.msk.f32.mxu1 %vm333_vm1, %v16678_v13 }
 0x286   : > { %19678 = vmatmul.mubr.msk.f32.gmra.mrb[42].mxu1 %vm333_vm1, %v16679_v40  ;;  %v16749_v40 = vld [vmem:[%s21999_s18 + $0x350] sm:$0xff] }
 0x287   : > { %19680 = vmatprep.mubr.msk.f32.mxu1 %vm333_vm1, %v16680_v55 }
 0x28a   : > { %19681 = vmatmul.mubr.msk.f32.gmra.mrb[44].mxu1 %vm333_vm1, %v16681_v42 }
 0x28b   : > { %19683 = vmatprep.mubr.msk.f32.mxu1 %vm333_vm1, %v16682_v7 }
 0x28e   : > { %19684 = vmatmul.mubr.msk.f32.gmra.mrb[46].mxu1 %vm333_vm1, %v16683_v58 }
 0x28f   : > { %19688 = vmatprep.mubr.msk.f32.mxu1 %vm333_vm1, %v17469_v56 }
 0x292   : > { %19689 = vmatmul.mubr.msk.f32.vlgmr.msra.gmra.mrb[16].mxu1 %vm333_vm1, %v17470_v24  ;;  %v16816_v24 = vld [vmem:[%s26599_s3 + $0x20] sm:$0xf] }
 0x293   : > { %19691 = vmatprep.mubr.msk.f32.mxu1 %vm333_vm1, %v17471_v25  ;;  %v16784_v25 = vld [vmem:[%s21999_s18 + $0x16b] sm:$0xff]  ;;  %19736 = vmatprep.subr.msk.mxu1 %vm626_vm0, %v16816_v24 }
 0x294   : > { %19737 = vmatpush3.msk.msra.mxu1 %vm626_vm0, %v16816_v24 }
 0x296   : > { %19692 = vmatmul.mubr.msk.f32.gmra.mrb[18].mxu1 %vm333_vm1, %v17472_v26 }
 0x297   : > { %19694 = vmatprep.mubr.msk.f32.mxu1 %vm333_vm1, %v17473_v27 }
 0x29a   : > { %19695 = vmatmul.mubr.msk.f32.gmra.mrb[20].mxu1 %vm333_vm1, %v17474_v28  ;;  %v16785_v28 = vld [vmem:[%s21999_s18 + $0x173] sm:$0xff] }
 0x29b   : > { %19697 = vmatprep.mubr.msk.f32.mxu1 %vm333_vm1, %v17475_v29 }
 0x29e   : > { %19698 = vmatmul.mubr.msk.f32.gmra.mrb[22].mxu1 %vm333_vm1, %v17476_v30 }
 0x29f   : > { %19700 = vmatprep.mubr.msk.f32.mxu1 %vm333_vm1, %v17477_v32 }
 0x2a2   : > { %19701 = vmatmul.mubr.msk.f32.gmra.mrb[24].mxu1 %vm333_vm1, %v17478_v33 }
 0x2a3   : > { %19703 = vmatprep.mubr.msk.f32.mxu1 %vm333_vm1, %v16728_v34  ;;  %v16786_v34 = vld [vmem:[%s21999_s18 + $0x18b] sm:$0xff] }
 0x2a6   : > { %19704 = vmatmul.mubr.msk.f32.gmra.mrb[26].mxu1 %vm333_vm1, %v16729_v35  ;;  %v16787_v35 = vld [vmem:[%s21999_s18 + $0x193] sm:$0xff] }
 0x2a7   : > { %19706 = vmatprep.mubr.msk.f32.mxu1 %vm333_vm1, %v16730_v36 }
 0x2aa   : > { %19707 = vmatmul.mubr.msk.f32.gmra.mrb[28].mxu1 %vm333_vm1, %v16731_v5 }
 0x2ab   : > { %19709 = vmatprep.mubr.msk.f32.mxu1 %vm333_vm1, %v16732_v43 }
 0x2ae   : > { %19710 = vmatmul.mubr.msk.f32.gmra.mrb[30].mxu1 %vm333_vm1, %v16733_v44 }
 0x2af   : > { %19712 = vmatprep.mubr.msk.f32.mxu1 %vm333_vm1, %v16734_v46 }
 0x2b2   : > { %19713 = vmatmul.mubr.msk.f32.gmra.mrb[32].mxu1 %vm333_vm1, %v16735_v47 }
 0x2b3   : > { %19715 = vmatprep.mubr.msk.f32.mxu1 %vm333_vm1, %v16736_v48  ;;  %v16788_v48 = vld [vmem:[%s21999_s18 + $0x1ab] sm:$0xff] }
 0x2b6   : > { %19716 = vmatmul.mubr.msk.f32.gmra.mrb[34].mxu1 %vm333_vm1, %v16737_v49  ;;  %v16789_v49 = vld [vmem:[%s21999_s18 + $0x1b3] sm:$0xff] }
 0x2b7   : > { %19718 = vmatprep.mubr.msk.f32.mxu1 %vm333_vm1, %v16738_v50 }
 0x2ba   : > { %19719 = vmatmul.mubr.msk.f32.gmra.mrb[36].mxu1 %vm333_vm1, %v16739_v51 }
 0x2bb   : > { %19721 = vmatprep.mubr.msk.f32.mxu1 %vm333_vm1, %v16740_v2 }
 0x2be   : > { %19722 = vmatmul.mubr.msk.f32.gmra.mrb[38].mxu1 %vm333_vm1, %v16741_v3 }
 0x2bf   : > { %19724 = vmatprep.mubr.msk.f32.mxu1 %vm333_vm1, %v16742_v16 }
 0x2c2   : > { %19725 = vmatmul.mubr.msk.f32.gmra.mrb[40].mxu1 %vm333_vm1, %v16743_v17 }
 0x2c3   : > { %19727 = vmatprep.mubr.msk.f32.mxu1 %vm333_vm1, %v16744_v54  ;;  %v16790_v54 = vld [vmem:[%s21999_s18 + $0x1cb] sm:$0xff] }
 0x2c6   : > { %19728 = vmatmul.mubr.msk.f32.gmra.mrb[42].mxu1 %vm333_vm1, %v16745_v22 }
 0x2c7   : > { %v19290_v19 = vpop.f32.mrb[0].mxu0  ;;  %19730 = vmatprep.mubr.msk.f32.mxu1 %vm333_vm1, %v16746_v20 }
 0x2c8   : > { %v23957_v23 = vadd.f32 %v19290_v19, %v23950_v63  ;;  %v3720_v37 = vpop.f32.mrb[1].mxu0  ;;  %v16791_v19 = vld [vmem:[%s21999_s18 + $0x1d3] sm:$0xff] }
 0x2c9   : > { %v23960_v10 = vadd.f32 %v23950_v63, %v3720_v37 }
 0x2ca   : > { %26819 = vst [vmem:[#allocation11_spill] sm:$0xff] %v23957_v23  ;;  %7310 = vst.msk [vmem:[#allocation2 + $0x110] sm:$0xff] %vm333_vm1, %v23957_v23  ;;  %19731 = vmatmul.mubr.msk.f32.gmra.mrb[44].mxu1 %vm333_vm1, %v16747_v4 }
 0x2cb   : > { %26820 = vst [vmem:[#allocation12_spill] sm:$0xff] %v23960_v10  ;;  %7309 = vst.msk [vmem:[#allocation2 + $0x108] sm:$0xff] %vm333_vm1, %v23960_v10  ;;  %v19293_v12 = vpop.f32.mrb[2].mxu0  ;;  %19733 = vmatprep.mubr.msk.f32.mxu1 %vm333_vm1, %v16748_v60  ;;  %v16792_v60 = vld [vmem:[%s21999_s18 + $0x1eb] sm:$0xff] }
 0x2cc   : > { %v23970_v1 = vadd.f32 %v19293_v12, %v23950_v63  ;;  %v3730_v31 = vpop.f32.mrb[3].mxu0 }
 0x2cd   : > { %v23974_v11 = vadd.f32 %v23950_v63, %v3730_v31 }
 0x2ce   : > { %26821 = vst [vmem:[#allocation13_spill] sm:$0xff] %v23970_v1  ;;  %7312 = vst.msk [vmem:[#allocation2 + $0x130] sm:$0xff] %vm333_vm1, %v23970_v1  ;;  %19734 = vmatmul.mubr.msk.f32.gmra.mrb[46].mxu1 %vm333_vm1, %v16749_v40 }
 0x2cf   : > { %26822 = vst [vmem:[#allocation14_spill] sm:$0xff] %v23974_v11  ;;  %7311 = vst.msk [vmem:[#allocation2 + $0x128] sm:$0xff] %vm333_vm1, %v23974_v11  ;;  %v19296_v13 = vpop.f32.mrb[4].mxu0  ;;  %19738 = vmatprep.mubr.msk.f32.mxu1 %vm333_vm1, %v16784_v25  ;;  %v16794_v25 = vld [vmem:[%s21999_s18 + $0x20b] sm:$0xff] }
 0x2d0   : > { %v23985_v55 = vadd.f32 %v19296_v13, %v23950_v63  ;;  %v3740_v42 = vpop.f32.mrb[5].mxu0  ;;  %v16793_v13 = vld [vmem:[%s21999_s18 + $0x1f3] sm:$0xff] }
 0x2d1   : > { %v23988_v7 = vadd.f32 %v23950_v63, %v3740_v42  ;;  %v7382_v62 = vld [vmem:[#allocation2 + $0x110] sm:$0xff] }
 0x2d2   : > { %26823 = vst [vmem:[#allocation15_spill] sm:$0xff] %v23985_v55  ;;  %7314 = vst.msk [vmem:[#allocation2 + $0x150] sm:$0xff] %vm333_vm1, %v23985_v55  ;;  %v7381_v58 = vld [vmem:[#allocation2 + $0x108] sm:$0xff]  ;;  %19739 = vmatmul.mubr.msk.f32.vlgmr.msra.gmra.mrb[16].mxu1 %vm333_vm1, %v16785_v28 }
 0x2d3   : > { %26824 = vst [vmem:[#allocation16_spill] sm:$0xff] %v23988_v7  ;;  %7313 = vst.msk [vmem:[#allocation2 + $0x148] sm:$0xff] %vm333_vm1, %v23988_v7  ;;  %v19299_v56 = vpop.f32.mrb[6].mxu0  ;;  %19797 = vmatprep.mubr.msk.f32.mxu0 %vm333_vm1, %v7381_v58  ;;  %19741 = vmatprep.mubr.msk.f32.mxu1 %vm333_vm1, %v16786_v34 }
 0x2d4   : > { %v24001_v26 = vadd.f32 %v19299_v56, %v23950_v63  ;;  %v3750_v27 = vpop.f32.mrb[7].mxu0  ;;  %19798 = vmatmul.mubr.msk.f32.gmra.mrb[38].mxu0 %vm333_vm1, %v7382_v62 }
 0x2d5   : > { %v24007_v29 = vadd.f32 %v23950_v63, %v3750_v27  ;;  %v7384_v33 = vld [vmem:[#allocation2 + $0x130] sm:$0xff] }
 0x2d6   : > { %26825 = vst [vmem:[#allocation17_spill] sm:$0xff] %v24001_v26  ;;  %7316 = vst.msk [vmem:[#allocation2 + $0x170] sm:$0xff] %vm333_vm1, %v24001_v26  ;;  %v7383_v30 = vld [vmem:[#allocation2 + $0x128] sm:$0xff]  ;;  %19742 = vmatmul.mubr.msk.f32.gmra.mrb[18].mxu1 %vm333_vm1, %v16787_v35  ;;  %v16795_v27 = vld [vmem:[%s21999_s18 + $0x213] sm:$0xff] }
 0x2d7   : > { %26826 = vst [vmem:[#allocation18_spill] sm:$0xff] %v24007_v29  ;;  %7315 = vst.msk [vmem:[#allocation2 + $0x168] sm:$0xff] %vm333_vm1, %v24007_v29  ;;  %v19302_v32 = vpop.f32.mrb[8].mxu0  ;;  %19800 = vmatprep.mubr.msk.f32.mxu0 %vm333_vm1, %v7383_v30  ;;  %19744 = vmatprep.mubr.msk.f32.mxu1 %vm333_vm1, %v16788_v48 }
 0x2d8   : > { %v24020_v36 = vadd.f32 %v19302_v32, %v23950_v63  ;;  %v3760_v5 = vpop.f32.mrb[9].mxu0  ;;  %19801 = vmatmul.mubr.msk.f32.gmra.mrb[40].mxu0 %vm333_vm1, %v7384_v33 }
 0x2d9   : > { %v24025_v43 = vadd.f32 %v23950_v63, %v3760_v5  ;;  %v7386_v47 = vld [vmem:[#allocation2 + $0x150] sm:$0xff] }
 0x2da   : > { %26827 = vst [vmem:[#allocation19_spill] sm:$0xff] %v24020_v36  ;;  %7318 = vst.msk [vmem:[#allocation2 + $0x190] sm:$0xff] %vm333_vm1, %v24020_v36  ;;  %v7385_v44 = vld [vmem:[#allocation2 + $0x148] sm:$0xff]  ;;  %19745 = vmatmul.mubr.msk.f32.gmra.mrb[20].mxu1 %vm333_vm1, %v16789_v49 }
 0x2db   : > { %26828 = vst [vmem:[#allocation20_spill] sm:$0xff] %v24025_v43  ;;  %7317 = vst.msk [vmem:[#allocation2 + $0x188] sm:$0xff] %vm333_vm1, %v24025_v43  ;;  %v19305_v46 = vpop.f32.mrb[10].mxu0  ;;  %19803 = vmatprep.mubr.msk.f32.mxu0 %vm333_vm1, %v7385_v44  ;;  %19747 = vmatprep.mubr.msk.f32.mxu1 %vm333_vm1, %v16790_v54  ;;  %v16796_v44 = vld [vmem:[%s21999_s18 + $0x22b] sm:$0xff] }
 0x2dc   : > { %v24036_v50 = vadd.f32 %v19305_v46, %v23950_v63  ;;  %v3770_v51 = vpop.f32.mrb[11].mxu0  ;;  %19804 = vmatmul.mubr.msk.f32.gmra.mrb[42].mxu0 %vm333_vm1, %v7386_v47  ;;  %v16797_v46 = vld [vmem:[%s21999_s18 + $0x233] sm:$0xff] }
 0x2dd   : > { %v24041_v2 = vadd.f32 %v23950_v63, %v3770_v51  ;;  %v7388_v17 = vld [vmem:[#allocation2 + $0x170] sm:$0xff] }
 0x2de   : > { %26829 = vst [vmem:[#allocation21_spill] sm:$0xff] %v24036_v50  ;;  %7320 = vst.msk [vmem:[#allocation2 + $0x1b0] sm:$0xff] %vm333_vm1, %v24036_v50  ;;  %v7387_v3 = vld [vmem:[#allocation2 + $0x168] sm:$0xff]  ;;  %19748 = vmatmul.mubr.msk.f32.gmra.mrb[22].mxu1 %vm333_vm1, %v16791_v19 }
 0x2df   : > { %26830 = vst [vmem:[#allocation22_spill] sm:$0xff] %v24041_v2  ;;  %7319 = vst.msk [vmem:[#allocation2 + $0x1a8] sm:$0xff] %vm333_vm1, %v24041_v2  ;;  %v19308_v16 = vpop.f32.mrb[12].mxu0  ;;  %19806 = vmatprep.mubr.msk.f32.mxu0 %vm333_vm1, %v7387_v3  ;;  %19750 = vmatprep.mubr.msk.f32.mxu1 %vm333_vm1, %v16792_v60  ;;  %v16801_v60 = vld [vmem:[%s21999_s18 + $0x273] sm:$0xff] }
 0x2e0   : > { %v24052_v22 = vadd.f32 %v19308_v16, %v23950_v63  ;;  %v3780_v37 = vpop.f32.mrb[13].mxu0  ;;  %19807 = vmatmul.mubr.msk.f32.gmra.mrb[44].mxu0 %vm333_vm1, %v7388_v17  ;;  %v16798_v17 = vld [vmem:[%s21999_s18 + $0x24b] sm:$0xff] }
 0x2e1   : > { %v24057_v12 = vadd.f32 %v23950_v63, %v3780_v37  ;;  %v7390_v31 = vld [vmem:[#allocation2 + $0x190] sm:$0xff] }
 0x2e2   : > { %26831 = vst [vmem:[#allocation23_spill] sm:$0xff] %v24052_v22  ;;  %7322 = vst.msk [vmem:[#allocation2 + $0x1d0] sm:$0xff] %vm333_vm1, %v24052_v22  ;;  %v7389_v20 = vld [vmem:[#allocation2 + $0x188] sm:$0xff]  ;;  %19751 = vmatmul.mubr.msk.f32.gmra.mrb[24].mxu1 %vm333_vm1, %v16793_v13 }
 0x2e3   : > { %26832 = vst [vmem:[#allocation24_spill] sm:$0xff] %v24057_v12  ;;  %7321 = vst.msk [vmem:[#allocation2 + $0x1c8] sm:$0xff] %vm333_vm1, %v24057_v12  ;;  %v19311_v4 = vpop.f32.mrb[14].mxu0  ;;  %19809 = vmatprep.mubr.msk.f32.mxu0 %vm333_vm1, %v7389_v20  ;;  %19753 = vmatprep.mubr.msk.f32.mxu1 %vm333_vm1, %v16794_v25  ;;  %v24448_v12 = vld [vmem:[#allocation2 + $0x193] sm:$0xff] }
 0x2e4   : > { %v24068_v40 = vadd.f32 %v19311_v4, %v23950_v63  ;;  %v3790_v42 = vpop.f32.mrb[15].mxu0  ;;  %19810 = vmatmul.mubr.msk.f32.gmra.mrb[46].mxu0 %vm333_vm1, %v7390_v31  ;;  %v16800_v31 = vld [vmem:[%s21999_s18 + $0x26b] sm:$0xff] }
 0x2e5   : > { %v24073_v58 = vadd.f32 %v23950_v63, %v3790_v42  ;;  %v7392_v24 = vld [vmem:[#allocation2 + $0x1b0] sm:$0xff] }
 0x2e6   : > { %26833 = vst [vmem:[#allocation25_spill] sm:$0xff] %v24068_v40  ;;  %7324 = vst.msk [vmem:[#allocation2 + $0x1f0] sm:$0xff] %vm333_vm1, %v24068_v40  ;;  %v7391_v56 = vld [vmem:[#allocation2 + $0x1a8] sm:$0xff]  ;;  %19754 = vmatmul.mubr.msk.f32.gmra.mrb[26].mxu1 %vm333_vm1, %v16795_v27  ;;  %v24456_v2 = vld [vmem:[#allocation2 + $0x1b3] sm:$0xff] }
 0x2e7   : > { %26834 = vst [vmem:[#allocation26_spill] sm:$0xff] %v24073_v58  ;;  %7323 = vst.msk [vmem:[#allocation2 + $0x1e8] sm:$0xff] %vm333_vm1, %v24073_v58  ;;  %v19314_v62 = vpop.f32.mrb[16].mxu0  ;;  %19812 = vmatprep.mubr.msk.f32.mxu0 %vm333_vm1, %v7391_v56  ;;  %19756 = vmatprep.mubr.msk.f32.mxu1 %vm333_vm1, %v16796_v44  ;;  %v16802_v27 = vld [vmem:[%s21999_s18 + $0x28b] sm:$0xff]  ;;  %v24440_v58 = vld [vmem:[#allocation2 + $0x173] sm:$0xff] }
 0x2e8   : > { %v20838_v28 = vadd.f32 %v19314_v62, %v23808_v14  ;;  %v3800_v30 = vpop.f32.mrb[17].mxu0  ;;  %19813 = vmatmul.mubr.msk.f32.gmra.mrb[48].mxu0 %vm333_vm1, %v7392_v24  ;;  %v24444_v40 = vld [vmem:[#allocation2 + $0x18b] sm:$0xff] }
 0x2e9   : > { %v20839_v32 = vadd.f32 %v3800_v30, %v23810_v15  ;;  %v24098_v14 = vld [vmem:[#allocation2 + $0x1d0] sm:$0xff] }
 0x2ea   : > { %v24088_v33 = vadd.f32 %v20838_v28, %v23950_v63  ;;  %v24090_v34 = vld [vmem:[#allocation2 + $0x1c8] sm:$0xff]  ;;  %19757 = vmatmul.mubr.msk.f32.gmra.mrb[28].mxu1 %vm333_vm1, %v16797_v46  ;;  %v24464_v43 = vld [vmem:[#allocation2 + $0x1d3] sm:$0xff] }
 0x2eb   : > { %v24094_v35 = vadd.f32 %v20839_v32, %v23950_v63  ;;  %v19317_v5 = vpop.f32.mrb[18].mxu0  ;;  %19815 = vmatprep.mubr.msk.f32.mxu0 %vm333_vm1, %v24090_v34  ;;  %19759 = vmatprep.mubr.msk.f32.mxu1 %vm333_vm1, %v16798_v17  ;;  %v24452_v22 = vld [vmem:[#allocation2 + $0x1ab] sm:$0xff] }
 0x2ec   : > { %26835 = vst [vmem:[#allocation27_spill] sm:$0xff] %v24088_v33  ;;  %7326 = vst.msk [vmem:[#allocation2 + $0x210] sm:$0xff] %vm333_vm1, %v24088_v33  ;;  %v20840_v15 = vadd.f32 %v19317_v5, %v23816_v38  ;;  %v3810_v47 = vpop.f32.mrb[19].mxu0  ;;  %19816 = vmatmul.mubr.msk.f32.gmra.mrb[50].mxu0 %vm333_vm1, %v24098_v14  ;;  %v24412_v33 = vld [vmem:[#allocation2 + $0x10b] sm:$0xff] }
 0x2ed   : > { %26836 = vst [vmem:[#allocation29_spill] sm:$0xff] %v24094_v35  ;;  %7325 = vst.msk [vmem:[#allocation2 + $0x208] sm:$0xff] %vm333_vm1, %v24094_v35  ;;  %v20841_v48 = vadd.f32 %v3810_v47, %v23818_v59  ;;  %v24122_v16 = vld [vmem:[#allocation2 + $0x1f0] sm:$0xff] }
 0x2ee   : > { %v24112_v49 = vadd.f32 %v20840_v15, %v23950_v63  ;;  %v24114_v51 = vld [vmem:[#allocation2 + $0x1e8] sm:$0xff]  ;;  %v16799_v59 = vld [vmem:[%s21999_s18 + $0x253] sm:$0xff] }
 0x2ef   : > { %v24118_v38 = vadd.f32 %v20841_v48, %v23950_v63  ;;  %v19320_v3 = vpop.f32.mrb[20].mxu0  ;;  %19818 = vmatprep.mubr.msk.f32.mxu0 %vm333_vm1, %v24114_v51  ;;  %19760 = vmatmul.mubr.msk.f32.gmra.mrb[30].mxu1 %vm333_vm1, %v16799_v59  ;;  %v16804_v47 = vld [vmem:[%s21999_s18 + $0x2ab] sm:$0xff]  ;;  %v24472_v29 = vld [vmem:[#allocation2 + $0x1f3] sm:$0xff] }
 0x2f0   : > { %26837 = vst [vmem:[#allocation31_spill] sm:$0xff] %v24112_v49  ;;  %7328 = vst.msk [vmem:[#allocation2 + $0x230] sm:$0xff] %vm333_vm1, %v24112_v49  ;;  %v20842_v54 = vadd.f32 %v19320_v3, %v23824_v0  ;;  %v3820_v19 = vpop.f32.mrb[21].mxu0  ;;  %19819 = vmatmul.mubr.msk.f32.gmra.mrb[52].mxu0 %vm333_vm1, %v24122_v16  ;;  %19762 = vmatprep.mubr.msk.f32.mxu1 %vm333_vm1, %v16800_v31  ;;  %v8059_v49 = vld [vmem:[#allocation2 + $0xd3] sm:$0xff]  ;;  %v8060_v35 = vld [vmem:[#allocation2 + $0xeb] sm:$0xff] }
 0x2f1   : > { %26838 = vst [vmem:[#allocation33_spill] sm:$0xff] %v24118_v38  ;;  %7327 = vst.msk [vmem:[#allocation2 + $0x228] sm:$0xff] %vm333_vm1, %v24118_v38  ;;  %v20843_v37 = vadd.f32 %v3820_v19, %v23826_v57  ;;  %v24401_v38 = vld [vmem:[%s26599_s3 + $0x10] sm:$0xf] }
 0x2f2   : > { %v24136_v20 = vadd.f32 %v20842_v54, %v23950_v63  ;;  %v24460_v50 = vld [vmem:[#allocation2 + $0x1cb] sm:$0xff] }
 0x2f3   : > { %v24140_v4 = vadd.f32 %v20843_v37, %v23950_v63  ;;  %v19323_v0 = vpop.f32.mrb[22].mxu0  ;;  %v24155_v62 = vld [vmem:[#allocation2 + $0x210] sm:$0xff]  ;;  %19763 = vmatmul.mubr.msk.f32.gmra.mrb[32].mxu1 %vm333_vm1, %v16801_v60 }
 0x2f4   : > { %26839 = vst [vmem:[#allocation34_spill] sm:$0xff] %v24136_v20  ;;  %7330 = vst.msk [vmem:[#allocation2 + $0x250] sm:$0xff] %vm333_vm1, %v24136_v20  ;;  %v20844_v13 = vadd.f32 %v19323_v0, %v23832_v45  ;;  %v3830_v42 = vpop.f32.mrb[23].mxu0  ;;  %v24147_v57 = vld [vmem:[#allocation2 + $0x208] sm:$0xff]  ;;  %19765 = vmatprep.mubr.msk.f32.mxu1 %vm333_vm1, %v16802_v27  ;;  %v24480_v7 = vld [vmem:[#allocation2 + $0x213] sm:$0xff] }
 0x2f5   : > { %26840 = vst [vmem:[#allocation3_spill] sm:$0xff] %v24140_v4  ;;  %7329 = vst.msk [vmem:[#allocation2 + $0x248] sm:$0xff] %vm333_vm1, %v24140_v4  ;;  %v20845_v56 = vadd.f32 %v3830_v42, %v23834_v53  ;;  %19821 = vmatprep.mubr.msk.f32.mxu0 %vm333_vm1, %v24147_v57  ;;  %v16803_v53 = vld [vmem:[%s21999_s18 + $0x293] sm:$0xff]  ;;  %v16806_v0 = vld [vmem:[%s21999_s18 + $0x2cb] sm:$0xff] }
 0x2f6   : > { %v24158_v24 = vadd.f32 %v20844_v13, %v23950_v63  ;;  %19822 = vmatmul.mubr.msk.f32.gmra.mrb[54].mxu0 %vm333_vm1, %v24155_v62  ;;  %v8057_v4 = vld [vmem:[#allocation2 + $0xb3] sm:$0xff]  ;;  %v8058_v20 = vld [vmem:[#allocation2 + $0xcb] sm:$0xff] }
 0x2f7   : > { %v24164_v45 = vadd.f32 %v20845_v56, %v23950_v63  ;;  %v19326_v25 = vpop.f32.mrb[24].mxu0  ;;  %v24179_v44 = vld [vmem:[#allocation2 + $0x230] sm:$0xff]  ;;  %19766 = vmatmul.mubr.msk.f32.gmra.mrb[34].mxu1 %vm333_vm1, %v16803_v53 }
 0x2f8   : > { %26841 = vst [vmem:[#allocation4_spill] sm:$0xff] %v24158_v24  ;;  %7332 = vst.msk [vmem:[#allocation2 + $0x270] sm:$0xff] %vm333_vm1, %v24158_v24  ;;  %v20846_v28 = vadd.f32 %v19326_v25, %v23840_v6  ;;  %v3840_v30 = vpop.f32.mrb[25].mxu0  ;;  %v24171_v32 = vld [vmem:[#allocation2 + $0x228] sm:$0xff]  ;;  %19768 = vmatprep.mubr.msk.f32.mxu1 %vm333_vm1, %v16804_v47  ;;  %v24488_v11 = vld [vmem:[#allocation2 + $0x233] sm:$0xff] }
 0x2f9   : > { %26842 = vst [vmem:[#allocation32_spill] sm:$0xff] %v24164_v45  ;;  %7331 = vst.msk [vmem:[#allocation2 + $0x268] sm:$0xff] %vm333_vm1, %v24164_v45  ;;  %v20847_v5 = vadd.f32 %v3840_v30, %v23842_v8  ;;  %19824 = vmatprep.mubr.msk.f32.mxu0 %vm333_vm1, %v24171_v32  ;;  %v16805_v8 = vld [vmem:[%s21999_s18 + $0x2b3] sm:$0xff]  ;;  %v16808_v53 = vld [vmem:[%s21999_s18 + $0x2eb] sm:$0xff] }
 0x2fa   : > { %v24182_v46 = vadd.f32 %v20846_v28, %v23950_v63  ;;  %19825 = vmatmul.mubr.msk.f32.gmra.mrb[56].mxu0 %vm333_vm1, %v24179_v44  ;;  %v16809_v28 = vld [vmem:[%s21999_s18 + $0x2f3] sm:$0xff]  ;;  %v8056_v45 = vld [vmem:[#allocation2 + $0xab] sm:$0xff]  ;;  %26853 = vst [vmem:[#allocation37_spill] sm:$0xff] %v24488_v11 }
 0x2fb   : > { %v24188_v6 = vadd.f32 %v20847_v5, %v23950_v63  ;;  %v19329_v15 = vpop.f32.mrb[26].mxu0  ;;  %v24203_v54 = vld [vmem:[#allocation2 + $0x250] sm:$0xff]  ;;  %19769 = vmatmul.mubr.msk.f32.gmra.mrb[36].mxu1 %vm333_vm1, %v16805_v8 }
 0x2fc   : > { %26843 = vst [vmem:[#allocation5_spill] sm:$0xff] %v24182_v46  ;;  %7334 = vst.msk [vmem:[#allocation2 + $0x290] sm:$0xff] %vm333_vm1, %v24182_v46  ;;  %v20848_v48 = vadd.f32 %v19329_v15, %v23848_v18  ;;  %v3850_v3 = vpop.f32.mrb[27].mxu0  ;;  %v24195_v17 = vld [vmem:[#allocation2 + $0x248] sm:$0xff]  ;;  %19771 = vmatprep.mubr.msk.f32.mxu1 %vm333_vm1, %v16806_v0  ;;  %v24496_v10 = vld [vmem:[#allocation2 + $0x253] sm:$0xff] }
 0x2fd   : > { %26844 = vst [vmem:[#allocation28_spill] sm:$0xff] %v24188_v6  ;;  %7333 = vst.msk [vmem:[#allocation2 + $0x288] sm:$0xff] %vm333_vm1, %v24188_v6  ;;  %v20849_v59 = vadd.f32 %v3850_v3, %v23851_v21  ;;  %19827 = vmatprep.mubr.msk.f32.mxu0 %vm333_vm1, %v24195_v17  ;;  %v16807_v21 = vld [vmem:[%s21999_s18 + $0x2d3] sm:$0xff]  ;;  %v7342_v15 = vld [vmem:[#allocation2 + $0xa5] sm:$0xff] }
 0x2fe   : > { %v24206_v19 = vadd.f32 %v20848_v48, %v23950_v63  ;;  %19828 = vmatmul.mubr.msk.f32.gmra.mrb[58].mxu0 %vm333_vm1, %v24203_v54  ;;  %v16810_v3 = vld [vmem:[%s21999_s18 + $0x30b] sm:$0xff] }
 0x2ff   : > { %v24212_v18 = vadd.f32 %v20849_v59, %v23950_v63  ;;  %v19332_v37 = vpop.f32.mrb[28].mxu0  ;;  %v24227_v56 = vld [vmem:[#allocation2 + $0x270] sm:$0xff]  ;;  %19772 = vmatmul.mubr.msk.f32.gmra.mrb[38].mxu1 %vm333_vm1, %v16807_v21 }
 0x300   : > { %26845 = vst [vmem:[#allocation30_spill] sm:$0xff] %v24206_v19  ;;  %7336 = vst.msk [vmem:[#allocation2 + $0x2b0] sm:$0xff] %vm333_vm1, %v24206_v19  ;;  %v20850_v31 = vadd.f32 %v19332_v37, %v23856_v9  ;;  %v3860_v60 = vpop.f32.mrb[29].mxu0  ;;  %v24219_v13 = vld [vmem:[#allocation2 + $0x268] sm:$0xff]  ;;  %19774 = vmatprep.mubr.msk.f32.mxu1 %vm333_vm1, %v16808_v53  ;;  %v16811_v59 = vld [vmem:[%s21999_s18 + $0x313] sm:$0xff] }
 0x301   : > { %26846 = vst [vmem:[#allocation6_spill] sm:$0xff] %v24212_v18  ;;  %7335 = vst.msk [vmem:[#allocation2 + $0x2a8] sm:$0xff] %vm333_vm1, %v24212_v18  ;;  %v20851_v42 = vadd.f32 %v3860_v60, %v23859_v61  ;;  %19830 = vmatprep.mubr.msk.f32.mxu0 %vm333_vm1, %v24219_v13  ;;  %v7344_v37 = vld [vmem:[#allocation2 + $0xc5] sm:$0xff]  ;;  %v7345_v0 = vld [vmem:[#allocation2 + $0xcd] sm:$0xff] }
 0x302   : > { %v24230_v25 = vadd.f32 %v20850_v31, %v23950_v63  ;;  %19831 = vmatmul.mubr.msk.f32.gmra.mrb[60].mxu0 %vm333_vm1, %v24227_v56  ;;  %v16812_v21 = vld [vmem:[%s21999_s18 + $0x32b] sm:$0xff]  ;;  %v16813_v31 = vld [vmem:[%s21999_s18 + $0x333] sm:$0xff] }
 0x303   : > { %v24236_v9 = vadd.f32 %v20851_v42, %v23950_v63  ;;  %v19335_v27 = vpop.f32.mrb[30].mxu0  ;;  %v24251_v8 = vld [vmem:[#allocation2 + $0x290] sm:$0xff]  ;;  %19775 = vmatmul.mubr.msk.f32.gmra.mrb[40].mxu1 %vm333_vm1, %v16809_v28  ;;  %v7346_v60 = vld [vmem:[#allocation2 + $0xe5] sm:$0xff] }
 0x304   : > { %26847 = vst [vmem:[#allocation8_spill] sm:$0xff] %v24230_v25  ;;  %7338 = vst.msk [vmem:[#allocation2 + $0x2d0] sm:$0xff] %vm333_vm1, %v24230_v25  ;;  %v20852_v61 = vadd.f32 %v19335_v27, %v23864_v52  ;;  %v3870_v30 = vpop.f32.mrb[31].mxu0  ;;  %v24243_v5 = vld [vmem:[#allocation2 + $0x288] sm:$0xff]  ;;  %19777 = vmatprep.mubr.msk.f32.mxu1 %vm333_vm1, %v16810_v3 }
 0x305   : > { %26848 = vst [vmem:[#allocation7_spill] sm:$0xff] %v24236_v9  ;;  %7337 = vst.msk [vmem:[#allocation2 + $0x2c8] sm:$0xff] %vm333_vm1, %v24236_v9  ;;  %v20853_v47 = vadd.f32 %v3870_v30, %v23867_v39  ;;  %19833 = vmatprep.mubr.msk.f32.mxu0 %vm333_vm1, %v24243_v5  ;;  %v7343_v39 = vld [vmem:[#allocation2 + $0xad] sm:$0xff]  ;;  %v24292_v53 = vld [vmem:[#allocation2 + $0x105] sm:$0xff] }
 0x306   : > { %v24254_v48 = vadd.f32 %v20852_v61, %v23950_v63  ;;  %19834 = vmatmul.mubr.msk.f32.gmra.mrb[62].mxu0 %vm333_vm1, %v24251_v8  ;;  %v7347_v42 = vld [vmem:[#allocation2 + $0xed] sm:$0xff]  ;;  %v24301_v61 = vld [vmem:[#allocation2 + $0x125] sm:$0xff] }
 0x307   : > { %v24260_v52 = vadd.f32 %v20853_v47, %v23950_v63  ;;  %19838 = vmatprep.mubr.msk.f32.mxu0 %vm333_vm1, %v7342_v15  ;;  %v24273_v63 = vld [vmem:[%s26599_s3 + $0xc] sm:$0xf]  ;;  %19778 = vmatmul.mubr.msk.f32.gmra.mrb[42].mxu1 %vm333_vm1, %v16811_v59 }
 0x308   : > { %26849 = vst [vmem:[#allocation9_spill] sm:$0xff] %v24254_v48  ;;  %7340 = vst.msk [vmem:[#allocation2 + $0x2f0] sm:$0xff] %vm333_vm1, %v24254_v48  ;;  %19780 = vmatprep.mubr.msk.f32.mxu1 %vm333_vm1, %v16812_v21  ;;  %v16814_v27 = vld [vmem:[%s21999_s18 + $0x34b] sm:$0xff] }
 0x309   : > { %26850 = vst [vmem:[#allocation10_spill] sm:$0xff] %v24260_v52  ;;  %7339 = vst.msk [vmem:[#allocation2 + $0x2e8] sm:$0xff] %vm333_vm1, %v24260_v52  ;;  %v24297_v28 = vld [vmem:[#allocation2 + $0x10d] sm:$0xff]  ;;  %v24309_v15 = vld [vmem:[#allocation2 + $0x145] sm:$0xff] }
 0x30a   : > { %19839 = vmatmul.mubr.msk.f32.vlgmr.msra.gmra.mrb[32].mxu0 %vm333_vm1, %v7343_v39  ;;  %v24305_v30 = vld [vmem:[#allocation2 + $0x12d] sm:$0xff]  ;;  %v24317_v39 = vld [vmem:[#allocation2 + $0x165] sm:$0xff] }
 0x30b   : > { %19887 = vmatpush3.msk.msra.mxu0 %vm626_vm0, %v23878_v41  ;;  %19841 = vmatprep.mubr.msk.f32.mxu0 %vm333_vm1, %v7344_v37  ;;  %v16815_v41 = vld [vmem:[%s21999_s18 + $0x353] sm:$0xff]  ;;  %v24325_v59 = vld [vmem:[#allocation2 + $0x185] sm:$0xff] }
 0x30c   : > { %19936 = vmatprep.subr.msk.mxu0 %vm626_vm0, %v24273_v63  ;;  %19781 = vmatmul.mubr.msk.f32.gmra.mrb[44].mxu1 %vm333_vm1, %v16813_v31  ;;  %v24313_v47 = vld [vmem:[#allocation2 + $0x14d] sm:$0xff]  ;;  %v24341_v31 = vld [vmem:[#allocation2 + $0x1c5] sm:$0xff] }
 0x30d   : > { %19783 = vmatprep.mubr.msk.f32.mxu1 %vm333_vm1, %v16814_v27  ;;  %v24321_v3 = vld [vmem:[#allocation2 + $0x16d] sm:$0xff]  ;;  %v24365_v48 = vld [vmem:[#allocation2 + $0x225] sm:$0xff] }
 0x30e   : > { %19842 = vmatmul.mubr.msk.f32.gmra.mrb[34].mxu0 %vm333_vm1, %v7345_v0  ;;  %v24329_v37 = vld [vmem:[#allocation2 + $0x18d] sm:$0xff]  ;;  %v24333_v0 = vld [vmem:[#allocation2 + $0x1a5] sm:$0xff] }
 0x30f   : > { %19844 = vmatprep.mubr.msk.f32.mxu0 %vm333_vm1, %v7346_v60  ;;  %v24337_v21 = vld [vmem:[#allocation2 + $0x1ad] sm:$0xff]  ;;  %v24373_v25 = vld [vmem:[#allocation2 + $0x245] sm:$0xff] }
 0x310   : > { %19784 = vmatmul.mubr.msk.f32.gmra.mrb[46].mxu1 %vm333_vm1, %v16815_v41  ;;  %v24345_v60 = vld [vmem:[#allocation2 + $0x1cd] sm:$0xff]  ;;  %v24357_v41 = vld [vmem:[#allocation2 + $0x205] sm:$0xff] }
 0x311   : > { %v24353_v27 = vld [vmem:[#allocation2 + $0x1ed] sm:$0xff]  ;;  %v24381_v19 = vld [vmem:[#allocation2 + $0x265] sm:$0xff] }
 0x312   : > { %19845 = vmatmul.mubr.msk.f32.gmra.mrb[36].mxu0 %vm333_vm1, %v7347_v42  ;;  %v24349_v42 = vld [vmem:[#allocation2 + $0x1e5] sm:$0xff]  ;;  %v24361_v52 = vld [vmem:[#allocation2 + $0x20d] sm:$0xff] }
 0x313   : > { %19847 = vmatprep.mubr.msk.f32.mxu0 %vm333_vm1, %v24292_v53  ;;  %v24369_v9 = vld [vmem:[#allocation2 + $0x22d] sm:$0xff]  ;;  %v24389_v46 = vld [vmem:[#allocation2 + $0x285] sm:$0xff] }
 0x314   : > { %v24377_v18 = vld [vmem:[#allocation2 + $0x24d] sm:$0xff] }
 0x315   : > { %v24385_v6 = vld [vmem:[#allocation2 + $0x26d] sm:$0xff] }
 0x316   : > { %19848 = vmatmul.mubr.msk.f32.gmra.mrb[38].mxu0 %vm333_vm1, %v24297_v28  ;;  %v24393_v24 = vld [vmem:[#allocation2 + $0x28d] sm:$0xff] }
 0x317   : > { %19850 = vmatprep.mubr.msk.f32.mxu0 %vm333_vm1, %v24301_v61  ;;  %26851 = vst [vmem:[#allocation35_spill] sm:$0xff] %v24393_v24  ;;  %v24468_v36 = vld [vmem:[#allocation2 + $0x1eb] sm:$0xff] }
 0x318   : > { %v24476_v26 = vld [vmem:[#allocation2 + $0x20b] sm:$0xff] }
 0x319   : > { %v24484_v55 = vld [vmem:[#allocation2 + $0x22b] sm:$0xff] }
 0x31a   : > { %19851 = vmatmul.mubr.msk.f32.gmra.mrb[40].mxu0 %vm333_vm1, %v24305_v30  ;;  %26852 = vst [vmem:[#allocation36_spill] sm:$0xff] %v24484_v55  ;;  %v24492_v1 = vld [vmem:[#allocation2 + $0x24b] sm:$0xff] }
 0x31b   : > { %19853 = vmatprep.mubr.msk.f32.mxu0 %vm333_vm1, %v24309_v15  ;;  %26854 = vst [vmem:[#allocation38_spill] sm:$0xff] %v24492_v1  ;;  %v24500_v23 = vld [vmem:[#allocation2 + $0x26b] sm:$0xff] }
 0x31c   : > { %26855 = vst [vmem:[#allocation39_spill] sm:$0xff] %v24500_v23 }
 0x31e   : > { %19854 = vmatmul.mubr.msk.f32.gmra.mrb[42].mxu0 %vm333_vm1, %v24313_v47 }
 0x31f   : > { %19856 = vmatprep.mubr.msk.f32.mxu0 %vm333_vm1, %v24317_v39 }
 0x322   : > { %19857 = vmatmul.mubr.msk.f32.gmra.mrb[44].mxu0 %vm333_vm1, %v24321_v3 }
 0x323   : > { %19859 = vmatprep.mubr.msk.f32.mxu0 %vm333_vm1, %v24325_v59 }
 0x326   : > { %19860 = vmatmul.mubr.msk.f32.gmra.mrb[46].mxu0 %vm333_vm1, %v24329_v37 }
 0x327   : > { %19862 = vmatprep.mubr.msk.f32.mxu0 %vm333_vm1, %v24333_v0 }
 0x32a   : > { %19863 = vmatmul.mubr.msk.f32.gmra.mrb[48].mxu0 %vm333_vm1, %v24337_v21 }
 0x32b   : > { %19865 = vmatprep.mubr.msk.f32.mxu0 %vm333_vm1, %v24341_v31 }
 0x32e   : > { %19866 = vmatmul.mubr.msk.f32.gmra.mrb[50].mxu0 %vm333_vm1, %v24345_v60 }
 0x32f   : > { %19868 = vmatprep.mubr.msk.f32.mxu0 %vm333_vm1, %v24349_v42 }
 0x332   : > { %19869 = vmatmul.mubr.msk.f32.gmra.mrb[52].mxu0 %vm333_vm1, %v24353_v27 }
 0x333   : > { %19871 = vmatprep.mubr.msk.f32.mxu0 %vm333_vm1, %v24357_v41 }
 0x336   : > { %19872 = vmatmul.mubr.msk.f32.gmra.mrb[54].mxu0 %vm333_vm1, %v24361_v52 }
 0x337   : > { %19874 = vmatprep.mubr.msk.f32.mxu0 %vm333_vm1, %v24365_v48 }
 0x33a   : > { %19875 = vmatmul.mubr.msk.f32.gmra.mrb[56].mxu0 %vm333_vm1, %v24369_v9 }
 0x33b   : > { %19877 = vmatprep.mubr.msk.f32.mxu0 %vm333_vm1, %v24373_v25 }
 0x33e   : > { %19878 = vmatmul.mubr.msk.f32.gmra.mrb[58].mxu0 %vm333_vm1, %v24377_v18 }
 0x33f   : > { %19880 = vmatprep.mubr.msk.f32.mxu0 %vm333_vm1, %v24381_v19 }
 0x342   : > { %19881 = vmatmul.mubr.msk.f32.gmra.mrb[60].mxu0 %vm333_vm1, %v24385_v6 }
 0x343   : > { %19883 = vmatprep.mubr.msk.f32.mxu0 %vm333_vm1, %v24389_v46 }
 0x346   : > { %19884 = vmatmul.mubr.msk.f32.gmra.mrb[62].mxu0 %vm333_vm1, %v24393_v24 }
 0x347   : > { %19888 = vmatprep.mubr.msk.f32.mxu0 %vm333_vm1, %v8056_v45  ;;  %v8061_v45 = vld [vmem:[#allocation2 + $0xf3] sm:$0xff] }
 0x34a   : > { %19889 = vmatmul.mubr.msk.f32.vlgmr.msra.gmra.mrb[32].mxu0 %vm333_vm1, %v8057_v4  ;;  %v24416_v4 = vld [vmem:[#allocation2 + $0x113] sm:$0xff] }
 0x34b   : > { %19937 = vmatpush3.msk.msra.mxu0 %vm626_vm0, %v24273_v63  ;;  %19891 = vmatprep.mubr.msk.f32.mxu0 %vm333_vm1, %v8058_v20  ;;  %v24420_v20 = vld [vmem:[#allocation2 + $0x12b] sm:$0xff]  ;;  %v24432_v63 = vld [vmem:[#allocation2 + $0x153] sm:$0xff] }
 0x34c   : > { %19986 = vmatprep.subr.msk.mxu0 %vm626_vm0, %v24401_v38 }
 0x34e   : > { %19892 = vmatmul.mubr.msk.f32.gmra.mrb[34].mxu0 %vm333_vm1, %v8059_v49  ;;  %v24424_v49 = vld [vmem:[#allocation2 + $0x133] sm:$0xff] }
 0x34f   : > { %19894 = vmatprep.mubr.msk.f32.mxu0 %vm333_vm1, %v8060_v35  ;;  %v24428_v35 = vld [vmem:[#allocation2 + $0x14b] sm:$0xff] }
 0x352   : > { %19895 = vmatmul.mubr.msk.f32.gmra.mrb[36].mxu0 %vm333_vm1, %v8061_v45  ;;  %v24436_v45 = vld [vmem:[#allocation2 + $0x16b] sm:$0xff] }
 0x353   : > { %19897 = vmatprep.mubr.msk.f32.mxu0 %vm333_vm1, %v24412_v33 }
 0x356   : > { %19898 = vmatmul.mubr.msk.f32.gmra.mrb[38].mxu0 %vm333_vm1, %v24416_v4 }
 0x357   : > { %19900 = vmatprep.mubr.msk.f32.mxu0 %vm333_vm1, %v24420_v20 }
 0x35a   : > { %19901 = vmatmul.mubr.msk.f32.gmra.mrb[40].mxu0 %vm333_vm1, %v24424_v49 }
 0x35b   : > { %19903 = vmatprep.mubr.msk.f32.mxu0 %vm333_vm1, %v24428_v35 }
 0x35e   : > { %19904 = vmatmul.mubr.msk.f32.gmra.mrb[42].mxu0 %vm333_vm1, %v24432_v63 }
 0x35f   : > { %19906 = vmatprep.mubr.msk.f32.mxu0 %vm333_vm1, %v24436_v45 }
 0x362   : > { %19907 = vmatmul.mubr.msk.f32.gmra.mrb[44].mxu0 %vm333_vm1, %v24440_v58 }
 0x363   : > { %19909 = vmatprep.mubr.msk.f32.mxu0 %vm333_vm1, %v24444_v40 }
 0x366   : > { %19910 = vmatmul.mubr.msk.f32.gmra.mrb[46].mxu0 %vm333_vm1, %v24448_v12 }
 0x367   : > { %19912 = vmatprep.mubr.msk.f32.mxu0 %vm333_vm1, %v24452_v22 }
 0x36a   : > { %19913 = vmatmul.mubr.msk.f32.gmra.mrb[48].mxu0 %vm333_vm1, %v24456_v2 }
 0x36b   : > { %19915 = vmatprep.mubr.msk.f32.mxu0 %vm333_vm1, %v24460_v50 }
 0x36e   : > { %19916 = vmatmul.mubr.msk.f32.gmra.mrb[50].mxu0 %vm333_vm1, %v24464_v43 }
 0x36f   : > { %19918 = vmatprep.mubr.msk.f32.mxu0 %vm333_vm1, %v24468_v36 }
 0x372   : > { %19919 = vmatmul.mubr.msk.f32.gmra.mrb[52].mxu0 %vm333_vm1, %v24472_v29 }
 0x373   : > { %19921 = vmatprep.mubr.msk.f32.mxu0 %vm333_vm1, %v24476_v26 }
 0x376   : > { %19922 = vmatmul.mubr.msk.f32.gmra.mrb[54].mxu0 %vm333_vm1, %v24480_v7 }
 0x377   : > { %19924 = vmatprep.mubr.msk.f32.mxu0 %vm333_vm1, %v24484_v55  ;;  %v24504_v55 = vld [vmem:[#allocation2 + $0x273] sm:$0xff] }
 0x37a   : > { %19925 = vmatmul.mubr.msk.f32.gmra.mrb[56].mxu0 %vm333_vm1, %v24488_v11  ;;  %v24508_v11 = vld [vmem:[#allocation2 + $0x28b] sm:$0xff] }
 0x37b   : > { %19927 = vmatprep.mubr.msk.f32.mxu0 %vm333_vm1, %v24492_v1  ;;  %v24512_v1 = vld [vmem:[#allocation2 + $0x293] sm:$0xff] }
 0x37e   : > { %19928 = vmatmul.mubr.msk.f32.gmra.mrb[58].mxu0 %vm333_vm1, %v24496_v10 }
 0x37f   : > { %19930 = vmatprep.mubr.msk.f32.mxu0 %vm333_vm1, %v24500_v23  ;;  %v24521_v23 = vld [vmem:[%s26599_s3 + $0x14] sm:$0xf] }
 0x382   : > { %19931 = vmatmul.mubr.msk.f32.gmra.mrb[60].mxu0 %vm333_vm1, %v24504_v55 }
 0x383   : > { %19933 = vmatprep.mubr.msk.f32.mxu0 %vm333_vm1, %v24508_v11 }
 0x386   : > { %19934 = vmatmul.mubr.msk.f32.gmra.mrb[62].mxu0 %vm333_vm1, %v24512_v1 }
 0x387   : > { %19938 = vmatprep.mubr.msk.f32.mxu0 %vm333_vm1, %v24292_v53 }
 0x38a   : > { %19939 = vmatmul.mubr.msk.f32.vlgmr.msra.gmra.mrb[32].mxu0 %vm333_vm1, %v24297_v28 }
 0x38b   : > { %19987 = vmatpush3.msk.msra.mxu0 %vm626_vm0, %v24401_v38  ;;  %19941 = vmatprep.mubr.msk.f32.mxu0 %vm333_vm1, %v24301_v61 }
 0x38c   : > { %20036 = vmatprep.subr.msk.mxu0 %vm626_vm0, %v24521_v23 }
 0x38e   : > { %19942 = vmatmul.mubr.msk.f32.gmra.mrb[34].mxu0 %vm333_vm1, %v24305_v30 }
 0x38f   : > { %19944 = vmatprep.mubr.msk.f32.mxu0 %vm333_vm1, %v24309_v15 }
 0x392   : > { %19945 = vmatmul.mubr.msk.f32.gmra.mrb[36].mxu0 %vm333_vm1, %v24313_v47 }
 0x393   : > { %19947 = vmatprep.mubr.msk.f32.mxu0 %vm333_vm1, %v24317_v39 }
 0x396   : > { %19948 = vmatmul.mubr.msk.f32.gmra.mrb[38].mxu0 %vm333_vm1, %v24321_v3 }
 0x397   : > { %19950 = vmatprep.mubr.msk.f32.mxu0 %vm333_vm1, %v24325_v59 }
 0x39a   : > { %19951 = vmatmul.mubr.msk.f32.gmra.mrb[40].mxu0 %vm333_vm1, %v24329_v37 }
 0x39b   : > { %19953 = vmatprep.mubr.msk.f32.mxu0 %vm333_vm1, %v24333_v0 }
 0x39e   : > { %19954 = vmatmul.mubr.msk.f32.gmra.mrb[42].mxu0 %vm333_vm1, %v24337_v21 }
 0x39f   : > { %19956 = vmatprep.mubr.msk.f32.mxu0 %vm333_vm1, %v24341_v31 }
 0x3a2   : > { %19957 = vmatmul.mubr.msk.f32.gmra.mrb[44].mxu0 %vm333_vm1, %v24345_v60 }
 0x3a3   : > { %19959 = vmatprep.mubr.msk.f32.mxu0 %vm333_vm1, %v24349_v42 }
 0x3a5   : > { %v24559_v38 = vpop.f32.mrb[16].mxu1 }
 0x3a6   : > { %19960 = vmatmul.mubr.msk.f32.gmra.mrb[46].mxu0 %vm333_vm1, %v24353_v27  ;;  %26856 = vst [vmem:[#allocation40_spill] sm:$0xff] %v24559_v38  ;;  %v24563_v53 = vpop.f32.mrb[17].mxu1 }
 0x3a7   : > { %19962 = vmatprep.mubr.msk.f32.mxu0 %vm333_vm1, %v24357_v41  ;;  %26857 = vst [vmem:[#allocation41_spill] sm:$0xff] %v24563_v53  ;;  %v24613_v53 = vld [vmem:[#allocation2 + $0x2cd] sm:$0xff] }
 0x3a8   : > { %26871 = vst [vmem:[#allocation55_spill] sm:$0xff] %v24613_v53 }
 0x3a9   : > { %v24567_v28 = vpop.f32.mrb[18].mxu1 }
 0x3aa   : > { %19963 = vmatmul.mubr.msk.f32.gmra.mrb[48].mxu0 %vm333_vm1, %v24361_v52  ;;  %26858 = vst [vmem:[#allocation42_spill] sm:$0xff] %v24567_v28  ;;  %v24571_v61 = vpop.f32.mrb[19].mxu1 }
 0x3ab   : > { %19965 = vmatprep.mubr.msk.f32.mxu0 %vm333_vm1, %v24365_v48  ;;  %26859 = vst [vmem:[#allocation43_spill] sm:$0xff] %v24571_v61 }
 0x3ad   : > { %v24575_v30 = vpop.f32.mrb[20].mxu1 }
 0x3ae   : > { %19966 = vmatmul.mubr.msk.f32.gmra.mrb[50].mxu0 %vm333_vm1, %v24369_v9  ;;  %26860 = vst [vmem:[#allocation44_spill] sm:$0xff] %v24575_v30  ;;  %v24579_v15 = vpop.f32.mrb[21].mxu1  ;;  %v24595_v30 = vld [vmem:[#allocation2 + $0x2a5] sm:$0xff] }
 0x3af   : > { %19968 = vmatprep.mubr.msk.f32.mxu0 %vm333_vm1, %v24373_v25  ;;  %26861 = vst [vmem:[#allocation45_spill] sm:$0xff] %v24579_v15  ;;  %26865 = vst [vmem:[#allocation49_spill] sm:$0xff] %v24595_v30 }
 0x3b1   : > { %v24583_v47 = vpop.f32.mrb[22].mxu1 }
 0x3b2   : > { %19969 = vmatmul.mubr.msk.f32.gmra.mrb[52].mxu0 %vm333_vm1, %v24377_v18  ;;  %26862 = vst [vmem:[#allocation46_spill] sm:$0xff] %v24583_v47  ;;  %v24587_v28 = vpop.f32.mrb[23].mxu1  ;;  %v24601_v47 = vld [vmem:[#allocation2 + $0x2ad] sm:$0xff] }
 0x3b3   : > { %19971 = vmatprep.mubr.msk.f32.mxu0 %vm333_vm1, %v24381_v19  ;;  %26863 = vst [vmem:[#allocation47_spill] sm:$0xff] %v24587_v28  ;;  %26867 = vst [vmem:[#allocation51_spill] sm:$0xff] %v24601_v47  ;;  %v24607_v28 = vld [vmem:[#allocation2 + $0x2c5] sm:$0xff] }
 0x3b4   : > { %26869 = vst [vmem:[#allocation53_spill] sm:$0xff] %v24607_v28 }
 0x3b5   : > { %v24591_v61 = vpop.f32.mrb[24].mxu1 }
 0x3b6   : > { %19972 = vmatmul.mubr.msk.f32.gmra.mrb[54].mxu0 %vm333_vm1, %v24385_v6  ;;  %26864 = vst [vmem:[#allocation48_spill] sm:$0xff] %v24591_v61  ;;  %v24597_v15 = vpop.f32.mrb[25].mxu1 }
 0x3b7   : > { %19974 = vmatprep.mubr.msk.f32.mxu0 %vm333_vm1, %v24389_v46  ;;  %26866 = vst [vmem:[#allocation50_spill] sm:$0xff] %v24597_v15 }
 0x3b9   : > { %v24603_v38 = vpop.f32.mrb[26].mxu1 }
 0x3ba   : > { %19975 = vmatmul.mubr.msk.f32.gmra.mrb[56].mxu0 %vm333_vm1, %v24393_v24  ;;  %26868 = vst [vmem:[#allocation52_spill] sm:$0xff] %v24603_v38  ;;  %v24609_v61 = vpop.f32.mrb[27].mxu1 }
 0x3bb   : > { %19977 = vmatprep.mubr.msk.f32.mxu0 %vm333_vm1, %v24595_v30  ;;  %26870 = vst [vmem:[#allocation54_spill] sm:$0xff] %v24609_v61  ;;  %v24619_v30 = vld [vmem:[#allocation2 + $0x2e5] sm:$0xff] }
 0x3bc   : > { %26873 = vst [vmem:[#allocation57_spill] sm:$0xff] %v24619_v30 }
 0x3bd   : > { %v24615_v15 = vpop.f32.mrb[28].mxu1 }
 0x3be   : > { %19978 = vmatmul.mubr.msk.f32.gmra.mrb[58].mxu0 %vm333_vm1, %v24601_v47  ;;  %26872 = vst [vmem:[#allocation56_spill] sm:$0xff] %v24615_v15  ;;  %v24621_v38 = vpop.f32.mrb[29].mxu1  ;;  %v24625_v47 = vld [vmem:[#allocation2 + $0x2ed] sm:$0xff] }
 0x3bf   : > { %19980 = vmatprep.mubr.msk.f32.mxu0 %vm333_vm1, %v24607_v28  ;;  %26874 = vst [vmem:[#allocation58_spill] sm:$0xff] %v24621_v38  ;;  %26875 = vst [vmem:[#allocation59_spill] sm:$0xff] %v24625_v47  ;;  %v8834_v28 = vld [vmem:[#allocation2 + $0x108] sm:$0xff]  ;;  %v8835_v15 = vld [vmem:[#allocation2 + $0x110] sm:$0xff] }
 0x3c0   : > { %v24637_v38 = vld [vmem:[%s26599_s3 + $0x18] sm:$0xf] }
 0x3c2   : > { %19981 = vmatmul.mubr.msk.f32.gmra.mrb[60].mxu0 %vm333_vm1, %v24613_v53  ;;  %v24627_v61 = vpop.f32.mrb[30].mxu1 }
 0x3c3   : > { %19983 = vmatprep.mubr.msk.f32.mxu0 %vm333_vm1, %v24619_v30  ;;  %26876 = vst [vmem:[#allocation60_spill] sm:$0xff] %v24627_v61  ;;  %v24631_v24 = vpop.f32.mrb[31].mxu1  ;;  %v8836_v30 = vld [vmem:[#allocation2 + $0x128] sm:$0xff] }
 0x3c4   : > { %26877 = vst [vmem:[#allocation61_spill] sm:$0xff] %v24631_v24 }
 0x3c6   : > { %19984 = vmatmul.mubr.msk.f32.gmra.mrb[62].mxu0 %vm333_vm1, %v24625_v47  ;;  %v24639_v53 = vpop.f32.mrb[32].mxu1  ;;  %v8838_v47 = vld [vmem:[#allocation2 + $0x148] sm:$0xff] }
 0x3c7   : > { %19988 = vmatprep.mubr.msk.f32.mxu0 %vm333_vm1, %v8834_v28  ;;  %26878 = vst [vmem:[#allocation62_spill] sm:$0xff] %v24639_v53  ;;  %v24642_v61 = vpop.f32.mrb[33].mxu1  ;;  %v8837_v28 = vld [vmem:[#allocation2 + $0x130] sm:$0xff] }
 0x3c8   : > { %26879 = vst [vmem:[#allocation63_spill] sm:$0xff] %v24642_v61 }
 0x3ca   : > { %19989 = vmatmul.mubr.msk.f32.vlgmr.msra.gmra.mrb[32].mxu0 %vm333_vm1, %v8835_v15  ;;  %v24649_v24 = vpop.f32.mrb[34].mxu1  ;;  %v8839_v15 = vld [vmem:[#allocation2 + $0x150] sm:$0xff] }
 0x3cb   : > { %20037 = vmatpush3.msk.msra.mxu0 %vm626_vm0, %v24521_v23  ;;  %19991 = vmatprep.mubr.msk.f32.mxu0 %vm333_vm1, %v8836_v30  ;;  %26880 = vst [vmem:[#allocation64_spill] sm:$0xff] %v24649_v24  ;;  %v24652_v53 = vpop.f32.mrb[35].mxu1  ;;  %v24658_v23 = vld [vmem:[#allocation2 + $0x168] sm:$0xff]  ;;  %v24664_v24 = vld [vmem:[#allocation2 + $0x170] sm:$0xff] }
 0x3cc   : > { %20086 = vmatprep.subr.msk.mxu0 %vm626_vm0, %v24637_v38  ;;  %26881 = vst [vmem:[#allocation65_spill] sm:$0xff] %v24652_v53  ;;  %26884 = vst [vmem:[#allocation68_spill] sm:$0xff] %v24664_v24 }
 0x3ce   : > { %19992 = vmatmul.mubr.msk.f32.gmra.mrb[34].mxu0 %vm333_vm1, %v8837_v28  ;;  %v24655_v61 = vpop.f32.mrb[36].mxu1 }
 0x3cf   : > { %19994 = vmatprep.mubr.msk.f32.mxu0 %vm333_vm1, %v8838_v47  ;;  %26882 = vst [vmem:[#allocation66_spill] sm:$0xff] %v24655_v61  ;;  %v24660_v30 = vpop.f32.mrb[37].mxu1  ;;  %v24670_v47 = vld [vmem:[#allocation2 + $0x188] sm:$0xff] }
 0x3d0   : > { %26883 = vst [vmem:[#allocation67_spill] sm:$0xff] %v24660_v30  ;;  %26886 = vst [vmem:[#allocation70_spill] sm:$0xff] %v24670_v47  ;;  %v24682_v30 = vld [vmem:[#allocation2 + $0x1a8] sm:$0xff] }
 0x3d1   : > { %26889 = vst [vmem:[#allocation73_spill] sm:$0xff] %v24682_v30 }
 0x3d2   : > { %19995 = vmatmul.mubr.msk.f32.gmra.mrb[36].mxu0 %vm333_vm1, %v8839_v15  ;;  %v24666_v28 = vpop.f32.mrb[38].mxu1  ;;  %v24676_v15 = vld [vmem:[#allocation2 + $0x190] sm:$0xff] }
 0x3d3   : > { %19997 = vmatprep.mubr.msk.f32.mxu0 %vm333_vm1, %v24658_v23  ;;  %26885 = vst [vmem:[#allocation69_spill] sm:$0xff] %v24666_v28  ;;  %v24672_v53 = vpop.f32.mrb[39].mxu1 }
 0x3d4   : > { %26887 = vst [vmem:[#allocation71_spill] sm:$0xff] %v24672_v53 }
 0x3d6   : > { %19998 = vmatmul.mubr.msk.f32.gmra.mrb[38].mxu0 %vm333_vm1, %v24664_v24  ;;  %v24678_v61 = vpop.f32.mrb[40].mxu1  ;;  %v24688_v24 = vld [vmem:[#allocation2 + $0x1b0] sm:$0xff] }
 0x3d7   : > { %20000 = vmatprep.mubr.msk.f32.mxu0 %vm333_vm1, %v24670_v47  ;;  %26888 = vst [vmem:[#allocation72_spill] sm:$0xff] %v24678_v61  ;;  %v24684_v28 = vpop.f32.mrb[41].mxu1 }
 0x3d8   : > { %26890 = vst [vmem:[#allocation74_spill] sm:$0xff] %v24684_v28 }
 0x3da   : > { %20001 = vmatmul.mubr.msk.f32.gmra.mrb[40].mxu0 %vm333_vm1, %v24676_v15  ;;  %v24690_v53 = vpop.f32.mrb[42].mxu1 }
 0x3db   : > { %20003 = vmatprep.mubr.msk.f32.mxu0 %vm333_vm1, %v24682_v30  ;;  %26891 = vst [vmem:[#allocation75_spill] sm:$0xff] %v24690_v53  ;;  %v24694_v47 = vpop.f32.mrb[43].mxu1 }
 0x3de   : > { %20004 = vmatmul.mubr.msk.f32.gmra.mrb[42].mxu0 %vm333_vm1, %v24688_v24 }
 0x3df   : > { %20006 = vmatprep.mubr.msk.f32.mxu0 %vm333_vm1, %v24090_v34  ;;  %v24698_v61 = vpop.f32.mrb[44].mxu1  ;;  %v24732_v34 = vld [vmem:[#allocation2 + $0x2a8] sm:$0xff] }
 0x3e0   : > { %v24702_v28 = vpop.f32.mrb[45].mxu1 }
 0x3e2   : > { %20007 = vmatmul.mubr.msk.f32.gmra.mrb[44].mxu0 %vm333_vm1, %v24098_v14  ;;  %v24736_v14 = vld [vmem:[#allocation2 + $0x2b0] sm:$0xff] }
 0x3e3   : > { %20009 = vmatprep.mubr.msk.f32.mxu0 %vm333_vm1, %v24114_v51  ;;  %v24706_v30 = vpop.f32.mrb[46].mxu1  ;;  %v24740_v51 = vld [vmem:[#allocation2 + $0x2c8] sm:$0xff] }
 0x3e4   : > { %v24710_v53 = vpop.f32.mrb[47].mxu1 }
 0x3e6   : > { %20010 = vmatmul.mubr.msk.f32.gmra.mrb[46].mxu0 %vm333_vm1, %v24122_v16  ;;  %v24744_v16 = vld [vmem:[#allocation2 + $0x2d0] sm:$0xff] }
 0x3e7   : > { %20012 = vmatprep.mubr.msk.f32.mxu0 %vm333_vm1, %v24147_v57  ;;  %v24748_v57 = vld [vmem:[#allocation2 + $0x2e8] sm:$0xff] }
 0x3ea   : > { %20013 = vmatmul.mubr.msk.f32.gmra.mrb[48].mxu0 %vm333_vm1, %v24155_v62  ;;  %v24752_v62 = vld [vmem:[#allocation2 + $0x2f0] sm:$0xff] }
 0x3eb   : > { %20015 = vmatprep.mubr.msk.f32.mxu0 %vm333_vm1, %v24171_v32  ;;  %v17088_v32 = vld [vmem:[%s26599_s3 + $0x1c] sm:$0xf] }
 0x3ee   : > { %20016 = vmatmul.mubr.msk.f32.gmra.mrb[50].mxu0 %vm333_vm1, %v24179_v44  ;;  %v26893_v44 = vld [vmem:[#allocation37_spill] sm:$0xff] }
 0x3ef   : > { %20018 = vmatprep.mubr.msk.f32.mxu0 %vm333_vm1, %v24195_v17  ;;  %v26894_v17 = vld [vmem:[#allocation38_spill] sm:$0xff] }
 0x3f2   : > { %20019 = vmatmul.mubr.msk.f32.gmra.mrb[52].mxu0 %vm333_vm1, %v24203_v54  ;;  %v26895_v54 = vld [vmem:[#allocation39_spill] sm:$0xff] }
 0x3f3   : > { %20021 = vmatprep.mubr.msk.f32.mxu0 %vm333_vm1, %v24219_v13  ;;  %v24814_v13 = vld [vmem:[#allocation2 + $0x2ab] sm:$0xff] }
 0x3f6   : > { %20022 = vmatmul.mubr.msk.f32.gmra.mrb[54].mxu0 %vm333_vm1, %v24227_v56  ;;  %v24818_v56 = vld [vmem:[#allocation2 + $0x2b3] sm:$0xff] }
 0x3f7   : > { %20024 = vmatprep.mubr.msk.f32.mxu0 %vm333_vm1, %v24243_v5  ;;  %v24822_v5 = vld [vmem:[#allocation2 + $0x2cb] sm:$0xff] }
 0x3fa   : > { %20025 = vmatmul.mubr.msk.f32.gmra.mrb[56].mxu0 %vm333_vm1, %v24251_v8  ;;  %v24826_v8 = vld [vmem:[#allocation2 + $0x2d3] sm:$0xff] }
 0x3fb   : > { %20027 = vmatprep.mubr.msk.f32.mxu0 %vm333_vm1, %v24732_v34 }
 0x3fe   : > { %20028 = vmatmul.mubr.msk.f32.gmra.mrb[58].mxu0 %vm333_vm1, %v24736_v14 }
 0x3ff   : > { %20030 = vmatprep.mubr.msk.f32.mxu0 %vm333_vm1, %v24740_v51 }
 0x402   : > { %20031 = vmatmul.mubr.msk.f32.gmra.mrb[60].mxu0 %vm333_vm1, %v24744_v16 }
 0x403   : > { %20033 = vmatprep.mubr.msk.f32.mxu0 %vm333_vm1, %v24748_v57 }
 0x406   : > { %20034 = vmatmul.mubr.msk.f32.gmra.mrb[62].mxu0 %vm333_vm1, %v24752_v62 }
 0x407   : > { %20038 = vmatprep.mubr.msk.f32.mxu0 %vm333_vm1, %v24412_v33  ;;  %v26892_v33 = vld [vmem:[#allocation36_spill] sm:$0xff] }
 0x40a   : > { %20039 = vmatmul.mubr.msk.f32.vlgmr.msra.gmra.mrb[32].mxu0 %vm333_vm1, %v24416_v4  ;;  %v24830_v4 = vld [vmem:[#allocation2 + $0x2eb] sm:$0xff] }
 0x40b   : > { %20087 = vmatpush3.msk.msra.mxu0 %vm626_vm0, %v24637_v38  ;;  %20041 = vmatprep.mubr.msk.f32.mxu0 %vm333_vm1, %v24420_v20  ;;  %v24834_v20 = vld [vmem:[#allocation2 + $0x2f3] sm:$0xff]  ;;  %v10012_v38 = vld [vmem:[#allocation2 + $0x208] sm:$0xff] }
 0x40c   : > { %20136 = vmatprep.subr.msk.mxu0 %vm626_vm0, %v17088_v32 }
 0x40e   : > { %20042 = vmatmul.mubr.msk.f32.gmra.mrb[34].mxu0 %vm333_vm1, %v24424_v49  ;;  %v17122_v49 = vld [vmem:[%s26599_s3 + $0x20] sm:$0xf] }
 0x40f   : > { %20044 = vmatprep.mubr.msk.f32.mxu0 %vm333_vm1, %v24428_v35  ;;  %v10010_v35 = vld [vmem:[#allocation2 + $0x1e8] sm:$0xff] }
 0x412   : > { %20045 = vmatmul.mubr.msk.f32.gmra.mrb[36].mxu0 %vm333_vm1, %v24432_v63  ;;  %v10011_v63 = vld [vmem:[#allocation2 + $0x1f0] sm:$0xff] }
 0x413   : > { %20047 = vmatprep.mubr.msk.f32.mxu0 %vm333_vm1, %v24436_v45 }
 0x416   : > { %20048 = vmatmul.mubr.msk.f32.gmra.mrb[38].mxu0 %vm333_vm1, %v24440_v58 }
 0x417   : > { %20050 = vmatprep.mubr.msk.f32.mxu0 %vm333_vm1, %v24444_v40 }
 0x41a   : > { %20051 = vmatmul.mubr.msk.f32.gmra.mrb[40].mxu0 %vm333_vm1, %v24448_v12 }
 0x41b   : > { %20053 = vmatprep.mubr.msk.f32.mxu0 %vm333_vm1, %v24452_v22 }
 0x41e   : > { %20054 = vmatmul.mubr.msk.f32.gmra.mrb[42].mxu0 %vm333_vm1, %v24456_v2 }
 0x41f   : > { %20056 = vmatprep.mubr.msk.f32.mxu0 %vm333_vm1, %v24460_v50 }
 0x422   : > { %20057 = vmatmul.mubr.msk.f32.gmra.mrb[44].mxu0 %vm333_vm1, %v24464_v43 }
 0x423   : > { %20059 = vmatprep.mubr.msk.f32.mxu0 %vm333_vm1, %v24468_v36 }
 0x426   : > { %20060 = vmatmul.mubr.msk.f32.gmra.mrb[46].mxu0 %vm333_vm1, %v24472_v29 }
 0x427   : > { %20062 = vmatprep.mubr.msk.f32.mxu0 %vm333_vm1, %v24476_v26 }
 0x42a   : > { %20063 = vmatmul.mubr.msk.f32.gmra.mrb[48].mxu0 %vm333_vm1, %v24480_v7 }
 0x42b   : > { %20065 = vmatprep.mubr.msk.f32.mxu0 %vm333_vm1, %v26892_v33 }
 0x42e   : > { %20066 = vmatmul.mubr.msk.f32.gmra.mrb[50].mxu0 %vm333_vm1, %v26893_v44 }
 0x42f   : > { %20068 = vmatprep.mubr.msk.f32.mxu0 %vm333_vm1, %v26894_v17 }
 0x432   : > { %20069 = vmatmul.mubr.msk.f32.gmra.mrb[52].mxu0 %vm333_vm1, %v24496_v10 }
 0x433   : > { %20071 = vmatprep.mubr.msk.f32.mxu0 %vm333_vm1, %v26895_v54 }
 0x436   : > { %20072 = vmatmul.mubr.msk.f32.gmra.mrb[54].mxu0 %vm333_vm1, %v24504_v55 }
 0x437   : > { %20074 = vmatprep.mubr.msk.f32.mxu0 %vm333_vm1, %v24508_v11 }
 0x43a   : > { %20075 = vmatmul.mubr.msk.f32.gmra.mrb[56].mxu0 %vm333_vm1, %v24512_v1 }
 0x43b   : > { %20077 = vmatprep.mubr.msk.f32.mxu0 %vm333_vm1, %v24814_v13 }
 0x43e   : > { %20078 = vmatmul.mubr.msk.f32.gmra.mrb[58].mxu0 %vm333_vm1, %v24818_v56 }
 0x43f   : > { %20080 = vmatprep.mubr.msk.f32.mxu0 %vm333_vm1, %v24822_v5 }
 0x442   : > { %20081 = vmatmul.mubr.msk.f32.gmra.mrb[60].mxu0 %vm333_vm1, %v24826_v8 }
 0x443   : > { %20083 = vmatprep.mubr.msk.f32.mxu0 %vm333_vm1, %v24830_v4 }
 0x446   : > { %20084 = vmatmul.mubr.msk.f32.gmra.mrb[62].mxu0 %vm333_vm1, %v24834_v20 }
 0x447   : > { %20088 = vmatprep.mubr.msk.f32.mxu0 %vm333_vm1, %v24317_v39  ;;  %v9640_v39 = vld [vmem:[#allocation2 + $0x30d] sm:$0xff] }
 0x44a   : > { %20089 = vmatmul.mubr.msk.f32.vlgmr.msra.gmra.mrb[32].mxu0 %vm333_vm1, %v24321_v3  ;;  %v9641_v3 = vld [vmem:[#allocation2 + $0x325] sm:$0xff] }
 0x44b   : > { %20137 = vmatpush3.msk.msra.mxu0 %vm626_vm0, %v17088_v32  ;;  %20091 = vmatprep.mubr.msk.f32.mxu0 %vm333_vm1, %v24325_v59  ;;  %v9642_v59 = vld [vmem:[#allocation2 + $0x32d] sm:$0xff] }
 0x44c   : > { %20186 = vmatprep.subr.msk.mxu0 %vm626_vm0, %v17122_v49  ;;  %v10016_v32 = vld [vmem:[#allocation2 + $0x248] sm:$0xff] }
 0x44e   : > { %20092 = vmatmul.mubr.msk.f32.gmra.mrb[34].mxu0 %vm333_vm1, %v24329_v37  ;;  %v9643_v37 = vld [vmem:[#allocation2 + $0x345] sm:$0xff] }
 0x44f   : > { %20094 = vmatprep.mubr.msk.f32.mxu0 %vm333_vm1, %v24333_v0  ;;  %v9644_v0 = vld [vmem:[#allocation2 + $0x34d] sm:$0xff] }
 0x452   : > { %20095 = vmatmul.mubr.msk.f32.gmra.mrb[36].mxu0 %vm333_vm1, %v24337_v21  ;;  %v24906_v21 = vld [vmem:[%s26603_s7] sm:$0xf] }
 0x453   : > { %20097 = vmatprep.mubr.msk.f32.mxu0 %vm333_vm1, %v24341_v31  ;;  %v26903_v31 = vld [vmem:[#allocation68_spill] sm:$0xff] }
 0x456   : > { %20098 = vmatmul.mubr.msk.f32.gmra.mrb[38].mxu0 %vm333_vm1, %v24345_v60  ;;  %v26904_v60 = vld [vmem:[#allocation70_spill] sm:$0xff] }
 0x457   : > { %20100 = vmatprep.mubr.msk.f32.mxu0 %vm333_vm1, %v24349_v42  ;;  %v26905_v42 = vld [vmem:[#allocation73_spill] sm:$0xff] }
 0x45a   : > { %20101 = vmatmul.mubr.msk.f32.gmra.mrb[40].mxu0 %vm333_vm1, %v24353_v27  ;;  %v10008_v27 = vld [vmem:[#allocation2 + $0x1c8] sm:$0xff] }
 0x45b   : > { %20103 = vmatprep.mubr.msk.f32.mxu0 %vm333_vm1, %v24357_v41  ;;  %v10009_v41 = vld [vmem:[#allocation2 + $0x1d0] sm:$0xff] }
 0x45e   : > { %20104 = vmatmul.mubr.msk.f32.gmra.mrb[42].mxu0 %vm333_vm1, %v24361_v52  ;;  %v26896_v52 = vld [vmem:[#allocation35_spill] sm:$0xff] }
 0x45f   : > { %20106 = vmatprep.mubr.msk.f32.mxu0 %vm333_vm1, %v24365_v48  ;;  %v26897_v48 = vld [vmem:[#allocation49_spill] sm:$0xff] }
 0x462   : > { %20107 = vmatmul.mubr.msk.f32.gmra.mrb[44].mxu0 %vm333_vm1, %v24369_v9  ;;  %v26898_v9 = vld [vmem:[#allocation51_spill] sm:$0xff] }
 0x463   : > { %20109 = vmatprep.mubr.msk.f32.mxu0 %vm333_vm1, %v24373_v25  ;;  %v26899_v25 = vld [vmem:[#allocation53_spill] sm:$0xff] }
 0x466   : > { %20110 = vmatmul.mubr.msk.f32.gmra.mrb[46].mxu0 %vm333_vm1, %v24377_v18  ;;  %v26900_v18 = vld [vmem:[#allocation55_spill] sm:$0xff] }
 0x467   : > { %20112 = vmatprep.mubr.msk.f32.mxu0 %vm333_vm1, %v24381_v19  ;;  %v26901_v19 = vld [vmem:[#allocation57_spill] sm:$0xff] }
 0x46a   : > { %20113 = vmatmul.mubr.msk.f32.gmra.mrb[48].mxu0 %vm333_vm1, %v24385_v6  ;;  %v9639_v6 = vld [vmem:[#allocation2 + $0x305] sm:$0xff] }
 0x46b   : > { %20115 = vmatprep.mubr.msk.f32.mxu0 %vm333_vm1, %v24389_v46  ;;  %v26902_v46 = vld [vmem:[#allocation59_spill] sm:$0xff] }
 0x46e   : > { %20116 = vmatmul.mubr.msk.f32.gmra.mrb[50].mxu0 %vm333_vm1, %v26896_v52  ;;  %v10018_v52 = vld [vmem:[#allocation2 + $0x268] sm:$0xff] }
 0x46f   : > { %20118 = vmatprep.mubr.msk.f32.mxu0 %vm333_vm1, %v26897_v48  ;;  %v10019_v48 = vld [vmem:[#allocation2 + $0x270] sm:$0xff] }
 0x472   : > { %20119 = vmatmul.mubr.msk.f32.gmra.mrb[52].mxu0 %vm333_vm1, %v26898_v9  ;;  %v10020_v9 = vld [vmem:[#allocation2 + $0x288] sm:$0xff] }
 0x473   : > { %20121 = vmatprep.mubr.msk.f32.mxu0 %vm333_vm1, %v26899_v25  ;;  %v10021_v25 = vld [vmem:[#allocation2 + $0x290] sm:$0xff] }
 0x476   : > { %20122 = vmatmul.mubr.msk.f32.gmra.mrb[54].mxu0 %vm333_vm1, %v26900_v18  ;;  %v10028_v18 = vld [vmem:[#allocation2 + $0x308] sm:$0xff] }
 0x477   : > { %20124 = vmatprep.mubr.msk.f32.mxu0 %vm333_vm1, %v26901_v19  ;;  %v10029_v19 = vld [vmem:[#allocation2 + $0x310] sm:$0xff] }
 0x47a   : > { %20125 = vmatmul.mubr.msk.f32.gmra.mrb[56].mxu0 %vm333_vm1, %v26902_v46  ;;  %v10886_v46 = vld [vmem:[#allocation2 + $0x70] sm:$0xff] }
 0x47b   : > { %20127 = vmatprep.mubr.msk.f32.mxu0 %vm333_vm1, %v9639_v6  ;;  %v10884_v6 = vld [vmem:[%s26601_s5] sm:$0xf] }
 0x47e   : > { %20128 = vmatmul.mubr.msk.f32.gmra.mrb[58].mxu0 %vm333_vm1, %v9640_v39  ;;  %v10887_v39 = vld [vmem:[#allocation2 + $0x88] sm:$0xff] }
 0x47f   : > { %20130 = vmatprep.mubr.msk.f32.mxu0 %vm333_vm1, %v9641_v3  ;;  %v10888_v3 = vld [vmem:[#allocation2 + $0x90] sm:$0xff] }
 0x482   : > { %20131 = vmatmul.mubr.msk.f32.gmra.mrb[60].mxu0 %vm333_vm1, %v9642_v59 }
 0x483   : > { %20133 = vmatprep.mubr.msk.f32.mxu0 %vm333_vm1, %v9643_v37  ;;  %v26916_v37 = vld [vmem:[#allocation54_spill] sm:$0xff] }
 0x486   : > { %20134 = vmatmul.mubr.msk.f32.gmra.mrb[62].mxu0 %vm333_vm1, %v9644_v0 }
 0x487   : > { %20138 = vmatprep.mubr.msk.f32.mxu0 %vm333_vm1, %v24658_v23  ;;  %v10013_v23 = vld [vmem:[#allocation2 + $0x210] sm:$0xff] }
 0x48a   : > { %20139 = vmatmul.mubr.msk.f32.vlgmr.msra.gmra.mrb[32].mxu0 %vm333_vm1, %v26903_v31 }
 0x48b   : > { %20187 = vmatpush3.msk.msra.mxu0 %vm626_vm0, %v17122_v49  ;;  %20141 = vmatprep.mubr.msk.f32.mxu0 %vm333_vm1, %v26904_v60  ;;  %v10017_v49 = vld [vmem:[#allocation2 + $0x250] sm:$0xff]  ;;  %v26918_v60 = vld [vmem:[#allocation58_spill] sm:$0xff] }
 0x48c   : > { %20686 = vmatprep.subr.msk.mxu0 %vm626_vm0, %v24906_v21 }
 0x48e   : > { %20142 = vmatmul.mubr.msk.f32.gmra.mrb[34].mxu0 %vm333_vm1, %v24676_v15  ;;  %v10014_v15 = vld [vmem:[#allocation2 + $0x228] sm:$0xff] }
 0x48f   : > { %20144 = vmatprep.mubr.msk.f32.mxu0 %vm333_vm1, %v26905_v42 }
 0x492   : > { %20145 = vmatmul.mubr.msk.f32.gmra.mrb[36].mxu0 %vm333_vm1, %v24688_v24  ;;  %v10015_v24 = vld [vmem:[#allocation2 + $0x230] sm:$0xff] }
 0x493   : > { %20147 = vmatprep.mubr.msk.f32.mxu0 %vm333_vm1, %v10008_v27  ;;  %v10889_v27 = vld [vmem:[#allocation2 + $0xa8] sm:$0xff] }
 0x496   : > { %20148 = vmatmul.mubr.msk.f32.gmra.mrb[38].mxu0 %vm333_vm1, %v10009_v41  ;;  %v26919_v41 = vld [vmem:[#allocation56_spill] sm:$0xff] }
 0x497   : > { %20150 = vmatprep.mubr.msk.f32.mxu0 %vm333_vm1, %v10010_v35 }
 0x49a   : > { %20151 = vmatmul.mubr.msk.f32.gmra.mrb[40].mxu0 %vm333_vm1, %v10011_v63  ;;  %v10890_v63 = vld [vmem:[#allocation2 + $0xb0] sm:$0xff] }
 0x49b   : > { %20153 = vmatprep.mubr.msk.f32.mxu0 %vm333_vm1, %v10012_v38  ;;  %v26920_v38 = vld [vmem:[#allocation61_spill] sm:$0xff] }
 0x49e   : > { %20154 = vmatmul.mubr.msk.f32.gmra.mrb[42].mxu0 %vm333_vm1, %v10013_v23 }
 0x49f   : > { %20156 = vmatprep.mubr.msk.f32.mxu0 %vm333_vm1, %v10014_v15  ;;  %v10891_v15 = vld [vmem:[#allocation2 + $0xc8] sm:$0xff] }
 0x4a2   : > { %20157 = vmatmul.mubr.msk.f32.gmra.mrb[44].mxu0 %vm333_vm1, %v10015_v24  ;;  %v26921_v24 = vld [vmem:[#allocation60_spill] sm:$0xff] }
 0x4a3   : > { %20159 = vmatprep.mubr.msk.f32.mxu0 %vm333_vm1, %v10016_v32 }
 0x4a6   : > { %20160 = vmatmul.mubr.msk.f32.gmra.mrb[46].mxu0 %vm333_vm1, %v10017_v49  ;;  %v10892_v49 = vld [vmem:[#allocation2 + $0xd0] sm:$0xff] }
 0x4a7   : > { %20162 = vmatprep.mubr.msk.f32.mxu0 %vm333_vm1, %v10018_v52  ;;  %v26922_v52 = vld [vmem:[#allocation63_spill] sm:$0xff] }
 0x4aa   : > { %20163 = vmatmul.mubr.msk.f32.gmra.mrb[48].mxu0 %vm333_vm1, %v10019_v48 }
 0x4ab   : > { %20165 = vmatprep.mubr.msk.f32.mxu0 %vm333_vm1, %v10020_v9  ;;  %v10893_v9 = vld [vmem:[#allocation2 + $0xe8] sm:$0xff] }
 0x4ae   : > { %20166 = vmatmul.mubr.msk.f32.gmra.mrb[50].mxu0 %vm333_vm1, %v10021_v25  ;;  %v26923_v25 = vld [vmem:[#allocation62_spill] sm:$0xff] }
 0x4af   : > { %20168 = vmatprep.mubr.msk.f32.mxu0 %vm333_vm1, %v24732_v34  ;;  %v10030_v34 = vld [vmem:[#allocation2 + $0x328] sm:$0xff] }
 0x4b2   : > { %20169 = vmatmul.mubr.msk.f32.gmra.mrb[52].mxu0 %vm333_vm1, %v24736_v14  ;;  %v10031_v14 = vld [vmem:[#allocation2 + $0x330] sm:$0xff] }
 0x4b3   : > { %20171 = vmatprep.mubr.msk.f32.mxu0 %vm333_vm1, %v24740_v51  ;;  %v10032_v51 = vld [vmem:[#allocation2 + $0x348] sm:$0xff] }
 0x4b6   : > { %20172 = vmatmul.mubr.msk.f32.gmra.mrb[54].mxu0 %vm333_vm1, %v24744_v16  ;;  %v10033_v16 = vld [vmem:[#allocation2 + $0x350] sm:$0xff] }
 0x4b7   : > { %20174 = vmatprep.mubr.msk.f32.mxu0 %vm333_vm1, %v24748_v57  ;;  %v17157_v57 = vld [vmem:[%s26601_s5 + $0x4] sm:$0xf] }
 0x4b8   : > { %20236 = vmatprep.subr.msk.mxu1 %vm626_vm0, %v17157_v57 }
 0x4b9   : > { %20237 = vmatpush3.msk.msra.mxu1 %vm626_vm0, %v17157_v57  ;;  %v26926_v57 = vld [vmem:[#allocation67_spill] sm:$0xff] }
 0x4ba   : > { %20175 = vmatmul.mubr.msk.f32.gmra.mrb[56].mxu0 %vm333_vm1, %v24752_v62  ;;  %v10885_v62 = vld [vmem:[#allocation2 + $0x68] sm:$0xff]  ;;  %20286 = vmatprep.subr.msk.mxu1 %vm626_vm0, %v10884_v6 }
 0x4bb   : > { %20177 = vmatprep.mubr.msk.f32.mxu0 %vm333_vm1, %v10028_v18  ;;  %20238 = vmatprep.mubr.msk.f32.mxu1 %vm333_vm1, %v10885_v62 }
 0x4bc   : > { %20239 = vmatmul.mubr.msk.f32.vlgmr.msra.gmra.mrb[48].mxu1 %vm333_vm1, %v10886_v46 }
 0x4bd   : > { %20287 = vmatpush3.msk.msra.mxu1 %vm626_vm0, %v10884_v6  ;;  %20241 = vmatprep.mubr.msk.f32.mxu1 %vm333_vm1, %v10887_v39  ;;  %v26927_v6 = vld [vmem:[#allocation66_spill] sm:$0xff]  ;;  %v26928_v39 = vld [vmem:[#allocation71_spill] sm:$0xff] }
 0x4be   : > { %20178 = vmatmul.mubr.msk.f32.gmra.mrb[58].mxu0 %vm333_vm1, %v10029_v19  ;;  %v10894_v19 = vld [vmem:[#allocation2 + $0xf0] sm:$0xff] }
 0x4bf   : > { %20180 = vmatprep.mubr.msk.f32.mxu0 %vm333_vm1, %v10030_v34  ;;  %v26924_v34 = vld [vmem:[#allocation65_spill] sm:$0xff] }
 0x4c0   : > { %20242 = vmatmul.mubr.msk.f32.gmra.mrb[50].mxu1 %vm333_vm1, %v10888_v3 }
 0x4c1   : > { %20244 = vmatprep.mubr.msk.f32.mxu1 %vm333_vm1, %v10889_v27 }
 0x4c2   : > { %20181 = vmatmul.mubr.msk.f32.gmra.mrb[60].mxu0 %vm333_vm1, %v10031_v14 }
 0x4c3   : > { %20183 = vmatprep.mubr.msk.f32.mxu0 %vm333_vm1, %v10032_v51  ;;  %v26925_v51 = vld [vmem:[#allocation64_spill] sm:$0xff] }
 0x4c4   : > { %20245 = vmatmul.mubr.msk.f32.gmra.mrb[52].mxu1 %vm333_vm1, %v10890_v63 }
 0x4c5   : > { %20247 = vmatprep.mubr.msk.f32.mxu1 %vm333_vm1, %v10891_v15 }
 0x4c6   : > { %20184 = vmatmul.mubr.msk.f32.gmra.mrb[62].mxu0 %vm333_vm1, %v10033_v16 }
 0x4c7   : > { %20188 = vmatprep.mubr.msk.f32.mxu0 %vm333_vm1, %v24436_v45  ;;  %v26910_v45 = vld [vmem:[#allocation45_spill] sm:$0xff] }
 0x4c8   : > { %20248 = vmatmul.mubr.msk.f32.gmra.mrb[54].mxu1 %vm333_vm1, %v10892_v49 }
 0x4c9   : > { %20250 = vmatprep.mubr.msk.f32.mxu1 %vm333_vm1, %v10893_v9 }
 0x4ca   : > { %20189 = vmatmul.mubr.msk.f32.vlgmr.msra.gmra.mrb[32].mxu0 %vm333_vm1, %v24440_v58 }
 0x4cb   : > { %20191 = vmatprep.mubr.msk.f32.mxu0 %vm333_vm1, %v24444_v40  ;;  %20687 = vmatpush3.msk.msra.mxu0 %vm626_vm0, %v24906_v21  ;;  %v26909_v40 = vld [vmem:[#allocation42_spill] sm:$0xff] }
 0x4cc   : > { %20786 = vmatprep.subr.msk.mxu0 %vm626_vm0, %v24906_v21  ;;  %20251 = vmatmul.mubr.msk.f32.gmra.mrb[56].mxu1 %vm333_vm1, %v10894_v19 }
 0x4ce   : > { %20192 = vmatmul.mubr.msk.f32.gmra.mrb[34].mxu0 %vm333_vm1, %v24448_v12 }
 0x4cf   : > { %20194 = vmatprep.mubr.msk.f32.mxu0 %vm333_vm1, %v24452_v22  ;;  %v26908_v22 = vld [vmem:[#allocation43_spill] sm:$0xff] }
 0x4d2   : > { %20195 = vmatmul.mubr.msk.f32.gmra.mrb[36].mxu0 %vm333_vm1, %v24456_v2 }
 0x4d3   : > { %20197 = vmatprep.mubr.msk.f32.mxu0 %vm333_vm1, %v24460_v50  ;;  %v26907_v50 = vld [vmem:[#allocation40_spill] sm:$0xff] }
 0x4d6   : > { %20198 = vmatmul.mubr.msk.f32.gmra.mrb[38].mxu0 %vm333_vm1, %v24464_v43 }
 0x4d7   : > { %20200 = vmatprep.mubr.msk.f32.mxu0 %vm333_vm1, %v24468_v36  ;;  %v26906_v36 = vld [vmem:[#allocation41_spill] sm:$0xff] }
 0x4da   : > { %20201 = vmatmul.mubr.msk.f32.gmra.mrb[40].mxu0 %vm333_vm1, %v24472_v29  ;;  %v10422_v29 = vld [vmem:[#allocation2 + $0x353] sm:$0xff] }
 0x4db   : > { %20203 = vmatprep.mubr.msk.f32.mxu0 %vm333_vm1, %v24476_v26  ;;  %v25029_v26 = vld [vmem:[%s26600_s4] ss:$0 sm:$0xff] }
 0x4dc   : > { %v7276_v43 = vadd.f32 %v25029_v26, %v26906_v36  ;;  %v7277_v2 = vadd.f32 %v26907_v50, %v25029_v26  ;;  %v7278_v12 = vadd.f32 %v25029_v26, %v26908_v22  ;;  %v7279_v58 = vadd.f32 %v26909_v40, %v25029_v26 }
 0x4dd   : > { %v7286_v0 = vadd.f32 %v25029_v26, %v26916_v37  ;;  %v7288_v42 = vadd.f32 %v25029_v26, %v26918_v60  ;;  %v7289_v35 = vadd.f32 %v26919_v41, %v25029_v26  ;;  %v7290_v23 = vadd.f32 %v25029_v26, %v26920_v38 }
 0x4de   : > { %20204 = vmatmul.mubr.msk.f32.gmra.mrb[42].mxu0 %vm333_vm1, %v24480_v7  ;;  %v10421_v7 = vld [vmem:[#allocation2 + $0x34b] sm:$0xff]  ;;  %v7291_v32 = vadd.f32 %v26921_v24, %v25029_v26  ;;  %v7292_v48 = vadd.f32 %v25029_v26, %v26922_v52  ;;  %v7293_v18 = vadd.f32 %v26923_v25, %v25029_v26  ;;  %v7294_v14 = vadd.f32 %v25029_v26, %v26924_v34 }
 0x4df   : > { %20206 = vmatprep.mubr.msk.f32.mxu0 %vm333_vm1, %v26892_v33  ;;  %v7280_v33 = vadd.f32 %v25029_v26, %v26910_v45  ;;  %v7295_v16 = vadd.f32 %v26925_v51, %v25029_v26  ;;  %v7296_v62 = vadd.f32 %v25029_v26, %v26926_v57  ;;  %v7297_v46 = vadd.f32 %v26927_v6, %v25029_v26 }
 0x4e0   : > { %v7298_v3 = vadd.f32 %v25029_v26, %v26928_v39  ;;  %v7302_v36 = vadd.f32 %v25029_v26, %v24694_v47  ;;  %v7305_v22 = vadd.f32 %v24698_v61, %v25029_v26  ;;  %v7306_v47 = vadd.f32 %v25029_v26, %v24710_v53 }
 0x4e2   : > { %20207 = vmatmul.mubr.msk.f32.gmra.mrb[44].mxu0 %vm333_vm1, %v26893_v44  ;;  %v26911_v44 = vld [vmem:[#allocation44_spill] sm:$0xff] }
 0x4e3   : > { %20209 = vmatprep.mubr.msk.f32.mxu0 %vm333_vm1, %v26894_v17  ;;  %v7281_v17 = vadd.f32 %v26911_v44, %v25029_v26 }
 0x4e6   : > { %20210 = vmatmul.mubr.msk.f32.gmra.mrb[46].mxu0 %vm333_vm1, %v24496_v10  ;;  %v10417_v10 = vld [vmem:[#allocation2 + $0x30b] sm:$0xff] }
 0x4e7   : > { %20212 = vmatprep.mubr.msk.f32.mxu0 %vm333_vm1, %v26895_v54  ;;  %v26912_v54 = vld [vmem:[#allocation47_spill] sm:$0xff] }
 0x4ea   : > { %20213 = vmatmul.mubr.msk.f32.gmra.mrb[48].mxu0 %vm333_vm1, %v24504_v55  ;;  %v10420_v55 = vld [vmem:[#allocation2 + $0x333] sm:$0xff] }
 0x4eb   : > { %20215 = vmatprep.mubr.msk.f32.mxu0 %vm333_vm1, %v24508_v11  ;;  %v10419_v11 = vld [vmem:[#allocation2 + $0x32b] sm:$0xff] }
 0x4ee   : > { %20216 = vmatmul.mubr.msk.f32.gmra.mrb[50].mxu0 %vm333_vm1, %v24512_v1  ;;  %v10418_v1 = vld [vmem:[#allocation2 + $0x313] sm:$0xff] }
 0x4ef   : > { %20218 = vmatprep.mubr.msk.f32.mxu0 %vm333_vm1, %v24814_v13  ;;  %v7282_v13 = vadd.f32 %v25029_v26, %v26912_v54 }
 0x4f2   : > { %20219 = vmatmul.mubr.msk.f32.gmra.mrb[52].mxu0 %vm333_vm1, %v24818_v56  ;;  %v26913_v56 = vld [vmem:[#allocation46_spill] sm:$0xff] }
 0x4f3   : > { %20221 = vmatprep.mubr.msk.f32.mxu0 %vm333_vm1, %v24822_v5  ;;  %v7283_v5 = vadd.f32 %v26913_v56, %v25029_v26 }
 0x4f6   : > { %20222 = vmatmul.mubr.msk.f32.gmra.mrb[54].mxu0 %vm333_vm1, %v24826_v8  ;;  %v26914_v8 = vld [vmem:[#allocation50_spill] sm:$0xff] }
 0x4f7   : > { %20224 = vmatprep.mubr.msk.f32.mxu0 %vm333_vm1, %v24830_v4  ;;  %v7284_v4 = vadd.f32 %v25029_v26, %v26914_v8 }
 0x4fa   : > { %20225 = vmatmul.mubr.msk.f32.gmra.mrb[56].mxu0 %vm333_vm1, %v24834_v20  ;;  %v26915_v20 = vld [vmem:[#allocation48_spill] sm:$0xff] }
 0x4fb   : > { %20227 = vmatprep.mubr.msk.f32.mxu0 %vm333_vm1, %v10417_v10  ;;  %v7285_v59 = vadd.f32 %v26915_v20, %v25029_v26  ;;  %v26929_v10 = vld [vmem:[#allocation69_spill] sm:$0xff] }
 0x4fe   : > { %20228 = vmatmul.mubr.msk.f32.gmra.mrb[58].mxu0 %vm333_vm1, %v10418_v1  ;;  %v7299_v1 = vadd.f32 %v26929_v10, %v25029_v26 }
 0x4ff   : > { %20230 = vmatprep.mubr.msk.f32.mxu0 %vm333_vm1, %v10419_v11  ;;  %v26930_v11 = vld [vmem:[#allocation74_spill] sm:$0xff] }
 0x502   : > { %20231 = vmatmul.mubr.msk.f32.gmra.mrb[60].mxu0 %vm333_vm1, %v10420_v55  ;;  %v7300_v55 = vadd.f32 %v25029_v26, %v26930_v11 }
 0x503   : > { %20233 = vmatprep.mubr.msk.f32.mxu0 %vm333_vm1, %v10421_v7  ;;  %v26931_v7 = vld [vmem:[#allocation72_spill] sm:$0xff] }
 0x506   : > { %20234 = vmatmul.mubr.msk.f32.gmra.mrb[62].mxu0 %vm333_vm1, %v10422_v29  ;;  %v7301_v29 = vadd.f32 %v26931_v7, %v25029_v26 }
 0x507   : > { %20688 = vmatprep.mubr.msk.f32.mxu0 %vm333_vm1, %v7276_v43  ;;  %v26932_v43 = vld [vmem:[#allocation75_spill] sm:$0xff] }
 0x508   : > { %v7303_v50 = vadd.f32 %v26932_v43, %v25029_v26 }
 0x50a   : > { %20689 = vmatmul.mubr.msk.f32.vlgmr.msra.gmra.mrb[64].mxu0 %vm333_vm1, %v7277_v2  ;;  %v7304_v2 = vadd.f32 %v25029_v26, %v24702_v28  ;;  %v25141_v28 = vld [vmem:[%s26601_s5 + $0x8] sm:$0xf] }
 0x50b   : > { %20691 = vmatprep.mubr.msk.f32.mxu0 %vm333_vm1, %v7278_v12  ;;  %20787 = vmatpush3.msk.msra.mxu0 %vm626_vm0, %v24906_v21  ;;  %v26917_v21 = vld [vmem:[#allocation52_spill] sm:$0xff]  ;;  %v7307_v12 = vadd.f32 %v24706_v30, %v25029_v26 }
 0x50c   : > { %v7287_v31 = vadd.f32 %v26917_v21, %v25029_v26  ;;  %20336 = vmatprep.subr.msk.mxu1 %vm626_vm0, %v25141_v28 }
 0x50e   : > { %20692 = vmatmul.mubr.msk.f32.gmra.mrb[66].mxu0 %vm333_vm1, %v7279_v58 }
 0x50f   : > { %20694 = vmatprep.mubr.msk.f32.mxu0 %vm333_vm1, %v7280_v33 }
 0x512   : > { %20695 = vmatmul.mubr.msk.f32.gmra.mrb[68].mxu0 %vm333_vm1, %v7281_v17 }
 0x513   : > { %20697 = vmatprep.mubr.msk.f32.mxu0 %vm333_vm1, %v7282_v13 }
 0x516   : > { %20698 = vmatmul.mubr.msk.f32.gmra.mrb[70].mxu0 %vm333_vm1, %v7283_v5 }
 0x517   : > { %20700 = vmatprep.mubr.msk.f32.mxu0 %vm333_vm1, %v7284_v4 }
 0x51a   : > { %20701 = vmatmul.mubr.msk.f32.gmra.mrb[72].mxu0 %vm333_vm1, %v7285_v59 }
 0x51b   : > { %20703 = vmatprep.mubr.msk.f32.mxu0 %vm333_vm1, %v7286_v0 }
 0x51e   : > { %20704 = vmatmul.mubr.msk.f32.gmra.mrb[74].mxu0 %vm333_vm1, %v7287_v31 }
 0x51f   : > { %20706 = vmatprep.mubr.msk.f32.mxu0 %vm333_vm1, %v7288_v42 }
 0x522   : > { %20707 = vmatmul.mubr.msk.f32.gmra.mrb[76].mxu0 %vm333_vm1, %v7289_v35 }
 0x523   : > { %20709 = vmatprep.mubr.msk.f32.mxu0 %vm333_vm1, %v7290_v23 }
 0x526   : > { %20710 = vmatmul.mubr.msk.f32.gmra.mrb[78].mxu0 %vm333_vm1, %v7291_v32 }
 0x527   : > { %20712 = vmatprep.mubr.msk.f32.mxu0 %vm333_vm1, %v7292_v48 }
 0x52a   : > { %20713 = vmatmul.mubr.msk.f32.gmra.mrb[80].mxu0 %vm333_vm1, %v7293_v18 }
 0x52b   : > { %20715 = vmatprep.mubr.msk.f32.mxu0 %vm333_vm1, %v7294_v14 }
 0x52e   : > { %20716 = vmatmul.mubr.msk.f32.gmra.mrb[82].mxu0 %vm333_vm1, %v7295_v16 }
 0x52f   : > { %20718 = vmatprep.mubr.msk.f32.mxu0 %vm333_vm1, %v7296_v62 }
 0x532   : > { %20719 = vmatmul.mubr.msk.f32.gmra.mrb[84].mxu0 %vm333_vm1, %v7297_v46 }
 0x533   : > { %20721 = vmatprep.mubr.msk.f32.mxu0 %vm333_vm1, %v7298_v3 }
 0x536   : > { %20722 = vmatmul.mubr.msk.f32.gmra.mrb[86].mxu0 %vm333_vm1, %v7299_v1 }
 0x537   : > { %20724 = vmatprep.mubr.msk.f32.mxu0 %vm333_vm1, %v7300_v55 }
 0x53a   : > { %20725 = vmatmul.mubr.msk.f32.gmra.mrb[88].mxu0 %vm333_vm1, %v7301_v29 }
 0x53b   : > { %20727 = vmatprep.mubr.msk.f32.mxu0 %vm333_vm1, %v7302_v36 }
 0x53e   : > { %20728 = vmatmul.mubr.msk.f32.gmra.mrb[90].mxu0 %vm333_vm1, %v7303_v50 }
 0x53f   : > { %20730 = vmatprep.mubr.msk.f32.mxu0 %vm333_vm1, %v7304_v2 }
 0x542   : > { %20731 = vmatmul.mubr.msk.f32.gmra.mrb[92].mxu0 %vm333_vm1, %v7305_v22 }
 0x543   : > { %20733 = vmatprep.mubr.msk.f32.mxu0 %vm333_vm1, %v7306_v47 }
 0x546   : > { %20734 = vmatmul.mubr.msk.f32.gmra.mrb[94].mxu0 %vm333_vm1, %v7307_v12 }
 0x59d   : > { %v20190_v61 = vpop.f32.mrb[32].mxu0 }
 0x59e   : > { %v25146_v53 = vadd.f32 %v20190_v61, %v25029_v26  ;;  %v10589_v40 = vpop.f32.mrb[33].mxu0 }
 0x59f   : > { %v25149_v58 = vadd.f32 %v25029_v26, %v10589_v40 }
 0x5a0   : > { %26933 = vst [vmem:[#allocation36_spill] sm:$0xff] %v25146_v53  ;;  %10820 = vst.msk [vmem:[#allocation2 + $0x110] sm:$0xff] %vm333_vm1, %v25146_v53 }
 0x5a1   : > { %26934 = vst [vmem:[#allocation37_spill] sm:$0xff] %v25149_v58  ;;  %10819 = vst.msk [vmem:[#allocation2 + $0x108] sm:$0xff] %vm333_vm1, %v25149_v58  ;;  %v20193_v30 = vpop.f32.mrb[34].mxu0 }
 0x5a2   : > { %v25156_v45 = vadd.f32 %v20193_v30, %v25029_v26  ;;  %v10599_v33 = vpop.f32.mrb[35].mxu0 }
 0x5a3   : > { %v25159_v44 = vadd.f32 %v25029_v26, %v10599_v33 }
 0x5a4   : > { %26935 = vst [vmem:[#allocation38_spill] sm:$0xff] %v25156_v45  ;;  %10822 = vst.msk [vmem:[#allocation2 + $0x130] sm:$0xff] %vm333_vm1, %v25156_v45 }
 0x5a5   : > { %26936 = vst [vmem:[#allocation39_spill] sm:$0xff] %v25159_v44  ;;  %10821 = vst.msk [vmem:[#allocation2 + $0x128] sm:$0xff] %vm333_vm1, %v25159_v44  ;;  %v20196_v17 = vpop.f32.mrb[36].mxu0 }
 0x5a6   : > { %v25166_v54 = vadd.f32 %v20196_v17, %v25029_v26  ;;  %v10609_v13 = vpop.f32.mrb[37].mxu0 }
 0x5a7   : > { %v25169_v56 = vadd.f32 %v25029_v26, %v10609_v13  ;;  %v10896_v4 = vld [vmem:[#allocation2 + $0x110] sm:$0xff] }
 0x5a8   : > { %26937 = vst [vmem:[#allocation35_spill] sm:$0xff] %v25166_v54  ;;  %10824 = vst.msk [vmem:[#allocation2 + $0x150] sm:$0xff] %vm333_vm1, %v25166_v54  ;;  %v10895_v5 = vld [vmem:[#allocation2 + $0x108] sm:$0xff] }
 0x5a9   : > { %26938 = vst [vmem:[#allocation49_spill] sm:$0xff] %v25169_v56  ;;  %10823 = vst.msk [vmem:[#allocation2 + $0x148] sm:$0xff] %vm333_vm1, %v25169_v56  ;;  %v20199_v8 = vpop.f32.mrb[38].mxu0  ;;  %20253 = vmatprep.mubr.msk.f32.mxu1 %vm333_vm1, %v10895_v5 }
 0x5aa   : > { %v25177_v20 = vadd.f32 %v20199_v8, %v25029_v26  ;;  %v10619_v59 = vpop.f32.mrb[39].mxu0  ;;  %20254 = vmatmul.mubr.msk.f32.gmra.mrb[58].mxu1 %vm333_vm1, %v10896_v4 }
 0x5ab   : > { %v25181_v37 = vadd.f32 %v25029_v26, %v10619_v59  ;;  %v25191_v31 = vld [vmem:[#allocation2 + $0x130] sm:$0xff] }
 0x5ac   : > { %26939 = vst [vmem:[#allocation51_spill] sm:$0xff] %v25177_v20  ;;  %10826 = vst.msk [vmem:[#allocation2 + $0x170] sm:$0xff] %vm333_vm1, %v25177_v20  ;;  %v25185_v0 = vld [vmem:[#allocation2 + $0x128] sm:$0xff] }
 0x5ad   : > { %26940 = vst [vmem:[#allocation53_spill] sm:$0xff] %v25181_v37  ;;  %10825 = vst.msk [vmem:[#allocation2 + $0x168] sm:$0xff] %vm333_vm1, %v25181_v37  ;;  %v20202_v21 = vpop.f32.mrb[40].mxu0  ;;  %20256 = vmatprep.mubr.msk.f32.mxu1 %vm333_vm1, %v25185_v0 }
 0x5ae   : > { %v25194_v60 = vadd.f32 %v20202_v21, %v25029_v26  ;;  %v10629_v42 = vpop.f32.mrb[41].mxu0  ;;  %20257 = vmatmul.mubr.msk.f32.gmra.mrb[60].mxu1 %vm333_vm1, %v25191_v31 }
 0x5af   : > { %v25199_v27 = vadd.f32 %v25029_v26, %v10629_v42  ;;  %v25209_v63 = vld [vmem:[#allocation2 + $0x150] sm:$0xff]  ;;  %v10852_v42 = vld [vmem:[#allocation2 + $0x63] sm:$0xff] }
 0x5b0   : > { %26941 = vst [vmem:[#allocation55_spill] sm:$0xff] %v25194_v60  ;;  %10828 = vst.msk [vmem:[#allocation2 + $0x190] sm:$0xff] %vm333_vm1, %v25194_v60  ;;  %v25203_v41 = vld [vmem:[#allocation2 + $0x148] sm:$0xff] }
 0x5b1   : > { %26942 = vst [vmem:[#allocation57_spill] sm:$0xff] %v25199_v27  ;;  %10827 = vst.msk [vmem:[#allocation2 + $0x188] sm:$0xff] %vm333_vm1, %v25199_v27  ;;  %v20205_v35 = vpop.f32.mrb[42].mxu0  ;;  %20259 = vmatprep.mubr.msk.f32.mxu1 %vm333_vm1, %v25203_v41 }
 0x5b2   : > { %v25212_v38 = vadd.f32 %v20205_v35, %v25029_v26  ;;  %v10639_v23 = vpop.f32.mrb[43].mxu0  ;;  %20260 = vmatmul.mubr.msk.f32.gmra.mrb[62].mxu1 %vm333_vm1, %v25209_v63 }
 0x5b3   : > { %v25217_v15 = vadd.f32 %v25029_v26, %v10639_v23  ;;  %v25227_v49 = vld [vmem:[#allocation2 + $0x170] sm:$0xff] }
 0x5b4   : > { %26943 = vst [vmem:[#allocation59_spill] sm:$0xff] %v25212_v38  ;;  %10830 = vst.msk [vmem:[#allocation2 + $0x1b0] sm:$0xff] %vm333_vm1, %v25212_v38  ;;  %v25221_v24 = vld [vmem:[#allocation2 + $0x168] sm:$0xff] }
 0x5b5   : > { %26944 = vst [vmem:[#allocation68_spill] sm:$0xff] %v25217_v15  ;;  %10829 = vst.msk [vmem:[#allocation2 + $0x1a8] sm:$0xff] %vm333_vm1, %v25217_v15  ;;  %v20208_v32 = vpop.f32.mrb[44].mxu0  ;;  %20262 = vmatprep.mubr.msk.f32.mxu1 %vm333_vm1, %v25221_v24  ;;  %v17482_v15 = vld [vmem:[%s21999_s18 + $0x230] sm:$0xff] }
 0x5b6   : > { %v25230_v52 = vadd.f32 %v20208_v32, %v25029_v26  ;;  %v10649_v48 = vpop.f32.mrb[45].mxu0  ;;  %20263 = vmatmul.mubr.msk.f32.gmra.mrb[64].mxu1 %vm333_vm1, %v25227_v49 }
 0x5b7   : > { %v25235_v9 = vadd.f32 %v25029_v26, %v10649_v48  ;;  %v25245_v19 = vld [vmem:[#allocation2 + $0x190] sm:$0xff] }
 0x5b8   : > { %26945 = vst [vmem:[#allocation70_spill] sm:$0xff] %v25230_v52  ;;  %10832 = vst.msk [vmem:[#allocation2 + $0x1d0] sm:$0xff] %vm333_vm1, %v25230_v52  ;;  %v25239_v25 = vld [vmem:[#allocation2 + $0x188] sm:$0xff] }
 0x5b9   : > { %26946 = vst [vmem:[#allocation73_spill] sm:$0xff] %v25235_v9  ;;  %10831 = vst.msk [vmem:[#allocation2 + $0x1c8] sm:$0xff] %vm333_vm1, %v25235_v9  ;;  %v20211_v18 = vpop.f32.mrb[46].mxu0  ;;  %20265 = vmatprep.mubr.msk.f32.mxu1 %vm333_vm1, %v25239_v25  ;;  %v17480_v9 = vld [vmem:[%s21999_s18 + $0x210] sm:$0xff] }
 0x5ba   : > { %v25248_v34 = vadd.f32 %v20211_v18, %v25029_v26  ;;  %v10659_v14 = vpop.f32.mrb[47].mxu0  ;;  %20266 = vmatmul.mubr.msk.f32.gmra.mrb[66].mxu1 %vm333_vm1, %v25245_v19 }
 0x5bb   : > { %v25253_v51 = vadd.f32 %v25029_v26, %v10659_v14  ;;  %v25263_v62 = vld [vmem:[#allocation2 + $0x1b0] sm:$0xff] }
 0x5bc   : > { %26947 = vst [vmem:[#allocation41_spill] sm:$0xff] %v25248_v34  ;;  %10834 = vst.msk [vmem:[#allocation2 + $0x1f0] sm:$0xff] %vm333_vm1, %v25248_v34  ;;  %v25257_v16 = vld [vmem:[#allocation2 + $0x1a8] sm:$0xff] }
 0x5bd   : > { %26948 = vst [vmem:[#allocation40_spill] sm:$0xff] %v25253_v51  ;;  %10833 = vst.msk [vmem:[#allocation2 + $0x1e8] sm:$0xff] %vm333_vm1, %v25253_v51  ;;  %v20214_v57 = vpop.f32.mrb[48].mxu0  ;;  %20268 = vmatprep.mubr.msk.f32.mxu1 %vm333_vm1, %v25257_v16  ;;  %v10853_v14 = vld [vmem:[#allocation2 + $0x6b] sm:$0xff] }
 0x5be   : > { %v25266_v6 = vadd.f32 %v20214_v57, %v25029_v26  ;;  %v10669_v46 = vpop.f32.mrb[49].mxu0  ;;  %20269 = vmatmul.mubr.msk.f32.gmra.mrb[68].mxu1 %vm333_vm1, %v25263_v62  ;;  %v10854_v57 = vld [vmem:[#allocation2 + $0x83] sm:$0xff] }
 0x5bf   : > { %v25271_v39 = vadd.f32 %v25029_v26, %v10669_v46  ;;  %v25281_v1 = vld [vmem:[#allocation2 + $0x1d0] sm:$0xff] }
 0x5c0   : > { %26949 = vst [vmem:[#allocation43_spill] sm:$0xff] %v25266_v6  ;;  %10836 = vst.msk [vmem:[#allocation2 + $0x210] sm:$0xff] %vm333_vm1, %v25266_v6  ;;  %v25275_v3 = vld [vmem:[#allocation2 + $0x1c8] sm:$0xff] }
 0x5c1   : > { %26950 = vst [vmem:[#allocation42_spill] sm:$0xff] %v25271_v39  ;;  %10835 = vst.msk [vmem:[#allocation2 + $0x208] sm:$0xff] %vm333_vm1, %v25271_v39  ;;  %v20217_v10 = vpop.f32.mrb[50].mxu0  ;;  %20271 = vmatprep.mubr.msk.f32.mxu1 %vm333_vm1, %v25275_v3  ;;  %v25552_v27 = vld [vmem:[#allocation2 + $0x1cb] sm:$0xff] }
 0x5c2   : > { %v25284_v11 = vadd.f32 %v20217_v10, %v25029_v26  ;;  %v10679_v55 = vpop.f32.mrb[51].mxu0  ;;  %20272 = vmatmul.mubr.msk.f32.gmra.mrb[70].mxu1 %vm333_vm1, %v25281_v1  ;;  %v25371_v10 = vld [vmem:[%s26601_s5 + $0xc] sm:$0xf] }
 0x5c3   : > { %v25289_v7 = vadd.f32 %v25029_v26, %v10679_v55  ;;  %v25299_v43 = vld [vmem:[#allocation2 + $0x1f0] sm:$0xff] }
 0x5c4   : > { %26951 = vst [vmem:[#allocation45_spill] sm:$0xff] %v25284_v11  ;;  %10838 = vst.msk [vmem:[#allocation2 + $0x230] sm:$0xff] %vm333_vm1, %v25284_v11  ;;  %v25293_v29 = vld [vmem:[#allocation2 + $0x1e8] sm:$0xff] }
 0x5c5   : > { %26952 = vst [vmem:[#allocation44_spill] sm:$0xff] %v25289_v7  ;;  %10837 = vst.msk [vmem:[#allocation2 + $0x228] sm:$0xff] %vm333_vm1, %v25289_v7  ;;  %v20220_v36 = vpop.f32.mrb[52].mxu0  ;;  %20274 = vmatprep.mubr.msk.f32.mxu1 %vm333_vm1, %v25293_v29  ;;  %v17467_v7 = vld [vmem:[%s21999_s18 + $0x148] sm:$0xff] }
 0x5c6   : > { %v25302_v50 = vadd.f32 %v20220_v36, %v25029_v26  ;;  %v10689_v2 = vpop.f32.mrb[53].mxu0  ;;  %20275 = vmatmul.mubr.msk.f32.gmra.mrb[72].mxu1 %vm333_vm1, %v25299_v43  ;;  %v25570_v37 = vld [vmem:[#allocation2 + $0x1eb] sm:$0xff] }
 0x5c7   : > { %v25307_v22 = vadd.f32 %v25029_v26, %v10689_v2  ;;  %v25317_v61 = vld [vmem:[#allocation2 + $0x210] sm:$0xff] }
 0x5c8   : > { %26953 = vst [vmem:[#allocation47_spill] sm:$0xff] %v25302_v50  ;;  %10840 = vst.msk [vmem:[#allocation2 + $0x250] sm:$0xff] %vm333_vm1, %v25302_v50  ;;  %v25311_v47 = vld [vmem:[#allocation2 + $0x208] sm:$0xff] }
 0x5c9   : > { %26954 = vst [vmem:[#allocation46_spill] sm:$0xff] %v25307_v22  ;;  %10839 = vst.msk [vmem:[#allocation2 + $0x248] sm:$0xff] %vm333_vm1, %v25307_v22  ;;  %v20223_v12 = vpop.f32.mrb[54].mxu0  ;;  %20277 = vmatprep.mubr.msk.f32.mxu1 %vm333_vm1, %v25311_v47  ;;  %v17465_v22 = vld [vmem:[%s21999_s18 + $0x128] sm:$0xff] }
 0x5ca   : > { %v25320_v40 = vadd.f32 %v20223_v12, %v25029_v26  ;;  %v10699_v30 = vpop.f32.mrb[55].mxu0  ;;  %20278 = vmatmul.mubr.msk.f32.gmra.mrb[74].mxu1 %vm333_vm1, %v25317_v61  ;;  %v10855_v12 = vld [vmem:[#allocation2 + $0x8b] sm:$0xff] }
 0x5cb   : > { %v25325_v33 = vadd.f32 %v25029_v26, %v10699_v30  ;;  %v25335_v5 = vld [vmem:[#allocation2 + $0x230] sm:$0xff]  ;;  %v10856_v30 = vld [vmem:[#allocation2 + $0xa3] sm:$0xff] }
 0x5cc   : > { %26955 = vst [vmem:[#allocation50_spill] sm:$0xff] %v25320_v40  ;;  %10842 = vst.msk [vmem:[#allocation2 + $0x270] sm:$0xff] %vm333_vm1, %v25320_v40  ;;  %v25329_v17 = vld [vmem:[#allocation2 + $0x228] sm:$0xff]  ;;  %v26971_v40 = vld [vmem:[#allocation14_spill] sm:$0xff] }
 0x5cd   : > { %26956 = vst [vmem:[#allocation48_spill] sm:$0xff] %v25325_v33  ;;  %10841 = vst.msk [vmem:[#allocation2 + $0x268] sm:$0xff] %vm333_vm1, %v25325_v33  ;;  %v20226_v13 = vpop.f32.mrb[56].mxu0  ;;  %20280 = vmatprep.mubr.msk.f32.mxu1 %vm333_vm1, %v25329_v17  ;;  %v14373_v33 = vmax.f32 %v26971_v40, 0.0  ;;  %v25588_v56 = vld [vmem:[#allocation2 + $0x20b] sm:$0xff] }
 0x5ce   : > { %26957 = vst [vmem:[#allocation54_spill] sm:$0xff] %v25335_v5  ;;  %v25338_v8 = vadd.f32 %v20226_v13, %v25029_v26  ;;  %v10709_v4 = vpop.f32.mrb[57].mxu0  ;;  %20281 = vmatmul.mubr.msk.f32.gmra.mrb[76].mxu1 %vm333_vm1, %v25335_v5  ;;  %v25606_v44 = vld [vmem:[#allocation2 + $0x22b] sm:$0xff] }
 0x5cf   : > { %v25343_v59 = vadd.f32 %v25029_v26, %v10709_v4  ;;  %v25353_v23 = vld [vmem:[#allocation2 + $0x250] sm:$0xff] }
 0x5d0   : > { %26958 = vst [vmem:[#allocation52_spill] sm:$0xff] %v25338_v8  ;;  %10844 = vst.msk [vmem:[#allocation2 + $0x290] sm:$0xff] %vm333_vm1, %v25338_v8  ;;  %v25347_v21 = vld [vmem:[#allocation2 + $0x248] sm:$0xff] }
 0x5d1   : > { %26959 = vst [vmem:[#allocation58_spill] sm:$0xff] %v25343_v59  ;;  %26960 = vst [vmem:[#allocation56_spill] sm:$0xff] %v25347_v21  ;;  %v20229_v35 = vpop.f32.mrb[58].mxu0  ;;  %20283 = vmatprep.mubr.msk.f32.mxu1 %vm333_vm1, %v25347_v21  ;;  %v10860_v8 = vld [vmem:[#allocation2 + $0xe3] sm:$0xff]  ;;  %v17492_v21 = vld [vmem:[%s21999_s18 + $0x2d0] sm:$0xff] }
 0x5d2   : > { %10843 = vst.msk [vmem:[#allocation2 + $0x288] sm:$0xff] %vm333_vm1, %v25343_v59  ;;  %26961 = vst [vmem:[#allocation61_spill] sm:$0xff] %v25353_v23  ;;  %v25356_v32 = vadd.f32 %v20229_v35, %v25029_v26  ;;  %v10719_v48 = vpop.f32.mrb[59].mxu0  ;;  %20284 = vmatmul.mubr.msk.f32.gmra.mrb[78].mxu1 %vm333_vm1, %v25353_v23  ;;  %v25400_v35 = vld [vmem:[%s26604_s8] ss:$0 sm:$0xff]  ;;  %v25624_v23 = vld [vmem:[#allocation2 + $0x24b] sm:$0xff] }
 0x5d3   : > { %v25361_v18 = vadd.f32 %v25029_v26, %v10719_v48  ;;  %20288 = vmatprep.mubr.msk.f32.mxu1 %vm333_vm1, %v10852_v42  ;;  %v10857_v48 = vld [vmem:[#allocation2 + $0xab] sm:$0xff] }
 0x5d4   : > { %26962 = vst [vmem:[#allocation60_spill] sm:$0xff] %v25356_v32  ;;  %10846 = vst.msk [vmem:[#allocation2 + $0x2b0] sm:$0xff] %vm333_vm1, %v25356_v32  ;;  %v26970_v32 = vld [vmem:[#allocation13_spill] sm:$0xff] }
 0x5d5   : > { %26963 = vst [vmem:[#allocation63_spill] sm:$0xff] %v25361_v18  ;;  %10845 = vst.msk [vmem:[#allocation2 + $0x2a8] sm:$0xff] %vm333_vm1, %v25361_v18  ;;  %v20232_v46 = vpop.f32.mrb[60].mxu0  ;;  %v14374_v18 = vmax.f32 %v26970_v32, 0.0 }
 0x5d6   : > { %v25374_v55 = vadd.f32 %v20232_v46, %v25029_v26  ;;  %v10729_v36 = vpop.f32.mrb[61].mxu0  ;;  %20289 = vmatmul.mubr.msk.f32.vlgmr.msra.gmra.mrb[48].mxu1 %vm333_vm1, %v10853_v14  ;;  %v26968_v14 = vld [vmem:[#allocation11_spill] sm:$0xff] }
 0x5d7   : > { %v25378_v2 = vadd.f32 %v25029_v26, %v10729_v36  ;;  %20337 = vmatpush3.msk.msra.mxu1 %vm626_vm0, %v25141_v28  ;;  %20291 = vmatprep.mubr.msk.f32.mxu1 %vm333_vm1, %v10854_v57  ;;  %v14372_v57 = vmax.f32 %v26968_v14, 0.0  ;;  %v10858_v46 = vld [vmem:[#allocation2 + $0xc3] sm:$0xff]  ;;  %v17464_v36 = vld [vmem:[%s21999_s18 + $0x110] sm:$0xff] }
 0x5d8   : > { %26964 = vst [vmem:[#allocation62_spill] sm:$0xff] %v25374_v55  ;;  %10848 = vst.msk [vmem:[#allocation2 + $0x2d0] sm:$0xff] %vm333_vm1, %v25374_v55  ;;  %20386 = vmatprep.subr.msk.mxu1 %vm626_vm0, %v25371_v10 }
 0x5d9   : > { %26965 = vst [vmem:[#allocation65_spill] sm:$0xff] %v25378_v2  ;;  %10847 = vst.msk [vmem:[#allocation2 + $0x2c8] sm:$0xff] %vm333_vm1, %v25378_v2  ;;  %v20235_v13 = vpop.f32.mrb[62].mxu0  ;;  %v14404_v2 = vadd.f32 %v17464_v36, %v14372_v57  ;;  %v10861_v36 = vld [vmem:[#allocation2 + $0xeb] sm:$0xff] }
 0x5da   : > { %v25390_v4 = vadd.f32 %v20235_v13, %v25029_v26  ;;  %v10739_v28 = vpop.f32.mrb[63].mxu0  ;;  %20292 = vmatmul.mubr.msk.f32.gmra.mrb[50].mxu1 %vm333_vm1, %v10855_v12  ;;  %v26969_v13 = vld [vmem:[#allocation12_spill] sm:$0xff] }
 0x5db   : > { %v25394_v42 = vadd.f32 %v25029_v26, %v10739_v28  ;;  %20294 = vmatprep.mubr.msk.f32.mxu1 %vm333_vm1, %v10856_v30  ;;  %v14371_v12 = vmax.f32 %v26969_v13, 0.0  ;;  %v17463_v30 = vld [vmem:[%s21999_s18 + $0x108] sm:$0xff] }
 0x5dc   : > { %26966 = vst [vmem:[#allocation64_spill] sm:$0xff] %v25390_v4  ;;  %10850 = vst.msk [vmem:[#allocation2 + $0x2f0] sm:$0xff] %vm333_vm1, %v25390_v4  ;;  %v10859_v4 = vld [vmem:[#allocation2 + $0xcb] sm:$0xff] }
 0x5dd   : > { %26967 = vst [vmem:[#allocation67_spill] sm:$0xff] %v25394_v42  ;;  %10849 = vst.msk [vmem:[#allocation2 + $0x2e8] sm:$0xff] %vm333_vm1, %v25394_v42  ;;  %v20690_v26 = vpop.f32.mrb[64].mxu0  ;;  %v14403_v59 = vadd.f32 %v17463_v30, %v14371_v12  ;;  %v17466_v42 = vld [vmem:[%s21999_s18 + $0x130] sm:$0xff]  ;;  %v26974_v12 = vld [vmem:[#allocation15_spill] sm:$0xff] }
 0x5de   : > { %v14612_v28 = vadd.f32 %v20690_v26, %v25400_v35  ;;  %20295 = vmatmul.mubr.msk.f32.gmra.mrb[52].mxu1 %vm333_vm1, %v10857_v48  ;;  %v14606_v55 = vpop.f32.mrb[65].mxu0  ;;  %v14406_v40 = vadd.f32 %v17466_v42, %v14374_v18  ;;  %v14376_v30 = vmax.f32 %v26974_v12, 0.0 }
 0x5df   : > { %v14607_v14 = vadd.f32 %v25400_v35, %v14606_v55  ;;  %20297 = vmatprep.mubr.msk.f32.mxu1 %vm333_vm1, %v10858_v46 }
 0x5e0   : > { %v14766_v13 = vmax.f32 %v14612_v28, 0.0 }
 0x5e1   : > { %v14765_v50 = vmax.f32 %v14607_v14, 0.0  ;;  %v20693_v26 = vpop.f32.mrb[66].mxu0  ;;  %v14405_v14 = vadd.f32 %v17465_v22, %v14373_v33  ;;  %v26978_v33 = vld [vmem:[#allocation17_spill] sm:$0xff] }
 0x5e2   : > { %v25418_v48 = vadd.f32 %v14766_v13, %v14404_v2  ;;  %v14622_v55 = vadd.f32 %v20693_v26, %v25400_v35  ;;  %20298 = vmatmul.mubr.msk.f32.gmra.mrb[54].mxu1 %vm333_vm1, %v10859_v4  ;;  %v14616_v57 = vpop.f32.mrb[67].mxu0  ;;  %v17468_v2 = vld [vmem:[%s21999_s18 + $0x150] sm:$0xff]  ;;  %v26975_v13 = vld [vmem:[#allocation16_spill] sm:$0xff] }
 0x5e3   : > { %v25422_v46 = vadd.f32 %v14765_v50, %v14403_v59  ;;  %v14617_v32 = vadd.f32 %v25400_v35, %v14616_v57  ;;  %20300 = vmatprep.mubr.msk.f32.mxu1 %vm333_vm1, %v10860_v8  ;;  %v25434_v8 = vld [vmem:[#allocation2 + $0x103] sm:$0xff]  ;;  %v14408_v22 = vadd.f32 %v17468_v2, %v14376_v30 }
 0x5e4   : > { %26972 = vst [vmem:[#allocation66_spill] sm:$0xff] %v25418_v48  ;;  %v14768_v28 = vmax.f32 %v14622_v55, 0.0  ;;  %v14375_v48 = vmax.f32 %v26975_v13, 0.0  ;;  %v14378_v55 = vmax.f32 %v26978_v33, 0.0  ;;  %v25443_v13 = vld [vmem:[#allocation2 + $0x10b] sm:$0xff]  ;;  %v25450_v2 = vld [vmem:[#allocation2 + $0x123] sm:$0xff] }
 0x5e5   : > { %26973 = vst [vmem:[#allocation71_spill] sm:$0xff] %v25422_v46  ;;  %v14767_v11 = vmax.f32 %v14617_v32, 0.0  ;;  %v20696_v26 = vpop.f32.mrb[68].mxu0  ;;  %v21902_v33 = vld [vmem:[%s21999_s18 + $0x168] sm:$0xff] }
 0x5e6   : > { %v25430_v4 = vadd.f32 %v14768_v28, %v14406_v40  ;;  %v14632_v50 = vadd.f32 %v20696_v26, %v25400_v35  ;;  %20301 = vmatmul.mubr.msk.f32.gmra.mrb[56].mxu1 %vm333_vm1, %v10861_v36  ;;  %v14626_v59 = vpop.f32.mrb[69].mxu0  ;;  %v14407_v32 = vadd.f32 %v17467_v7, %v14375_v48  ;;  %v26979_v40 = vld [vmem:[#allocation18_spill] sm:$0xff]  ;;  %v21901_v48 = vld [vmem:[%s21999_s18 + $0x170] sm:$0xff] }
 0x5e7   : > { %v25436_v18 = vadd.f32 %v14767_v11, %v14405_v14  ;;  %v14627_v42 = vadd.f32 %v25400_v35, %v14626_v59  ;;  %20303 = vmatprep.mubr.msk.f32.mxu1 %vm333_vm1, %v25434_v8  ;;  %v14377_v12 = vmax.f32 %v26979_v40, 0.0  ;;  %v26982_v59 = vld [vmem:[#allocation19_spill] sm:$0xff]  ;;  %v26983_v40 = vld [vmem:[#allocation20_spill] sm:$0xff] }
 0x5e8   : > { %26976 = vst [vmem:[#allocation69_spill] sm:$0xff] %v25430_v4  ;;  %v14770_v57 = vmax.f32 %v14632_v50, 0.0  ;;  %v14410_v50 = vadd.f32 %v21901_v48, %v14378_v55  ;;  %v25468_v48 = vld [vmem:[#allocation2 + $0x143] sm:$0xff] }
 0x5e9   : > { %26977 = vst [vmem:[#allocation74_spill] sm:$0xff] %v25436_v18  ;;  %v14769_v36 = vmax.f32 %v14627_v42, 0.0  ;;  %v20699_v28 = vpop.f32.mrb[70].mxu0  ;;  %v14380_v42 = vmax.f32 %v26982_v59, 0.0 }
 0x5ea   : > { %v25445_v11 = vadd.f32 %v14770_v57, %v14408_v22  ;;  %v14642_v14 = vadd.f32 %v20699_v28, %v25400_v35  ;;  %20304 = vmatmul.mubr.msk.f32.gmra.mrb[58].mxu1 %vm333_vm1, %v25443_v13  ;;  %v14636_v30 = vpop.f32.mrb[71].mxu0  ;;  %v14409_v57 = vadd.f32 %v21902_v33, %v14377_v12  ;;  %v14379_v28 = vmax.f32 %v26983_v40, 0.0  ;;  %v26986_v33 = vld [vmem:[#allocation21_spill] sm:$0xff] }
 0x5eb   : > { %v25452_v26 = vadd.f32 %v14769_v36, %v14407_v32  ;;  %v14637_v7 = vadd.f32 %v25400_v35, %v14636_v30  ;;  %20306 = vmatprep.mubr.msk.f32.mxu1 %vm333_vm1, %v25450_v2  ;;  %v25461_v32 = vld [vmem:[#allocation2 + $0x12b] sm:$0xff] }
 0x5ec   : > { %26980 = vst [vmem:[#allocation72_spill] sm:$0xff] %v25445_v11  ;;  %v14772_v22 = vmax.f32 %v14642_v14, 0.0 }
 0x5ed   : > { %26981 = vst [vmem:[#allocation75_spill] sm:$0xff] %v25452_v26  ;;  %v14771_v11 = vmax.f32 %v14637_v7, 0.0  ;;  %v20702_v18 = vpop.f32.mrb[72].mxu0  ;;  %v21903_v7 = vld [vmem:[%s21999_s18 + $0x190] sm:$0xff] }
 0x5ee   : > { %v25463_v36 = vadd.f32 %v14772_v22, %v14410_v50  ;;  %v14652_v30 = vadd.f32 %v20702_v18, %v25400_v35  ;;  %20307 = vmatmul.mubr.msk.f32.gmra.mrb[60].mxu1 %vm333_vm1, %v25461_v32  ;;  %v14646_v55 = vpop.f32.mrb[73].mxu0  ;;  %v14412_v59 = vadd.f32 %v21903_v7, %v14380_v42  ;;  %v14382_v50 = vmax.f32 %v26986_v33, 0.0  ;;  %v21904_v18 = vld [vmem:[%s21999_s18 + $0x188] sm:$0xff]  ;;  %v26990_v33 = vld [vmem:[#allocation23_spill] sm:$0xff] }
 0x5ef   : > { %v25470_v14 = vadd.f32 %v14771_v11, %v14409_v57  ;;  %v14647_v12 = vadd.f32 %v25400_v35, %v14646_v55  ;;  %20309 = vmatprep.mubr.msk.f32.mxu1 %vm333_vm1, %v25468_v48  ;;  %v14411_v40 = vadd.f32 %v21904_v18, %v14379_v28  ;;  %v25479_v11 = vld [vmem:[#allocation2 + $0x14b] sm:$0xff]  ;;  %v25486_v7 = vld [vmem:[#allocation2 + $0x163] sm:$0xff] }
 0x5f0   : > { %26984 = vst [vmem:[#allocation11_spill] sm:$0xff] %v25463_v36  ;;  %v14774_v22 = vmax.f32 %v14652_v30, 0.0  ;;  %v26987_v36 = vld [vmem:[#allocation22_spill] sm:$0xff] }
 0x5f1   : > { %26985 = vst [vmem:[#allocation12_spill] sm:$0xff] %v25470_v14  ;;  %v14381_v26 = vmax.f32 %v26987_v36, 0.0  ;;  %v14773_v4 = vmax.f32 %v14647_v12, 0.0  ;;  %v20705_v46 = vpop.f32.mrb[74].mxu0  ;;  %v21905_v36 = vld [vmem:[%s21999_s18 + $0x1b0] sm:$0xff] }
 0x5f2   : > { %v25481_v57 = vadd.f32 %v14774_v22, %v14412_v59  ;;  %v14662_v55 = vadd.f32 %v20705_v46, %v25400_v35  ;;  %20310 = vmatmul.mubr.msk.f32.gmra.mrb[62].mxu1 %vm333_vm1, %v25479_v11  ;;  %v14656_v42 = vpop.f32.mrb[75].mxu0  ;;  %v14414_v12 = vadd.f32 %v21905_v36, %v14382_v50  ;;  %v14384_v59 = vmax.f32 %v26990_v33, 0.0  ;;  %v21906_v46 = vld [vmem:[%s21999_s18 + $0x1a8] sm:$0xff]  ;;  %v26994_v33 = vld [vmem:[#allocation25_spill] sm:$0xff] }
 0x5f3   : > { %v25488_v30 = vadd.f32 %v14773_v4, %v14411_v40  ;;  %v14657_v28 = vadd.f32 %v25400_v35, %v14656_v42  ;;  %20312 = vmatprep.mubr.msk.f32.mxu1 %vm333_vm1, %v25486_v7  ;;  %v14413_v18 = vadd.f32 %v21906_v46, %v14381_v26  ;;  %v25497_v4 = vld [vmem:[#allocation2 + $0x16b] sm:$0xff]  ;;  %v25504_v36 = vld [vmem:[#allocation2 + $0x183] sm:$0xff] }
 0x5f4   : > { %26988 = vst [vmem:[#allocation13_spill] sm:$0xff] %v25481_v57  ;;  %v14776_v22 = vmax.f32 %v14662_v55, 0.0  ;;  %v26991_v57 = vld [vmem:[#allocation24_spill] sm:$0xff] }
 0x5f5   : > { %26989 = vst [vmem:[#allocation14_spill] sm:$0xff] %v25488_v30  ;;  %v14383_v14 = vmax.f32 %v26991_v57, 0.0  ;;  %v14775_v6 = vmax.f32 %v14657_v28, 0.0  ;;  %v20708_v39 = vpop.f32.mrb[76].mxu0  ;;  %v21907_v57 = vld [vmem:[%s21999_s18 + $0x1d0] sm:$0xff] }
 0x5f6   : > { %v25499_v40 = vadd.f32 %v14776_v22, %v14414_v12  ;;  %v14672_v42 = vadd.f32 %v20708_v39, %v25400_v35  ;;  %20313 = vmatmul.mubr.msk.f32.gmra.mrb[64].mxu1 %vm333_vm1, %v25497_v4  ;;  %v14666_v50 = vpop.f32.mrb[77].mxu0  ;;  %v14416_v28 = vadd.f32 %v21907_v57, %v14384_v59  ;;  %v14386_v12 = vmax.f32 %v26994_v33, 0.0  ;;  %v21908_v39 = vld [vmem:[%s21999_s18 + $0x1c8] sm:$0xff] }
 0x5f7   : > { %v25506_v55 = vadd.f32 %v14775_v6, %v14413_v18  ;;  %v14667_v26 = vadd.f32 %v25400_v35, %v14666_v50  ;;  %20315 = vmatprep.mubr.msk.f32.mxu1 %vm333_vm1, %v25504_v36  ;;  %v14415_v46 = vadd.f32 %v21908_v39, %v14383_v14  ;;  %v25515_v6 = vld [vmem:[#allocation2 + $0x18b] sm:$0xff]  ;;  %v25522_v57 = vld [vmem:[#allocation2 + $0x1a3] sm:$0xff] }
 0x5f8   : > { %26992 = vst [vmem:[#allocation15_spill] sm:$0xff] %v25499_v40  ;;  %v14778_v22 = vmax.f32 %v14672_v42, 0.0  ;;  %v26995_v40 = vld [vmem:[#allocation26_spill] sm:$0xff] }
 0x5f9   : > { %26993 = vst [vmem:[#allocation16_spill] sm:$0xff] %v25506_v55  ;;  %v14385_v30 = vmax.f32 %v26995_v40, 0.0  ;;  %v14777_v34 = vmax.f32 %v14667_v26, 0.0  ;;  %v20711_v51 = vpop.f32.mrb[78].mxu0  ;;  %v21909_v40 = vld [vmem:[%s21999_s18 + $0x1f0] sm:$0xff] }
 0x5fa   : > { %v25517_v18 = vadd.f32 %v14778_v22, %v14416_v28  ;;  %v14682_v50 = vadd.f32 %v20711_v51, %v25400_v35  ;;  %20316 = vmatmul.mubr.msk.f32.gmra.mrb[66].mxu1 %vm333_vm1, %v25515_v6  ;;  %v14676_v59 = vpop.f32.mrb[79].mxu0  ;;  %v14418_v26 = vadd.f32 %v21909_v40, %v14386_v12  ;;  %v26998_v28 = vld [vmem:[#allocation27_spill] sm:$0xff]  ;;  %v21910_v51 = vld [vmem:[%s21999_s18 + $0x1e8] sm:$0xff] }
 0x5fb   : > { %v25524_v42 = vadd.f32 %v14777_v34, %v14415_v46  ;;  %v14677_v14 = vadd.f32 %v25400_v35, %v14676_v59  ;;  %20318 = vmatprep.mubr.msk.f32.mxu1 %vm333_vm1, %v25522_v57  ;;  %v14388_v33 = vmax.f32 %v26998_v28, 0.0  ;;  %v14417_v39 = vadd.f32 %v21910_v51, %v14385_v30  ;;  %v25534_v34 = vld [vmem:[#allocation2 + $0x1ab] sm:$0xff] }
 0x5fc   : > { %26996 = vst [vmem:[#allocation17_spill] sm:$0xff] %v25517_v18  ;;  %v14780_v22 = vmax.f32 %v14682_v50, 0.0  ;;  %v26999_v18 = vld [vmem:[#allocation29_spill] sm:$0xff]  ;;  %v17479_v12 = vld [vmem:[%s21999_s18 + $0x208] sm:$0xff] }
 0x5fd   : > { %26997 = vst [vmem:[#allocation18_spill] sm:$0xff] %v25524_v42  ;;  %v14387_v55 = vmax.f32 %v26999_v18, 0.0  ;;  %v14779_v52 = vmax.f32 %v14677_v14, 0.0  ;;  %v20714_v38 = vpop.f32.mrb[80].mxu0  ;;  %v25542_v50 = vld [vmem:[#allocation2 + $0x1c3] sm:$0xff]  ;;  %v14420_v28 = vadd.f32 %v17480_v9, %v14388_v33 }
 0x5fe   : > { %v25536_v46 = vadd.f32 %v14780_v22, %v14418_v26  ;;  %v14692_v59 = vadd.f32 %v20714_v38, %v25400_v35  ;;  %20319 = vmatmul.mubr.msk.f32.gmra.mrb[68].mxu1 %vm333_vm1, %v25534_v34  ;;  %v14686_v40 = vpop.f32.mrb[81].mxu0  ;;  %v27002_v14 = vld [vmem:[#allocation31_spill] sm:$0xff]  ;;  %v27003_v38 = vld [vmem:[#allocation33_spill] sm:$0xff] }
 0x5ff   : > { %v25544_v30 = vadd.f32 %v14779_v52, %v14417_v39  ;;  %v14687_v18 = vadd.f32 %v25400_v35, %v14686_v40  ;;  %20321 = vmatprep.mubr.msk.f32.mxu1 %vm333_vm1, %v25542_v50  ;;  %v14390_v26 = vmax.f32 %v27002_v14, 0.0  ;;  %v14389_v51 = vmax.f32 %v27003_v38, 0.0  ;;  %v17481_v40 = vld [vmem:[%s21999_s18 + $0x228] sm:$0xff] }
 0x600   : > { %27000 = vst [vmem:[#allocation19_spill] sm:$0xff] %v25536_v46  ;;  %v14782_v22 = vmax.f32 %v14692_v59, 0.0  ;;  %v14419_v46 = vadd.f32 %v17479_v12, %v14387_v55  ;;  %v25560_v9 = vld [vmem:[#allocation2 + $0x1e3] sm:$0xff]  ;;  %v27006_v59 = vld [vmem:[#allocation34_spill] sm:$0xff] }
 0x601   : > { %27001 = vst [vmem:[#allocation20_spill] sm:$0xff] %v25544_v30  ;;  %v14781_v42 = vmax.f32 %v14687_v18, 0.0  ;;  %v20717_v60 = vpop.f32.mrb[82].mxu0  ;;  %v14392_v12 = vmax.f32 %v27006_v59, 0.0  ;;  %v14422_v18 = vadd.f32 %v17482_v15, %v14390_v26  ;;  %v14421_v38 = vadd.f32 %v17481_v40, %v14389_v51  ;;  %v17484_v30 = vld [vmem:[%s21999_s18 + $0x250] sm:$0xff]  ;;  %v25578_v15 = vld [vmem:[#allocation2 + $0x203] sm:$0xff] }
 0x602   : > { %v25554_v52 = vadd.f32 %v14782_v22, %v14420_v28  ;;  %v14702_v39 = vadd.f32 %v20717_v60, %v25400_v35  ;;  %20322 = vmatmul.mubr.msk.f32.gmra.mrb[70].mxu1 %vm333_vm1, %v25552_v27  ;;  %v14696_v14 = vpop.f32.mrb[83].mxu0  ;;  %v27007_v60 = vld [vmem:[#allocation3_spill] sm:$0xff] }
 0x603   : > { %v25562_v33 = vadd.f32 %v14781_v42, %v14419_v46  ;;  %v14697_v55 = vadd.f32 %v25400_v35, %v14696_v14  ;;  %20324 = vmatprep.mubr.msk.f32.mxu1 %vm333_vm1, %v25560_v9  ;;  %v14391_v22 = vmax.f32 %v27007_v60, 0.0  ;;  %v17483_v14 = vld [vmem:[%s21999_s18 + $0x248] sm:$0xff] }
 0x604   : > { %27004 = vst [vmem:[#allocation21_spill] sm:$0xff] %v25554_v52  ;;  %v14784_v28 = vmax.f32 %v14702_v39, 0.0  ;;  %v27010_v39 = vld [vmem:[#allocation4_spill] sm:$0xff] }
 0x605   : > { %27005 = vst [vmem:[#allocation22_spill] sm:$0xff] %v25562_v33  ;;  %v14783_v52 = vmax.f32 %v14697_v55, 0.0  ;;  %v20720_v20 = vpop.f32.mrb[84].mxu0  ;;  %v14394_v40 = vmax.f32 %v27010_v39, 0.0  ;;  %v14424_v55 = vadd.f32 %v17484_v30, %v14392_v12  ;;  %v14423_v60 = vadd.f32 %v17483_v14, %v14391_v22  ;;  %v17486_v33 = vld [vmem:[%s21999_s18 + $0x270] sm:$0xff]  ;;  %v25596_v30 = vld [vmem:[#allocation2 + $0x223] sm:$0xff] }
 0x606   : > { %v25572_v42 = vadd.f32 %v14784_v28, %v14422_v18  ;;  %v14712_v46 = vadd.f32 %v20720_v20, %v25400_v35  ;;  %20325 = vmatmul.mubr.msk.f32.gmra.mrb[72].mxu1 %vm333_vm1, %v25570_v37  ;;  %v14706_v59 = vpop.f32.mrb[85].mxu0  ;;  %v27011_v20 = vld [vmem:[#allocation32_spill] sm:$0xff] }
 0x607   : > { %v25580_v26 = vadd.f32 %v14783_v52, %v14421_v38  ;;  %v14707_v51 = vadd.f32 %v25400_v35, %v14706_v59  ;;  %20327 = vmatprep.mubr.msk.f32.mxu1 %vm333_vm1, %v25578_v15  ;;  %v14393_v28 = vmax.f32 %v27011_v20, 0.0  ;;  %v17485_v59 = vld [vmem:[%s21999_s18 + $0x268] sm:$0xff] }
 0x608   : > { %27008 = vst [vmem:[#allocation23_spill] sm:$0xff] %v25572_v42  ;;  %v14786_v18 = vmax.f32 %v14712_v46, 0.0  ;;  %v27014_v46 = vld [vmem:[#allocation5_spill] sm:$0xff] }
 0x609   : > { %27009 = vst [vmem:[#allocation24_spill] sm:$0xff] %v25580_v26  ;;  %v14785_v42 = vmax.f32 %v14707_v51, 0.0  ;;  %v20723_v54 = vpop.f32.mrb[86].mxu0  ;;  %v14396_v14 = vmax.f32 %v27014_v46, 0.0  ;;  %v14426_v51 = vadd.f32 %v17486_v33, %v14394_v40  ;;  %v14425_v20 = vadd.f32 %v17485_v59, %v14393_v28  ;;  %v17488_v26 = vld [vmem:[%s21999_s18 + $0x290] sm:$0xff]  ;;  %v25614_v33 = vld [vmem:[#allocation2 + $0x243] sm:$0xff] }
 0x60a   : > { %v25590_v52 = vadd.f32 %v14786_v18, %v14424_v55  ;;  %v14722_v38 = vadd.f32 %v20723_v54, %v25400_v35  ;;  %20328 = vmatmul.mubr.msk.f32.gmra.mrb[74].mxu1 %vm333_vm1, %v25588_v56  ;;  %v14716_v39 = vpop.f32.mrb[87].mxu0  ;;  %v27015_v54 = vld [vmem:[#allocation28_spill] sm:$0xff] }
 0x60b   : > { %v25598_v12 = vadd.f32 %v14785_v42, %v14423_v60  ;;  %v14717_v22 = vadd.f32 %v25400_v35, %v14716_v39  ;;  %20330 = vmatprep.mubr.msk.f32.mxu1 %vm333_vm1, %v25596_v30  ;;  %v14395_v18 = vmax.f32 %v27015_v54, 0.0  ;;  %v17487_v60 = vld [vmem:[%s21999_s18 + $0x288] sm:$0xff] }
 0x60c   : > { %27012 = vst [vmem:[#allocation25_spill] sm:$0xff] %v25590_v52  ;;  %v14788_v55 = vmax.f32 %v14722_v38, 0.0  ;;  %v27018_v38 = vld [vmem:[#allocation30_spill] sm:$0xff] }
 0x60d   : > { %27013 = vst [vmem:[#allocation26_spill] sm:$0xff] %v25598_v12  ;;  %v14787_v52 = vmax.f32 %v14717_v22, 0.0  ;;  %v20726_v45 = vpop.f32.mrb[88].mxu0  ;;  %v14398_v59 = vmax.f32 %v27018_v38, 0.0  ;;  %v14428_v22 = vadd.f32 %v17488_v26, %v14396_v14  ;;  %v14427_v54 = vadd.f32 %v17487_v60, %v14395_v18  ;;  %v17490_v12 = vld [vmem:[%s21999_s18 + $0x2b0] sm:$0xff]  ;;  %v27022_v60 = vld [vmem:[#allocation8_spill] sm:$0xff] }
 0x60e   : > { %v25608_v53 = vadd.f32 %v14788_v55, %v14426_v51  ;;  %v14732_v42 = vadd.f32 %v20726_v45, %v25400_v35  ;;  %20331 = vmatmul.mubr.msk.f32.gmra.mrb[76].mxu1 %vm333_vm1, %v25606_v44  ;;  %v14726_v39 = vpop.f32.mrb[89].mxu0  ;;  %v11567_v45 = vld [vmem:[#allocation2 + $0x6d] sm:$0xff]  ;;  %v27019_v51 = vld [vmem:[#allocation6_spill] sm:$0xff] }
 0x60f   : > { %v25616_v40 = vadd.f32 %v14787_v52, %v14425_v20  ;;  %v14727_v28 = vadd.f32 %v25400_v35, %v14726_v39  ;;  %20333 = vmatprep.mubr.msk.f32.mxu1 %vm333_vm1, %v25614_v33  ;;  %v14397_v55 = vmax.f32 %v27019_v51, 0.0  ;;  %v17489_v39 = vld [vmem:[%s21999_s18 + $0x2a8] sm:$0xff]  ;;  %v11568_v18 = vld [vmem:[#allocation2 + $0x75] sm:$0xff]  ;;  %v14430_v38 = vadd.f32 %v17490_v12, %v14398_v59  ;;  %v27023_v51 = vld [vmem:[#allocation7_spill] sm:$0xff] }
 0x610   : > { %27016 = vst [vmem:[#allocation27_spill] sm:$0xff] %v25608_v53  ;;  %v14790_v46 = vmax.f32 %v14732_v42, 0.0  ;;  %v17491_v12 = vld [vmem:[%s21999_s18 + $0x2c8] sm:$0xff] }
 0x611   : > { %27017 = vst [vmem:[#allocation29_spill] sm:$0xff] %v25616_v40  ;;  %v14789_v53 = vmax.f32 %v14727_v28, 0.0  ;;  %v20729_v58 = vpop.f32.mrb[90].mxu0  ;;  %v14400_v28 = vmax.f32 %v27022_v60, 0.0 }
 0x612   : > { %v25626_v52 = vadd.f32 %v14790_v46, %v14428_v22  ;;  %v14742_v20 = vadd.f32 %v20729_v58, %v25400_v35  ;;  %20334 = vmatmul.mubr.msk.f32.gmra.mrb[78].mxu1 %vm333_vm1, %v25624_v23  ;;  %v14736_v26 = vpop.f32.mrb[91].mxu0  ;;  %v11569_v46 = vld [vmem:[#allocation2 + $0x8d] sm:$0xff]  ;;  %v14399_v58 = vmax.f32 %v27023_v51, 0.0 }
 0x613   : > { %v25632_v14 = vadd.f32 %v14789_v53, %v14427_v54  ;;  %v14737_v42 = vadd.f32 %v25400_v35, %v14736_v26  ;;  %20338 = vmatprep.mubr.msk.f32.mxu1 %vm333_vm1, %v11567_v45  ;;  %v25642_v53 = vld [vmem:[%s26601_s5 + $0x10] sm:$0xf]  ;;  %v14432_v60 = vadd.f32 %v17492_v21, %v14400_v28 }
 0x614   : > { %27020 = vst [vmem:[#allocation31_spill] sm:$0xff] %v25626_v52  ;;  %v14792_v22 = vmax.f32 %v14742_v20, 0.0  ;;  %v14429_v52 = vadd.f32 %v17489_v39, %v14397_v55  ;;  %v11570_v39 = vld [vmem:[#allocation2 + $0x95] sm:$0xff] }
 0x615   : > { %27021 = vst [vmem:[#allocation33_spill] sm:$0xff] %v25632_v14  ;;  %v14791_v40 = vmax.f32 %v14737_v42, 0.0  ;;  %v20732_v5 = vpop.f32.mrb[92].mxu0  ;;  %v27026_v26 = vld [vmem:[#allocation9_spill] sm:$0xff]  ;;  %v17360_v14 = vld [vmem:[%s26601_s5 + $0x18] sm:$0xf] }
 0x616   : > { %v25644_v54 = vadd.f32 %v14792_v22, %v14430_v38  ;;  %v14752_v45 = vadd.f32 %v20732_v5, %v25400_v35  ;;  %20339 = vmatmul.mubr.msk.f32.vlgmr.msra.gmra.mrb[48].mxu1 %vm333_vm1, %v11568_v18  ;;  %v14746_v59 = vpop.f32.mrb[93].mxu0  ;;  %v14402_v42 = vmax.f32 %v27026_v26, 0.0  ;;  %v11571_v38 = vld [vmem:[#allocation2 + $0xad] sm:$0xff]  ;;  %v27027_v18 = vld [vmem:[#allocation10_spill] sm:$0xff] }
 0x617   : > { %v25649_v20 = vadd.f32 %v14791_v40, %v14429_v52  ;;  %20387 = vmatpush3.msk.msra.mxu1 %vm626_vm0, %v25371_v10  ;;  %v14747_v55 = vadd.f32 %v25400_v35, %v14746_v59  ;;  %20341 = vmatprep.mubr.msk.f32.mxu1 %vm333_vm1, %v11569_v46  ;;  %v14401_v40 = vmax.f32 %v27027_v18, 0.0  ;;  %v14431_v52 = vadd.f32 %v17491_v12, %v14399_v58  ;;  %v17494_v51 = vld [vmem:[%s21999_s18 + $0x2f0] sm:$0xff]  ;;  %v17493_v46 = vld [vmem:[%s21999_s18 + $0x2e8] sm:$0xff] }
 0x618   : > { %27024 = vst [vmem:[#allocation34_spill] sm:$0xff] %v25644_v54  ;;  %v14794_v5 = vmax.f32 %v14752_v45, 0.0  ;;  %20436 = vmatprep.subr.msk.mxu1 %vm626_vm0, %v25642_v53  ;;  %v11572_v45 = vld [vmem:[#allocation2 + $0xb5] sm:$0xff]  ;;  %v14434_v18 = vadd.f32 %v17494_v51, %v14402_v42  ;;  %v11573_v12 = vld [vmem:[#allocation2 + $0xcd] sm:$0xff] }
 0x619   : > { %27025 = vst [vmem:[#allocation3_spill] sm:$0xff] %v25649_v20  ;;  %v14793_v22 = vmax.f32 %v14747_v55, 0.0  ;;  %v20735_v10 = vpop.f32.mrb[94].mxu0  ;;  %v14433_v55 = vadd.f32 %v17493_v46, %v14401_v40  ;;  %v25678_v42 = vld [vmem:[#allocation2 + $0x10d] sm:$0xff]  ;;  %v25690_v40 = vld [vmem:[#allocation2 + $0x135] sm:$0xff] }
 0x61a   : > { %v25660_v20 = vadd.f32 %v14794_v5, %v14432_v60  ;;  %v14762_v59 = vadd.f32 %v20735_v10, %v25400_v35  ;;  %20342 = vmatmul.mubr.msk.f32.gmra.mrb[50].mxu1 %vm333_vm1, %v11570_v39  ;;  %v14756_v26 = vpop.f32.mrb[95].mxu0  ;;  %v11574_v39 = vld [vmem:[#allocation2 + $0xd5] sm:$0xff]  ;;  %v25702_v10 = vld [vmem:[#allocation2 + $0x16d] sm:$0xff] }
 0x61b   : > { %v25665_v21 = vadd.f32 %v14793_v22, %v14431_v52  ;;  %v14757_v28 = vadd.f32 %v25400_v35, %v14756_v26  ;;  %20344 = vmatprep.mubr.msk.f32.mxu1 %vm333_vm1, %v11571_v38  ;;  %v11575_v52 = vld [vmem:[#allocation2 + $0xed] sm:$0xff]  ;;  %v11576_v35 = vld [vmem:[#allocation2 + $0xf5] sm:$0xff] }
 0x61c   : > { %27028 = vst [vmem:[#allocation4_spill] sm:$0xff] %v25660_v20  ;;  %v14796_v58 = vmax.f32 %v14762_v59, 0.0  ;;  %v25682_v38 = vld [vmem:[#allocation2 + $0x115] sm:$0xff]  ;;  %v25694_v22 = vld [vmem:[#allocation2 + $0x14d] sm:$0xff] }
 0x61d   : > { %27029 = vst [vmem:[#allocation32_spill] sm:$0xff] %v25665_v21  ;;  %v14795_v54 = vmax.f32 %v14757_v28, 0.0  ;;  %v25698_v51 = vld [vmem:[#allocation2 + $0x155] sm:$0xff]  ;;  %v25710_v46 = vld [vmem:[#allocation2 + $0x18d] sm:$0xff] }
 0x61e   : > { %v25669_v60 = vadd.f32 %v14796_v58, %v14434_v18  ;;  %20345 = vmatmul.mubr.msk.f32.gmra.mrb[52].mxu1 %vm333_vm1, %v11572_v45  ;;  %v25706_v59 = vld [vmem:[#allocation2 + $0x175] sm:$0xff]  ;;  %v25718_v28 = vld [vmem:[#allocation2 + $0x1ad] sm:$0xff] }
 0x61f   : > { %v25672_v5 = vadd.f32 %v14795_v54, %v14433_v55  ;;  %20347 = vmatprep.mubr.msk.f32.mxu1 %vm333_vm1, %v11573_v12  ;;  %v25686_v54 = vld [vmem:[#allocation2 + $0x12d] sm:$0xff]  ;;  %v25714_v26 = vld [vmem:[#allocation2 + $0x195] sm:$0xff] }
 0x620   : > { %27030 = vst [vmem:[#allocation5_spill] sm:$0xff] %v25669_v60  ;;  %v25722_v45 = vld [vmem:[#allocation2 + $0x1b5] sm:$0xff]  ;;  %v25726_v18 = vld [vmem:[#allocation2 + $0x1cd] sm:$0xff] }
 0x621   : > { %27031 = vst [vmem:[#allocation28_spill] sm:$0xff] %v25672_v5  ;;  %v25730_v58 = vld [vmem:[#allocation2 + $0x1d5] sm:$0xff]  ;;  %v25734_v12 = vld [vmem:[#allocation2 + $0x1ed] sm:$0xff] }
 0x622   : > { %20348 = vmatmul.mubr.msk.f32.gmra.mrb[54].mxu1 %vm333_vm1, %v11574_v39  ;;  %v25738_v55 = vld [vmem:[#allocation2 + $0x1f5] sm:$0xff]  ;;  %v25742_v39 = vld [vmem:[#allocation2 + $0x20d] sm:$0xff] }
 0x623   : > { %20350 = vmatprep.mubr.msk.f32.mxu1 %vm333_vm1, %v11575_v52  ;;  %v25746_v52 = vld [vmem:[#allocation2 + $0x215] sm:$0xff]  ;;  %v25758_v60 = vld [vmem:[#allocation2 + $0x24d] sm:$0xff] }
 0x624   : > { %v25754_v5 = vld [vmem:[#allocation2 + $0x235] sm:$0xff] }
 0x625   : > { %v25762_v21 = vld [vmem:[#allocation2 + $0x255] sm:$0xff] }
 0x626   : > { %20351 = vmatmul.mubr.msk.f32.gmra.mrb[56].mxu1 %vm333_vm1, %v11576_v35  ;;  %v25750_v35 = vld [vmem:[#allocation2 + $0x22d] sm:$0xff] }
 0x627   : > { %20353 = vmatprep.mubr.msk.f32.mxu1 %vm333_vm1, %v25678_v42  ;;  %v17326_v20 = vld [vmem:[%s26601_s5 + $0x14] sm:$0xf] }
 0x62a   : > { %20354 = vmatmul.mubr.msk.f32.gmra.mrb[58].mxu1 %vm333_vm1, %v25682_v38 }
 0x62b   : > { %20356 = vmatprep.mubr.msk.f32.mxu1 %vm333_vm1, %v25686_v54 }
 0x62e   : > { %20357 = vmatmul.mubr.msk.f32.gmra.mrb[60].mxu1 %vm333_vm1, %v25690_v40 }
 0x62f   : > { %20359 = vmatprep.mubr.msk.f32.mxu1 %vm333_vm1, %v25694_v22 }
 0x632   : > { %20360 = vmatmul.mubr.msk.f32.gmra.mrb[62].mxu1 %vm333_vm1, %v25698_v51 }
 0x633   : > { %20362 = vmatprep.mubr.msk.f32.mxu1 %vm333_vm1, %v25702_v10 }
 0x636   : > { %20363 = vmatmul.mubr.msk.f32.gmra.mrb[64].mxu1 %vm333_vm1, %v25706_v59 }
 0x637   : > { %20365 = vmatprep.mubr.msk.f32.mxu1 %vm333_vm1, %v25710_v46 }
 0x63a   : > { %20366 = vmatmul.mubr.msk.f32.gmra.mrb[66].mxu1 %vm333_vm1, %v25714_v26 }
 0x63b   : > { %20368 = vmatprep.mubr.msk.f32.mxu1 %vm333_vm1, %v25718_v28 }
 0x63e   : > { %20369 = vmatmul.mubr.msk.f32.gmra.mrb[68].mxu1 %vm333_vm1, %v25722_v45 }
 0x63f   : > { %20371 = vmatprep.mubr.msk.f32.mxu1 %vm333_vm1, %v25726_v18 }
 0x642   : > { %20372 = vmatmul.mubr.msk.f32.gmra.mrb[70].mxu1 %vm333_vm1, %v25730_v58 }
 0x643   : > { %20374 = vmatprep.mubr.msk.f32.mxu1 %vm333_vm1, %v25734_v12 }
 0x646   : > { %20375 = vmatmul.mubr.msk.f32.gmra.mrb[72].mxu1 %vm333_vm1, %v25738_v55 }
 0x647   : > { %20377 = vmatprep.mubr.msk.f32.mxu1 %vm333_vm1, %v25742_v39 }
 0x64a   : > { %20378 = vmatmul.mubr.msk.f32.gmra.mrb[74].mxu1 %vm333_vm1, %v25746_v52 }
 0x64b   : > { %20380 = vmatprep.mubr.msk.f32.mxu1 %vm333_vm1, %v25750_v35 }
 0x64e   : > { %20381 = vmatmul.mubr.msk.f32.gmra.mrb[76].mxu1 %vm333_vm1, %v25754_v5 }
 0x64f   : > { %20383 = vmatprep.mubr.msk.f32.mxu1 %vm333_vm1, %v25758_v60 }
 0x652   : > { %20384 = vmatmul.mubr.msk.f32.gmra.mrb[78].mxu1 %vm333_vm1, %v25762_v21 }
 0x653   : > { %20388 = vmatprep.mubr.msk.f32.mxu1 %vm333_vm1, %v25434_v8  ;;  %v25816_v8 = vld [vmem:[#allocation2 + $0x263] sm:$0xff] }
 0x656   : > { %20389 = vmatmul.mubr.msk.f32.vlgmr.msra.gmra.mrb[48].mxu1 %vm333_vm1, %v25443_v13  ;;  %v25820_v13 = vld [vmem:[#allocation2 + $0x26b] sm:$0xff] }
 0x657   : > { %20437 = vmatpush3.msk.msra.mxu1 %vm626_vm0, %v25642_v53  ;;  %20391 = vmatprep.mubr.msk.f32.mxu1 %vm333_vm1, %v25450_v2  ;;  %v25824_v2 = vld [vmem:[#allocation2 + $0x283] sm:$0xff] }
 0x658   : > { %20486 = vmatprep.subr.msk.mxu1 %vm626_vm0, %v17326_v20  ;;  %v21911_v53 = vld [vmem:[#allocation2 + $0x108] sm:$0xff] }
 0x65a   : > { %20392 = vmatmul.mubr.msk.f32.gmra.mrb[50].mxu1 %vm333_vm1, %v25461_v32  ;;  %v25828_v32 = vld [vmem:[#allocation2 + $0x28b] sm:$0xff] }
 0x65b   : > { %20394 = vmatprep.mubr.msk.f32.mxu1 %vm333_vm1, %v25468_v48  ;;  %v25832_v48 = vld [vmem:[#allocation2 + $0x2a3] sm:$0xff] }
 0x65e   : > { %20395 = vmatmul.mubr.msk.f32.gmra.mrb[52].mxu1 %vm333_vm1, %v25479_v11  ;;  %v25836_v11 = vld [vmem:[#allocation2 + $0x2ab] sm:$0xff] }
 0x65f   : > { %20397 = vmatprep.mubr.msk.f32.mxu1 %vm333_vm1, %v25486_v7  ;;  %v25840_v7 = vld [vmem:[#allocation2 + $0x2c3] sm:$0xff] }
 0x660   : > { %27032 = vst [vmem:[#allocation30_spill] sm:$0xff] %v25840_v7 }
 0x662   : > { %20398 = vmatmul.mubr.msk.f32.gmra.mrb[54].mxu1 %vm333_vm1, %v25497_v4  ;;  %v25844_v4 = vld [vmem:[#allocation2 + $0x2cb] sm:$0xff] }
 0x663   : > { %20400 = vmatprep.mubr.msk.f32.mxu1 %vm333_vm1, %v25504_v36  ;;  %v25848_v36 = vld [vmem:[#allocation2 + $0x2e3] sm:$0xff] }
 0x666   : > { %20401 = vmatmul.mubr.msk.f32.gmra.mrb[56].mxu1 %vm333_vm1, %v25515_v6  ;;  %v25852_v6 = vld [vmem:[#allocation2 + $0x2eb] sm:$0xff] }
 0x667   : > { %20403 = vmatprep.mubr.msk.f32.mxu1 %vm333_vm1, %v25522_v57 }
 0x66a   : > { %20404 = vmatmul.mubr.msk.f32.gmra.mrb[58].mxu1 %vm333_vm1, %v25534_v34 }
 0x66b   : > { %20406 = vmatprep.mubr.msk.f32.mxu1 %vm333_vm1, %v25542_v50 }
 0x66e   : > { %20407 = vmatmul.mubr.msk.f32.gmra.mrb[60].mxu1 %vm333_vm1, %v25552_v27 }
 0x66f   : > { %20409 = vmatprep.mubr.msk.f32.mxu1 %vm333_vm1, %v25560_v9 }
 0x672   : > { %20410 = vmatmul.mubr.msk.f32.gmra.mrb[62].mxu1 %vm333_vm1, %v25570_v37 }
 0x673   : > { %20412 = vmatprep.mubr.msk.f32.mxu1 %vm333_vm1, %v25578_v15 }
 0x676   : > { %20413 = vmatmul.mubr.msk.f32.gmra.mrb[64].mxu1 %vm333_vm1, %v25588_v56 }
 0x677   : > { %20415 = vmatprep.mubr.msk.f32.mxu1 %vm333_vm1, %v25596_v30 }
 0x67a   : > { %20416 = vmatmul.mubr.msk.f32.gmra.mrb[66].mxu1 %vm333_vm1, %v25606_v44 }
 0x67b   : > { %20418 = vmatprep.mubr.msk.f32.mxu1 %vm333_vm1, %v25614_v33 }
 0x67e   : > { %20419 = vmatmul.mubr.msk.f32.gmra.mrb[68].mxu1 %vm333_vm1, %v25624_v23 }
 0x67f   : > { %20421 = vmatprep.mubr.msk.f32.mxu1 %vm333_vm1, %v25816_v8 }
 0x682   : > { %20422 = vmatmul.mubr.msk.f32.gmra.mrb[70].mxu1 %vm333_vm1, %v25820_v13 }
 0x683   : > { %20424 = vmatprep.mubr.msk.f32.mxu1 %vm333_vm1, %v25824_v2 }
 0x686   : > { %20425 = vmatmul.mubr.msk.f32.gmra.mrb[72].mxu1 %vm333_vm1, %v25828_v32 }
 0x687   : > { %20427 = vmatprep.mubr.msk.f32.mxu1 %vm333_vm1, %v25832_v48 }
 0x68a   : > { %20428 = vmatmul.mubr.msk.f32.gmra.mrb[74].mxu1 %vm333_vm1, %v25836_v11 }
 0x68b   : > { %20430 = vmatprep.mubr.msk.f32.mxu1 %vm333_vm1, %v25840_v7  ;;  %v21912_v7 = vld [vmem:[#allocation2 + $0x110] sm:$0xff] }
 0x68e   : > { %20431 = vmatmul.mubr.msk.f32.gmra.mrb[76].mxu1 %vm333_vm1, %v25844_v4 }
 0x68f   : > { %20433 = vmatprep.mubr.msk.f32.mxu1 %vm333_vm1, %v25848_v36 }
 0x692   : > { %20434 = vmatmul.mubr.msk.f32.gmra.mrb[78].mxu1 %vm333_vm1, %v25852_v6 }
 0x693   : > { %20438 = vmatprep.mubr.msk.f32.mxu1 %vm333_vm1, %v21911_v53  ;;  %v13542_v53 = vld [vmem:[#allocation2 + $0x328] sm:$0xff] }
 0x696   : > { %20439 = vmatmul.mubr.msk.f32.vlgmr.msra.gmra.mrb[48].mxu1 %vm333_vm1, %v21912_v7  ;;  %v13528_v7 = vld [vmem:[#allocation2 + $0x248] sm:$0xff] }
 0x697   : > { %20487 = vmatpush3.msk.msra.mxu1 %vm626_vm0, %v17326_v20  ;;  %20441 = vmatprep.mubr.msk.f32.mxu1 %vm333_vm1, %v25185_v0  ;;  %v27033_v0 = vld [vmem:[#allocation54_spill] sm:$0xff]  ;;  %v26008_v20 = vld [vmem:[#allocation2 + $0x2ad] sm:$0xff] }
 0x698   : > { %20536 = vmatprep.subr.msk.mxu1 %vm626_vm0, %v17360_v14 }
 0x69a   : > { %20442 = vmatmul.mubr.msk.f32.gmra.mrb[50].mxu1 %vm333_vm1, %v25191_v31  ;;  %v27034_v31 = vld [vmem:[#allocation56_spill] sm:$0xff] }
 0x69b   : > { %20444 = vmatprep.mubr.msk.f32.mxu1 %vm333_vm1, %v25203_v41  ;;  %v27035_v41 = vld [vmem:[#allocation61_spill] sm:$0xff] }
 0x69e   : > { %20445 = vmatmul.mubr.msk.f32.gmra.mrb[52].mxu1 %vm333_vm1, %v25209_v63  ;;  %v25903_v63 = vld [vmem:[#allocation2 + $0x268] sm:$0xff] }
 0x69f   : > { %20447 = vmatprep.mubr.msk.f32.mxu1 %vm333_vm1, %v25221_v24  ;;  %v25907_v24 = vld [vmem:[#allocation2 + $0x270] sm:$0xff] }
 0x6a2   : > { %20448 = vmatmul.mubr.msk.f32.gmra.mrb[54].mxu1 %vm333_vm1, %v25227_v49  ;;  %v25911_v49 = vld [vmem:[#allocation2 + $0x288] sm:$0xff] }
 0x6a3   : > { %20450 = vmatprep.mubr.msk.f32.mxu1 %vm333_vm1, %v25239_v25  ;;  %v25915_v25 = vld [vmem:[#allocation2 + $0x290] sm:$0xff] }
 0x6a6   : > { %20451 = vmatmul.mubr.msk.f32.gmra.mrb[56].mxu1 %vm333_vm1, %v25245_v19  ;;  %v25919_v19 = vld [vmem:[#allocation2 + $0x2a8] sm:$0xff] }
 0x6a7   : > { %20453 = vmatprep.mubr.msk.f32.mxu1 %vm333_vm1, %v25257_v16  ;;  %v25923_v16 = vld [vmem:[#allocation2 + $0x2b0] sm:$0xff] }
 0x6aa   : > { %20454 = vmatmul.mubr.msk.f32.gmra.mrb[58].mxu1 %vm333_vm1, %v25263_v62  ;;  %v25927_v62 = vld [vmem:[#allocation2 + $0x2c8] sm:$0xff] }
 0x6ab   : > { %20456 = vmatprep.mubr.msk.f32.mxu1 %vm333_vm1, %v25275_v3  ;;  %v25931_v3 = vld [vmem:[#allocation2 + $0x2d0] sm:$0xff] }
 0x6ae   : > { %20457 = vmatmul.mubr.msk.f32.gmra.mrb[60].mxu1 %vm333_vm1, %v25281_v1  ;;  %v25935_v1 = vld [vmem:[#allocation2 + $0x2e8] sm:$0xff] }
 0x6af   : > { %20459 = vmatprep.mubr.msk.f32.mxu1 %vm333_vm1, %v25293_v29  ;;  %v25939_v29 = vld [vmem:[#allocation2 + $0x2f0] sm:$0xff] }
 0x6b2   : > { %20460 = vmatmul.mubr.msk.f32.gmra.mrb[62].mxu1 %vm333_vm1, %v25299_v43  ;;  %v17394_v43 = vld [vmem:[%s26601_s5 + $0x1c] sm:$0xf] }
 0x6b3   : > { %20462 = vmatprep.mubr.msk.f32.mxu1 %vm333_vm1, %v25311_v47  ;;  %v25992_v47 = vld [vmem:[#allocation2 + $0x26d] sm:$0xff] }
 0x6b6   : > { %20463 = vmatmul.mubr.msk.f32.gmra.mrb[64].mxu1 %vm333_vm1, %v25317_v61  ;;  %v25996_v61 = vld [vmem:[#allocation2 + $0x275] sm:$0xff] }
 0x6b7   : > { %20465 = vmatprep.mubr.msk.f32.mxu1 %vm333_vm1, %v25329_v17  ;;  %v26000_v17 = vld [vmem:[#allocation2 + $0x28d] sm:$0xff] }
 0x6ba   : > { %20466 = vmatmul.mubr.msk.f32.gmra.mrb[66].mxu1 %vm333_vm1, %v27033_v0  ;;  %v13543_v0 = vld [vmem:[#allocation2 + $0x330] sm:$0xff] }
 0x6bb   : > { %20468 = vmatprep.mubr.msk.f32.mxu1 %vm333_vm1, %v27034_v31  ;;  %v13544_v31 = vld [vmem:[#allocation2 + $0x348] sm:$0xff] }
 0x6be   : > { %20469 = vmatmul.mubr.msk.f32.gmra.mrb[68].mxu1 %vm333_vm1, %v27035_v41  ;;  %v13545_v41 = vld [vmem:[#allocation2 + $0x350] sm:$0xff] }
 0x6bf   : > { %20471 = vmatprep.mubr.msk.f32.mxu1 %vm333_vm1, %v25903_v63 }
 0x6c2   : > { %20472 = vmatmul.mubr.msk.f32.gmra.mrb[70].mxu1 %vm333_vm1, %v25907_v24 }
 0x6c3   : > { %20474 = vmatprep.mubr.msk.f32.mxu1 %vm333_vm1, %v25911_v49 }
 0x6c6   : > { %20475 = vmatmul.mubr.msk.f32.gmra.mrb[72].mxu1 %vm333_vm1, %v25915_v25 }
 0x6c7   : > { %20477 = vmatprep.mubr.msk.f32.mxu1 %vm333_vm1, %v25919_v19 }
 0x6ca   : > { %20478 = vmatmul.mubr.msk.f32.gmra.mrb[74].mxu1 %vm333_vm1, %v25923_v16 }
 0x6cb   : > { %20480 = vmatprep.mubr.msk.f32.mxu1 %vm333_vm1, %v25927_v62 }
 0x6ce   : > { %20481 = vmatmul.mubr.msk.f32.gmra.mrb[76].mxu1 %vm333_vm1, %v25931_v3 }
 0x6cf   : > { %20483 = vmatprep.mubr.msk.f32.mxu1 %vm333_vm1, %v25935_v1 }
 0x6d2   : > { %20484 = vmatmul.mubr.msk.f32.gmra.mrb[78].mxu1 %vm333_vm1, %v25939_v29 }
 0x6d3   : > { %20488 = vmatprep.mubr.msk.f32.mxu1 %vm333_vm1, %v25678_v42  ;;  %v26012_v42 = vld [vmem:[#allocation2 + $0x2b5] sm:$0xff] }
 0x6d6   : > { %20489 = vmatmul.mubr.msk.f32.vlgmr.msra.gmra.mrb[48].mxu1 %vm333_vm1, %v25682_v38  ;;  %v26016_v38 = vld [vmem:[#allocation2 + $0x2cd] sm:$0xff] }
 0x6d7   : > { %20537 = vmatpush3.msk.msra.mxu1 %vm626_vm0, %v17360_v14  ;;  %20491 = vmatprep.mubr.msk.f32.mxu1 %vm333_vm1, %v25686_v54  ;;  %v26004_v14 = vld [vmem:[#allocation2 + $0x295] sm:$0xff] }
 0x6d8   : > { %20586 = vmatprep.subr.msk.mxu1 %vm626_vm0, %v17394_v43  ;;  %v26020_v54 = vld [vmem:[#allocation2 + $0x2d5] sm:$0xff] }
 0x6da   : > { %20492 = vmatmul.mubr.msk.f32.gmra.mrb[50].mxu1 %vm333_vm1, %v25690_v40  ;;  %v26024_v40 = vld [vmem:[#allocation2 + $0x2ed] sm:$0xff] }
 0x6db   : > { %20494 = vmatprep.mubr.msk.f32.mxu1 %vm333_vm1, %v25694_v22  ;;  %v26028_v22 = vld [vmem:[#allocation2 + $0x2f5] sm:$0xff] }
 0x6de   : > { %20495 = vmatmul.mubr.msk.f32.gmra.mrb[52].mxu1 %vm333_vm1, %v25698_v51  ;;  %v17428_v51 = vld [vmem:[%s26601_s5 + $0x20] sm:$0xf] }
 0x6df   : > { %20497 = vmatprep.mubr.msk.f32.mxu1 %vm333_vm1, %v25702_v10  ;;  %v13519_v10 = vld [vmem:[#allocation2 + $0x1b0] sm:$0xff] }
 0x6e2   : > { %20498 = vmatmul.mubr.msk.f32.gmra.mrb[54].mxu1 %vm333_vm1, %v25706_v59  ;;  %v13520_v59 = vld [vmem:[#allocation2 + $0x1c8] sm:$0xff] }
 0x6e3   : > { %20500 = vmatprep.mubr.msk.f32.mxu1 %vm333_vm1, %v25710_v46  ;;  %v21913_v46 = vld [vmem:[%s26603_s7] sm:$0xf] }
 0x6e6   : > { %20501 = vmatmul.mubr.msk.f32.gmra.mrb[56].mxu1 %vm333_vm1, %v25714_v26  ;;  %v13521_v26 = vld [vmem:[#allocation2 + $0x1d0] sm:$0xff] }
 0x6e7   : > { %20503 = vmatprep.mubr.msk.f32.mxu1 %vm333_vm1, %v25718_v28 }
 0x6ea   : > { %20504 = vmatmul.mubr.msk.f32.gmra.mrb[58].mxu1 %vm333_vm1, %v25722_v45 }
 0x6eb   : > { %20506 = vmatprep.mubr.msk.f32.mxu1 %vm333_vm1, %v25726_v18 }
 0x6ee   : > { %20507 = vmatmul.mubr.msk.f32.gmra.mrb[60].mxu1 %vm333_vm1, %v25730_v58 }
 0x6ef   : > { %20509 = vmatprep.mubr.msk.f32.mxu1 %vm333_vm1, %v25734_v12 }
 0x6f2   : > { %20510 = vmatmul.mubr.msk.f32.gmra.mrb[62].mxu1 %vm333_vm1, %v25738_v55 }
 0x6f3   : > { %20512 = vmatprep.mubr.msk.f32.mxu1 %vm333_vm1, %v25742_v39 }
 0x6f6   : > { %20513 = vmatmul.mubr.msk.f32.gmra.mrb[64].mxu1 %vm333_vm1, %v25746_v52 }
 0x6f7   : > { %20515 = vmatprep.mubr.msk.f32.mxu1 %vm333_vm1, %v25750_v35 }
 0x6fa   : > { %20516 = vmatmul.mubr.msk.f32.gmra.mrb[66].mxu1 %vm333_vm1, %v25754_v5 }
 0x6fb   : > { %20518 = vmatprep.mubr.msk.f32.mxu1 %vm333_vm1, %v25758_v60 }
 0x6fe   : > { %20519 = vmatmul.mubr.msk.f32.gmra.mrb[68].mxu1 %vm333_vm1, %v25762_v21 }
 0x6ff   : > { %20521 = vmatprep.mubr.msk.f32.mxu1 %vm333_vm1, %v25992_v47 }
 0x702   : > { %20522 = vmatmul.mubr.msk.f32.gmra.mrb[70].mxu1 %vm333_vm1, %v25996_v61 }
 0x703   : > { %20524 = vmatprep.mubr.msk.f32.mxu1 %vm333_vm1, %v26000_v17 }
 0x706   : > { %20525 = vmatmul.mubr.msk.f32.gmra.mrb[72].mxu1 %vm333_vm1, %v26004_v14 }
 0x707   : > { %20527 = vmatprep.mubr.msk.f32.mxu1 %vm333_vm1, %v26008_v20 }
 0x70a   : > { %20528 = vmatmul.mubr.msk.f32.gmra.mrb[74].mxu1 %vm333_vm1, %v26012_v42 }
 0x70b   : > { %20530 = vmatprep.mubr.msk.f32.mxu1 %vm333_vm1, %v26016_v38 }
 0x70e   : > { %20531 = vmatmul.mubr.msk.f32.gmra.mrb[76].mxu1 %vm333_vm1, %v26020_v54 }
 0x70f   : > { %20533 = vmatprep.mubr.msk.f32.mxu1 %vm333_vm1, %v26024_v40 }
 0x712   : > { %20534 = vmatmul.mubr.msk.f32.gmra.mrb[78].mxu1 %vm333_vm1, %v26028_v22 }
 0x713   : > { %20538 = vmatprep.mubr.msk.f32.mxu1 %vm333_vm1, %v25522_v57  ;;  %v13154_v57 = vld [vmem:[#allocation2 + $0x343] sm:$0xff] }
 0x716   : > { %20539 = vmatmul.mubr.msk.f32.vlgmr.msra.gmra.mrb[48].mxu1 %vm333_vm1, %v25534_v34  ;;  %v13155_v34 = vld [vmem:[#allocation2 + $0x34b] sm:$0xff] }
 0x717   : > { %20587 = vmatpush3.msk.msra.mxu1 %vm626_vm0, %v17394_v43  ;;  %20541 = vmatprep.mubr.msk.f32.mxu1 %vm333_vm1, %v25542_v50  ;;  %v13156_v50 = vld [vmem:[#allocation2 + $0x363] sm:$0xff]  ;;  %v27045_v43 = vld [vmem:[#allocation57_spill] sm:$0xff] }
 0x718   : > { %20636 = vmatprep.subr.msk.mxu1 %vm626_vm0, %v17428_v51 }
 0x71a   : > { %20542 = vmatmul.mubr.msk.f32.gmra.mrb[50].mxu1 %vm333_vm1, %v25552_v27  ;;  %v13152_v27 = vld [vmem:[#allocation2 + $0x323] sm:$0xff] }
 0x71b   : > { %20544 = vmatprep.mubr.msk.f32.mxu1 %vm333_vm1, %v25560_v9  ;;  %v13157_v9 = vld [vmem:[#allocation2 + $0x36b] sm:$0xff] }
 0x71e   : > { %20545 = vmatmul.mubr.msk.f32.gmra.mrb[52].mxu1 %vm333_vm1, %v25570_v37  ;;  %v13151_v37 = vld [vmem:[#allocation2 + $0x30b] sm:$0xff] }
 0x71f   : > { %20547 = vmatprep.mubr.msk.f32.mxu1 %vm333_vm1, %v25578_v15  ;;  %v13158_v15 = vld [vmem:[#allocation2 + $0x383] sm:$0xff] }
 0x722   : > { %20548 = vmatmul.mubr.msk.f32.gmra.mrb[54].mxu1 %vm333_vm1, %v25588_v56  ;;  %v13150_v56 = vld [vmem:[#allocation2 + $0x303] sm:$0xff] }
 0x723   : > { %20550 = vmatprep.mubr.msk.f32.mxu1 %vm333_vm1, %v25596_v30  ;;  %v13159_v30 = vld [vmem:[#allocation2 + $0x38b] sm:$0xff] }
 0x726   : > { %20551 = vmatmul.mubr.msk.f32.gmra.mrb[56].mxu1 %vm333_vm1, %v25606_v44  ;;  %v27036_v44 = vld [vmem:[#allocation30_spill] sm:$0xff] }
 0x727   : > { %20553 = vmatprep.mubr.msk.f32.mxu1 %vm333_vm1, %v25614_v33  ;;  %v13518_v33 = vld [vmem:[#allocation2 + $0x1a8] sm:$0xff] }
 0x72a   : > { %20554 = vmatmul.mubr.msk.f32.gmra.mrb[58].mxu1 %vm333_vm1, %v25624_v23  ;;  %v13153_v23 = vld [vmem:[#allocation2 + $0x32b] sm:$0xff] }
 0x72b   : > { %20556 = vmatprep.mubr.msk.f32.mxu1 %vm333_vm1, %v25816_v8  ;;  %v13522_v8 = vld [vmem:[#allocation2 + $0x1e8] sm:$0xff] }
 0x72e   : > { %20557 = vmatmul.mubr.msk.f32.gmra.mrb[60].mxu1 %vm333_vm1, %v25820_v13  ;;  %v13523_v13 = vld [vmem:[#allocation2 + $0x1f0] sm:$0xff] }
 0x72f   : > { %20559 = vmatprep.mubr.msk.f32.mxu1 %vm333_vm1, %v25824_v2  ;;  %v13524_v2 = vld [vmem:[#allocation2 + $0x208] sm:$0xff] }
 0x732   : > { %20560 = vmatmul.mubr.msk.f32.gmra.mrb[62].mxu1 %vm333_vm1, %v25828_v32  ;;  %v13525_v32 = vld [vmem:[#allocation2 + $0x210] sm:$0xff] }
 0x733   : > { %20562 = vmatprep.mubr.msk.f32.mxu1 %vm333_vm1, %v25832_v48  ;;  %v13526_v48 = vld [vmem:[#allocation2 + $0x228] sm:$0xff] }
 0x736   : > { %20563 = vmatmul.mubr.msk.f32.gmra.mrb[64].mxu1 %vm333_vm1, %v25836_v11  ;;  %v13527_v11 = vld [vmem:[#allocation2 + $0x230] sm:$0xff] }
 0x737   : > { %20565 = vmatprep.mubr.msk.f32.mxu1 %vm333_vm1, %v27036_v44  ;;  %v27057_v44 = vld [vmem:[#allocation46_spill] sm:$0xff] }
 0x73a   : > { %20566 = vmatmul.mubr.msk.f32.gmra.mrb[66].mxu1 %vm333_vm1, %v25844_v4  ;;  %v13529_v4 = vld [vmem:[#allocation2 + $0x250] sm:$0xff] }
 0x73b   : > { %20568 = vmatprep.mubr.msk.f32.mxu1 %vm333_vm1, %v25848_v36  ;;  %v13540_v36 = vld [vmem:[#allocation2 + $0x308] sm:$0xff] }
 0x73e   : > { %20569 = vmatmul.mubr.msk.f32.gmra.mrb[68].mxu1 %vm333_vm1, %v25852_v6  ;;  %v13541_v6 = vld [vmem:[#allocation2 + $0x310] sm:$0xff] }
 0x73f   : > { %20571 = vmatprep.mubr.msk.f32.mxu1 %vm333_vm1, %v13150_v56  ;;  %v27058_v56 = vld [vmem:[#allocation47_spill] sm:$0xff] }
 0x742   : > { %20572 = vmatmul.mubr.msk.f32.gmra.mrb[70].mxu1 %vm333_vm1, %v13151_v37  ;;  %v27059_v37 = vld [vmem:[#allocation48_spill] sm:$0xff] }
 0x743   : > { %20574 = vmatprep.mubr.msk.f32.mxu1 %vm333_vm1, %v13152_v27  ;;  %v27060_v27 = vld [vmem:[#allocation50_spill] sm:$0xff] }
 0x746   : > { %20575 = vmatmul.mubr.msk.f32.gmra.mrb[72].mxu1 %vm333_vm1, %v13153_v23  ;;  %v27061_v23 = vld [vmem:[#allocation58_spill] sm:$0xff] }
 0x747   : > { %20577 = vmatprep.mubr.msk.f32.mxu1 %vm333_vm1, %v13154_v57  ;;  %v27062_v57 = vld [vmem:[#allocation52_spill] sm:$0xff] }
 0x74a   : > { %20578 = vmatmul.mubr.msk.f32.gmra.mrb[74].mxu1 %vm333_vm1, %v13155_v34  ;;  %v27063_v34 = vld [vmem:[#allocation63_spill] sm:$0xff] }
 0x74b   : > { %20580 = vmatprep.mubr.msk.f32.mxu1 %vm333_vm1, %v13156_v50  ;;  %v27064_v50 = vld [vmem:[#allocation60_spill] sm:$0xff] }
 0x74e   : > { %20581 = vmatmul.mubr.msk.f32.gmra.mrb[76].mxu1 %vm333_vm1, %v13157_v9  ;;  %v27065_v9 = vld [vmem:[#allocation65_spill] sm:$0xff] }
 0x74f   : > { %20583 = vmatprep.mubr.msk.f32.mxu1 %vm333_vm1, %v13158_v15  ;;  %v27066_v15 = vld [vmem:[#allocation62_spill] sm:$0xff] }
 0x752   : > { %20584 = vmatmul.mubr.msk.f32.gmra.mrb[78].mxu1 %vm333_vm1, %v13159_v30  ;;  %v27067_v30 = vld [vmem:[#allocation67_spill] sm:$0xff] }
 0x753   : > { %20588 = vmatprep.mubr.msk.f32.mxu1 %vm333_vm1, %v13518_v33  ;;  %v27068_v33 = vld [vmem:[#allocation64_spill] sm:$0xff] }
 0x756   : > { %20589 = vmatmul.mubr.msk.f32.vlgmr.msra.gmra.mrb[48].mxu1 %vm333_vm1, %v13519_v10  ;;  %v26260_v10 = vld [vmem:[%s26602_s6] ss:$0 sm:$0xff] }
 0x757   : > { %20637 = vmatpush3.msk.msra.mxu1 %vm626_vm0, %v17428_v51  ;;  %20591 = vmatprep.mubr.msk.f32.mxu1 %vm333_vm1, %v13520_v59  ;;  %v27056_v51 = vld [vmem:[#allocation45_spill] sm:$0xff] }
 0x758   : > { %20736 = vmatprep.subr.msk.mxu1 %vm626_vm0, %v21913_v46 }
 0x75a   : > { %20592 = vmatmul.mubr.msk.f32.gmra.mrb[50].mxu1 %vm333_vm1, %v13521_v26 }
 0x75b   : > { %20594 = vmatprep.mubr.msk.f32.mxu1 %vm333_vm1, %v13522_v8 }
 0x75e   : > { %20595 = vmatmul.mubr.msk.f32.gmra.mrb[52].mxu1 %vm333_vm1, %v13523_v13 }
 0x75f   : > { %20597 = vmatprep.mubr.msk.f32.mxu1 %vm333_vm1, %v13524_v2 }
 0x762   : > { %20598 = vmatmul.mubr.msk.f32.gmra.mrb[54].mxu1 %vm333_vm1, %v13525_v32 }
 0x763   : > { %20600 = vmatprep.mubr.msk.f32.mxu1 %vm333_vm1, %v13526_v48 }
 0x766   : > { %20601 = vmatmul.mubr.msk.f32.gmra.mrb[56].mxu1 %vm333_vm1, %v13527_v11 }
 0x767   : > { %20603 = vmatprep.mubr.msk.f32.mxu1 %vm333_vm1, %v13528_v7 }
 0x76a   : > { %20604 = vmatmul.mubr.msk.f32.gmra.mrb[58].mxu1 %vm333_vm1, %v13529_v4 }
 0x76b   : > { %20606 = vmatprep.mubr.msk.f32.mxu1 %vm333_vm1, %v25903_v63  ;;  %v13546_v63 = vld [vmem:[#allocation2 + $0x368] sm:$0xff] }
 0x76e   : > { %20607 = vmatmul.mubr.msk.f32.gmra.mrb[60].mxu1 %vm333_vm1, %v25907_v24  ;;  %v13547_v24 = vld [vmem:[#allocation2 + $0x370] sm:$0xff] }
 0x76f   : > { %20609 = vmatprep.mubr.msk.f32.mxu1 %vm333_vm1, %v25911_v49  ;;  %v13548_v49 = vld [vmem:[#allocation2 + $0x388] sm:$0xff] }
 0x772   : > { %20610 = vmatmul.mubr.msk.f32.gmra.mrb[62].mxu1 %vm333_vm1, %v25915_v25  ;;  %v13549_v25 = vld [vmem:[#allocation2 + $0x390] sm:$0xff] }
 0x773   : > { %20612 = vmatprep.mubr.msk.f32.mxu1 %vm333_vm1, %v25919_v19  ;;  %v27039_v19 = vld [vmem:[#allocation39_spill] sm:$0xff] }
 0x776   : > { %20613 = vmatmul.mubr.msk.f32.gmra.mrb[64].mxu1 %vm333_vm1, %v25923_v16  ;;  %v27040_v16 = vld [vmem:[#allocation38_spill] sm:$0xff] }
 0x777   : > { %20615 = vmatprep.mubr.msk.f32.mxu1 %vm333_vm1, %v25927_v62  ;;  %v27041_v62 = vld [vmem:[#allocation49_spill] sm:$0xff] }
 0x77a   : > { %20616 = vmatmul.mubr.msk.f32.gmra.mrb[66].mxu1 %vm333_vm1, %v25931_v3  ;;  %v27042_v3 = vld [vmem:[#allocation35_spill] sm:$0xff] }
 0x77b   : > { %20618 = vmatprep.mubr.msk.f32.mxu1 %vm333_vm1, %v25935_v1  ;;  %v27043_v1 = vld [vmem:[#allocation53_spill] sm:$0xff] }
 0x77e   : > { %20619 = vmatmul.mubr.msk.f32.gmra.mrb[68].mxu1 %vm333_vm1, %v25939_v29  ;;  %v27044_v29 = vld [vmem:[#allocation51_spill] sm:$0xff] }
 0x77f   : > { %20621 = vmatprep.mubr.msk.f32.mxu1 %vm333_vm1, %v13540_v36 }
 0x782   : > { %20622 = vmatmul.mubr.msk.f32.gmra.mrb[70].mxu1 %vm333_vm1, %v13541_v6 }
 0x783   : > { %20624 = vmatprep.mubr.msk.f32.mxu1 %vm333_vm1, %v13542_v53 }
 0x786   : > { %20625 = vmatmul.mubr.msk.f32.gmra.mrb[72].mxu1 %vm333_vm1, %v13543_v0 }
 0x787   : > { %20627 = vmatprep.mubr.msk.f32.mxu1 %vm333_vm1, %v13544_v31 }
 0x78a   : > { %20628 = vmatmul.mubr.msk.f32.gmra.mrb[74].mxu1 %vm333_vm1, %v13545_v41 }
 0x78b   : > { %20630 = vmatprep.mubr.msk.f32.mxu1 %vm333_vm1, %v13546_v63 }
 0x78e   : > { %20631 = vmatmul.mubr.msk.f32.gmra.mrb[76].mxu1 %vm333_vm1, %v13547_v24 }
 0x78f   : > { %20633 = vmatprep.mubr.msk.f32.mxu1 %vm333_vm1, %v13548_v49 }
 0x792   : > { %20634 = vmatmul.mubr.msk.f32.gmra.mrb[78].mxu1 %vm333_vm1, %v13549_v25 }
 0x793   : > { %20638 = vmatprep.mubr.msk.f32.mxu1 %vm333_vm1, %v25718_v28  ;;  %v13933_v28 = vld [vmem:[#allocation2 + $0x335] sm:$0xff] }
 0x796   : > { %20639 = vmatmul.mubr.msk.f32.vlgmr.msra.gmra.mrb[48].mxu1 %vm333_vm1, %v25722_v45  ;;  %v13934_v45 = vld [vmem:[#allocation2 + $0x34d] sm:$0xff] }
 0x797   : > { %20641 = vmatprep.mubr.msk.f32.mxu1 %vm333_vm1, %v25726_v18  ;;  %20737 = vmatpush3.msk.msra.mxu1 %vm626_vm0, %v21913_v46  ;;  %v13935_v18 = vld [vmem:[#allocation2 + $0x355] sm:$0xff] }
 0x79a   : > { %20642 = vmatmul.mubr.msk.f32.gmra.mrb[50].mxu1 %vm333_vm1, %v25730_v58  ;;  %v13936_v58 = vld [vmem:[#allocation2 + $0x36d] sm:$0xff] }
 0x79b   : > { %20644 = vmatprep.mubr.msk.f32.mxu1 %vm333_vm1, %v25734_v12  ;;  %v13937_v12 = vld [vmem:[#allocation2 + $0x375] sm:$0xff] }
 0x79e   : > { %20645 = vmatmul.mubr.msk.f32.gmra.mrb[52].mxu1 %vm333_vm1, %v25738_v55  ;;  %v13938_v55 = vld [vmem:[#allocation2 + $0x38d] sm:$0xff] }
 0x79f   : > { %20647 = vmatprep.mubr.msk.f32.mxu1 %vm333_vm1, %v25742_v39  ;;  %v13939_v39 = vld [vmem:[#allocation2 + $0x395] sm:$0xff] }
 0x7a2   : > { %20648 = vmatmul.mubr.msk.f32.gmra.mrb[54].mxu1 %vm333_vm1, %v25746_v52  ;;  %v27037_v52 = vld [vmem:[#allocation37_spill] sm:$0xff] }
 0x7a3   : > { %20650 = vmatprep.mubr.msk.f32.mxu1 %vm333_vm1, %v25750_v35  ;;  %v27038_v35 = vld [vmem:[#allocation36_spill] sm:$0xff] }
 0x7a6   : > { %20651 = vmatmul.mubr.msk.f32.gmra.mrb[56].mxu1 %vm333_vm1, %v25754_v5  ;;  %v13932_v5 = vld [vmem:[#allocation2 + $0x32d] sm:$0xff] }
 0x7a7   : > { %20653 = vmatprep.mubr.msk.f32.mxu1 %vm333_vm1, %v25758_v60  ;;  %v13931_v60 = vld [vmem:[#allocation2 + $0x315] sm:$0xff] }
 0x7aa   : > { %20654 = vmatmul.mubr.msk.f32.gmra.mrb[58].mxu1 %vm333_vm1, %v25762_v21  ;;  %v13930_v21 = vld [vmem:[#allocation2 + $0x30d] sm:$0xff] }
 0x7ab   : > { %20656 = vmatprep.mubr.msk.f32.mxu1 %vm333_vm1, %v25992_v47  ;;  %v27046_v47 = vld [vmem:[#allocation55_spill] sm:$0xff] }
 0x7ae   : > { %20657 = vmatmul.mubr.msk.f32.gmra.mrb[60].mxu1 %vm333_vm1, %v25996_v61  ;;  %v27047_v61 = vld [vmem:[#allocation68_spill] sm:$0xff] }
 0x7af   : > { %20659 = vmatprep.mubr.msk.f32.mxu1 %vm333_vm1, %v26000_v17  ;;  %v27048_v17 = vld [vmem:[#allocation59_spill] sm:$0xff] }
 0x7b2   : > { %20660 = vmatmul.mubr.msk.f32.gmra.mrb[62].mxu1 %vm333_vm1, %v26004_v14  ;;  %v27049_v14 = vld [vmem:[#allocation73_spill] sm:$0xff] }
 0x7b3   : > { %20662 = vmatprep.mubr.msk.f32.mxu1 %vm333_vm1, %v26008_v20  ;;  %v27050_v20 = vld [vmem:[#allocation70_spill] sm:$0xff] }
 0x7b6   : > { %20663 = vmatmul.mubr.msk.f32.gmra.mrb[64].mxu1 %vm333_vm1, %v26012_v42  ;;  %v27051_v42 = vld [vmem:[#allocation40_spill] sm:$0xff] }
 0x7b7   : > { %20665 = vmatprep.mubr.msk.f32.mxu1 %vm333_vm1, %v26016_v38  ;;  %v27052_v38 = vld [vmem:[#allocation41_spill] sm:$0xff] }
 0x7ba   : > { %20666 = vmatmul.mubr.msk.f32.gmra.mrb[66].mxu1 %vm333_vm1, %v26020_v54  ;;  %v27053_v54 = vld [vmem:[#allocation42_spill] sm:$0xff] }
 0x7bb   : > { %20668 = vmatprep.mubr.msk.f32.mxu1 %vm333_vm1, %v26024_v40  ;;  %v27054_v40 = vld [vmem:[#allocation43_spill] sm:$0xff] }
 0x7be   : > { %20669 = vmatmul.mubr.msk.f32.gmra.mrb[68].mxu1 %vm333_vm1, %v26028_v22  ;;  %v27055_v22 = vld [vmem:[#allocation44_spill] sm:$0xff] }
 0x7bf   : > { %20671 = vmatprep.mubr.msk.f32.mxu1 %vm333_vm1, %v13930_v21 }
 0x7c2   : > { %20672 = vmatmul.mubr.msk.f32.gmra.mrb[70].mxu1 %vm333_vm1, %v13931_v60 }
 0x7c3   : > { %20674 = vmatprep.mubr.msk.f32.mxu1 %vm333_vm1, %v13932_v5 }
 0x7c6   : > { %20675 = vmatmul.mubr.msk.f32.gmra.mrb[72].mxu1 %vm333_vm1, %v13933_v28 }
 0x7c7   : > { %20677 = vmatprep.mubr.msk.f32.mxu1 %vm333_vm1, %v13934_v45 }
 0x7ca   : > { %20678 = vmatmul.mubr.msk.f32.gmra.mrb[74].mxu1 %vm333_vm1, %v13935_v18 }
 0x7cb   : > { %20680 = vmatprep.mubr.msk.f32.mxu1 %vm333_vm1, %v13936_v58 }
 0x7ce   : > { %20681 = vmatmul.mubr.msk.f32.gmra.mrb[76].mxu1 %vm333_vm1, %v13937_v12 }
 0x7cf   : > { %20683 = vmatprep.mubr.msk.f32.mxu1 %vm333_vm1, %v13938_v55 }
 0x7d2   : > { %20684 = vmatmul.mubr.msk.f32.gmra.mrb[78].mxu1 %vm333_vm1, %v13939_v39 }
 0x7d3   : > { %20738 = vmatprep.mubr.msk.f32.mxu1 %vm333_vm1, %v27037_v52 }
 0x7d6   : > { %20739 = vmatmul.mubr.msk.f32.vlgmr.msra.gmra.mrb[80].mxu1 %vm333_vm1, %v27038_v35 }
 0x7d7   : > { %20741 = vmatprep.mubr.msk.f32.mxu1 %vm333_vm1, %v27039_v19 }
 0x7da   : > { %20742 = vmatmul.mubr.msk.f32.gmra.mrb[82].mxu1 %vm333_vm1, %v27040_v16 }
 0x7db   : > { %20744 = vmatprep.mubr.msk.f32.mxu1 %vm333_vm1, %v27041_v62 }
 0x7de   : > { %20745 = vmatmul.mubr.msk.f32.gmra.mrb[84].mxu1 %vm333_vm1, %v27042_v3 }
 0x7df   : > { %20747 = vmatprep.mubr.msk.f32.mxu1 %vm333_vm1, %v27043_v1 }
 0x7e2   : > { %20748 = vmatmul.mubr.msk.f32.gmra.mrb[86].mxu1 %vm333_vm1, %v27044_v29 }
 0x7e3   : > { %20750 = vmatprep.mubr.msk.f32.mxu1 %vm333_vm1, %v27045_v43 }
 0x7e6   : > { %20751 = vmatmul.mubr.msk.f32.gmra.mrb[88].mxu1 %vm333_vm1, %v27046_v47 }
 0x7e7   : > { %20753 = vmatprep.mubr.msk.f32.mxu1 %vm333_vm1, %v27047_v61 }
 0x7ea   : > { %20754 = vmatmul.mubr.msk.f32.gmra.mrb[90].mxu1 %vm333_vm1, %v27048_v17 }
 0x7eb   : > { %20756 = vmatprep.mubr.msk.f32.mxu1 %vm333_vm1, %v27049_v14 }
 0x7ee   : > { %20757 = vmatmul.mubr.msk.f32.gmra.mrb[92].mxu1 %vm333_vm1, %v27050_v20 }
 0x7ef   : > { %20759 = vmatprep.mubr.msk.f32.mxu1 %vm333_vm1, %v27051_v42 }
 0x7f2   : > { %20760 = vmatmul.mubr.msk.f32.gmra.mrb[94].mxu1 %vm333_vm1, %v27052_v38 }
 0x7f3   : > { %20762 = vmatprep.mubr.msk.f32.mxu1 %vm333_vm1, %v27053_v54 }
 0x7f6   : > { %20763 = vmatmul.mubr.msk.f32.gmra.mrb[96].mxu1 %vm333_vm1, %v27054_v40 }
 0x7f7   : > { %20765 = vmatprep.mubr.msk.f32.mxu1 %vm333_vm1, %v27055_v22 }
 0x7fa   : > { %20766 = vmatmul.mubr.msk.f32.gmra.mrb[98].mxu1 %vm333_vm1, %v27056_v51 }
 0x7fb   : > { %20768 = vmatprep.mubr.msk.f32.mxu1 %vm333_vm1, %v27057_v44 }
 0x7fe   : > { %20769 = vmatmul.mubr.msk.f32.gmra.mrb[100].mxu1 %vm333_vm1, %v27058_v56 }
 0x7ff   : > { %20771 = vmatprep.mubr.msk.f32.mxu1 %vm333_vm1, %v27059_v37 }
 0x802   : > { %20772 = vmatmul.mubr.msk.f32.gmra.mrb[102].mxu1 %vm333_vm1, %v27060_v27 }
 0x803   : > { %20774 = vmatprep.mubr.msk.f32.mxu1 %vm333_vm1, %v27061_v23 }
 0x806   : > { %20775 = vmatmul.mubr.msk.f32.gmra.mrb[104].mxu1 %vm333_vm1, %v27062_v57 }
 0x807   : > { %20777 = vmatprep.mubr.msk.f32.mxu1 %vm333_vm1, %v27063_v34 }
 0x80a   : > { %20778 = vmatmul.mubr.msk.f32.gmra.mrb[106].mxu1 %vm333_vm1, %v27064_v50 }
 0x80b   : > { %20780 = vmatprep.mubr.msk.f32.mxu1 %vm333_vm1, %v27065_v9 }
 0x80e   : > { %20781 = vmatmul.mubr.msk.f32.gmra.mrb[108].mxu1 %vm333_vm1, %v27066_v15 }
 0x80f   : > { %20783 = vmatprep.mubr.msk.f32.mxu1 %vm333_vm1, %v27067_v30 }
 0x812   : > { %20784 = vmatmul.mubr.msk.f32.gmra.mrb[110].mxu1 %vm333_vm1, %v27068_v33 }
 0x869   : > { %v20640_v59 = vpop.f32.mrb[48].mxu1 }
 0x86a   : > { %v14107_v46 = vpop.f32.mrb[49].mxu1  ;;  %v14306_v8 = vadd.f32 %v20640_v59, %v26260_v10 }
 0x86b   : > { %v14305_v26 = vadd.f32 %v26260_v10, %v14107_v46 }
 0x86d   : > { %v20643_v13 = vpop.f32.mrb[50].mxu1  ;;  %20788 = vmatprep.mubr.msk.f32.mxu0 %vm333_vm1, %v14305_v26  ;;  %v26328_v26 = vld [vmem:[%s26604_s8] ss:$0 sm:$0xff] }
 0x86e   : > { %v14117_v2 = vpop.f32.mrb[51].mxu1  ;;  %20789 = vmatmul.mubr.msk.f32.vlgmr.msra.gmra.mrb[96].mxu0 %vm333_vm1, %v14306_v8  ;;  %v14308_v48 = vadd.f32 %v20643_v13, %v26260_v10 }
 0x86f   : > { %v14307_v32 = vadd.f32 %v26260_v10, %v14117_v2 }
 0x871   : > { %v20646_v11 = vpop.f32.mrb[52].mxu1  ;;  %20791 = vmatprep.mubr.msk.f32.mxu0 %vm333_vm1, %v14307_v32 }
 0x872   : > { %v14127_v7 = vpop.f32.mrb[53].mxu1  ;;  %20792 = vmatmul.mubr.msk.f32.gmra.mrb[98].mxu0 %vm333_vm1, %v14308_v48  ;;  %v14310_v36 = vadd.f32 %v20646_v11, %v26260_v10 }
 0x873   : > { %v14309_v4 = vadd.f32 %v26260_v10, %v14127_v7  ;;  %v27069_v7 = vld [vmem:[#allocation66_spill] sm:$0xff] }
 0x875   : > { %v20649_v6 = vpop.f32.mrb[54].mxu1  ;;  %20794 = vmatprep.mubr.msk.f32.mxu0 %vm333_vm1, %v14309_v4 }
 0x876   : > { %v14137_v53 = vpop.f32.mrb[55].mxu1  ;;  %20795 = vmatmul.mubr.msk.f32.gmra.mrb[100].mxu0 %vm333_vm1, %v14310_v36  ;;  %v14312_v31 = vadd.f32 %v20649_v6, %v26260_v10  ;;  %v27070_v6 = vld [vmem:[#allocation71_spill] sm:$0xff] }
 0x877   : > { %v14311_v0 = vadd.f32 %v26260_v10, %v14137_v53 }
 0x879   : > { %v20652_v41 = vpop.f32.mrb[56].mxu1  ;;  %20797 = vmatprep.mubr.msk.f32.mxu0 %vm333_vm1, %v14311_v0 }
 0x87a   : > { %v14147_v63 = vpop.f32.mrb[57].mxu1  ;;  %20798 = vmatmul.mubr.msk.f32.gmra.mrb[102].mxu0 %vm333_vm1, %v14312_v31  ;;  %v14314_v49 = vadd.f32 %v20652_v41, %v26260_v10 }
 0x87b   : > { %v14313_v24 = vadd.f32 %v26260_v10, %v14147_v63 }
 0x87d   : > { %v20655_v25 = vpop.f32.mrb[58].mxu1  ;;  %20800 = vmatprep.mubr.msk.f32.mxu0 %vm333_vm1, %v14313_v24  ;;  %v27071_v24 = vld [vmem:[#allocation69_spill] sm:$0xff] }
 0x87e   : > { %v14157_v21 = vpop.f32.mrb[59].mxu1  ;;  %20801 = vmatmul.mubr.msk.f32.gmra.mrb[104].mxu0 %vm333_vm1, %v14314_v49  ;;  %v14316_v5 = vadd.f32 %v20655_v25, %v26260_v10 }
 0x87f   : > { %v14315_v60 = vadd.f32 %v26260_v10, %v14157_v21 }
 0x881   : > { %v20658_v28 = vpop.f32.mrb[60].mxu1  ;;  %20803 = vmatprep.mubr.msk.f32.mxu0 %vm333_vm1, %v14315_v60  ;;  %v27072_v60 = vld [vmem:[#allocation74_spill] sm:$0xff] }
 0x882   : > { %v14167_v45 = vpop.f32.mrb[61].mxu1  ;;  %20804 = vmatmul.mubr.msk.f32.gmra.mrb[106].mxu0 %vm333_vm1, %v14316_v5  ;;  %v14318_v58 = vadd.f32 %v20658_v28, %v26260_v10 }
 0x883   : > { %v14317_v18 = vadd.f32 %v26260_v10, %v14167_v45 }
 0x885   : > { %v20661_v12 = vpop.f32.mrb[62].mxu1  ;;  %20806 = vmatprep.mubr.msk.f32.mxu0 %vm333_vm1, %v14317_v18 }
 0x886   : > { %v14177_v55 = vpop.f32.mrb[63].mxu1  ;;  %20807 = vmatmul.mubr.msk.f32.gmra.mrb[108].mxu0 %vm333_vm1, %v14318_v58  ;;  %v14320_v52 = vadd.f32 %v20661_v12, %v26260_v10  ;;  %v27073_v12 = vld [vmem:[#allocation72_spill] sm:$0xff] }
 0x887   : > { %v14319_v39 = vadd.f32 %v26260_v10, %v14177_v55 }
 0x889   : > { %v20664_v35 = vpop.f32.mrb[64].mxu1  ;;  %20809 = vmatprep.mubr.msk.f32.mxu0 %vm333_vm1, %v14319_v39 }
 0x88a   : > { %v14187_v19 = vpop.f32.mrb[65].mxu1  ;;  %20810 = vmatmul.mubr.msk.f32.gmra.mrb[110].mxu0 %vm333_vm1, %v14320_v52  ;;  %v14322_v62 = vadd.f32 %v20664_v35, %v26260_v10  ;;  %v27074_v35 = vld [vmem:[#allocation75_spill] sm:$0xff] }
 0x88b   : > { %v14321_v16 = vadd.f32 %v26260_v10, %v14187_v19 }
 0x88d   : > { %v20667_v3 = vpop.f32.mrb[66].mxu1  ;;  %20812 = vmatprep.mubr.msk.f32.mxu0 %vm333_vm1, %v14321_v16 }
 0x88e   : > { %v14197_v1 = vpop.f32.mrb[67].mxu1  ;;  %20813 = vmatmul.mubr.msk.f32.gmra.mrb[112].mxu0 %vm333_vm1, %v14322_v62  ;;  %v14324_v43 = vadd.f32 %v20667_v3, %v26260_v10 }
 0x88f   : > { %v14323_v29 = vadd.f32 %v26260_v10, %v14197_v1 }
 0x891   : > { %v20670_v47 = vpop.f32.mrb[68].mxu1  ;;  %20815 = vmatprep.mubr.msk.f32.mxu0 %vm333_vm1, %v14323_v29  ;;  %v27075_v29 = vld [vmem:[#allocation11_spill] sm:$0xff] }
 0x892   : > { %v14207_v61 = vpop.f32.mrb[69].mxu1  ;;  %20816 = vmatmul.mubr.msk.f32.gmra.mrb[114].mxu0 %vm333_vm1, %v14324_v43  ;;  %v14326_v14 = vadd.f32 %v20670_v47, %v26260_v10 }
 0x893   : > { %v14325_v17 = vadd.f32 %v26260_v10, %v14207_v61 }
 0x895   : > { %v20673_v20 = vpop.f32.mrb[70].mxu1  ;;  %20818 = vmatprep.mubr.msk.f32.mxu0 %vm333_vm1, %v14325_v17  ;;  %v27076_v17 = vld [vmem:[#allocation12_spill] sm:$0xff] }
 0x896   : > { %v14217_v42 = vpop.f32.mrb[71].mxu1  ;;  %20819 = vmatmul.mubr.msk.f32.gmra.mrb[116].mxu0 %vm333_vm1, %v14326_v14  ;;  %v14328_v54 = vadd.f32 %v20673_v20, %v26260_v10 }
 0x897   : > { %v14327_v38 = vadd.f32 %v26260_v10, %v14217_v42 }
 0x899   : > { %v20676_v40 = vpop.f32.mrb[72].mxu1  ;;  %20821 = vmatprep.mubr.msk.f32.mxu0 %vm333_vm1, %v14327_v38 }
 0x89a   : > { %v14227_v22 = vpop.f32.mrb[73].mxu1  ;;  %20822 = vmatmul.mubr.msk.f32.gmra.mrb[118].mxu0 %vm333_vm1, %v14328_v54  ;;  %v14330_v44 = vadd.f32 %v20676_v40, %v26260_v10  ;;  %v27077_v40 = vld [vmem:[#allocation13_spill] sm:$0xff] }
 0x89b   : > { %v14329_v51 = vadd.f32 %v26260_v10, %v14227_v22 }
 0x89d   : > { %v20679_v56 = vpop.f32.mrb[74].mxu1  ;;  %20824 = vmatprep.mubr.msk.f32.mxu0 %vm333_vm1, %v14329_v51 }
 0x89e   : > { %v14237_v37 = vpop.f32.mrb[75].mxu1  ;;  %20825 = vmatmul.mubr.msk.f32.gmra.mrb[120].mxu0 %vm333_vm1, %v14330_v44  ;;  %v14332_v23 = vadd.f32 %v20679_v56, %v26260_v10  ;;  %v27078_v56 = vld [vmem:[#allocation14_spill] sm:$0xff] }
 0x89f   : > { %v14331_v27 = vadd.f32 %v26260_v10, %v14237_v37 }
 0x8a1   : > { %v20682_v57 = vpop.f32.mrb[76].mxu1  ;;  %20827 = vmatprep.mubr.msk.f32.mxu0 %vm333_vm1, %v14331_v27 }
 0x8a2   : > { %v14247_v34 = vpop.f32.mrb[77].mxu1  ;;  %20828 = vmatmul.mubr.msk.f32.gmra.mrb[122].mxu0 %vm333_vm1, %v14332_v23  ;;  %v14334_v9 = vadd.f32 %v20682_v57, %v26260_v10 }
 0x8a3   : > { %v14333_v50 = vadd.f32 %v26260_v10, %v14247_v34 }
 0x8a5   : > { %v20685_v15 = vpop.f32.mrb[78].mxu1  ;;  %20830 = vmatprep.mubr.msk.f32.mxu0 %vm333_vm1, %v14333_v50  ;;  %v27079_v50 = vld [vmem:[#allocation15_spill] sm:$0xff] }
 0x8a6   : > { %v14257_v30 = vpop.f32.mrb[79].mxu1  ;;  %20831 = vmatmul.mubr.msk.f32.gmra.mrb[124].mxu0 %vm333_vm1, %v14334_v9  ;;  %v14336_v59 = vadd.f32 %v20685_v15, %v26260_v10 }
 0x8a7   : > { %v14335_v33 = vadd.f32 %v26260_v10, %v14257_v30 }
 0x8a9   : > { %v20740_v46 = vpop.f32.mrb[80].mxu1  ;;  %20833 = vmatprep.mubr.msk.f32.mxu0 %vm333_vm1, %v14335_v33  ;;  %v27080_v33 = vld [vmem:[#allocation16_spill] sm:$0xff] }
 0x8aa   : > { %v14997_v8 = vadd.f32 %v26328_v26, %v20740_v46  ;;  %v14991_v13 = vpop.f32.mrb[81].mxu1  ;;  %20834 = vmatmul.mubr.msk.f32.gmra.mrb[126].mxu0 %vm333_vm1, %v14336_v59 }
 0x8ab   : > { %v14992_v2 = vadd.f32 %v26328_v26, %v14991_v13 }
 0x8ac   : > { %v15151_v32 = vmax.f32 %v14997_v8, 0.0 }
 0x8ad   : > { %v15150_v48 = vmax.f32 %v14992_v2, 0.0  ;;  %v20743_v11 = vpop.f32.mrb[82].mxu1 }
 0x8ae   : > { %v26334_v10 = vadd.f32 %v15151_v32, %v27069_v7  ;;  %v15007_v4 = vadd.f32 %v26328_v26, %v20743_v11  ;;  %v15001_v36 = vpop.f32.mrb[83].mxu1  ;;  %v27081_v32 = vld [vmem:[#allocation17_spill] sm:$0xff] }
 0x8af   : > { %v26338_v53 = vadd.f32 %v15150_v48, %v27070_v6  ;;  %v15002_v0 = vadd.f32 %v26328_v26, %v15001_v36 }
 0x8b0   : > { %v15153_v31 = vmax.f32 %v15007_v4, 0.0  ;;  %v27082_v4 = vld [vmem:[#allocation18_spill] sm:$0xff] }
 0x8b1   : > { %v15152_v41 = vmax.f32 %v15002_v0, 0.0  ;;  %v20746_v63 = vpop.f32.mrb[84].mxu1 }
 0x8b2   : > { %v26342_v49 = vadd.f32 %v15153_v31, %v27071_v24  ;;  %v15017_v25 = vadd.f32 %v26328_v26, %v20746_v63  ;;  %v15011_v21 = vpop.f32.mrb[85].mxu1  ;;  %v27083_v63 = vld [vmem:[#allocation19_spill] sm:$0xff] }
 0x8b3   : > { %v26346_v5 = vadd.f32 %v15152_v41, %v27072_v60  ;;  %v15012_v28 = vadd.f32 %v26328_v26, %v15011_v21  ;;  %v27084_v60 = vld [vmem:[#allocation20_spill] sm:$0xff] }
 0x8b4   : > { %v15155_v45 = vmax.f32 %v15017_v25, 0.0 }
 0x8b5   : > { %v15154_v18 = vmax.f32 %v15012_v28, 0.0  ;;  %v20749_v58 = vpop.f32.mrb[86].mxu1 }
 0x8b6   : > { %v26350_v55 = vadd.f32 %v15155_v45, %v27073_v12  ;;  %v15027_v39 = vadd.f32 %v26328_v26, %v20749_v58  ;;  %v15021_v52 = vpop.f32.mrb[87].mxu1 }
 0x8b7   : > { %v26354_v19 = vadd.f32 %v15154_v18, %v27074_v35  ;;  %v15022_v16 = vadd.f32 %v26328_v26, %v15021_v52 }
 0x8b8   : > { %v15157_v62 = vmax.f32 %v15027_v39, 0.0  ;;  %v27085_v39 = vld [vmem:[#allocation21_spill] sm:$0xff] }
 0x8b9   : > { %v15156_v3 = vmax.f32 %v15022_v16, 0.0  ;;  %v20752_v1 = vpop.f32.mrb[88].mxu1 }
 0x8ba   : > { %v26358_v43 = vadd.f32 %v15157_v62, %v27075_v29  ;;  %v15037_v47 = vadd.f32 %v26328_v26, %v20752_v1  ;;  %v15031_v61 = vpop.f32.mrb[89].mxu1  ;;  %v27086_v62 = vld [vmem:[#allocation22_spill] sm:$0xff] }
 0x8bb   : > { %v26362_v14 = vadd.f32 %v15156_v3, %v27076_v17  ;;  %v15032_v20 = vadd.f32 %v26328_v26, %v15031_v61  ;;  %v27087_v17 = vld [vmem:[#allocation23_spill] sm:$0xff] }
 0x8bc   : > { %v15159_v42 = vmax.f32 %v15037_v47, 0.0 }
 0x8bd   : > { %v15158_v38 = vmax.f32 %v15032_v20, 0.0  ;;  %v20755_v54 = vpop.f32.mrb[90].mxu1 }
 0x8be   : > { %v26366_v22 = vadd.f32 %v15159_v42, %v27077_v40  ;;  %v15047_v51 = vadd.f32 %v26328_v26, %v20755_v54  ;;  %v15041_v44 = vpop.f32.mrb[91].mxu1  ;;  %v27088_v54 = vld [vmem:[#allocation24_spill] sm:$0xff] }
 0x8bf   : > { %v26370_v37 = vadd.f32 %v15158_v38, %v27078_v56  ;;  %v15042_v27 = vadd.f32 %v26328_v26, %v15041_v44 }
 0x8c0   : > { %v15161_v23 = vmax.f32 %v15047_v51, 0.0 }
 0x8c1   : > { %v15160_v57 = vmax.f32 %v15042_v27, 0.0  ;;  %v20758_v34 = vpop.f32.mrb[92].mxu1 }
 0x8c2   : > { %v26374_v9 = vadd.f32 %v15161_v23, %v27079_v50  ;;  %v15057_v15 = vadd.f32 %v26328_v26, %v20758_v34  ;;  %v15051_v30 = vpop.f32.mrb[93].mxu1  ;;  %v27089_v23 = vld [vmem:[#allocation25_spill] sm:$0xff] }
 0x8c3   : > { %v26378_v59 = vadd.f32 %v15160_v57, %v27080_v33  ;;  %v15052_v46 = vadd.f32 %v26328_v26, %v15051_v30 }
 0x8c4   : > { %v15163_v8 = vmax.f32 %v15057_v15, 0.0  ;;  %v27090_v15 = vld [vmem:[#allocation26_spill] sm:$0xff] }
 0x8c5   : > { %v15162_v13 = vmax.f32 %v15052_v46, 0.0  ;;  %v20761_v2 = vpop.f32.mrb[94].mxu1 }
 0x8c6   : > { %v26382_v48 = vadd.f32 %v15163_v8, %v27081_v32  ;;  %v15067_v11 = vadd.f32 %v26328_v26, %v20761_v2  ;;  %v15061_v7 = vpop.f32.mrb[95].mxu1  ;;  %v27091_v2 = vld [vmem:[#allocation27_spill] sm:$0xff] }
 0x8c7   : > { %v26386_v36 = vadd.f32 %v15162_v13, %v27082_v4  ;;  %v15062_v6 = vadd.f32 %v26328_v26, %v15061_v7  ;;  %v27092_v4 = vld [vmem:[#allocation29_spill] sm:$0xff] }
 0x8c8   : > { %v15165_v0 = vmax.f32 %v15067_v11, 0.0 }
 0x8c9   : > { %v15164_v31 = vmax.f32 %v15062_v6, 0.0  ;;  %v20764_v41 = vpop.f32.mrb[96].mxu1 }
 0x8ca   : > { %v26390_v24 = vadd.f32 %v15165_v0, %v27083_v63  ;;  %v15077_v25 = vadd.f32 %v26328_v26, %v20764_v41  ;;  %v15071_v21 = vpop.f32.mrb[97].mxu1 }
 0x8cb   : > { %v26394_v28 = vadd.f32 %v15164_v31, %v27084_v60  ;;  %v15072_v45 = vadd.f32 %v26328_v26, %v15071_v21 }
 0x8cc   : > { %v15167_v18 = vmax.f32 %v15077_v25, 0.0  ;;  %v27093_v25 = vld [vmem:[#allocation31_spill] sm:$0xff] }
 0x8cd   : > { %v15166_v58 = vmax.f32 %v15072_v45, 0.0  ;;  %v20767_v12 = vpop.f32.mrb[98].mxu1 }
 0x8ce   : > { %v26398_v52 = vadd.f32 %v15167_v18, %v27085_v39  ;;  %v15087_v35 = vadd.f32 %v26328_v26, %v20767_v12  ;;  %v15081_v16 = vpop.f32.mrb[99].mxu1  ;;  %v27094_v18 = vld [vmem:[#allocation33_spill] sm:$0xff] }
 0x8cf   : > { %v26402_v3 = vadd.f32 %v15166_v58, %v27086_v62  ;;  %v15082_v1 = vadd.f32 %v26328_v26, %v15081_v16  ;;  %v27095_v62 = vld [vmem:[#allocation34_spill] sm:$0xff] }
 0x8d0   : > { %v15169_v29 = vmax.f32 %v15087_v35, 0.0 }
 0x8d1   : > { %v15168_v47 = vmax.f32 %v15082_v1, 0.0  ;;  %v20770_v61 = vpop.f32.mrb[100].mxu1 }
 0x8d2   : > { %v26406_v20 = vadd.f32 %v15169_v29, %v27087_v17  ;;  %v15097_v42 = vadd.f32 %v26328_v26, %v20770_v61  ;;  %v15091_v38 = vpop.f32.mrb[101].mxu1  ;;  %v27096_v61 = vld [vmem:[#allocation3_spill] sm:$0xff] }
 0x8d3   : > { %v26410_v40 = vadd.f32 %v15168_v47, %v27088_v54  ;;  %v15092_v51 = vadd.f32 %v26328_v26, %v15091_v38 }
 0x8d4   : > { %v15171_v44 = vmax.f32 %v15097_v42, 0.0 }
 0x8d5   : > { %v15170_v56 = vmax.f32 %v15092_v51, 0.0  ;;  %v20773_v27 = vpop.f32.mrb[102].mxu1 }
 0x8d6   : > { %v26414_v57 = vadd.f32 %v15171_v44, %v27089_v23  ;;  %v15107_v34 = vadd.f32 %v26328_v26, %v20773_v27  ;;  %v15101_v50 = vpop.f32.mrb[103].mxu1  ;;  %v27097_v44 = vld [vmem:[#allocation4_spill] sm:$0xff] }
 0x8d7   : > { %v26418_v30 = vadd.f32 %v15170_v56, %v27090_v15  ;;  %v15102_v33 = vadd.f32 %v26328_v26, %v15101_v50 }
 0x8d8   : > { %v15173_v46 = vmax.f32 %v15107_v34, 0.0  ;;  %v27098_v34 = vld [vmem:[#allocation32_spill] sm:$0xff] }
 0x8d9   : > { %v15172_v8 = vmax.f32 %v15102_v33, 0.0  ;;  %v20776_v13 = vpop.f32.mrb[104].mxu1 }
 0x8da   : > { %v26422_v32 = vadd.f32 %v15173_v46, %v27091_v2  ;;  %v15117_v11 = vadd.f32 %v26328_v26, %v20776_v13  ;;  %v15111_v7 = vpop.f32.mrb[105].mxu1  ;;  %v27100_v2 = vld [vmem:[#allocation28_spill] sm:$0xff] }
 0x8db   : > { %v26426_v6 = vadd.f32 %v15172_v8, %v27092_v4  ;;  %v15112_v0 = vadd.f32 %v26328_v26, %v15111_v7  ;;  %v27099_v8 = vld [vmem:[#allocation5_spill] sm:$0xff] }
 0x8dc   : > { %v15175_v31 = vmax.f32 %v15117_v11, 0.0 }
 0x8dd   : > { %v15174_v41 = vmax.f32 %v15112_v0, 0.0  ;;  %v20779_v63 = vpop.f32.mrb[106].mxu1 }
 0x8de   : > { %v26430_v21 = vadd.f32 %v15175_v31, %v27093_v25  ;;  %v15127_v60 = vadd.f32 %v26328_v26, %v20779_v63  ;;  %v15121_v45 = vpop.f32.mrb[107].mxu1 }
 0x8df   : > { %v26434_v58 = vadd.f32 %v15174_v41, %v27094_v18  ;;  %v15122_v12 = vadd.f32 %v26328_v26, %v15121_v45 }
 0x8e0   : > { %v15177_v39 = vmax.f32 %v15127_v60, 0.0 }
 0x8e1   : > { %v15176_v35 = vmax.f32 %v15122_v12, 0.0  ;;  %v20782_v16 = vpop.f32.mrb[108].mxu1 }
 0x8e2   : > { %v26438_v1 = vadd.f32 %v15177_v39, %v27095_v62  ;;  %v15137_v29 = vadd.f32 %v26328_v26, %v20782_v16  ;;  %v15131_v47 = vpop.f32.mrb[109].mxu1 }
 0x8e3   : > { %v26442_v17 = vadd.f32 %v15176_v35, %v27096_v61  ;;  %v15132_v42 = vadd.f32 %v26328_v26, %v15131_v47 }
 0x8e4   : > { %v15179_v38 = vmax.f32 %v15137_v29, 0.0 }
 0x8e5   : > { %v15178_v54 = vmax.f32 %v15132_v42, 0.0  ;;  %v20785_v51 = vpop.f32.mrb[110].mxu1 }
 0x8e6   : > { %v26446_v56 = vadd.f32 %v15179_v38, %v27097_v44  ;;  %v15147_v27 = vadd.f32 %v26328_v26, %v20785_v51  ;;  %v15141_v23 = vpop.f32.mrb[111].mxu1 }
 0x8e7   : > { %v26450_v50 = vadd.f32 %v15178_v54, %v27098_v34  ;;  %v15142_v15 = vadd.f32 %v26328_v26, %v15141_v23 }
 0x8e8   : > { %v15181_v33 = vmax.f32 %v15147_v27, 0.0 }
 0x8e9   : > { %v15180_v46 = vmax.f32 %v15142_v15, 0.0 }
 0x8ea   : > { %v26454_v13 = vadd.f32 %v15181_v33, %v27099_v8 }
 0x8eb   : > { %v26457_v11 = vadd.f32 %v15180_v46, %v27100_v2 }
 0x941   : > { %v20790_v7 = vpop.f32.mrb[96].mxu0 }
 0x942   : > { %v15382_v4 = vadd.f32 %v26328_v26, %v20790_v7  ;;  %v15376_v0 = vpop.f32.mrb[97].mxu0 }
 0x943   : > { %v15377_v31 = vadd.f32 %v26328_v26, %v15376_v0 }
 0x944   : > { %v15536_v41 = vmax.f32 %v15382_v4, 0.0 }
 0x945   : > { %v15535_v63 = vmax.f32 %v15377_v31, 0.0  ;;  %v20793_v25 = vpop.f32.mrb[98].mxu0 }
 0x946   : > { %v15568_v60 = vadd.f32 %v15536_v41, %v26334_v10  ;;  %v15392_v45 = vadd.f32 %v26328_v26, %v20793_v25  ;;  %v15386_v18 = vpop.f32.mrb[99].mxu0 }
 0x947   : > { %v15567_v12 = vadd.f32 %v15535_v63, %v26338_v53  ;;  %v15387_v39 = vadd.f32 %v26328_v26, %v15386_v18 }
 0x948   : > { %15600 = vst.msk [vmem:[%s26465_s12 + $0x8] sm:$0xff] %vm333_vm1, %v15568_v60  ;;  %v15538_v35 = vmax.f32 %v15392_v45, 0.0 }
 0x949   : > { %15599 = vst.msk [vmem:[%s26465_s12] sm:$0xff] %vm333_vm1, %v15567_v12  ;;  %v15537_v16 = vmax.f32 %v15387_v39, 0.0  ;;  %v20796_v62 = vpop.f32.mrb[100].mxu0 }
 0x94a   : > { %v15570_v29 = vadd.f32 %v15538_v35, %v26342_v49  ;;  %v15402_v10 = vadd.f32 %v26328_v26, %v20796_v62  ;;  %v15396_v47 = vpop.f32.mrb[101].mxu0 }
 0x94b   : > { %v15569_v61 = vadd.f32 %v15537_v16, %v26346_v5  ;;  %v15397_v53 = vadd.f32 %v26328_v26, %v15396_v47 }
 0x94c   : > { %15602 = vst.msk [vmem:[%s26465_s12 + $0x18] sm:$0xff] %vm333_vm1, %v15570_v29  ;;  %v15540_v42 = vmax.f32 %v15402_v10, 0.0 }
 0x94d   : > { %15601 = vst.msk [vmem:[%s26465_s12 + $0x10] sm:$0xff] %vm333_vm1, %v15569_v61  ;;  %v15539_v38 = vmax.f32 %v15397_v53, 0.0  ;;  %v20799_v54 = vpop.f32.mrb[102].mxu0 }
 0x94e   : > { %v15572_v51 = vadd.f32 %v15540_v42, %v26350_v55  ;;  %v15412_v49 = vadd.f32 %v26328_v26, %v20799_v54  ;;  %v15406_v44 = vpop.f32.mrb[103].mxu0 }
 0x94f   : > { %v15571_v27 = vadd.f32 %v15539_v38, %v26354_v19  ;;  %v15407_v5 = vadd.f32 %v26328_v26, %v15406_v44 }
 0x950   : > { %15604 = vst.msk [vmem:[%s26465_s12 + $0x28] sm:$0xff] %vm333_vm1, %v15572_v51  ;;  %v15542_v23 = vmax.f32 %v15412_v49, 0.0 }
 0x951   : > { %15603 = vst.msk [vmem:[%s26465_s12 + $0x20] sm:$0xff] %vm333_vm1, %v15571_v27  ;;  %v15541_v34 = vmax.f32 %v15407_v5, 0.0  ;;  %v20802_v15 = vpop.f32.mrb[104].mxu0 }
 0x952   : > { %v15574_v33 = vadd.f32 %v15542_v23, %v26358_v43  ;;  %v15422_v55 = vadd.f32 %v26328_v26, %v20802_v15  ;;  %v15416_v46 = vpop.f32.mrb[105].mxu0 }
 0x953   : > { %v15573_v8 = vadd.f32 %v15541_v34, %v26362_v14  ;;  %v15417_v19 = vadd.f32 %v26328_v26, %v15416_v46 }
 0x954   : > { %15606 = vst.msk [vmem:[%s26465_s12 + $0x38] sm:$0xff] %vm333_vm1, %v15574_v33  ;;  %v15544_v2 = vmax.f32 %v15422_v55, 0.0 }
 0x955   : > { %15605 = vst.msk [vmem:[%s26465_s12 + $0x30] sm:$0xff] %vm333_vm1, %v15573_v8  ;;  %v15543_v7 = vmax.f32 %v15417_v19, 0.0  ;;  %v20805_v4 = vpop.f32.mrb[106].mxu0 }
 0x956   : > { %v15576_v0 = vadd.f32 %v15544_v2, %v26366_v22  ;;  %v15432_v43 = vadd.f32 %v26328_v26, %v20805_v4  ;;  %v15426_v31 = vpop.f32.mrb[107].mxu0 }
 0x957   : > { %v15575_v41 = vadd.f32 %v15543_v7, %v26370_v37  ;;  %v15427_v14 = vadd.f32 %v26328_v26, %v15426_v31 }
 0x958   : > { %15608 = vst.msk [vmem:[%s26465_s12 + $0x48] sm:$0xff] %vm333_vm1, %v15576_v0  ;;  %v15546_v63 = vmax.f32 %v15432_v43, 0.0 }
 0x959   : > { %15607 = vst.msk [vmem:[%s26465_s12 + $0x40] sm:$0xff] %vm333_vm1, %v15575_v41  ;;  %v15545_v25 = vmax.f32 %v15427_v14, 0.0  ;;  %v20808_v60 = vpop.f32.mrb[108].mxu0 }
 0x95a   : > { %v15578_v45 = vadd.f32 %v15546_v63, %v26374_v9  ;;  %v15442_v22 = vadd.f32 %v26328_v26, %v20808_v60  ;;  %v15436_v18 = vpop.f32.mrb[109].mxu0 }
 0x95b   : > { %v15577_v12 = vadd.f32 %v15545_v25, %v26378_v59  ;;  %v15437_v37 = vadd.f32 %v26328_v26, %v15436_v18 }
 0x95c   : > { %15610 = vst.msk [vmem:[%s26465_s12 + $0x58] sm:$0xff] %vm333_vm1, %v15578_v45  ;;  %v15548_v39 = vmax.f32 %v15442_v22, 0.0 }
 0x95d   : > { %15609 = vst.msk [vmem:[%s26465_s12 + $0x50] sm:$0xff] %vm333_vm1, %v15577_v12  ;;  %v15547_v35 = vmax.f32 %v15437_v37, 0.0  ;;  %v20811_v16 = vpop.f32.mrb[110].mxu0 }
 0x95e   : > { %v15580_v62 = vadd.f32 %v15548_v39, %v26382_v48  ;;  %v15452_v9 = vadd.f32 %v26328_v26, %v20811_v16  ;;  %v15446_v29 = vpop.f32.mrb[111].mxu0 }
 0x95f   : > { %v15579_v10 = vadd.f32 %v15547_v35, %v26386_v36  ;;  %v15447_v59 = vadd.f32 %v26328_v26, %v15446_v29 }
 0x960   : > { %15612 = vst.msk [vmem:[%s26465_s12 + $0x68] sm:$0xff] %vm333_vm1, %v15580_v62  ;;  %v15550_v47 = vmax.f32 %v15452_v9, 0.0 }
 0x961   : > { %15611 = vst.msk [vmem:[%s26465_s12 + $0x60] sm:$0xff] %vm333_vm1, %v15579_v10  ;;  %v15549_v61 = vmax.f32 %v15447_v59, 0.0  ;;  %v20814_v53 = vpop.f32.mrb[112].mxu0 }
 0x962   : > { %v15582_v42 = vadd.f32 %v15550_v47, %v26390_v24  ;;  %v15462_v48 = vadd.f32 %v26328_v26, %v20814_v53  ;;  %v15456_v38 = vpop.f32.mrb[113].mxu0 }
 0x963   : > { %v15581_v54 = vadd.f32 %v15549_v61, %v26394_v28  ;;  %v15457_v36 = vadd.f32 %v26328_v26, %v15456_v38 }
 0x964   : > { %15614 = vst.msk [vmem:[%s26465_s12 + $0x78] sm:$0xff] %vm333_vm1, %v15582_v42  ;;  %v15552_v51 = vmax.f32 %v15462_v48, 0.0 }
 0x965   : > { %15613 = vst.msk [vmem:[%s26465_s12 + $0x70] sm:$0xff] %vm333_vm1, %v15581_v54  ;;  %v15551_v49 = vmax.f32 %v15457_v36, 0.0  ;;  %v20817_v44 = vpop.f32.mrb[114].mxu0 }
 0x966   : > { %v15584_v27 = vadd.f32 %v15552_v51, %v26398_v52  ;;  %v15472_v24 = vadd.f32 %v26328_v26, %v20817_v44  ;;  %v15466_v5 = vpop.f32.mrb[115].mxu0 }
 0x967   : > { %v15583_v23 = vadd.f32 %v15551_v49, %v26402_v3  ;;  %v15467_v28 = vadd.f32 %v26328_v26, %v15466_v5 }
 0x968   : > { %15616 = vst.msk [vmem:[%s26465_s12 + $0x88] sm:$0xff] %vm333_vm1, %v15584_v27  ;;  %v15554_v34 = vmax.f32 %v15472_v24, 0.0 }
 0x969   : > { %15615 = vst.msk [vmem:[%s26465_s12 + $0x80] sm:$0xff] %vm333_vm1, %v15583_v23  ;;  %v15553_v15 = vmax.f32 %v15467_v28, 0.0  ;;  %v20820_v33 = vpop.f32.mrb[116].mxu0 }
 0x96a   : > { %v15586_v55 = vadd.f32 %v15554_v34, %v26406_v20  ;;  %v15482_v52 = vadd.f32 %v26328_v26, %v20820_v33  ;;  %v15476_v46 = vpop.f32.mrb[117].mxu0 }
 0x96b   : > { %v15585_v8 = vadd.f32 %v15553_v15, %v26410_v40  ;;  %v15477_v3 = vadd.f32 %v26328_v26, %v15476_v46 }
 0x96c   : > { %15618 = vst.msk [vmem:[%s26465_s12 + $0x98] sm:$0xff] %vm333_vm1, %v15586_v55  ;;  %v15556_v19 = vmax.f32 %v15482_v52, 0.0 }
 0x96d   : > { %15617 = vst.msk [vmem:[%s26465_s12 + $0x90] sm:$0xff] %vm333_vm1, %v15585_v8  ;;  %v15555_v2 = vmax.f32 %v15477_v3, 0.0  ;;  %v20823_v7 = vpop.f32.mrb[118].mxu0 }
 0x96e   : > { %v15588_v4 = vadd.f32 %v15556_v19, %v26414_v57  ;;  %v15492_v20 = vadd.f32 %v26328_v26, %v20823_v7  ;;  %v15486_v0 = vpop.f32.mrb[119].mxu0 }
 0x96f   : > { %v15587_v43 = vadd.f32 %v15555_v2, %v26418_v30  ;;  %v15487_v40 = vadd.f32 %v26328_v26, %v15486_v0 }
 0x970   : > { %15620 = vst.msk [vmem:[%s26465_s12 + $0xa8] sm:$0xff] %vm333_vm1, %v15588_v4  ;;  %v15558_v31 = vmax.f32 %v15492_v20, 0.0 }
 0x971   : > { %15619 = vst.msk [vmem:[%s26465_s12 + $0xa0] sm:$0xff] %vm333_vm1, %v15587_v43  ;;  %v15557_v41 = vmax.f32 %v15487_v40, 0.0  ;;  %v20826_v14 = vpop.f32.mrb[120].mxu0 }
 0x972   : > { %v15590_v63 = vadd.f32 %v15558_v31, %v26422_v32  ;;  %v15502_v57 = vadd.f32 %v26328_v26, %v20826_v14  ;;  %v15496_v25 = vpop.f32.mrb[121].mxu0 }
 0x973   : > { %v15589_v60 = vadd.f32 %v15557_v41, %v26426_v6  ;;  %v15497_v30 = vadd.f32 %v26328_v26, %v15496_v25 }
 0x974   : > { %15622 = vst.msk [vmem:[%s26465_s12 + $0xb8] sm:$0xff] %vm333_vm1, %v15590_v63  ;;  %v15560_v45 = vmax.f32 %v15502_v57, 0.0 }
 0x975   : > { %15621 = vst.msk [vmem:[%s26465_s12 + $0xb0] sm:$0xff] %vm333_vm1, %v15589_v60  ;;  %v15559_v22 = vmax.f32 %v15497_v30, 0.0  ;;  %v20829_v18 = vpop.f32.mrb[122].mxu0 }
 0x976   : > { %v15592_v12 = vadd.f32 %v15560_v45, %v26430_v21  ;;  %v15512_v32 = vadd.f32 %v26328_v26, %v20829_v18  ;;  %v15506_v37 = vpop.f32.mrb[123].mxu0 }
 0x977   : > { %v15591_v39 = vadd.f32 %v15559_v22, %v26434_v58  ;;  %v15507_v6 = vadd.f32 %v26328_v26, %v15506_v37 }
 0x978   : > { %15624 = vst.msk [vmem:[%s26465_s12 + $0xc8] sm:$0xff] %vm333_vm1, %v15592_v12  ;;  %v15562_v35 = vmax.f32 %v15512_v32, 0.0 }
 0x979   : > { %15623 = vst.msk [vmem:[%s26465_s12 + $0xc0] sm:$0xff] %vm333_vm1, %v15591_v39  ;;  %v15561_v16 = vmax.f32 %v15507_v6, 0.0  ;;  %v20832_v62 = vpop.f32.mrb[124].mxu0 }
 0x97a   : > { %v15594_v9 = vadd.f32 %v15562_v35, %v26438_v1  ;;  %v15522_v21 = vadd.f32 %v26328_v26, %v20832_v62  ;;  %v15516_v29 = vpop.f32.mrb[125].mxu0 }
 0x97b   : > { %v15593_v10 = vadd.f32 %v15561_v16, %v26442_v17  ;;  %v15517_v58 = vadd.f32 %v26328_v26, %v15516_v29 }
 0x97c   : > { %15626 = vst.msk [vmem:[%s26465_s12 + $0xd8] sm:$0xff] %vm333_vm1, %v15594_v9  ;;  %v15564_v59 = vmax.f32 %v15522_v21, 0.0 }
 0x97d   : > { %15625 = vst.msk [vmem:[%s26465_s12 + $0xd0] sm:$0xff] %vm333_vm1, %v15593_v10  ;;  %v15563_v47 = vmax.f32 %v15517_v58, 0.0  ;;  %v20835_v61 = vpop.f32.mrb[126].mxu0 }
 0x97e   : > { %v15596_v53 = vadd.f32 %v15564_v59, %v26446_v56  ;;  %v15532_v1 = vadd.f32 %v26328_v26, %v20835_v61  ;;  %v15526_v42 = vpop.f32.mrb[127].mxu0 }
 0x97f   : > { %v15595_v48 = vadd.f32 %v15563_v47, %v26450_v50  ;;  %v15527_v17 = vadd.f32 %v26328_v26, %v15526_v42 }
 0x980   : > { %15628 = vst.msk [vmem:[%s26465_s12 + $0xe8] sm:$0xff] %vm333_vm1, %v15596_v53  ;;  %v15566_v38 = vmax.f32 %v15532_v1, 0.0 }
 0x981   : > { %15627 = vst.msk [vmem:[%s26465_s12 + $0xe0] sm:$0xff] %vm333_vm1, %v15595_v48  ;;  %v15565_v54 = vmax.f32 %v15527_v17, 0.0 }
 0x982   : > { %v15598_v36 = vadd.f32 %v15566_v38, %v26454_v13 }
 0x983   : > { %v15597_v51 = vadd.f32 %v15565_v54, %v26457_v11 }
 0x984   : > { %15630 = vst.msk [vmem:[%s26465_s12 + $0xf8] sm:$0xff] %vm333_vm1, %v15598_v36 }
 0x985   : > { %15629 = vst.msk [vmem:[%s26465_s12 + $0xf0] sm:$0xff] %vm333_vm1, %v15597_v51 }
 0x986 PF: > { %s19_s30 = sadd.s32 1, %s21921_s30  }
 0x987   : > { %p16_p4 = scmp.ge.s32.totalorder %s19_s30, 4  }
 0x989   :  { %18 = sbr.rel (!%p16_p4) target bundleno = 1 (0x1), region = 120 }

</bundles_post_ra>
